<compile_context>
chip_gen: v6e
topology: v6e:2x2x1
jax: 0.10.0
libtpu: 0.0.40
codegen_flags: <defaults>
</compile_context>

<pallas_src>
import math
import functools

import jax
import jax.numpy as jnp
from jax.experimental import pallas as pl
from jax.experimental.pallas import tpu as pltpu


def lint_kernel(x_ref, pos_ref, wp_ref, wattn_ref, w1_ref, b1_ref, w2_ref,
                lvec_ref, fvec_ref, wout_ref, bout_ref, out_ref,
                *, num_layers, num_heads, embed_dim, bb, seq_len):
    D = embed_dim
    H = num_heads
    hd = D // H
    T = seq_len
    N = bb * T
    f32 = jnp.float32
    bf16 = jnp.bfloat16

    def layer_norm(y, g, b):
        mu = jnp.mean(y, axis=-1, keepdims=True)
        var = jnp.mean(jnp.square(y - mu), axis=-1, keepdims=True)
        return (y - mu) * jax.lax.rsqrt(var + 1e-5) * g + b

    # Causal additive bias built in-kernel (cheap VPU iota work, no HBM traffic).
    row = jax.lax.broadcasted_iota(jnp.int32, (T, T), 0)
    col = jax.lax.broadcasted_iota(jnp.int32, (T, T), 1)
    bias = jnp.where(col <= row, 0.0, -1e9).astype(f32)          # (T, T)

    x = x_ref[...].astype(bf16)                                   # (N, F_in)

    # 1x1 Conv1d projector (bias=False); sqrt(D) embed scale is folded into Wp.
    h = jnp.dot(x, wp_ref[...], preferred_element_type=f32)       # (N, D) f32

    # sinusoidal positional embedding, (T, D) tiled over the folded batch.
    pos = pos_ref[...]
    h = h + (pos if bb == 1 else jnp.concatenate([pos] * bb, axis=0))

    for l in range(num_layers):
        lv = lvec_ref[l]     # (9, D) f32: ln1_g, ln1_b, bq, bk, bv, bo, ln2_g, ln2_b, b2

        # ---- pre-norm multi-head causal self-attention + residual ----
        y = layer_norm(h, lv[0:1], lv[1:2]).astype(bf16)
        # 1/sqrt(hd) is already folded into Wq and bq on the host.
        q = jnp.dot(y, wattn_ref[l, 0], preferred_element_type=f32) + lv[2:3]
        k = jnp.dot(y, wattn_ref[l, 1], preferred_element_type=f32) + lv[3:4]
        v = jnp.dot(y, wattn_ref[l, 2], preferred_element_type=f32) + lv[4:5]
        q = q.astype(bf16)
        k = k.astype(bf16)
        v = v.astype(bf16)

        ctx_heads = []
        for hh in range(H):
            s0 = hh * hd
            qh = q[:, s0:s0 + hd].reshape(bb, T, hd)               # (bb, T, hd)
            kh = k[:, s0:s0 + hd].reshape(bb, T, hd)
            vh = v[:, s0:s0 + hd].reshape(bb, T, hd)
            s = jnp.einsum('bqd,bkd->bqk', qh, kh,
                           preferred_element_type=f32)             # (bb, T, T) f32
            s = s + bias[None]
            s = s - jnp.max(s, axis=-1, keepdims=True)
            p = jnp.exp(s)
            p = p * pl.reciprocal(jnp.sum(p, axis=-1, keepdims=True), approx=True)
            ctx = jnp.einsum('bqk,bkd->bqd', p.astype(bf16), vh,
                             preferred_element_type=f32)           # (bb, T, hd)
            ctx_heads.append(ctx.reshape(N, hd))
        # Concatenate heads once, then ONE full-depth (K = D) output projection.
        ctx = jnp.concatenate(ctx_heads, axis=-1).astype(bf16)     # (N, D)
        attn = jnp.dot(ctx, wattn_ref[l, 3], preferred_element_type=f32)
        h = h + attn + lv[5:6]                                     # + out_proj bias, residual

        # ---- pre-norm ReLU feed-forward (4*D hidden) + residual ----
        y = layer_norm(h, lv[6:7], lv[7:8]).astype(bf16)
        y = jnp.maximum(
            jnp.dot(y, w1_ref[l], preferred_element_type=f32) + b1_ref[l], 0.0)
        y = jnp.dot(y.astype(bf16), w2_ref[l], preferred_element_type=f32) + lv[8:9]
        h = h + y

    # final encoder LayerNorm, then output Linear (128-padded, lane-dense slab).
    h = layer_norm(h, fvec_ref[0], fvec_ref[1]).astype(bf16)
    out_ref[...] = jnp.dot(h, wout_ref[...], preferred_element_type=f32) + bout_ref[...]


def sinusoidal_pos_emb(T, D, padding_idx=0):
    """fairseq/MulT SinusoidalPositionalEmbedding: concat([sin, cos]) with
    positions starting at padding_idx + 1 (no padding tokens at inference)."""
    half = D // 2
    emb = math.log(10000.0) / max(half - 1, 1)
    freqs = jnp.exp(jnp.arange(half, dtype=jnp.float32) * -emb)
    positions = jnp.arange(padding_idx + 1, padding_idx + 1 + T, dtype=jnp.float32)
    angles = positions[:, None] * freqs[None, :]
    pe = jnp.concatenate([jnp.sin(angles), jnp.cos(angles)], axis=1)
    if D % 2 == 1:
        pe = jnp.concatenate([pe, jnp.zeros((T, 1), jnp.float32)], axis=1)
    return pe.astype(jnp.float32)


def make_lint_params(key, f_in, d, num_layers, num_heads, out_dim):
    """Parameters in kernel-friendly (pre-transposed / packed) layout, f32.

    Mapping to PyTorch:
      wp          = Conv1d.weight[:, :, 0].T                      (F_in, D)
      w_attn[l,i] = {Wq, Wk, Wv, Wout_proj}[l].T                  (D, D) each, (in, out)
      w1[l]       = fc1.weight.T    (D, 4D);  w2[l] = fc2.weight.T (4D, D)
      lvec[l]     = [ln1_g, ln1_b, bq, bk, bv, bo, ln2_g, ln2_b, b2]
      fvec        = [final_ln_g, final_ln_b]
      wout        = out_layer.weight.T (D, out_dim); bout = out_layer.bias
    """
    ffn = 4 * d
    ks = jax.random.split(key, 10)
    w = lambda k, shape: (0.02 * jax.random.normal(k, shape)).astype(jnp.float32)

    lvec = jnp.zeros((num_layers, 9, d), jnp.float32)
    lvec = lvec.at[:, 0].set(1.0)                                # ln1 gamma
    lvec = lvec.at[:, 6].set(1.0)                                # ln2 gamma
    lvec = lvec.at[:, 2:6].set(w(ks[5], (num_layers, 4, d)))     # bq, bk, bv, bo
    lvec = lvec.at[:, 8].set(w(ks[6], (num_layers, d)))          # b2

    return dict(
        wp=w(ks[0], (f_in, d)),
        w_attn=w(ks[1], (num_layers, 4, d, d)),
        w1=w(ks[2], (num_layers, d, ffn)),
        b1=w(ks[7], (num_layers, 1, ffn)),
        w2=w(ks[3], (num_layers, ffn, d)),
        lvec=lvec,
        fvec=jnp.zeros((2, 1, d), jnp.float32).at[0].set(1.0),
        wout=w(ks[4], (d, out_dim)),
        bout=w(ks[8], (1, out_dim)),
    )


def _vmem_budget_bytes():
    """~75% of this generation's physical VMEM (128 MiB v5e/v6e, 64 MiB v7x)."""
    try:
        phys = int(pltpu.get_tpu_info().vmem_capacity_bytes)
    except Exception:
        phys = 64 * 1024 * 1024          # conservative (v7x-sized) fallback
    budget = (phys * 3) // 4
    return max(32 << 20, min(budget, 128 << 20))


def _pick_batch_block(B, T, per_batch_bytes, const_bytes, budget, max_block=64):
    """Largest sublane-aligned divisor of B that fits the VMEM budget; prefer an
    even number of grid steps so both v7x TensorCores get work."""
    cands = [c for c in range(1, min(B, max_block) + 1)
             if B % c == 0 and ((c * T) % 8 == 0 or c == B)]
    if not cands:
        return B
    fitting = [c for c in cands if const_bytes + c * per_batch_bytes <= budget]
    if not fitting:
        fitting = cands[:1]
    even = [c for c in fitting if (B // c) % 2 == 0]
    return max(even) if even else max(fitting)


def lint_forward(x, params, *, num_layers, num_heads, embed_dim, out_dim,
                 max_batch_block=64):
    B, T, F_in = x.shape
    D = embed_dim
    H = num_heads
    hd = D // H
    ffn = 4 * D
    bf16 = jnp.bfloat16
    out_pad = ((out_dim + 127) // 128) * 128        # lane-dense output width

    # ---- host-side constant prep: fold scales, cast weights to bf16, pad out head ----
    scale_q = 1.0 / math.sqrt(hd)
    wp = (params["wp"] * math.sqrt(D)).astype(bf16)                 # sqrt(D) folded in
    w_attn = params["w_attn"].at[:, 0].multiply(scale_q).astype(bf16)  # 1/sqrt(hd) -> Wq
    lvec = params["lvec"].at[:, 2].multiply(scale_q)                   # ... and bq
    w1 = params["w1"].astype(bf16)
    w2 = params["w2"].astype(bf16)
    b1 = params["b1"]
    fvec = params["fvec"]
    wout = jnp.zeros((D, out_pad), bf16).at[:, :out_dim].set(params["wout"].astype(bf16))
    bout = jnp.zeros((1, out_pad), jnp.float32).at[:, :out_dim].set(params["bout"])
    pos = sinusoidal_pos_emb(T, D)                                   # (T, D) f32

    consts = [pos, wp, w_attn, w1, b1, w2, lvec, fvec, wout, bout]

    # ---- VMEM-aware batch-block selection ----
    budget = _vmem_budget_bytes()
    const_bytes = 2 * sum(int(a.size) * a.dtype.itemsize for a in consts)  # assume 2 bufs
    per_batch_bytes = (T * (10 * D + ffn) * 4        # h/y/q/k/v/ctx/attn + FFN hidden (f32)
                       + H * T * T * 4               # per-head scores/probs
                       + 2 * T * (F_in * 4 + out_pad * 4))   # double-buffered I/O tiles
    bb = _pick_batch_block(B, T, per_batch_bytes, const_bytes, budget, max_batch_block)
    grid = B // bb
    N = bb * T

    # input stays f32 (keeps the (8,128)-aligned block legal at any bb*T); cast in-kernel.
    x2 = x.reshape(B * T, F_in).astype(jnp.float32)

    kernel = functools.partial(lint_kernel,
                               num_layers=num_layers, num_heads=num_heads,
                               embed_dim=embed_dim, bb=bb, seq_len=T)

    def _run(single_buffer_consts):
        def const_spec(a):
            idx = lambda b, _n=a.ndim: (0,) * _n
            if single_buffer_consts:
                # constant block index -> no need for 2x VMEM double-buffering
                return pl.BlockSpec(a.shape, idx, pipeline_mode=pl.Buffered(1))
            return pl.BlockSpec(a.shape, idx)

        in_specs = [pl.BlockSpec((N, F_in), lambda b: (b, 0))] + \
                   [const_spec(a) for a in consts]
        out_specs = pl.BlockSpec((N, out_pad), lambda b: (b, 0))

        out = pl.pallas_call(
            kernel,
            out_shape=jax.ShapeDtypeStruct((B * T, out_pad), jnp.float32),
            grid=(grid,),
            in_specs=in_specs,
            out_specs=out_specs,
            compiler_params=pltpu.CompilerParams(
                dimension_semantics=("parallel",),
                vmem_limit_bytes=int(budget)),
        )(x2, *consts)
        return jax.block_until_ready(out)

    try:
        out = _run(True)          # single-buffered constants (preferred)
    except Exception:
        out = _run(False)         # fall back to default double-buffering

    return out[:, :out_dim].reshape(B, T, out_dim)


if __name__ == "__main__":
    # Small shapes consistent with LinT(input_modality_channels=16, output_dim=8,
    # projected_modality_dim=32, number_of_heads=8, number_of_layers=2)
    B, T, F_IN = 2, 8, 16
    D, HEADS, LAYERS, OUT_DIM = 32, 8, 2, 8

    key = jax.random.PRNGKey(0)
    k_x, k_p = jax.random.split(key)
    x = jax.random.normal(k_x, (B, T, F_IN), dtype=jnp.float32)
    params = make_lint_params(k_p, F_IN, D, LAYERS, HEADS, OUT_DIM)

    out = lint_forward(x, params,
                       num_layers=LAYERS, num_heads=HEADS,
                       embed_dim=D, out_dim=OUT_DIM)
    jax.block_until_ready(out)
    assert out.shape == (B, T, OUT_DIM)
    assert bool(jnp.all(jnp.isfinite(out)))
    print("KERNEL_OK")
</pallas_src>

<mosaic_0001>
module attributes {stable_mosaic.version = 11 : i64} {
  func.func @lint_kernel(%arg0: i32, %arg1: memref<8x16xf32, #tpu.memory_space<vmem>>, %arg2: memref<8x32xf32, #tpu.memory_space<vmem>>, %arg3: memref<16x32xbf16, #tpu.memory_space<vmem>>, %arg4: memref<2x4x32x32xbf16, #tpu.memory_space<vmem>>, %arg5: memref<2x32x128xbf16, #tpu.memory_space<vmem>>, %arg6: memref<2x1x128xf32, #tpu.memory_space<vmem>>, %arg7: memref<2x128x32xbf16, #tpu.memory_space<vmem>>, %arg8: memref<2x9x32xf32, #tpu.memory_space<vmem>>, %arg9: memref<2x1x32xf32, #tpu.memory_space<vmem>>, %arg10: memref<32x128xbf16, #tpu.memory_space<vmem>>, %arg11: memref<1x128xf32, #tpu.memory_space<vmem>>, %arg12: memref<8x128xf32, #tpu.memory_space<vmem>>) attributes {dimension_semantics = [#tpu.dimension_semantics<parallel>], iteration_bounds = array<i64: 2>, scalar_prefetch = 0 : i64, scratch_operands = 0 : i64, tpu.core_type = #tpu.core_type<tc>, window_params = [{transform_indices = @transform_0, window_bounds = array<i64: 8, 16>}, {pipeline_mode = #tpu.pipeline_mode<synchronous>, transform_indices = @transform_1, window_bounds = array<i64: 8, 32>}, {pipeline_mode = #tpu.pipeline_mode<synchronous>, transform_indices = @transform_2, window_bounds = array<i64: 16, 32>}, {pipeline_mode = #tpu.pipeline_mode<synchronous>, transform_indices = @transform_3, window_bounds = array<i64: 2, 4, 32, 32>}, {pipeline_mode = #tpu.pipeline_mode<synchronous>, transform_indices = @transform_4, window_bounds = array<i64: 2, 32, 128>}, {pipeline_mode = #tpu.pipeline_mode<synchronous>, transform_indices = @transform_5, window_bounds = array<i64: 2, 1, 128>}, {pipeline_mode = #tpu.pipeline_mode<synchronous>, transform_indices = @transform_6, window_bounds = array<i64: 2, 128, 32>}, {pipeline_mode = #tpu.pipeline_mode<synchronous>, transform_indices = @transform_7, window_bounds = array<i64: 2, 9, 32>}, {pipeline_mode = #tpu.pipeline_mode<synchronous>, transform_indices = @transform_8, window_bounds = array<i64: 2, 1, 32>}, {pipeline_mode = #tpu.pipeline_mode<synchronous>, transform_indices = @transform_9, window_bounds = array<i64: 32, 128>}, {pipeline_mode = #tpu.pipeline_mode<synchronous>, transform_indices = @transform_10, window_bounds = array<i64: 1, 128>}, {transform_indices = @transform_11, window_bounds = array<i64: 8, 128>}]} {
    %0 = tpu.iota {dimensions = array<i32: 0>} : vector<8x8xi32>
    %1 = tpu.iota {dimensions = array<i32: 1>} : vector<8x8xi32>
    %2 = arith.cmpi sle, %1, %0 : vector<8x8xi32>
    %cst = arith.constant 0.000000e+00 : f32
    %cst_0 = arith.constant -1.000000e+09 : f32
    %3 = vector.broadcast %cst : f32 to vector<8x8xf32>
    %4 = vector.broadcast %cst_0 : f32 to vector<8x8xf32>
    %5 = arith.select %2, %3, %4 : vector<8x8xi1>, vector<8x8xf32>
    %c0 = arith.constant 0 : index
    %c0_1 = arith.constant 0 : index
    %6 = vector.load %arg1[%c0, %c0_1] : memref<8x16xf32, #tpu.memory_space<vmem>>, vector<8x16xf32>
    %7 = arith.truncf %6 : vector<8x16xf32> to vector<8x16xbf16>
    %c0_2 = arith.constant 0 : index
    %c0_3 = arith.constant 0 : index
    %8 = vector.load %arg3[%c0_2, %c0_3] : memref<16x32xbf16, #tpu.memory_space<vmem>>, vector<16x32xbf16>
    %cst_4 = arith.constant dense<0.000000e+00> : vector<8x32xf32>
    %9 = tpu.matmul %7, %8, %cst_4 {dimension_numbers = #tpu.dot_dimension_numbers<[1], [0], [0], [1], [0, 0, 1, 1], [], []>} : vector<8x16xbf16>, vector<16x32xbf16>, vector<8x32xf32> -> vector<8x32xf32>
    %c0_5 = arith.constant 0 : index
    %c0_6 = arith.constant 0 : index
    %10 = vector.load %arg2[%c0_5, %c0_6] : memref<8x32xf32, #tpu.memory_space<vmem>>, vector<8x32xf32>
    %11 = arith.addf %9, %10 : vector<8x32xf32>
    %c0_7 = arith.constant 0 : index
    %c0_8 = arith.constant 0 : index
    %c0_9 = arith.constant 0 : index
    %12 = vector.load %arg8[%c0_7, %c0_8, %c0_9] : memref<2x9x32xf32, #tpu.memory_space<vmem>>, vector<1x9x32xf32>
    %13 = vector.shape_cast %12 : vector<1x9x32xf32> to vector<9x32xf32>
    %14 = vector.extract_strided_slice %13 {offsets = [0, 0], sizes = [1, 32], strides = [1, 1]} : vector<9x32xf32> to vector<1x32xf32>
    %15 = vector.extract_strided_slice %13 {offsets = [1, 0], sizes = [1, 32], strides = [1, 1]} : vector<9x32xf32> to vector<1x32xf32>
    %cst_10 = arith.constant dense<0.000000e+00> : vector<8xf32>
    %16 = vector.multi_reduction <add>, %11, %cst_10 [1] : vector<8x32xf32> to vector<8xf32>
    %17 = vector.shape_cast %16 : vector<8xf32> to vector<8x1xf32>
    %cst_11 = arith.constant 3.200000e+01 : f32
    %18 = vector.broadcast %cst_11 : f32 to vector<8x1xf32>
    %19 = arith.divf %17, %18 : vector<8x1xf32>
    %20 = vector.broadcast %19 : vector<8x1xf32> to vector<8x32xf32>
    %21 = arith.subf %11, %20 : vector<8x32xf32>
    %22 = arith.mulf %21, %21 : vector<8x32xf32>
    %cst_12 = arith.constant dense<0.000000e+00> : vector<8xf32>
    %23 = vector.multi_reduction <add>, %22, %cst_12 [1] : vector<8x32xf32> to vector<8xf32>
    %24 = vector.shape_cast %23 : vector<8xf32> to vector<8x1xf32>
    %cst_13 = arith.constant 3.200000e+01 : f32
    %25 = vector.broadcast %cst_13 : f32 to vector<8x1xf32>
    %26 = arith.divf %24, %25 : vector<8x1xf32>
    %27 = vector.broadcast %19 : vector<8x1xf32> to vector<8x32xf32>
    %28 = arith.subf %11, %27 : vector<8x32xf32>
    %cst_14 = arith.constant 9.99999974E-6 : f32
    %29 = vector.broadcast %cst_14 : f32 to vector<8x1xf32>
    %30 = arith.addf %26, %29 : vector<8x1xf32>
    %31 = math.rsqrt %30 : vector<8x1xf32>
    %32 = vector.broadcast %31 : vector<8x1xf32> to vector<8x32xf32>
    %33 = arith.mulf %28, %32 : vector<8x32xf32>
    %34 = vector.broadcast %14 : vector<1x32xf32> to vector<8x32xf32>
    %35 = arith.mulf %33, %34 : vector<8x32xf32>
    %36 = vector.broadcast %15 : vector<1x32xf32> to vector<8x32xf32>
    %37 = arith.addf %35, %36 : vector<8x32xf32>
    %38 = arith.truncf %37 : vector<8x32xf32> to vector<8x32xbf16>
    %c0_15 = arith.constant 0 : index
    %c0_16 = arith.constant 0 : index
    %c0_17 = arith.constant 0 : index
    %c0_18 = arith.constant 0 : index
    %39 = vector.load %arg4[%c0_15, %c0_16, %c0_17, %c0_18] : memref<2x4x32x32xbf16, #tpu.memory_space<vmem>>, vector<1x1x32x32xbf16>
    %40 = vector.shape_cast %39 : vector<1x1x32x32xbf16> to vector<32x32xbf16>
    %cst_19 = arith.constant dense<0.000000e+00> : vector<8x32xf32>
    %41 = tpu.matmul %38, %40, %cst_19 {dimension_numbers = #tpu.dot_dimension_numbers<[1], [0], [0], [1], [0, 0, 1, 1], [], []>} : vector<8x32xbf16>, vector<32x32xbf16>, vector<8x32xf32> -> vector<8x32xf32>
    %42 = vector.extract_strided_slice %13 {offsets = [2, 0], sizes = [1, 32], strides = [1, 1]} : vector<9x32xf32> to vector<1x32xf32>
    %43 = vector.broadcast %42 : vector<1x32xf32> to vector<8x32xf32>
    %44 = arith.addf %41, %43 : vector<8x32xf32>
    %c0_20 = arith.constant 0 : index
    %c1 = arith.constant 1 : index
    %c0_21 = arith.constant 0 : index
    %c0_22 = arith.constant 0 : index
    %45 = vector.load %arg4[%c0_20, %c1, %c0_21, %c0_22] : memref<2x4x32x32xbf16, #tpu.memory_space<vmem>>, vector<1x1x32x32xbf16>
    %46 = vector.shape_cast %45 : vector<1x1x32x32xbf16> to vector<32x32xbf16>
    %cst_23 = arith.constant dense<0.000000e+00> : vector<8x32xf32>
    %47 = tpu.matmul %38, %46, %cst_23 {dimension_numbers = #tpu.dot_dimension_numbers<[1], [0], [0], [1], [0, 0, 1, 1], [], []>} : vector<8x32xbf16>, vector<32x32xbf16>, vector<8x32xf32> -> vector<8x32xf32>
    %48 = vector.extract_strided_slice %13 {offsets = [3, 0], sizes = [1, 32], strides = [1, 1]} : vector<9x32xf32> to vector<1x32xf32>
    %49 = vector.broadcast %48 : vector<1x32xf32> to vector<8x32xf32>
    %50 = arith.addf %47, %49 : vector<8x32xf32>
    %c0_24 = arith.constant 0 : index
    %c2 = arith.constant 2 : index
    %c0_25 = arith.constant 0 : index
    %c0_26 = arith.constant 0 : index
    %51 = vector.load %arg4[%c0_24, %c2, %c0_25, %c0_26] : memref<2x4x32x32xbf16, #tpu.memory_space<vmem>>, vector<1x1x32x32xbf16>
    %52 = vector.shape_cast %51 : vector<1x1x32x32xbf16> to vector<32x32xbf16>
    %cst_27 = arith.constant dense<0.000000e+00> : vector<8x32xf32>
    %53 = tpu.matmul %38, %52, %cst_27 {dimension_numbers = #tpu.dot_dimension_numbers<[1], [0], [0], [1], [0, 0, 1, 1], [], []>} : vector<8x32xbf16>, vector<32x32xbf16>, vector<8x32xf32> -> vector<8x32xf32>
    %54 = vector.extract_strided_slice %13 {offsets = [4, 0], sizes = [1, 32], strides = [1, 1]} : vector<9x32xf32> to vector<1x32xf32>
    %55 = vector.broadcast %54 : vector<1x32xf32> to vector<8x32xf32>
    %56 = arith.addf %53, %55 : vector<8x32xf32>
    %57 = arith.truncf %44 : vector<8x32xf32> to vector<8x32xbf16>
    %58 = arith.truncf %50 : vector<8x32xf32> to vector<8x32xbf16>
    %59 = arith.truncf %56 : vector<8x32xf32> to vector<8x32xbf16>
    %60 = vector.extract_strided_slice %57 {offsets = [0, 0], sizes = [8, 4], strides = [1, 1]} : vector<8x32xbf16> to vector<8x4xbf16>
    %61 = vector.shape_cast %60 : vector<8x4xbf16> to vector<1x8x4xbf16>
    %62 = vector.extract_strided_slice %58 {offsets = [0, 0], sizes = [8, 4], strides = [1, 1]} : vector<8x32xbf16> to vector<8x4xbf16>
    %63 = vector.shape_cast %62 : vector<8x4xbf16> to vector<1x8x4xbf16>
    %64 = vector.extract_strided_slice %59 {offsets = [0, 0], sizes = [8, 4], strides = [1, 1]} : vector<8x32xbf16> to vector<8x4xbf16>
    %65 = vector.shape_cast %64 : vector<8x4xbf16> to vector<1x8x4xbf16>
    "tpu.trace_start"() <{level = 10 : i32, message = "bqd,bkd->bqk"}> : () -> ()
    %cst_28 = arith.constant dense<0.000000e+00> : vector<1x8x8xf32>
    %66 = tpu.matmul %61, %63, %cst_28 {dimension_numbers = #tpu.dot_dimension_numbers<[2], [2], [1], [1], [0, 0, 0, 1, 1, 1], [0], [0]>} : vector<1x8x4xbf16>, vector<1x8x4xbf16>, vector<1x8x8xf32> -> vector<1x8x8xf32>
    "tpu.trace_stop"() : () -> ()
    %67 = vector.shape_cast %5 : vector<8x8xf32> to vector<1x8x8xf32>
    %68 = arith.addf %66, %67 : vector<1x8x8xf32>
    %cst_29 = arith.constant dense<0xFF800000> : vector<1x8xf32>
    %69 = vector.multi_reduction <maximumf>, %68, %cst_29 [2] : vector<1x8x8xf32> to vector<1x8xf32>
    %70 = vector.shape_cast %69 : vector<1x8xf32> to vector<1x8x1xf32>
    %71 = vector.broadcast %70 : vector<1x8x1xf32> to vector<1x8x8xf32>
    %72 = arith.subf %68, %71 : vector<1x8x8xf32>
    %73 = math.exp %72 : vector<1x8x8xf32>
    %cst_30 = arith.constant dense<0.000000e+00> : vector<1x8xf32>
    %74 = vector.multi_reduction <add>, %73, %cst_30 [2] : vector<1x8x8xf32> to vector<1x8xf32>
    %75 = vector.shape_cast %74 : vector<1x8xf32> to vector<1x8x1xf32>
    %76 = tpu.reciprocal %75 {approx = true} : vector<1x8x1xf32> -> vector<1x8x1xf32>
    %77 = vector.broadcast %76 : vector<1x8x1xf32> to vector<1x8x8xf32>
    %78 = arith.mulf %73, %77 : vector<1x8x8xf32>
    %79 = arith.truncf %78 : vector<1x8x8xf32> to vector<1x8x8xbf16>
    "tpu.trace_start"() <{level = 10 : i32, message = "bqk,bkd->bqd"}> : () -> ()
    %cst_31 = arith.constant dense<0.000000e+00> : vector<1x8x4xf32>
    %80 = tpu.matmul %79, %65, %cst_31 {dimension_numbers = #tpu.dot_dimension_numbers<[2], [1], [1], [2], [0, 0, 0, 1, 1, 2], [0], [0]>} : vector<1x8x8xbf16>, vector<1x8x4xbf16>, vector<1x8x4xf32> -> vector<1x8x4xf32>
    "tpu.trace_stop"() : () -> ()
    %81 = vector.shape_cast %80 : vector<1x8x4xf32> to vector<8x4xf32>
    %82 = vector.extract_strided_slice %57 {offsets = [0, 4], sizes = [8, 4], strides = [1, 1]} : vector<8x32xbf16> to vector<8x4xbf16>
    %83 = vector.shape_cast %82 : vector<8x4xbf16> to vector<1x8x4xbf16>
    %84 = vector.extract_strided_slice %58 {offsets = [0, 4], sizes = [8, 4], strides = [1, 1]} : vector<8x32xbf16> to vector<8x4xbf16>
    %85 = vector.shape_cast %84 : vector<8x4xbf16> to vector<1x8x4xbf16>
    %86 = vector.extract_strided_slice %59 {offsets = [0, 4], sizes = [8, 4], strides = [1, 1]} : vector<8x32xbf16> to vector<8x4xbf16>
    %87 = vector.shape_cast %86 : vector<8x4xbf16> to vector<1x8x4xbf16>
    "tpu.trace_start"() <{level = 10 : i32, message = "bqd,bkd->bqk"}> : () -> ()
    %cst_32 = arith.constant dense<0.000000e+00> : vector<1x8x8xf32>
    %88 = tpu.matmul %83, %85, %cst_32 {dimension_numbers = #tpu.dot_dimension_numbers<[2], [2], [1], [1], [0, 0, 0, 1, 1, 1], [0], [0]>} : vector<1x8x4xbf16>, vector<1x8x4xbf16>, vector<1x8x8xf32> -> vector<1x8x8xf32>
    "tpu.trace_stop"() : () -> ()
    %89 = vector.shape_cast %5 : vector<8x8xf32> to vector<1x8x8xf32>
    %90 = arith.addf %88, %89 : vector<1x8x8xf32>
    %cst_33 = arith.constant dense<0xFF800000> : vector<1x8xf32>
    %91 = vector.multi_reduction <maximumf>, %90, %cst_33 [2] : vector<1x8x8xf32> to vector<1x8xf32>
    %92 = vector.shape_cast %91 : vector<1x8xf32> to vector<1x8x1xf32>
    %93 = vector.broadcast %92 : vector<1x8x1xf32> to vector<1x8x8xf32>
    %94 = arith.subf %90, %93 : vector<1x8x8xf32>
    %95 = math.exp %94 : vector<1x8x8xf32>
    %cst_34 = arith.constant dense<0.000000e+00> : vector<1x8xf32>
    %96 = vector.multi_reduction <add>, %95, %cst_34 [2] : vector<1x8x8xf32> to vector<1x8xf32>
    %97 = vector.shape_cast %96 : vector<1x8xf32> to vector<1x8x1xf32>
    %98 = tpu.reciprocal %97 {approx = true} : vector<1x8x1xf32> -> vector<1x8x1xf32>
    %99 = vector.broadcast %98 : vector<1x8x1xf32> to vector<1x8x8xf32>
    %100 = arith.mulf %95, %99 : vector<1x8x8xf32>
    %101 = arith.truncf %100 : vector<1x8x8xf32> to vector<1x8x8xbf16>
    "tpu.trace_start"() <{level = 10 : i32, message = "bqk,bkd->bqd"}> : () -> ()
    %cst_35 = arith.constant dense<0.000000e+00> : vector<1x8x4xf32>
    %102 = tpu.matmul %101, %87, %cst_35 {dimension_numbers = #tpu.dot_dimension_numbers<[2], [1], [1], [2], [0, 0, 0, 1, 1, 2], [0], [0]>} : vector<1x8x8xbf16>, vector<1x8x4xbf16>, vector<1x8x4xf32> -> vector<1x8x4xf32>
    "tpu.trace_stop"() : () -> ()
    %103 = vector.shape_cast %102 : vector<1x8x4xf32> to vector<8x4xf32>
    %104 = vector.extract_strided_slice %57 {offsets = [0, 8], sizes = [8, 4], strides = [1, 1]} : vector<8x32xbf16> to vector<8x4xbf16>
    %105 = vector.shape_cast %104 : vector<8x4xbf16> to vector<1x8x4xbf16>
    %106 = vector.extract_strided_slice %58 {offsets = [0, 8], sizes = [8, 4], strides = [1, 1]} : vector<8x32xbf16> to vector<8x4xbf16>
    %107 = vector.shape_cast %106 : vector<8x4xbf16> to vector<1x8x4xbf16>
    %108 = vector.extract_strided_slice %59 {offsets = [0, 8], sizes = [8, 4], strides = [1, 1]} : vector<8x32xbf16> to vector<8x4xbf16>
    %109 = vector.shape_cast %108 : vector<8x4xbf16> to vector<1x8x4xbf16>
    "tpu.trace_start"() <{level = 10 : i32, message = "bqd,bkd->bqk"}> : () -> ()
    %cst_36 = arith.constant dense<0.000000e+00> : vector<1x8x8xf32>
    %110 = tpu.matmul %105, %107, %cst_36 {dimension_numbers = #tpu.dot_dimension_numbers<[2], [2], [1], [1], [0, 0, 0, 1, 1, 1], [0], [0]>} : vector<1x8x4xbf16>, vector<1x8x4xbf16>, vector<1x8x8xf32> -> vector<1x8x8xf32>
    "tpu.trace_stop"() : () -> ()
    %111 = vector.shape_cast %5 : vector<8x8xf32> to vector<1x8x8xf32>
    %112 = arith.addf %110, %111 : vector<1x8x8xf32>
    %cst_37 = arith.constant dense<0xFF800000> : vector<1x8xf32>
    %113 = vector.multi_reduction <maximumf>, %112, %cst_37 [2] : vector<1x8x8xf32> to vector<1x8xf32>
    %114 = vector.shape_cast %113 : vector<1x8xf32> to vector<1x8x1xf32>
    %115 = vector.broadcast %114 : vector<1x8x1xf32> to vector<1x8x8xf32>
    %116 = arith.subf %112, %115 : vector<1x8x8xf32>
    %117 = math.exp %116 : vector<1x8x8xf32>
    %cst_38 = arith.constant dense<0.000000e+00> : vector<1x8xf32>
    %118 = vector.multi_reduction <add>, %117, %cst_38 [2] : vector<1x8x8xf32> to vector<1x8xf32>
    %119 = vector.shape_cast %118 : vector<1x8xf32> to vector<1x8x1xf32>
    %120 = tpu.reciprocal %119 {approx = true} : vector<1x8x1xf32> -> vector<1x8x1xf32>
    %121 = vector.broadcast %120 : vector<1x8x1xf32> to vector<1x8x8xf32>
    %122 = arith.mulf %117, %121 : vector<1x8x8xf32>
    %123 = arith.truncf %122 : vector<1x8x8xf32> to vector<1x8x8xbf16>
    "tpu.trace_start"() <{level = 10 : i32, message = "bqk,bkd->bqd"}> : () -> ()
    %cst_39 = arith.constant dense<0.000000e+00> : vector<1x8x4xf32>
    %124 = tpu.matmul %123, %109, %cst_39 {dimension_numbers = #tpu.dot_dimension_numbers<[2], [1], [1], [2], [0, 0, 0, 1, 1, 2], [0], [0]>} : vector<1x8x8xbf16>, vector<1x8x4xbf16>, vector<1x8x4xf32> -> vector<1x8x4xf32>
    "tpu.trace_stop"() : () -> ()
    %125 = vector.shape_cast %124 : vector<1x8x4xf32> to vector<8x4xf32>
    %126 = vector.extract_strided_slice %57 {offsets = [0, 12], sizes = [8, 4], strides = [1, 1]} : vector<8x32xbf16> to vector<8x4xbf16>
    %127 = vector.shape_cast %126 : vector<8x4xbf16> to vector<1x8x4xbf16>
    %128 = vector.extract_strided_slice %58 {offsets = [0, 12], sizes = [8, 4], strides = [1, 1]} : vector<8x32xbf16> to vector<8x4xbf16>
    %129 = vector.shape_cast %128 : vector<8x4xbf16> to vector<1x8x4xbf16>
    %130 = vector.extract_strided_slice %59 {offsets = [0, 12], sizes = [8, 4], strides = [1, 1]} : vector<8x32xbf16> to vector<8x4xbf16>
    %131 = vector.shape_cast %130 : vector<8x4xbf16> to vector<1x8x4xbf16>
    "tpu.trace_start"() <{level = 10 : i32, message = "bqd,bkd->bqk"}> : () -> ()
    %cst_40 = arith.constant dense<0.000000e+00> : vector<1x8x8xf32>
    %132 = tpu.matmul %127, %129, %cst_40 {dimension_numbers = #tpu.dot_dimension_numbers<[2], [2], [1], [1], [0, 0, 0, 1, 1, 1], [0], [0]>} : vector<1x8x4xbf16>, vector<1x8x4xbf16>, vector<1x8x8xf32> -> vector<1x8x8xf32>
    "tpu.trace_stop"() : () -> ()
    %133 = vector.shape_cast %5 : vector<8x8xf32> to vector<1x8x8xf32>
    %134 = arith.addf %132, %133 : vector<1x8x8xf32>
    %cst_41 = arith.constant dense<0xFF800000> : vector<1x8xf32>
    %135 = vector.multi_reduction <maximumf>, %134, %cst_41 [2] : vector<1x8x8xf32> to vector<1x8xf32>
    %136 = vector.shape_cast %135 : vector<1x8xf32> to vector<1x8x1xf32>
    %137 = vector.broadcast %136 : vector<1x8x1xf32> to vector<1x8x8xf32>
    %138 = arith.subf %134, %137 : vector<1x8x8xf32>
    %139 = math.exp %138 : vector<1x8x8xf32>
    %cst_42 = arith.constant dense<0.000000e+00> : vector<1x8xf32>
    %140 = vector.multi_reduction <add>, %139, %cst_42 [2] : vector<1x8x8xf32> to vector<1x8xf32>
    %141 = vector.shape_cast %140 : vector<1x8xf32> to vector<1x8x1xf32>
    %142 = tpu.reciprocal %141 {approx = true} : vector<1x8x1xf32> -> vector<1x8x1xf32>
    %143 = vector.broadcast %142 : vector<1x8x1xf32> to vector<1x8x8xf32>
    %144 = arith.mulf %139, %143 : vector<1x8x8xf32>
    %145 = arith.truncf %144 : vector<1x8x8xf32> to vector<1x8x8xbf16>
    "tpu.trace_start"() <{level = 10 : i32, message = "bqk,bkd->bqd"}> : () -> ()
    %cst_43 = arith.constant dense<0.000000e+00> : vector<1x8x4xf32>
    %146 = tpu.matmul %145, %131, %cst_43 {dimension_numbers = #tpu.dot_dimension_numbers<[2], [1], [1], [2], [0, 0, 0, 1, 1, 2], [0], [0]>} : vector<1x8x8xbf16>, vector<1x8x4xbf16>, vector<1x8x4xf32> -> vector<1x8x4xf32>
    "tpu.trace_stop"() : () -> ()
    %147 = vector.shape_cast %146 : vector<1x8x4xf32> to vector<8x4xf32>
    %148 = vector.extract_strided_slice %57 {offsets = [0, 16], sizes = [8, 4], strides = [1, 1]} : vector<8x32xbf16> to vector<8x4xbf16>
    %149 = vector.shape_cast %148 : vector<8x4xbf16> to vector<1x8x4xbf16>
    %150 = vector.extract_strided_slice %58 {offsets = [0, 16], sizes = [8, 4], strides = [1, 1]} : vector<8x32xbf16> to vector<8x4xbf16>
    %151 = vector.shape_cast %150 : vector<8x4xbf16> to vector<1x8x4xbf16>
    %152 = vector.extract_strided_slice %59 {offsets = [0, 16], sizes = [8, 4], strides = [1, 1]} : vector<8x32xbf16> to vector<8x4xbf16>
    %153 = vector.shape_cast %152 : vector<8x4xbf16> to vector<1x8x4xbf16>
    "tpu.trace_start"() <{level = 10 : i32, message = "bqd,bkd->bqk"}> : () -> ()
    %cst_44 = arith.constant dense<0.000000e+00> : vector<1x8x8xf32>
    %154 = tpu.matmul %149, %151, %cst_44 {dimension_numbers = #tpu.dot_dimension_numbers<[2], [2], [1], [1], [0, 0, 0, 1, 1, 1], [0], [0]>} : vector<1x8x4xbf16>, vector<1x8x4xbf16>, vector<1x8x8xf32> -> vector<1x8x8xf32>
    "tpu.trace_stop"() : () -> ()
    %155 = vector.shape_cast %5 : vector<8x8xf32> to vector<1x8x8xf32>
    %156 = arith.addf %154, %155 : vector<1x8x8xf32>
    %cst_45 = arith.constant dense<0xFF800000> : vector<1x8xf32>
    %157 = vector.multi_reduction <maximumf>, %156, %cst_45 [2] : vector<1x8x8xf32> to vector<1x8xf32>
    %158 = vector.shape_cast %157 : vector<1x8xf32> to vector<1x8x1xf32>
    %159 = vector.broadcast %158 : vector<1x8x1xf32> to vector<1x8x8xf32>
    %160 = arith.subf %156, %159 : vector<1x8x8xf32>
    %161 = math.exp %160 : vector<1x8x8xf32>
    %cst_46 = arith.constant dense<0.000000e+00> : vector<1x8xf32>
    %162 = vector.multi_reduction <add>, %161, %cst_46 [2] : vector<1x8x8xf32> to vector<1x8xf32>
    %163 = vector.shape_cast %162 : vector<1x8xf32> to vector<1x8x1xf32>
    %164 = tpu.reciprocal %163 {approx = true} : vector<1x8x1xf32> -> vector<1x8x1xf32>
    %165 = vector.broadcast %164 : vector<1x8x1xf32> to vector<1x8x8xf32>
    %166 = arith.mulf %161, %165 : vector<1x8x8xf32>
    %167 = arith.truncf %166 : vector<1x8x8xf32> to vector<1x8x8xbf16>
    "tpu.trace_start"() <{level = 10 : i32, message = "bqk,bkd->bqd"}> : () -> ()
    %cst_47 = arith.constant dense<0.000000e+00> : vector<1x8x4xf32>
    %168 = tpu.matmul %167, %153, %cst_47 {dimension_numbers = #tpu.dot_dimension_numbers<[2], [1], [1], [2], [0, 0, 0, 1, 1, 2], [0], [0]>} : vector<1x8x8xbf16>, vector<1x8x4xbf16>, vector<1x8x4xf32> -> vector<1x8x4xf32>
    "tpu.trace_stop"() : () -> ()
    %169 = vector.shape_cast %168 : vector<1x8x4xf32> to vector<8x4xf32>
    %170 = vector.extract_strided_slice %57 {offsets = [0, 20], sizes = [8, 4], strides = [1, 1]} : vector<8x32xbf16> to vector<8x4xbf16>
    %171 = vector.shape_cast %170 : vector<8x4xbf16> to vector<1x8x4xbf16>
    %172 = vector.extract_strided_slice %58 {offsets = [0, 20], sizes = [8, 4], strides = [1, 1]} : vector<8x32xbf16> to vector<8x4xbf16>
    %173 = vector.shape_cast %172 : vector<8x4xbf16> to vector<1x8x4xbf16>
    %174 = vector.extract_strided_slice %59 {offsets = [0, 20], sizes = [8, 4], strides = [1, 1]} : vector<8x32xbf16> to vector<8x4xbf16>
    %175 = vector.shape_cast %174 : vector<8x4xbf16> to vector<1x8x4xbf16>
    "tpu.trace_start"() <{level = 10 : i32, message = "bqd,bkd->bqk"}> : () -> ()
    %cst_48 = arith.constant dense<0.000000e+00> : vector<1x8x8xf32>
    %176 = tpu.matmul %171, %173, %cst_48 {dimension_numbers = #tpu.dot_dimension_numbers<[2], [2], [1], [1], [0, 0, 0, 1, 1, 1], [0], [0]>} : vector<1x8x4xbf16>, vector<1x8x4xbf16>, vector<1x8x8xf32> -> vector<1x8x8xf32>
    "tpu.trace_stop"() : () -> ()
    %177 = vector.shape_cast %5 : vector<8x8xf32> to vector<1x8x8xf32>
    %178 = arith.addf %176, %177 : vector<1x8x8xf32>
    %cst_49 = arith.constant dense<0xFF800000> : vector<1x8xf32>
    %179 = vector.multi_reduction <maximumf>, %178, %cst_49 [2] : vector<1x8x8xf32> to vector<1x8xf32>
    %180 = vector.shape_cast %179 : vector<1x8xf32> to vector<1x8x1xf32>
    %181 = vector.broadcast %180 : vector<1x8x1xf32> to vector<1x8x8xf32>
    %182 = arith.subf %178, %181 : vector<1x8x8xf32>
    %183 = math.exp %182 : vector<1x8x8xf32>
    %cst_50 = arith.constant dense<0.000000e+00> : vector<1x8xf32>
    %184 = vector.multi_reduction <add>, %183, %cst_50 [2] : vector<1x8x8xf32> to vector<1x8xf32>
    %185 = vector.shape_cast %184 : vector<1x8xf32> to vector<1x8x1xf32>
    %186 = tpu.reciprocal %185 {approx = true} : vector<1x8x1xf32> -> vector<1x8x1xf32>
    %187 = vector.broadcast %186 : vector<1x8x1xf32> to vector<1x8x8xf32>
    %188 = arith.mulf %183, %187 : vector<1x8x8xf32>
    %189 = arith.truncf %188 : vector<1x8x8xf32> to vector<1x8x8xbf16>
    "tpu.trace_start"() <{level = 10 : i32, message = "bqk,bkd->bqd"}> : () -> ()
    %cst_51 = arith.constant dense<0.000000e+00> : vector<1x8x4xf32>
    %190 = tpu.matmul %189, %175, %cst_51 {dimension_numbers = #tpu.dot_dimension_numbers<[2], [1], [1], [2], [0, 0, 0, 1, 1, 2], [0], [0]>} : vector<1x8x8xbf16>, vector<1x8x4xbf16>, vector<1x8x4xf32> -> vector<1x8x4xf32>
    "tpu.trace_stop"() : () -> ()
    %191 = vector.shape_cast %190 : vector<1x8x4xf32> to vector<8x4xf32>
    %192 = vector.extract_strided_slice %57 {offsets = [0, 24], sizes = [8, 4], strides = [1, 1]} : vector<8x32xbf16> to vector<8x4xbf16>
    %193 = vector.shape_cast %192 : vector<8x4xbf16> to vector<1x8x4xbf16>
    %194 = vector.extract_strided_slice %58 {offsets = [0, 24], sizes = [8, 4], strides = [1, 1]} : vector<8x32xbf16> to vector<8x4xbf16>
    %195 = vector.shape_cast %194 : vector<8x4xbf16> to vector<1x8x4xbf16>
    %196 = vector.extract_strided_slice %59 {offsets = [0, 24], sizes = [8, 4], strides = [1, 1]} : vector<8x32xbf16> to vector<8x4xbf16>
    %197 = vector.shape_cast %196 : vector<8x4xbf16> to vector<1x8x4xbf16>
    "tpu.trace_start"() <{level = 10 : i32, message = "bqd,bkd->bqk"}> : () -> ()
    %cst_52 = arith.constant dense<0.000000e+00> : vector<1x8x8xf32>
    %198 = tpu.matmul %193, %195, %cst_52 {dimension_numbers = #tpu.dot_dimension_numbers<[2], [2], [1], [1], [0, 0, 0, 1, 1, 1], [0], [0]>} : vector<1x8x4xbf16>, vector<1x8x4xbf16>, vector<1x8x8xf32> -> vector<1x8x8xf32>
    "tpu.trace_stop"() : () -> ()
    %199 = vector.shape_cast %5 : vector<8x8xf32> to vector<1x8x8xf32>
    %200 = arith.addf %198, %199 : vector<1x8x8xf32>
    %cst_53 = arith.constant dense<0xFF800000> : vector<1x8xf32>
    %201 = vector.multi_reduction <maximumf>, %200, %cst_53 [2] : vector<1x8x8xf32> to vector<1x8xf32>
    %202 = vector.shape_cast %201 : vector<1x8xf32> to vector<1x8x1xf32>
    %203 = vector.broadcast %202 : vector<1x8x1xf32> to vector<1x8x8xf32>
    %204 = arith.subf %200, %203 : vector<1x8x8xf32>
    %205 = math.exp %204 : vector<1x8x8xf32>
    %cst_54 = arith.constant dense<0.000000e+00> : vector<1x8xf32>
    %206 = vector.multi_reduction <add>, %205, %cst_54 [2] : vector<1x8x8xf32> to vector<1x8xf32>
    %207 = vector.shape_cast %206 : vector<1x8xf32> to vector<1x8x1xf32>
    %208 = tpu.reciprocal %207 {approx = true} : vector<1x8x1xf32> -> vector<1x8x1xf32>
    %209 = vector.broadcast %208 : vector<1x8x1xf32> to vector<1x8x8xf32>
    %210 = arith.mulf %205, %209 : vector<1x8x8xf32>
    %211 = arith.truncf %210 : vector<1x8x8xf32> to vector<1x8x8xbf16>
    "tpu.trace_start"() <{level = 10 : i32, message = "bqk,bkd->bqd"}> : () -> ()
    %cst_55 = arith.constant dense<0.000000e+00> : vector<1x8x4xf32>
    %212 = tpu.matmul %211, %197, %cst_55 {dimension_numbers = #tpu.dot_dimension_numbers<[2], [1], [1], [2], [0, 0, 0, 1, 1, 2], [0], [0]>} : vector<1x8x8xbf16>, vector<1x8x4xbf16>, vector<1x8x4xf32> -> vector<1x8x4xf32>
    "tpu.trace_stop"() : () -> ()
    %213 = vector.shape_cast %212 : vector<1x8x4xf32> to vector<8x4xf32>
    %214 = vector.extract_strided_slice %57 {offsets = [0, 28], sizes = [8, 4], strides = [1, 1]} : vector<8x32xbf16> to vector<8x4xbf16>
    %215 = vector.shape_cast %214 : vector<8x4xbf16> to vector<1x8x4xbf16>
    %216 = vector.extract_strided_slice %58 {offsets = [0, 28], sizes = [8, 4], strides = [1, 1]} : vector<8x32xbf16> to vector<8x4xbf16>
    %217 = vector.shape_cast %216 : vector<8x4xbf16> to vector<1x8x4xbf16>
    %218 = vector.extract_strided_slice %59 {offsets = [0, 28], sizes = [8, 4], strides = [1, 1]} : vector<8x32xbf16> to vector<8x4xbf16>
    %219 = vector.shape_cast %218 : vector<8x4xbf16> to vector<1x8x4xbf16>
    "tpu.trace_start"() <{level = 10 : i32, message = "bqd,bkd->bqk"}> : () -> ()
    %cst_56 = arith.constant dense<0.000000e+00> : vector<1x8x8xf32>
    %220 = tpu.matmul %215, %217, %cst_56 {dimension_numbers = #tpu.dot_dimension_numbers<[2], [2], [1], [1], [0, 0, 0, 1, 1, 1], [0], [0]>} : vector<1x8x4xbf16>, vector<1x8x4xbf16>, vector<1x8x8xf32> -> vector<1x8x8xf32>
    "tpu.trace_stop"() : () -> ()
    %221 = vector.shape_cast %5 : vector<8x8xf32> to vector<1x8x8xf32>
    %222 = arith.addf %220, %221 : vector<1x8x8xf32>
    %cst_57 = arith.constant dense<0xFF800000> : vector<1x8xf32>
    %223 = vector.multi_reduction <maximumf>, %222, %cst_57 [2] : vector<1x8x8xf32> to vector<1x8xf32>
    %224 = vector.shape_cast %223 : vector<1x8xf32> to vector<1x8x1xf32>
    %225 = vector.broadcast %224 : vector<1x8x1xf32> to vector<1x8x8xf32>
    %226 = arith.subf %222, %225 : vector<1x8x8xf32>
    %227 = math.exp %226 : vector<1x8x8xf32>
    %cst_58 = arith.constant dense<0.000000e+00> : vector<1x8xf32>
    %228 = vector.multi_reduction <add>, %227, %cst_58 [2] : vector<1x8x8xf32> to vector<1x8xf32>
    %229 = vector.shape_cast %228 : vector<1x8xf32> to vector<1x8x1xf32>
    %230 = tpu.reciprocal %229 {approx = true} : vector<1x8x1xf32> -> vector<1x8x1xf32>
    %231 = vector.broadcast %230 : vector<1x8x1xf32> to vector<1x8x8xf32>
    %232 = arith.mulf %227, %231 : vector<1x8x8xf32>
    %233 = arith.truncf %232 : vector<1x8x8xf32> to vector<1x8x8xbf16>
    "tpu.trace_start"() <{level = 10 : i32, message = "bqk,bkd->bqd"}> : () -> ()
    %cst_59 = arith.constant dense<0.000000e+00> : vector<1x8x4xf32>
    %234 = tpu.matmul %233, %219, %cst_59 {dimension_numbers = #tpu.dot_dimension_numbers<[2], [1], [1], [2], [0, 0, 0, 1, 1, 2], [0], [0]>} : vector<1x8x8xbf16>, vector<1x8x4xbf16>, vector<1x8x4xf32> -> vector<1x8x4xf32>
    "tpu.trace_stop"() : () -> ()
    %235 = vector.shape_cast %234 : vector<1x8x4xf32> to vector<8x4xf32>
    %236 = tpu.concatenate %81, %103, %125, %147, %169, %191, %213, %235 in 1 : vector<8x4xf32>, vector<8x4xf32>, vector<8x4xf32>, vector<8x4xf32>, vector<8x4xf32>, vector<8x4xf32>, vector<8x4xf32>, vector<8x4xf32> -> vector<8x32xf32>
    %237 = arith.truncf %236 : vector<8x32xf32> to vector<8x32xbf16>
    %c0_60 = arith.constant 0 : index
    %c3 = arith.constant 3 : index
    %c0_61 = arith.constant 0 : index
    %c0_62 = arith.constant 0 : index
    %238 = vector.load %arg4[%c0_60, %c3, %c0_61, %c0_62] : memref<2x4x32x32xbf16, #tpu.memory_space<vmem>>, vector<1x1x32x32xbf16>
    %239 = vector.shape_cast %238 : vector<1x1x32x32xbf16> to vector<32x32xbf16>
    %cst_63 = arith.constant dense<0.000000e+00> : vector<8x32xf32>
    %240 = tpu.matmul %237, %239, %cst_63 {dimension_numbers = #tpu.dot_dimension_numbers<[1], [0], [0], [1], [0, 0, 1, 1], [], []>} : vector<8x32xbf16>, vector<32x32xbf16>, vector<8x32xf32> -> vector<8x32xf32>
    %241 = arith.addf %11, %240 : vector<8x32xf32>
    %242 = vector.extract_strided_slice %13 {offsets = [5, 0], sizes = [1, 32], strides = [1, 1]} : vector<9x32xf32> to vector<1x32xf32>
    %243 = vector.broadcast %242 : vector<1x32xf32> to vector<8x32xf32>
    %244 = arith.addf %241, %243 : vector<8x32xf32>
    %245 = vector.extract_strided_slice %13 {offsets = [6, 0], sizes = [1, 32], strides = [1, 1]} : vector<9x32xf32> to vector<1x32xf32>
    %246 = vector.extract_strided_slice %13 {offsets = [7, 0], sizes = [1, 32], strides = [1, 1]} : vector<9x32xf32> to vector<1x32xf32>
    %cst_64 = arith.constant dense<0.000000e+00> : vector<8xf32>
    %247 = vector.multi_reduction <add>, %244, %cst_64 [1] : vector<8x32xf32> to vector<8xf32>
    %248 = vector.shape_cast %247 : vector<8xf32> to vector<8x1xf32>
    %cst_65 = arith.constant 3.200000e+01 : f32
    %249 = vector.broadcast %cst_65 : f32 to vector<8x1xf32>
    %250 = arith.divf %248, %249 : vector<8x1xf32>
    %251 = vector.broadcast %250 : vector<8x1xf32> to vector<8x32xf32>
    %252 = arith.subf %244, %251 : vector<8x32xf32>
    %253 = arith.mulf %252, %252 : vector<8x32xf32>
    %cst_66 = arith.constant dense<0.000000e+00> : vector<8xf32>
    %254 = vector.multi_reduction <add>, %253, %cst_66 [1] : vector<8x32xf32> to vector<8xf32>
    %255 = vector.shape_cast %254 : vector<8xf32> to vector<8x1xf32>
    %cst_67 = arith.constant 3.200000e+01 : f32
    %256 = vector.broadcast %cst_67 : f32 to vector<8x1xf32>
    %257 = arith.divf %255, %256 : vector<8x1xf32>
    %258 = vector.broadcast %250 : vector<8x1xf32> to vector<8x32xf32>
    %259 = arith.subf %244, %258 : vector<8x32xf32>
    %cst_68 = arith.constant 9.99999974E-6 : f32
    %260 = vector.broadcast %cst_68 : f32 to vector<8x1xf32>
    %261 = arith.addf %257, %260 : vector<8x1xf32>
    %262 = math.rsqrt %261 : vector<8x1xf32>
    %263 = vector.broadcast %262 : vector<8x1xf32> to vector<8x32xf32>
    %264 = arith.mulf %259, %263 : vector<8x32xf32>
    %265 = vector.broadcast %245 : vector<1x32xf32> to vector<8x32xf32>
    %266 = arith.mulf %264, %265 : vector<8x32xf32>
    %267 = vector.broadcast %246 : vector<1x32xf32> to vector<8x32xf32>
    %268 = arith.addf %266, %267 : vector<8x32xf32>
    %269 = arith.truncf %268 : vector<8x32xf32> to vector<8x32xbf16>
    %c0_69 = arith.constant 0 : index
    %c0_70 = arith.constant 0 : index
    %c0_71 = arith.constant 0 : index
    %270 = vector.load %arg5[%c0_69, %c0_70, %c0_71] : memref<2x32x128xbf16, #tpu.memory_space<vmem>>, vector<1x32x128xbf16>
    %271 = vector.shape_cast %270 : vector<1x32x128xbf16> to vector<32x128xbf16>
    %cst_72 = arith.constant dense<0.000000e+00> : vector<8x128xf32>
    %272 = tpu.matmul %269, %271, %cst_72 {dimension_numbers = #tpu.dot_dimension_numbers<[1], [0], [0], [1], [0, 0, 1, 1], [], []>} : vector<8x32xbf16>, vector<32x128xbf16>, vector<8x128xf32> -> vector<8x128xf32>
    %c0_73 = arith.constant 0 : index
    %c0_74 = arith.constant 0 : index
    %c0_75 = arith.constant 0 : index
    %273 = vector.load %arg6[%c0_73, %c0_74, %c0_75] : memref<2x1x128xf32, #tpu.memory_space<vmem>>, vector<1x1x128xf32>
    %274 = vector.shape_cast %273 : vector<1x1x128xf32> to vector<1x128xf32>
    %275 = vector.broadcast %274 : vector<1x128xf32> to vector<8x128xf32>
    %276 = arith.addf %272, %275 : vector<8x128xf32>
    %cst_76 = arith.constant 0.000000e+00 : f32
    %277 = vector.broadcast %cst_76 : f32 to vector<8x128xf32>
    %278 = arith.maximumf %276, %277 : vector<8x128xf32>
    %279 = arith.truncf %278 : vector<8x128xf32> to vector<8x128xbf16>
    %c0_77 = arith.constant 0 : index
    %c0_78 = arith.constant 0 : index
    %c0_79 = arith.constant 0 : index
    %280 = vector.load %arg7[%c0_77, %c0_78, %c0_79] : memref<2x128x32xbf16, #tpu.memory_space<vmem>>, vector<1x128x32xbf16>
    %281 = vector.shape_cast %280 : vector<1x128x32xbf16> to vector<128x32xbf16>
    %cst_80 = arith.constant dense<0.000000e+00> : vector<8x32xf32>
    %282 = tpu.matmul %279, %281, %cst_80 {dimension_numbers = #tpu.dot_dimension_numbers<[1], [0], [0], [1], [0, 0, 1, 1], [], []>} : vector<8x128xbf16>, vector<128x32xbf16>, vector<8x32xf32> -> vector<8x32xf32>
    %283 = vector.extract_strided_slice %13 {offsets = [8, 0], sizes = [1, 32], strides = [1, 1]} : vector<9x32xf32> to vector<1x32xf32>
    %284 = vector.broadcast %283 : vector<1x32xf32> to vector<8x32xf32>
    %285 = arith.addf %282, %284 : vector<8x32xf32>
    %286 = arith.addf %244, %285 : vector<8x32xf32>
    %c1_81 = arith.constant 1 : index
    %c0_82 = arith.constant 0 : index
    %c0_83 = arith.constant 0 : index
    %287 = vector.load %arg8[%c1_81, %c0_82, %c0_83] : memref<2x9x32xf32, #tpu.memory_space<vmem>>, vector<1x9x32xf32>
    %288 = vector.shape_cast %287 : vector<1x9x32xf32> to vector<9x32xf32>
    %289 = vector.extract_strided_slice %288 {offsets = [0, 0], sizes = [1, 32], strides = [1, 1]} : vector<9x32xf32> to vector<1x32xf32>
    %290 = vector.extract_strided_slice %288 {offsets = [1, 0], sizes = [1, 32], strides = [1, 1]} : vector<9x32xf32> to vector<1x32xf32>
    %cst_84 = arith.constant dense<0.000000e+00> : vector<8xf32>
    %291 = vector.multi_reduction <add>, %286, %cst_84 [1] : vector<8x32xf32> to vector<8xf32>
    %292 = vector.shape_cast %291 : vector<8xf32> to vector<8x1xf32>
    %cst_85 = arith.constant 3.200000e+01 : f32
    %293 = vector.broadcast %cst_85 : f32 to vector<8x1xf32>
    %294 = arith.divf %292, %293 : vector<8x1xf32>
    %295 = vector.broadcast %294 : vector<8x1xf32> to vector<8x32xf32>
    %296 = arith.subf %286, %295 : vector<8x32xf32>
    %297 = arith.mulf %296, %296 : vector<8x32xf32>
    %cst_86 = arith.constant dense<0.000000e+00> : vector<8xf32>
    %298 = vector.multi_reduction <add>, %297, %cst_86 [1] : vector<8x32xf32> to vector<8xf32>
    %299 = vector.shape_cast %298 : vector<8xf32> to vector<8x1xf32>
    %cst_87 = arith.constant 3.200000e+01 : f32
    %300 = vector.broadcast %cst_87 : f32 to vector<8x1xf32>
    %301 = arith.divf %299, %300 : vector<8x1xf32>
    %302 = vector.broadcast %294 : vector<8x1xf32> to vector<8x32xf32>
    %303 = arith.subf %286, %302 : vector<8x32xf32>
    %cst_88 = arith.constant 9.99999974E-6 : f32
    %304 = vector.broadcast %cst_88 : f32 to vector<8x1xf32>
    %305 = arith.addf %301, %304 : vector<8x1xf32>
    %306 = math.rsqrt %305 : vector<8x1xf32>
    %307 = vector.broadcast %306 : vector<8x1xf32> to vector<8x32xf32>
    %308 = arith.mulf %303, %307 : vector<8x32xf32>
    %309 = vector.broadcast %289 : vector<1x32xf32> to vector<8x32xf32>
    %310 = arith.mulf %308, %309 : vector<8x32xf32>
    %311 = vector.broadcast %290 : vector<1x32xf32> to vector<8x32xf32>
    %312 = arith.addf %310, %311 : vector<8x32xf32>
    %313 = arith.truncf %312 : vector<8x32xf32> to vector<8x32xbf16>
    %c1_89 = arith.constant 1 : index
    %c0_90 = arith.constant 0 : index
    %c0_91 = arith.constant 0 : index
    %c0_92 = arith.constant 0 : index
    %314 = vector.load %arg4[%c1_89, %c0_90, %c0_91, %c0_92] : memref<2x4x32x32xbf16, #tpu.memory_space<vmem>>, vector<1x1x32x32xbf16>
    %315 = vector.shape_cast %314 : vector<1x1x32x32xbf16> to vector<32x32xbf16>
    %cst_93 = arith.constant dense<0.000000e+00> : vector<8x32xf32>
    %316 = tpu.matmul %313, %315, %cst_93 {dimension_numbers = #tpu.dot_dimension_numbers<[1], [0], [0], [1], [0, 0, 1, 1], [], []>} : vector<8x32xbf16>, vector<32x32xbf16>, vector<8x32xf32> -> vector<8x32xf32>
    %317 = vector.extract_strided_slice %288 {offsets = [2, 0], sizes = [1, 32], strides = [1, 1]} : vector<9x32xf32> to vector<1x32xf32>
    %318 = vector.broadcast %317 : vector<1x32xf32> to vector<8x32xf32>
    %319 = arith.addf %316, %318 : vector<8x32xf32>
    %c1_94 = arith.constant 1 : index
    %c1_95 = arith.constant 1 : index
    %c0_96 = arith.constant 0 : index
    %c0_97 = arith.constant 0 : index
    %320 = vector.load %arg4[%c1_94, %c1_95, %c0_96, %c0_97] : memref<2x4x32x32xbf16, #tpu.memory_space<vmem>>, vector<1x1x32x32xbf16>
    %321 = vector.shape_cast %320 : vector<1x1x32x32xbf16> to vector<32x32xbf16>
    %cst_98 = arith.constant dense<0.000000e+00> : vector<8x32xf32>
    %322 = tpu.matmul %313, %321, %cst_98 {dimension_numbers = #tpu.dot_dimension_numbers<[1], [0], [0], [1], [0, 0, 1, 1], [], []>} : vector<8x32xbf16>, vector<32x32xbf16>, vector<8x32xf32> -> vector<8x32xf32>
    %323 = vector.extract_strided_slice %288 {offsets = [3, 0], sizes = [1, 32], strides = [1, 1]} : vector<9x32xf32> to vector<1x32xf32>
    %324 = vector.broadcast %323 : vector<1x32xf32> to vector<8x32xf32>
    %325 = arith.addf %322, %324 : vector<8x32xf32>
    %c1_99 = arith.constant 1 : index
    %c2_100 = arith.constant 2 : index
    %c0_101 = arith.constant 0 : index
    %c0_102 = arith.constant 0 : index
    %326 = vector.load %arg4[%c1_99, %c2_100, %c0_101, %c0_102] : memref<2x4x32x32xbf16, #tpu.memory_space<vmem>>, vector<1x1x32x32xbf16>
    %327 = vector.shape_cast %326 : vector<1x1x32x32xbf16> to vector<32x32xbf16>
    %cst_103 = arith.constant dense<0.000000e+00> : vector<8x32xf32>
    %328 = tpu.matmul %313, %327, %cst_103 {dimension_numbers = #tpu.dot_dimension_numbers<[1], [0], [0], [1], [0, 0, 1, 1], [], []>} : vector<8x32xbf16>, vector<32x32xbf16>, vector<8x32xf32> -> vector<8x32xf32>
    %329 = vector.extract_strided_slice %288 {offsets = [4, 0], sizes = [1, 32], strides = [1, 1]} : vector<9x32xf32> to vector<1x32xf32>
    %330 = vector.broadcast %329 : vector<1x32xf32> to vector<8x32xf32>
    %331 = arith.addf %328, %330 : vector<8x32xf32>
    %332 = arith.truncf %319 : vector<8x32xf32> to vector<8x32xbf16>
    %333 = arith.truncf %325 : vector<8x32xf32> to vector<8x32xbf16>
    %334 = arith.truncf %331 : vector<8x32xf32> to vector<8x32xbf16>
    %335 = vector.extract_strided_slice %332 {offsets = [0, 0], sizes = [8, 4], strides = [1, 1]} : vector<8x32xbf16> to vector<8x4xbf16>
    %336 = vector.shape_cast %335 : vector<8x4xbf16> to vector<1x8x4xbf16>
    %337 = vector.extract_strided_slice %333 {offsets = [0, 0], sizes = [8, 4], strides = [1, 1]} : vector<8x32xbf16> to vector<8x4xbf16>
    %338 = vector.shape_cast %337 : vector<8x4xbf16> to vector<1x8x4xbf16>
    %339 = vector.extract_strided_slice %334 {offsets = [0, 0], sizes = [8, 4], strides = [1, 1]} : vector<8x32xbf16> to vector<8x4xbf16>
    %340 = vector.shape_cast %339 : vector<8x4xbf16> to vector<1x8x4xbf16>
    "tpu.trace_start"() <{level = 10 : i32, message = "bqd,bkd->bqk"}> : () -> ()
    %cst_104 = arith.constant dense<0.000000e+00> : vector<1x8x8xf32>
    %341 = tpu.matmul %336, %338, %cst_104 {dimension_numbers = #tpu.dot_dimension_numbers<[2], [2], [1], [1], [0, 0, 0, 1, 1, 1], [0], [0]>} : vector<1x8x4xbf16>, vector<1x8x4xbf16>, vector<1x8x8xf32> -> vector<1x8x8xf32>
    "tpu.trace_stop"() : () -> ()
    %342 = vector.shape_cast %5 : vector<8x8xf32> to vector<1x8x8xf32>
    %343 = arith.addf %341, %342 : vector<1x8x8xf32>
    %cst_105 = arith.constant dense<0xFF800000> : vector<1x8xf32>
    %344 = vector.multi_reduction <maximumf>, %343, %cst_105 [2] : vector<1x8x8xf32> to vector<1x8xf32>
    %345 = vector.shape_cast %344 : vector<1x8xf32> to vector<1x8x1xf32>
    %346 = vector.broadcast %345 : vector<1x8x1xf32> to vector<1x8x8xf32>
    %347 = arith.subf %343, %346 : vector<1x8x8xf32>
    %348 = math.exp %347 : vector<1x8x8xf32>
    %cst_106 = arith.constant dense<0.000000e+00> : vector<1x8xf32>
    %349 = vector.multi_reduction <add>, %348, %cst_106 [2] : vector<1x8x8xf32> to vector<1x8xf32>
    %350 = vector.shape_cast %349 : vector<1x8xf32> to vector<1x8x1xf32>
    %351 = tpu.reciprocal %350 {approx = true} : vector<1x8x1xf32> -> vector<1x8x1xf32>
    %352 = vector.broadcast %351 : vector<1x8x1xf32> to vector<1x8x8xf32>
    %353 = arith.mulf %348, %352 : vector<1x8x8xf32>
    %354 = arith.truncf %353 : vector<1x8x8xf32> to vector<1x8x8xbf16>
    "tpu.trace_start"() <{level = 10 : i32, message = "bqk,bkd->bqd"}> : () -> ()
    %cst_107 = arith.constant dense<0.000000e+00> : vector<1x8x4xf32>
    %355 = tpu.matmul %354, %340, %cst_107 {dimension_numbers = #tpu.dot_dimension_numbers<[2], [1], [1], [2], [0, 0, 0, 1, 1, 2], [0], [0]>} : vector<1x8x8xbf16>, vector<1x8x4xbf16>, vector<1x8x4xf32> -> vector<1x8x4xf32>
    "tpu.trace_stop"() : () -> ()
    %356 = vector.shape_cast %355 : vector<1x8x4xf32> to vector<8x4xf32>
    %357 = vector.extract_strided_slice %332 {offsets = [0, 4], sizes = [8, 4], strides = [1, 1]} : vector<8x32xbf16> to vector<8x4xbf16>
    %358 = vector.shape_cast %357 : vector<8x4xbf16> to vector<1x8x4xbf16>
    %359 = vector.extract_strided_slice %333 {offsets = [0, 4], sizes = [8, 4], strides = [1, 1]} : vector<8x32xbf16> to vector<8x4xbf16>
    %360 = vector.shape_cast %359 : vector<8x4xbf16> to vector<1x8x4xbf16>
    %361 = vector.extract_strided_slice %334 {offsets = [0, 4], sizes = [8, 4], strides = [1, 1]} : vector<8x32xbf16> to vector<8x4xbf16>
    %362 = vector.shape_cast %361 : vector<8x4xbf16> to vector<1x8x4xbf16>
    "tpu.trace_start"() <{level = 10 : i32, message = "bqd,bkd->bqk"}> : () -> ()
    %cst_108 = arith.constant dense<0.000000e+00> : vector<1x8x8xf32>
    %363 = tpu.matmul %358, %360, %cst_108 {dimension_numbers = #tpu.dot_dimension_numbers<[2], [2], [1], [1], [0, 0, 0, 1, 1, 1], [0], [0]>} : vector<1x8x4xbf16>, vector<1x8x4xbf16>, vector<1x8x8xf32> -> vector<1x8x8xf32>
    "tpu.trace_stop"() : () -> ()
    %364 = vector.shape_cast %5 : vector<8x8xf32> to vector<1x8x8xf32>
    %365 = arith.addf %363, %364 : vector<1x8x8xf32>
    %cst_109 = arith.constant dense<0xFF800000> : vector<1x8xf32>
    %366 = vector.multi_reduction <maximumf>, %365, %cst_109 [2] : vector<1x8x8xf32> to vector<1x8xf32>
    %367 = vector.shape_cast %366 : vector<1x8xf32> to vector<1x8x1xf32>
    %368 = vector.broadcast %367 : vector<1x8x1xf32> to vector<1x8x8xf32>
    %369 = arith.subf %365, %368 : vector<1x8x8xf32>
    %370 = math.exp %369 : vector<1x8x8xf32>
    %cst_110 = arith.constant dense<0.000000e+00> : vector<1x8xf32>
    %371 = vector.multi_reduction <add>, %370, %cst_110 [2] : vector<1x8x8xf32> to vector<1x8xf32>
    %372 = vector.shape_cast %371 : vector<1x8xf32> to vector<1x8x1xf32>
    %373 = tpu.reciprocal %372 {approx = true} : vector<1x8x1xf32> -> vector<1x8x1xf32>
    %374 = vector.broadcast %373 : vector<1x8x1xf32> to vector<1x8x8xf32>
    %375 = arith.mulf %370, %374 : vector<1x8x8xf32>
    %376 = arith.truncf %375 : vector<1x8x8xf32> to vector<1x8x8xbf16>
    "tpu.trace_start"() <{level = 10 : i32, message = "bqk,bkd->bqd"}> : () -> ()
    %cst_111 = arith.constant dense<0.000000e+00> : vector<1x8x4xf32>
    %377 = tpu.matmul %376, %362, %cst_111 {dimension_numbers = #tpu.dot_dimension_numbers<[2], [1], [1], [2], [0, 0, 0, 1, 1, 2], [0], [0]>} : vector<1x8x8xbf16>, vector<1x8x4xbf16>, vector<1x8x4xf32> -> vector<1x8x4xf32>
    "tpu.trace_stop"() : () -> ()
    %378 = vector.shape_cast %377 : vector<1x8x4xf32> to vector<8x4xf32>
    %379 = vector.extract_strided_slice %332 {offsets = [0, 8], sizes = [8, 4], strides = [1, 1]} : vector<8x32xbf16> to vector<8x4xbf16>
    %380 = vector.shape_cast %379 : vector<8x4xbf16> to vector<1x8x4xbf16>
    %381 = vector.extract_strided_slice %333 {offsets = [0, 8], sizes = [8, 4], strides = [1, 1]} : vector<8x32xbf16> to vector<8x4xbf16>
    %382 = vector.shape_cast %381 : vector<8x4xbf16> to vector<1x8x4xbf16>
    %383 = vector.extract_strided_slice %334 {offsets = [0, 8], sizes = [8, 4], strides = [1, 1]} : vector<8x32xbf16> to vector<8x4xbf16>
    %384 = vector.shape_cast %383 : vector<8x4xbf16> to vector<1x8x4xbf16>
    "tpu.trace_start"() <{level = 10 : i32, message = "bqd,bkd->bqk"}> : () -> ()
    %cst_112 = arith.constant dense<0.000000e+00> : vector<1x8x8xf32>
    %385 = tpu.matmul %380, %382, %cst_112 {dimension_numbers = #tpu.dot_dimension_numbers<[2], [2], [1], [1], [0, 0, 0, 1, 1, 1], [0], [0]>} : vector<1x8x4xbf16>, vector<1x8x4xbf16>, vector<1x8x8xf32> -> vector<1x8x8xf32>
    "tpu.trace_stop"() : () -> ()
    %386 = vector.shape_cast %5 : vector<8x8xf32> to vector<1x8x8xf32>
    %387 = arith.addf %385, %386 : vector<1x8x8xf32>
    %cst_113 = arith.constant dense<0xFF800000> : vector<1x8xf32>
    %388 = vector.multi_reduction <maximumf>, %387, %cst_113 [2] : vector<1x8x8xf32> to vector<1x8xf32>
    %389 = vector.shape_cast %388 : vector<1x8xf32> to vector<1x8x1xf32>
    %390 = vector.broadcast %389 : vector<1x8x1xf32> to vector<1x8x8xf32>
    %391 = arith.subf %387, %390 : vector<1x8x8xf32>
    %392 = math.exp %391 : vector<1x8x8xf32>
    %cst_114 = arith.constant dense<0.000000e+00> : vector<1x8xf32>
    %393 = vector.multi_reduction <add>, %392, %cst_114 [2] : vector<1x8x8xf32> to vector<1x8xf32>
    %394 = vector.shape_cast %393 : vector<1x8xf32> to vector<1x8x1xf32>
    %395 = tpu.reciprocal %394 {approx = true} : vector<1x8x1xf32> -> vector<1x8x1xf32>
    %396 = vector.broadcast %395 : vector<1x8x1xf32> to vector<1x8x8xf32>
    %397 = arith.mulf %392, %396 : vector<1x8x8xf32>
    %398 = arith.truncf %397 : vector<1x8x8xf32> to vector<1x8x8xbf16>
    "tpu.trace_start"() <{level = 10 : i32, message = "bqk,bkd->bqd"}> : () -> ()
    %cst_115 = arith.constant dense<0.000000e+00> : vector<1x8x4xf32>
    %399 = tpu.matmul %398, %384, %cst_115 {dimension_numbers = #tpu.dot_dimension_numbers<[2], [1], [1], [2], [0, 0, 0, 1, 1, 2], [0], [0]>} : vector<1x8x8xbf16>, vector<1x8x4xbf16>, vector<1x8x4xf32> -> vector<1x8x4xf32>
    "tpu.trace_stop"() : () -> ()
    %400 = vector.shape_cast %399 : vector<1x8x4xf32> to vector<8x4xf32>
    %401 = vector.extract_strided_slice %332 {offsets = [0, 12], sizes = [8, 4], strides = [1, 1]} : vector<8x32xbf16> to vector<8x4xbf16>
    %402 = vector.shape_cast %401 : vector<8x4xbf16> to vector<1x8x4xbf16>
    %403 = vector.extract_strided_slice %333 {offsets = [0, 12], sizes = [8, 4], strides = [1, 1]} : vector<8x32xbf16> to vector<8x4xbf16>
    %404 = vector.shape_cast %403 : vector<8x4xbf16> to vector<1x8x4xbf16>
    %405 = vector.extract_strided_slice %334 {offsets = [0, 12], sizes = [8, 4], strides = [1, 1]} : vector<8x32xbf16> to vector<8x4xbf16>
    %406 = vector.shape_cast %405 : vector<8x4xbf16> to vector<1x8x4xbf16>
    "tpu.trace_start"() <{level = 10 : i32, message = "bqd,bkd->bqk"}> : () -> ()
    %cst_116 = arith.constant dense<0.000000e+00> : vector<1x8x8xf32>
    %407 = tpu.matmul %402, %404, %cst_116 {dimension_numbers = #tpu.dot_dimension_numbers<[2], [2], [1], [1], [0, 0, 0, 1, 1, 1], [0], [0]>} : vector<1x8x4xbf16>, vector<1x8x4xbf16>, vector<1x8x8xf32> -> vector<1x8x8xf32>
    "tpu.trace_stop"() : () -> ()
    %408 = vector.shape_cast %5 : vector<8x8xf32> to vector<1x8x8xf32>
    %409 = arith.addf %407, %408 : vector<1x8x8xf32>
    %cst_117 = arith.constant dense<0xFF800000> : vector<1x8xf32>
    %410 = vector.multi_reduction <maximumf>, %409, %cst_117 [2] : vector<1x8x8xf32> to vector<1x8xf32>
    %411 = vector.shape_cast %410 : vector<1x8xf32> to vector<1x8x1xf32>
    %412 = vector.broadcast %411 : vector<1x8x1xf32> to vector<1x8x8xf32>
    %413 = arith.subf %409, %412 : vector<1x8x8xf32>
    %414 = math.exp %413 : vector<1x8x8xf32>
    %cst_118 = arith.constant dense<0.000000e+00> : vector<1x8xf32>
    %415 = vector.multi_reduction <add>, %414, %cst_118 [2] : vector<1x8x8xf32> to vector<1x8xf32>
    %416 = vector.shape_cast %415 : vector<1x8xf32> to vector<1x8x1xf32>
    %417 = tpu.reciprocal %416 {approx = true} : vector<1x8x1xf32> -> vector<1x8x1xf32>
    %418 = vector.broadcast %417 : vector<1x8x1xf32> to vector<1x8x8xf32>
    %419 = arith.mulf %414, %418 : vector<1x8x8xf32>
    %420 = arith.truncf %419 : vector<1x8x8xf32> to vector<1x8x8xbf16>
    "tpu.trace_start"() <{level = 10 : i32, message = "bqk,bkd->bqd"}> : () -> ()
    %cst_119 = arith.constant dense<0.000000e+00> : vector<1x8x4xf32>
    %421 = tpu.matmul %420, %406, %cst_119 {dimension_numbers = #tpu.dot_dimension_numbers<[2], [1], [1], [2], [0, 0, 0, 1, 1, 2], [0], [0]>} : vector<1x8x8xbf16>, vector<1x8x4xbf16>, vector<1x8x4xf32> -> vector<1x8x4xf32>
    "tpu.trace_stop"() : () -> ()
    %422 = vector.shape_cast %421 : vector<1x8x4xf32> to vector<8x4xf32>
    %423 = vector.extract_strided_slice %332 {offsets = [0, 16], sizes = [8, 4], strides = [1, 1]} : vector<8x32xbf16> to vector<8x4xbf16>
    %424 = vector.shape_cast %423 : vector<8x4xbf16> to vector<1x8x4xbf16>
    %425 = vector.extract_strided_slice %333 {offsets = [0, 16], sizes = [8, 4], strides = [1, 1]} : vector<8x32xbf16> to vector<8x4xbf16>
    %426 = vector.shape_cast %425 : vector<8x4xbf16> to vector<1x8x4xbf16>
    %427 = vector.extract_strided_slice %334 {offsets = [0, 16], sizes = [8, 4], strides = [1, 1]} : vector<8x32xbf16> to vector<8x4xbf16>
    %428 = vector.shape_cast %427 : vector<8x4xbf16> to vector<1x8x4xbf16>
    "tpu.trace_start"() <{level = 10 : i32, message = "bqd,bkd->bqk"}> : () -> ()
    %cst_120 = arith.constant dense<0.000000e+00> : vector<1x8x8xf32>
    %429 = tpu.matmul %424, %426, %cst_120 {dimension_numbers = #tpu.dot_dimension_numbers<[2], [2], [1], [1], [0, 0, 0, 1, 1, 1], [0], [0]>} : vector<1x8x4xbf16>, vector<1x8x4xbf16>, vector<1x8x8xf32> -> vector<1x8x8xf32>
    "tpu.trace_stop"() : () -> ()
    %430 = vector.shape_cast %5 : vector<8x8xf32> to vector<1x8x8xf32>
    %431 = arith.addf %429, %430 : vector<1x8x8xf32>
    %cst_121 = arith.constant dense<0xFF800000> : vector<1x8xf32>
    %432 = vector.multi_reduction <maximumf>, %431, %cst_121 [2] : vector<1x8x8xf32> to vector<1x8xf32>
    %433 = vector.shape_cast %432 : vector<1x8xf32> to vector<1x8x1xf32>
    %434 = vector.broadcast %433 : vector<1x8x1xf32> to vector<1x8x8xf32>
    %435 = arith.subf %431, %434 : vector<1x8x8xf32>
    %436 = math.exp %435 : vector<1x8x8xf32>
    %cst_122 = arith.constant dense<0.000000e+00> : vector<1x8xf32>
    %437 = vector.multi_reduction <add>, %436, %cst_122 [2] : vector<1x8x8xf32> to vector<1x8xf32>
    %438 = vector.shape_cast %437 : vector<1x8xf32> to vector<1x8x1xf32>
    %439 = tpu.reciprocal %438 {approx = true} : vector<1x8x1xf32> -> vector<1x8x1xf32>
    %440 = vector.broadcast %439 : vector<1x8x1xf32> to vector<1x8x8xf32>
    %441 = arith.mulf %436, %440 : vector<1x8x8xf32>
    %442 = arith.truncf %441 : vector<1x8x8xf32> to vector<1x8x8xbf16>
    "tpu.trace_start"() <{level = 10 : i32, message = "bqk,bkd->bqd"}> : () -> ()
    %cst_123 = arith.constant dense<0.000000e+00> : vector<1x8x4xf32>
    %443 = tpu.matmul %442, %428, %cst_123 {dimension_numbers = #tpu.dot_dimension_numbers<[2], [1], [1], [2], [0, 0, 0, 1, 1, 2], [0], [0]>} : vector<1x8x8xbf16>, vector<1x8x4xbf16>, vector<1x8x4xf32> -> vector<1x8x4xf32>
    "tpu.trace_stop"() : () -> ()
    %444 = vector.shape_cast %443 : vector<1x8x4xf32> to vector<8x4xf32>
    %445 = vector.extract_strided_slice %332 {offsets = [0, 20], sizes = [8, 4], strides = [1, 1]} : vector<8x32xbf16> to vector<8x4xbf16>
    %446 = vector.shape_cast %445 : vector<8x4xbf16> to vector<1x8x4xbf16>
    %447 = vector.extract_strided_slice %333 {offsets = [0, 20], sizes = [8, 4], strides = [1, 1]} : vector<8x32xbf16> to vector<8x4xbf16>
    %448 = vector.shape_cast %447 : vector<8x4xbf16> to vector<1x8x4xbf16>
    %449 = vector.extract_strided_slice %334 {offsets = [0, 20], sizes = [8, 4], strides = [1, 1]} : vector<8x32xbf16> to vector<8x4xbf16>
    %450 = vector.shape_cast %449 : vector<8x4xbf16> to vector<1x8x4xbf16>
    "tpu.trace_start"() <{level = 10 : i32, message = "bqd,bkd->bqk"}> : () -> ()
    %cst_124 = arith.constant dense<0.000000e+00> : vector<1x8x8xf32>
    %451 = tpu.matmul %446, %448, %cst_124 {dimension_numbers = #tpu.dot_dimension_numbers<[2], [2], [1], [1], [0, 0, 0, 1, 1, 1], [0], [0]>} : vector<1x8x4xbf16>, vector<1x8x4xbf16>, vector<1x8x8xf32> -> vector<1x8x8xf32>
    "tpu.trace_stop"() : () -> ()
    %452 = vector.shape_cast %5 : vector<8x8xf32> to vector<1x8x8xf32>
    %453 = arith.addf %451, %452 : vector<1x8x8xf32>
    %cst_125 = arith.constant dense<0xFF800000> : vector<1x8xf32>
    %454 = vector.multi_reduction <maximumf>, %453, %cst_125 [2] : vector<1x8x8xf32> to vector<1x8xf32>
    %455 = vector.shape_cast %454 : vector<1x8xf32> to vector<1x8x1xf32>
    %456 = vector.broadcast %455 : vector<1x8x1xf32> to vector<1x8x8xf32>
    %457 = arith.subf %453, %456 : vector<1x8x8xf32>
    %458 = math.exp %457 : vector<1x8x8xf32>
    %cst_126 = arith.constant dense<0.000000e+00> : vector<1x8xf32>
    %459 = vector.multi_reduction <add>, %458, %cst_126 [2] : vector<1x8x8xf32> to vector<1x8xf32>
    %460 = vector.shape_cast %459 : vector<1x8xf32> to vector<1x8x1xf32>
    %461 = tpu.reciprocal %460 {approx = true} : vector<1x8x1xf32> -> vector<1x8x1xf32>
    %462 = vector.broadcast %461 : vector<1x8x1xf32> to vector<1x8x8xf32>
    %463 = arith.mulf %458, %462 : vector<1x8x8xf32>
    %464 = arith.truncf %463 : vector<1x8x8xf32> to vector<1x8x8xbf16>
    "tpu.trace_start"() <{level = 10 : i32, message = "bqk,bkd->bqd"}> : () -> ()
    %cst_127 = arith.constant dense<0.000000e+00> : vector<1x8x4xf32>
    %465 = tpu.matmul %464, %450, %cst_127 {dimension_numbers = #tpu.dot_dimension_numbers<[2], [1], [1], [2], [0, 0, 0, 1, 1, 2], [0], [0]>} : vector<1x8x8xbf16>, vector<1x8x4xbf16>, vector<1x8x4xf32> -> vector<1x8x4xf32>
    "tpu.trace_stop"() : () -> ()
    %466 = vector.shape_cast %465 : vector<1x8x4xf32> to vector<8x4xf32>
    %467 = vector.extract_strided_slice %332 {offsets = [0, 24], sizes = [8, 4], strides = [1, 1]} : vector<8x32xbf16> to vector<8x4xbf16>
    %468 = vector.shape_cast %467 : vector<8x4xbf16> to vector<1x8x4xbf16>
    %469 = vector.extract_strided_slice %333 {offsets = [0, 24], sizes = [8, 4], strides = [1, 1]} : vector<8x32xbf16> to vector<8x4xbf16>
    %470 = vector.shape_cast %469 : vector<8x4xbf16> to vector<1x8x4xbf16>
    %471 = vector.extract_strided_slice %334 {offsets = [0, 24], sizes = [8, 4], strides = [1, 1]} : vector<8x32xbf16> to vector<8x4xbf16>
    %472 = vector.shape_cast %471 : vector<8x4xbf16> to vector<1x8x4xbf16>
    "tpu.trace_start"() <{level = 10 : i32, message = "bqd,bkd->bqk"}> : () -> ()
    %cst_128 = arith.constant dense<0.000000e+00> : vector<1x8x8xf32>
    %473 = tpu.matmul %468, %470, %cst_128 {dimension_numbers = #tpu.dot_dimension_numbers<[2], [2], [1], [1], [0, 0, 0, 1, 1, 1], [0], [0]>} : vector<1x8x4xbf16>, vector<1x8x4xbf16>, vector<1x8x8xf32> -> vector<1x8x8xf32>
    "tpu.trace_stop"() : () -> ()
    %474 = vector.shape_cast %5 : vector<8x8xf32> to vector<1x8x8xf32>
    %475 = arith.addf %473, %474 : vector<1x8x8xf32>
    %cst_129 = arith.constant dense<0xFF800000> : vector<1x8xf32>
    %476 = vector.multi_reduction <maximumf>, %475, %cst_129 [2] : vector<1x8x8xf32> to vector<1x8xf32>
    %477 = vector.shape_cast %476 : vector<1x8xf32> to vector<1x8x1xf32>
    %478 = vector.broadcast %477 : vector<1x8x1xf32> to vector<1x8x8xf32>
    %479 = arith.subf %475, %478 : vector<1x8x8xf32>
    %480 = math.exp %479 : vector<1x8x8xf32>
    %cst_130 = arith.constant dense<0.000000e+00> : vector<1x8xf32>
    %481 = vector.multi_reduction <add>, %480, %cst_130 [2] : vector<1x8x8xf32> to vector<1x8xf32>
    %482 = vector.shape_cast %481 : vector<1x8xf32> to vector<1x8x1xf32>
    %483 = tpu.reciprocal %482 {approx = true} : vector<1x8x1xf32> -> vector<1x8x1xf32>
    %484 = vector.broadcast %483 : vector<1x8x1xf32> to vector<1x8x8xf32>
    %485 = arith.mulf %480, %484 : vector<1x8x8xf32>
    %486 = arith.truncf %485 : vector<1x8x8xf32> to vector<1x8x8xbf16>
    "tpu.trace_start"() <{level = 10 : i32, message = "bqk,bkd->bqd"}> : () -> ()
    %cst_131 = arith.constant dense<0.000000e+00> : vector<1x8x4xf32>
    %487 = tpu.matmul %486, %472, %cst_131 {dimension_numbers = #tpu.dot_dimension_numbers<[2], [1], [1], [2], [0, 0, 0, 1, 1, 2], [0], [0]>} : vector<1x8x8xbf16>, vector<1x8x4xbf16>, vector<1x8x4xf32> -> vector<1x8x4xf32>
    "tpu.trace_stop"() : () -> ()
    %488 = vector.shape_cast %487 : vector<1x8x4xf32> to vector<8x4xf32>
    %489 = vector.extract_strided_slice %332 {offsets = [0, 28], sizes = [8, 4], strides = [1, 1]} : vector<8x32xbf16> to vector<8x4xbf16>
    %490 = vector.shape_cast %489 : vector<8x4xbf16> to vector<1x8x4xbf16>
    %491 = vector.extract_strided_slice %333 {offsets = [0, 28], sizes = [8, 4], strides = [1, 1]} : vector<8x32xbf16> to vector<8x4xbf16>
    %492 = vector.shape_cast %491 : vector<8x4xbf16> to vector<1x8x4xbf16>
    %493 = vector.extract_strided_slice %334 {offsets = [0, 28], sizes = [8, 4], strides = [1, 1]} : vector<8x32xbf16> to vector<8x4xbf16>
    %494 = vector.shape_cast %493 : vector<8x4xbf16> to vector<1x8x4xbf16>
    "tpu.trace_start"() <{level = 10 : i32, message = "bqd,bkd->bqk"}> : () -> ()
    %cst_132 = arith.constant dense<0.000000e+00> : vector<1x8x8xf32>
    %495 = tpu.matmul %490, %492, %cst_132 {dimension_numbers = #tpu.dot_dimension_numbers<[2], [2], [1], [1], [0, 0, 0, 1, 1, 1], [0], [0]>} : vector<1x8x4xbf16>, vector<1x8x4xbf16>, vector<1x8x8xf32> -> vector<1x8x8xf32>
    "tpu.trace_stop"() : () -> ()
    %496 = vector.shape_cast %5 : vector<8x8xf32> to vector<1x8x8xf32>
    %497 = arith.addf %495, %496 : vector<1x8x8xf32>
    %cst_133 = arith.constant dense<0xFF800000> : vector<1x8xf32>
    %498 = vector.multi_reduction <maximumf>, %497, %cst_133 [2] : vector<1x8x8xf32> to vector<1x8xf32>
    %499 = vector.shape_cast %498 : vector<1x8xf32> to vector<1x8x1xf32>
    %500 = vector.broadcast %499 : vector<1x8x1xf32> to vector<1x8x8xf32>
    %501 = arith.subf %497, %500 : vector<1x8x8xf32>
    %502 = math.exp %501 : vector<1x8x8xf32>
    %cst_134 = arith.constant dense<0.000000e+00> : vector<1x8xf32>
    %503 = vector.multi_reduction <add>, %502, %cst_134 [2] : vector<1x8x8xf32> to vector<1x8xf32>
    %504 = vector.shape_cast %503 : vector<1x8xf32> to vector<1x8x1xf32>
    %505 = tpu.reciprocal %504 {approx = true} : vector<1x8x1xf32> -> vector<1x8x1xf32>
    %506 = vector.broadcast %505 : vector<1x8x1xf32> to vector<1x8x8xf32>
    %507 = arith.mulf %502, %506 : vector<1x8x8xf32>
    %508 = arith.truncf %507 : vector<1x8x8xf32> to vector<1x8x8xbf16>
    "tpu.trace_start"() <{level = 10 : i32, message = "bqk,bkd->bqd"}> : () -> ()
    %cst_135 = arith.constant dense<0.000000e+00> : vector<1x8x4xf32>
    %509 = tpu.matmul %508, %494, %cst_135 {dimension_numbers = #tpu.dot_dimension_numbers<[2], [1], [1], [2], [0, 0, 0, 1, 1, 2], [0], [0]>} : vector<1x8x8xbf16>, vector<1x8x4xbf16>, vector<1x8x4xf32> -> vector<1x8x4xf32>
    "tpu.trace_stop"() : () -> ()
    %510 = vector.shape_cast %509 : vector<1x8x4xf32> to vector<8x4xf32>
    %511 = tpu.concatenate %356, %378, %400, %422, %444, %466, %488, %510 in 1 : vector<8x4xf32>, vector<8x4xf32>, vector<8x4xf32>, vector<8x4xf32>, vector<8x4xf32>, vector<8x4xf32>, vector<8x4xf32>, vector<8x4xf32> -> vector<8x32xf32>
    %512 = arith.truncf %511 : vector<8x32xf32> to vector<8x32xbf16>
    %c1_136 = arith.constant 1 : index
    %c3_137 = arith.constant 3 : index
    %c0_138 = arith.constant 0 : index
    %c0_139 = arith.constant 0 : index
    %513 = vector.load %arg4[%c1_136, %c3_137, %c0_138, %c0_139] : memref<2x4x32x32xbf16, #tpu.memory_space<vmem>>, vector<1x1x32x32xbf16>
    %514 = vector.shape_cast %513 : vector<1x1x32x32xbf16> to vector<32x32xbf16>
    %cst_140 = arith.constant dense<0.000000e+00> : vector<8x32xf32>
    %515 = tpu.matmul %512, %514, %cst_140 {dimension_numbers = #tpu.dot_dimension_numbers<[1], [0], [0], [1], [0, 0, 1, 1], [], []>} : vector<8x32xbf16>, vector<32x32xbf16>, vector<8x32xf32> -> vector<8x32xf32>
    %516 = arith.addf %286, %515 : vector<8x32xf32>
    %517 = vector.extract_strided_slice %288 {offsets = [5, 0], sizes = [1, 32], strides = [1, 1]} : vector<9x32xf32> to vector<1x32xf32>
    %518 = vector.broadcast %517 : vector<1x32xf32> to vector<8x32xf32>
    %519 = arith.addf %516, %518 : vector<8x32xf32>
    %520 = vector.extract_strided_slice %288 {offsets = [6, 0], sizes = [1, 32], strides = [1, 1]} : vector<9x32xf32> to vector<1x32xf32>
    %521 = vector.extract_strided_slice %288 {offsets = [7, 0], sizes = [1, 32], strides = [1, 1]} : vector<9x32xf32> to vector<1x32xf32>
    %cst_141 = arith.constant dense<0.000000e+00> : vector<8xf32>
    %522 = vector.multi_reduction <add>, %519, %cst_141 [1] : vector<8x32xf32> to vector<8xf32>
    %523 = vector.shape_cast %522 : vector<8xf32> to vector<8x1xf32>
    %cst_142 = arith.constant 3.200000e+01 : f32
    %524 = vector.broadcast %cst_142 : f32 to vector<8x1xf32>
    %525 = arith.divf %523, %524 : vector<8x1xf32>
    %526 = vector.broadcast %525 : vector<8x1xf32> to vector<8x32xf32>
    %527 = arith.subf %519, %526 : vector<8x32xf32>
    %528 = arith.mulf %527, %527 : vector<8x32xf32>
    %cst_143 = arith.constant dense<0.000000e+00> : vector<8xf32>
    %529 = vector.multi_reduction <add>, %528, %cst_143 [1] : vector<8x32xf32> to vector<8xf32>
    %530 = vector.shape_cast %529 : vector<8xf32> to vector<8x1xf32>
    %cst_144 = arith.constant 3.200000e+01 : f32
    %531 = vector.broadcast %cst_144 : f32 to vector<8x1xf32>
    %532 = arith.divf %530, %531 : vector<8x1xf32>
    %533 = vector.broadcast %525 : vector<8x1xf32> to vector<8x32xf32>
    %534 = arith.subf %519, %533 : vector<8x32xf32>
    %cst_145 = arith.constant 9.99999974E-6 : f32
    %535 = vector.broadcast %cst_145 : f32 to vector<8x1xf32>
    %536 = arith.addf %532, %535 : vector<8x1xf32>
    %537 = math.rsqrt %536 : vector<8x1xf32>
    %538 = vector.broadcast %537 : vector<8x1xf32> to vector<8x32xf32>
    %539 = arith.mulf %534, %538 : vector<8x32xf32>
    %540 = vector.broadcast %520 : vector<1x32xf32> to vector<8x32xf32>
    %541 = arith.mulf %539, %540 : vector<8x32xf32>
    %542 = vector.broadcast %521 : vector<1x32xf32> to vector<8x32xf32>
    %543 = arith.addf %541, %542 : vector<8x32xf32>
    %544 = arith.truncf %543 : vector<8x32xf32> to vector<8x32xbf16>
    %c1_146 = arith.constant 1 : index
    %c0_147 = arith.constant 0 : index
    %c0_148 = arith.constant 0 : index
    %545 = vector.load %arg5[%c1_146, %c0_147, %c0_148] : memref<2x32x128xbf16, #tpu.memory_space<vmem>>, vector<1x32x128xbf16>
    %546 = vector.shape_cast %545 : vector<1x32x128xbf16> to vector<32x128xbf16>
    %cst_149 = arith.constant dense<0.000000e+00> : vector<8x128xf32>
    %547 = tpu.matmul %544, %546, %cst_149 {dimension_numbers = #tpu.dot_dimension_numbers<[1], [0], [0], [1], [0, 0, 1, 1], [], []>} : vector<8x32xbf16>, vector<32x128xbf16>, vector<8x128xf32> -> vector<8x128xf32>
    %c1_150 = arith.constant 1 : index
    %c0_151 = arith.constant 0 : index
    %c0_152 = arith.constant 0 : index
    %548 = vector.load %arg6[%c1_150, %c0_151, %c0_152] : memref<2x1x128xf32, #tpu.memory_space<vmem>>, vector<1x1x128xf32>
    %549 = vector.shape_cast %548 : vector<1x1x128xf32> to vector<1x128xf32>
    %550 = vector.broadcast %549 : vector<1x128xf32> to vector<8x128xf32>
    %551 = arith.addf %547, %550 : vector<8x128xf32>
    %cst_153 = arith.constant 0.000000e+00 : f32
    %552 = vector.broadcast %cst_153 : f32 to vector<8x128xf32>
    %553 = arith.maximumf %551, %552 : vector<8x128xf32>
    %554 = arith.truncf %553 : vector<8x128xf32> to vector<8x128xbf16>
    %c1_154 = arith.constant 1 : index
    %c0_155 = arith.constant 0 : index
    %c0_156 = arith.constant 0 : index
    %555 = vector.load %arg7[%c1_154, %c0_155, %c0_156] : memref<2x128x32xbf16, #tpu.memory_space<vmem>>, vector<1x128x32xbf16>
    %556 = vector.shape_cast %555 : vector<1x128x32xbf16> to vector<128x32xbf16>
    %cst_157 = arith.constant dense<0.000000e+00> : vector<8x32xf32>
    %557 = tpu.matmul %554, %556, %cst_157 {dimension_numbers = #tpu.dot_dimension_numbers<[1], [0], [0], [1], [0, 0, 1, 1], [], []>} : vector<8x128xbf16>, vector<128x32xbf16>, vector<8x32xf32> -> vector<8x32xf32>
    %558 = vector.extract_strided_slice %288 {offsets = [8, 0], sizes = [1, 32], strides = [1, 1]} : vector<9x32xf32> to vector<1x32xf32>
    %559 = vector.broadcast %558 : vector<1x32xf32> to vector<8x32xf32>
    %560 = arith.addf %557, %559 : vector<8x32xf32>
    %561 = arith.addf %519, %560 : vector<8x32xf32>
    %c0_158 = arith.constant 0 : index
    %c0_159 = arith.constant 0 : index
    %c0_160 = arith.constant 0 : index
    %562 = vector.load %arg9[%c0_158, %c0_159, %c0_160] : memref<2x1x32xf32, #tpu.memory_space<vmem>>, vector<1x1x32xf32>
    %563 = vector.shape_cast %562 : vector<1x1x32xf32> to vector<1x32xf32>
    %c1_161 = arith.constant 1 : index
    %c0_162 = arith.constant 0 : index
    %c0_163 = arith.constant 0 : index
    %564 = vector.load %arg9[%c1_161, %c0_162, %c0_163] : memref<2x1x32xf32, #tpu.memory_space<vmem>>, vector<1x1x32xf32>
    %565 = vector.shape_cast %564 : vector<1x1x32xf32> to vector<1x32xf32>
    %cst_164 = arith.constant dense<0.000000e+00> : vector<8xf32>
    %566 = vector.multi_reduction <add>, %561, %cst_164 [1] : vector<8x32xf32> to vector<8xf32>
    %567 = vector.shape_cast %566 : vector<8xf32> to vector<8x1xf32>
    %cst_165 = arith.constant 3.200000e+01 : f32
    %568 = vector.broadcast %cst_165 : f32 to vector<8x1xf32>
    %569 = arith.divf %567, %568 : vector<8x1xf32>
    %570 = vector.broadcast %569 : vector<8x1xf32> to vector<8x32xf32>
    %571 = arith.subf %561, %570 : vector<8x32xf32>
    %572 = arith.mulf %571, %571 : vector<8x32xf32>
    %cst_166 = arith.constant dense<0.000000e+00> : vector<8xf32>
    %573 = vector.multi_reduction <add>, %572, %cst_166 [1] : vector<8x32xf32> to vector<8xf32>
    %574 = vector.shape_cast %573 : vector<8xf32> to vector<8x1xf32>
    %cst_167 = arith.constant 3.200000e+01 : f32
    %575 = vector.broadcast %cst_167 : f32 to vector<8x1xf32>
    %576 = arith.divf %574, %575 : vector<8x1xf32>
    %577 = vector.broadcast %569 : vector<8x1xf32> to vector<8x32xf32>
    %578 = arith.subf %561, %577 : vector<8x32xf32>
    %cst_168 = arith.constant 9.99999974E-6 : f32
    %579 = vector.broadcast %cst_168 : f32 to vector<8x1xf32>
    %580 = arith.addf %576, %579 : vector<8x1xf32>
    %581 = math.rsqrt %580 : vector<8x1xf32>
    %582 = vector.broadcast %581 : vector<8x1xf32> to vector<8x32xf32>
    %583 = arith.mulf %578, %582 : vector<8x32xf32>
    %584 = vector.broadcast %563 : vector<1x32xf32> to vector<8x32xf32>
    %585 = arith.mulf %583, %584 : vector<8x32xf32>
    %586 = vector.broadcast %565 : vector<1x32xf32> to vector<8x32xf32>
    %587 = arith.addf %585, %586 : vector<8x32xf32>
    %588 = arith.truncf %587 : vector<8x32xf32> to vector<8x32xbf16>
    %c0_169 = arith.constant 0 : index
    %c0_170 = arith.constant 0 : index
    %589 = vector.load %arg10[%c0_169, %c0_170] : memref<32x128xbf16, #tpu.memory_space<vmem>>, vector<32x128xbf16>
    %cst_171 = arith.constant dense<0.000000e+00> : vector<8x128xf32>
    %590 = tpu.matmul %588, %589, %cst_171 {dimension_numbers = #tpu.dot_dimension_numbers<[1], [0], [0], [1], [0, 0, 1, 1], [], []>} : vector<8x32xbf16>, vector<32x128xbf16>, vector<8x128xf32> -> vector<8x128xf32>
    %c0_172 = arith.constant 0 : index
    %c0_173 = arith.constant 0 : index
    %591 = vector.load %arg11[%c0_172, %c0_173] : memref<1x128xf32, #tpu.memory_space<vmem>>, vector<1x128xf32>
    %592 = vector.broadcast %591 : vector<1x128xf32> to vector<8x128xf32>
    %593 = arith.addf %590, %592 : vector<8x128xf32>
    %c0_174 = arith.constant 0 : index
    %c0_175 = arith.constant 0 : index
    %594 = vector.load %arg12[%c0_174, %c0_175] : memref<8x128xf32, #tpu.memory_space<vmem>>, vector<8x128xf32>
    tpu.vector_store %arg12[%c0_174, %c0_175], %593 {strides = array<i32>} : memref<8x128xf32, #tpu.memory_space<vmem>>, vector<8x128xf32>,
    return
  }
  func.func @transform_0(%arg0: i32) -> (i32, i32) {
    %c0_i32 = arith.constant 0 : i32
    %c0_i32_0 = arith.constant 0 : i32
    return %arg0, %c0_i32 : i32, i32
  }
  func.func @transform_1(%arg0: i32) -> (i32, i32) {
    %c0_i32 = arith.constant 0 : i32
    %c0_i32_0 = arith.constant 0 : i32
    %c0_i32_1 = arith.constant 0 : i32
    return %c0_i32, %c0_i32_0 : i32, i32
  }
  func.func @transform_2(%arg0: i32) -> (i32, i32) {
    %c0_i32 = arith.constant 0 : i32
    %c0_i32_0 = arith.constant 0 : i32
    %c0_i32_1 = arith.constant 0 : i32
    return %c0_i32, %c0_i32_0 : i32, i32
  }
  func.func @transform_3(%arg0: i32) -> (i32, i32, i32, i32) {
    %c0_i32 = arith.constant 0 : i32
    %c0_i32_0 = arith.constant 0 : i32
    %c0_i32_1 = arith.constant 0 : i32
    %c0_i32_2 = arith.constant 0 : i32
    %c0_i32_3 = arith.constant 0 : i32
    return %c0_i32, %c0_i32_0, %c0_i32_1, %c0_i32_2 : i32, i32, i32, i32
  }
  func.func @transform_4(%arg0: i32) -> (i32, i32, i32) {
    %c0_i32 = arith.constant 0 : i32
    %c0_i32_0 = arith.constant 0 : i32
    %c0_i32_1 = arith.constant 0 : i32
    %c0_i32_2 = arith.constant 0 : i32
    return %c0_i32, %c0_i32_0, %c0_i32_1 : i32, i32, i32
  }
  func.func @transform_5(%arg0: i32) -> (i32, i32, i32) {
    %c0_i32 = arith.constant 0 : i32
    %c0_i32_0 = arith.constant 0 : i32
    %c0_i32_1 = arith.constant 0 : i32
    %c0_i32_2 = arith.constant 0 : i32
    return %c0_i32, %c0_i32_0, %c0_i32_1 : i32, i32, i32
  }
  func.func @transform_6(%arg0: i32) -> (i32, i32, i32) {
    %c0_i32 = arith.constant 0 : i32
    %c0_i32_0 = arith.constant 0 : i32
    %c0_i32_1 = arith.constant 0 : i32
    %c0_i32_2 = arith.constant 0 : i32
    return %c0_i32, %c0_i32_0, %c0_i32_1 : i32, i32, i32
  }
  func.func @transform_7(%arg0: i32) -> (i32, i32, i32) {
    %c0_i32 = arith.constant 0 : i32
    %c0_i32_0 = arith.constant 0 : i32
    %c0_i32_1 = arith.constant 0 : i32
    %c0_i32_2 = arith.constant 0 : i32
    return %c0_i32, %c0_i32_0, %c0_i32_1 : i32, i32, i32
  }
  func.func @transform_8(%arg0: i32) -> (i32, i32, i32) {
    %c0_i32 = arith.constant 0 : i32
    %c0_i32_0 = arith.constant 0 : i32
    %c0_i32_1 = arith.constant 0 : i32
    %c0_i32_2 = arith.constant 0 : i32
    return %c0_i32, %c0_i32_0, %c0_i32_1 : i32, i32, i32
  }
  func.func @transform_9(%arg0: i32) -> (i32, i32) {
    %c0_i32 = arith.constant 0 : i32
    %c0_i32_0 = arith.constant 0 : i32
    %c0_i32_1 = arith.constant 0 : i32
    return %c0_i32, %c0_i32_0 : i32, i32
  }
  func.func @transform_10(%arg0: i32) -> (i32, i32) {
    %c0_i32 = arith.constant 0 : i32
    %c0_i32_0 = arith.constant 0 : i32
    %c0_i32_1 = arith.constant 0 : i32
    return %c0_i32, %c0_i32_0 : i32, i32
  }
  func.func @transform_11(%arg0: i32) -> (i32, i32) {
    %c0_i32 = arith.constant 0 : i32
    %c0_i32_0 = arith.constant 0 : i32
    return %arg0, %c0_i32 : i32, i32
  }
}

module attributes {stable_mosaic.version = 11 : i64} {
  func.func @lint_kernel(%arg0: i32, %arg1: memref<8x16xf32, #tpu.memory_space<vmem>>, %arg2: memref<8x32xf32, #tpu.memory_space<vmem>>, %arg3: memref<16x32xbf16, #tpu.memory_space<vmem>>, %arg4: memref<2x4x32x32xbf16, #tpu.memory_space<vmem>>, %arg5: memref<2x32x128xbf16, #tpu.memory_space<vmem>>, %arg6: memref<2x1x128xf32, #tpu.memory_space<vmem>>, %arg7: memref<2x128x32xbf16, #tpu.memory_space<vmem>>, %arg8: memref<2x9x32xf32, #tpu.memory_space<vmem>>, %arg9: memref<2x1x32xf32, #tpu.memory_space<vmem>>, %arg10: memref<32x128xbf16, #tpu.memory_space<vmem>>, %arg11: memref<1x128xf32, #tpu.memory_space<vmem>>, %arg12: memref<8x128xf32, #tpu.memory_space<vmem>>) attributes {dimension_semantics = [#tpu.dimension_semantics<parallel>], iteration_bounds = array<i64: 2>, scalar_prefetch = 0 : i64, scratch_operands = 0 : i64, tpu.core_type = #tpu.core_type<tc>, window_params = [{transform_indices = @transform_0, window_bounds = array<i64: 8, 16>}, {pipeline_mode = #tpu.pipeline_mode<synchronous>, transform_indices = @transform_1, window_bounds = array<i64: 8, 32>}, {pipeline_mode = #tpu.pipeline_mode<synchronous>, transform_indices = @transform_2, window_bounds = array<i64: 16, 32>}, {pipeline_mode = #tpu.pipeline_mode<synchronous>, transform_indices = @transform_3, window_bounds = array<i64: 2, 4, 32, 32>}, {pipeline_mode = #tpu.pipeline_mode<synchronous>, transform_indices = @transform_4, window_bounds = array<i64: 2, 32, 128>}, {pipeline_mode = #tpu.pipeline_mode<synchronous>, transform_indices = @transform_5, window_bounds = array<i64: 2, 1, 128>}, {pipeline_mode = #tpu.pipeline_mode<synchronous>, transform_indices = @transform_6, window_bounds = array<i64: 2, 128, 32>}, {pipeline_mode = #tpu.pipeline_mode<synchronous>, transform_indices = @transform_7, window_bounds = array<i64: 2, 9, 32>}, {pipeline_mode = #tpu.pipeline_mode<synchronous>, transform_indices = @transform_8, window_bounds = array<i64: 2, 1, 32>}, {pipeline_mode = #tpu.pipeline_mode<synchronous>, transform_indices = @transform_9, window_bounds = array<i64: 32, 128>}, {pipeline_mode = #tpu.pipeline_mode<synchronous>, transform_indices = @transform_10, window_bounds = array<i64: 1, 128>}, {transform_indices = @transform_11, window_bounds = array<i64: 8, 128>}]} {
    %0 = tpu.iota {dimensions = array<i32: 0>} : vector<8x8xi32>
    %1 = tpu.iota {dimensions = array<i32: 1>} : vector<8x8xi32>
    %2 = arith.cmpi sle, %1, %0 : vector<8x8xi32>
    %cst = arith.constant 0.000000e+00 : f32
    %cst_0 = arith.constant -1.000000e+09 : f32
    %3 = vector.broadcast %cst : f32 to vector<8x8xf32>
    %4 = vector.broadcast %cst_0 : f32 to vector<8x8xf32>
    %5 = arith.select %2, %3, %4 : vector<8x8xi1>, vector<8x8xf32>
    %c0 = arith.constant 0 : index
    %c0_1 = arith.constant 0 : index
    %6 = vector.load %arg1[%c0, %c0_1] : memref<8x16xf32, #tpu.memory_space<vmem>>, vector<8x16xf32>
    %7 = arith.truncf %6 : vector<8x16xf32> to vector<8x16xbf16>
    %c0_2 = arith.constant 0 : index
    %c0_3 = arith.constant 0 : index
    %8 = vector.load %arg3[%c0_2, %c0_3] : memref<16x32xbf16, #tpu.memory_space<vmem>>, vector<16x32xbf16>
    %cst_4 = arith.constant dense<0.000000e+00> : vector<8x32xf32>
    %9 = tpu.matmul %7, %8, %cst_4 {dimension_numbers = #tpu.dot_dimension_numbers<[1], [0], [0], [1], [0, 0, 1, 1], [], []>} : vector<8x16xbf16>, vector<16x32xbf16>, vector<8x32xf32> -> vector<8x32xf32>
    %c0_5 = arith.constant 0 : index
    %c0_6 = arith.constant 0 : index
    %10 = vector.load %arg2[%c0_5, %c0_6] : memref<8x32xf32, #tpu.memory_space<vmem>>, vector<8x32xf32>
    %11 = arith.addf %9, %10 : vector<8x32xf32>
    %c0_7 = arith.constant 0 : index
    %c0_8 = arith.constant 0 : index
    %c0_9 = arith.constant 0 : index
    %12 = vector.load %arg8[%c0_7, %c0_8, %c0_9] : memref<2x9x32xf32, #tpu.memory_space<vmem>>, vector<1x9x32xf32>
    %13 = vector.shape_cast %12 : vector<1x9x32xf32> to vector<9x32xf32>
    %14 = vector.extract_strided_slice %13 {offsets = [0, 0], sizes = [1, 32], strides = [1, 1]} : vector<9x32xf32> to vector<1x32xf32>
    %15 = vector.extract_strided_slice %13 {offsets = [1, 0], sizes = [1, 32], strides = [1, 1]} : vector<9x32xf32> to vector<1x32xf32>
    %cst_10 = arith.constant dense<0.000000e+00> : vector<8xf32>
    %16 = vector.multi_reduction <add>, %11, %cst_10 [1] : vector<8x32xf32> to vector<8xf32>
    %17 = vector.shape_cast %16 : vector<8xf32> to vector<8x1xf32>
    %cst_11 = arith.constant 3.200000e+01 : f32
    %18 = vector.broadcast %cst_11 : f32 to vector<8x1xf32>
    %19 = arith.divf %17, %18 : vector<8x1xf32>
    %20 = vector.broadcast %19 : vector<8x1xf32> to vector<8x32xf32>
    %21 = arith.subf %11, %20 : vector<8x32xf32>
    %22 = arith.mulf %21, %21 : vector<8x32xf32>
    %cst_12 = arith.constant dense<0.000000e+00> : vector<8xf32>
    %23 = vector.multi_reduction <add>, %22, %cst_12 [1] : vector<8x32xf32> to vector<8xf32>
    %24 = vector.shape_cast %23 : vector<8xf32> to vector<8x1xf32>
    %cst_13 = arith.constant 3.200000e+01 : f32
    %25 = vector.broadcast %cst_13 : f32 to vector<8x1xf32>
    %26 = arith.divf %24, %25 : vector<8x1xf32>
    %27 = vector.broadcast %19 : vector<8x1xf32> to vector<8x32xf32>
    %28 = arith.subf %11, %27 : vector<8x32xf32>
    %cst_14 = arith.constant 9.99999974E-6 : f32
    %29 = vector.broadcast %cst_14 : f32 to vector<8x1xf32>
    %30 = arith.addf %26, %29 : vector<8x1xf32>
    %31 = math.rsqrt %30 : vector<8x1xf32>
    %32 = vector.broadcast %31 : vector<8x1xf32> to vector<8x32xf32>
    %33 = arith.mulf %28, %32 : vector<8x32xf32>
    %34 = vector.broadcast %14 : vector<1x32xf32> to vector<8x32xf32>
    %35 = arith.mulf %33, %34 : vector<8x32xf32>
    %36 = vector.broadcast %15 : vector<1x32xf32> to vector<8x32xf32>
    %37 = arith.addf %35, %36 : vector<8x32xf32>
    %38 = arith.truncf %37 : vector<8x32xf32> to vector<8x32xbf16>
    %c0_15 = arith.constant 0 : index
    %c0_16 = arith.constant 0 : index
    %c0_17 = arith.constant 0 : index
    %c0_18 = arith.constant 0 : index
    %39 = vector.load %arg4[%c0_15, %c0_16, %c0_17, %c0_18] : memref<2x4x32x32xbf16, #tpu.memory_space<vmem>>, vector<1x1x32x32xbf16>
    %40 = vector.shape_cast %39 : vector<1x1x32x32xbf16> to vector<32x32xbf16>
    %cst_19 = arith.constant dense<0.000000e+00> : vector<8x32xf32>
    %41 = tpu.matmul %38, %40, %cst_19 {dimension_numbers = #tpu.dot_dimension_numbers<[1], [0], [0], [1], [0, 0, 1, 1], [], []>} : vector<8x32xbf16>, vector<32x32xbf16>, vector<8x32xf32> -> vector<8x32xf32>
    %42 = vector.extract_strided_slice %13 {offsets = [2, 0], sizes = [1, 32], strides = [1, 1]} : vector<9x32xf32> to vector<1x32xf32>
    %43 = vector.broadcast %42 : vector<1x32xf32> to vector<8x32xf32>
    %44 = arith.addf %41, %43 : vector<8x32xf32>
    %c0_20 = arith.constant 0 : index
    %c1 = arith.constant 1 : index
    %c0_21 = arith.constant 0 : index
    %c0_22 = arith.constant 0 : index
    %45 = vector.load %arg4[%c0_20, %c1, %c0_21, %c0_22] : memref<2x4x32x32xbf16, #tpu.memory_space<vmem>>, vector<1x1x32x32xbf16>
    %46 = vector.shape_cast %45 : vector<1x1x32x32xbf16> to vector<32x32xbf16>
    %cst_23 = arith.constant dense<0.000000e+00> : vector<8x32xf32>
    %47 = tpu.matmul %38, %46, %cst_23 {dimension_numbers = #tpu.dot_dimension_numbers<[1], [0], [0], [1], [0, 0, 1, 1], [], []>} : vector<8x32xbf16>, vector<32x32xbf16>, vector<8x32xf32> -> vector<8x32xf32>
    %48 = vector.extract_strided_slice %13 {offsets = [3, 0], sizes = [1, 32], strides = [1, 1]} : vector<9x32xf32> to vector<1x32xf32>
    %49 = vector.broadcast %48 : vector<1x32xf32> to vector<8x32xf32>
    %50 = arith.addf %47, %49 : vector<8x32xf32>
    %c0_24 = arith.constant 0 : index
    %c2 = arith.constant 2 : index
    %c0_25 = arith.constant 0 : index
    %c0_26 = arith.constant 0 : index
    %51 = vector.load %arg4[%c0_24, %c2, %c0_25, %c0_26] : memref<2x4x32x32xbf16, #tpu.memory_space<vmem>>, vector<1x1x32x32xbf16>
    %52 = vector.shape_cast %51 : vector<1x1x32x32xbf16> to vector<32x32xbf16>
    %cst_27 = arith.constant dense<0.000000e+00> : vector<8x32xf32>
    %53 = tpu.matmul %38, %52, %cst_27 {dimension_numbers = #tpu.dot_dimension_numbers<[1], [0], [0], [1], [0, 0, 1, 1], [], []>} : vector<8x32xbf16>, vector<32x32xbf16>, vector<8x32xf32> -> vector<8x32xf32>
    %54 = vector.extract_strided_slice %13 {offsets = [4, 0], sizes = [1, 32], strides = [1, 1]} : vector<9x32xf32> to vector<1x32xf32>
    %55 = vector.broadcast %54 : vector<1x32xf32> to vector<8x32xf32>
    %56 = arith.addf %53, %55 : vector<8x32xf32>
    %57 = arith.truncf %44 : vector<8x32xf32> to vector<8x32xbf16>
    %58 = arith.truncf %50 : vector<8x32xf32> to vector<8x32xbf16>
    %59 = arith.truncf %56 : vector<8x32xf32> to vector<8x32xbf16>
    %60 = vector.extract_strided_slice %57 {offsets = [0, 0], sizes = [8, 4], strides = [1, 1]} : vector<8x32xbf16> to vector<8x4xbf16>
    %61 = vector.shape_cast %60 : vector<8x4xbf16> to vector<1x8x4xbf16>
    %62 = vector.extract_strided_slice %58 {offsets = [0, 0], sizes = [8, 4], strides = [1, 1]} : vector<8x32xbf16> to vector<8x4xbf16>
    %63 = vector.shape_cast %62 : vector<8x4xbf16> to vector<1x8x4xbf16>
    %64 = vector.extract_strided_slice %59 {offsets = [0, 0], sizes = [8, 4], strides = [1, 1]} : vector<8x32xbf16> to vector<8x4xbf16>
    %65 = vector.shape_cast %64 : vector<8x4xbf16> to vector<1x8x4xbf16>
    "tpu.trace_start"() <{level = 10 : i32, message = "bqd,bkd->bqk"}> : () -> ()
    %cst_28 = arith.constant dense<0.000000e+00> : vector<1x8x8xf32>
    %66 = tpu.matmul %61, %63, %cst_28 {dimension_numbers = #tpu.dot_dimension_numbers<[2], [2], [1], [1], [0, 0, 0, 1, 1, 1], [0], [0]>} : vector<1x8x4xbf16>, vector<1x8x4xbf16>, vector<1x8x8xf32> -> vector<1x8x8xf32>
    "tpu.trace_stop"() : () -> ()
    %67 = vector.shape_cast %5 : vector<8x8xf32> to vector<1x8x8xf32>
    %68 = arith.addf %66, %67 : vector<1x8x8xf32>
    %cst_29 = arith.constant dense<0xFF800000> : vector<1x8xf32>
    %69 = vector.multi_reduction <maximumf>, %68, %cst_29 [2] : vector<1x8x8xf32> to vector<1x8xf32>
    %70 = vector.shape_cast %69 : vector<1x8xf32> to vector<1x8x1xf32>
    %71 = vector.broadcast %70 : vector<1x8x1xf32> to vector<1x8x8xf32>
    %72 = arith.subf %68, %71 : vector<1x8x8xf32>
    %73 = math.exp %72 : vector<1x8x8xf32>
    %cst_30 = arith.constant dense<0.000000e+00> : vector<1x8xf32>
    %74 = vector.multi_reduction <add>, %73, %cst_30 [2] : vector<1x8x8xf32> to vector<1x8xf32>
    %75 = vector.shape_cast %74 : vector<1x8xf32> to vector<1x8x1xf32>
    %76 = tpu.reciprocal %75 {approx = true} : vector<1x8x1xf32> -> vector<1x8x1xf32>
    %77 = vector.broadcast %76 : vector<1x8x1xf32> to vector<1x8x8xf32>
    %78 = arith.mulf %73, %77 : vector<1x8x8xf32>
    %79 = arith.truncf %78 : vector<1x8x8xf32> to vector<1x8x8xbf16>
    "tpu.trace_start"() <{level = 10 : i32, message = "bqk,bkd->bqd"}> : () -> ()
    %cst_31 = arith.constant dense<0.000000e+00> : vector<1x8x4xf32>
    %80 = tpu.matmul %79, %65, %cst_31 {dimension_numbers = #tpu.dot_dimension_numbers<[2], [1], [1], [2], [0, 0, 0, 1, 1, 2], [0], [0]>} : vector<1x8x8xbf16>, vector<1x8x4xbf16>, vector<1x8x4xf32> -> vector<1x8x4xf32>
    "tpu.trace_stop"() : () -> ()
    %81 = vector.shape_cast %80 : vector<1x8x4xf32> to vector<8x4xf32>
    %82 = vector.extract_strided_slice %57 {offsets = [0, 4], sizes = [8, 4], strides = [1, 1]} : vector<8x32xbf16> to vector<8x4xbf16>
    %83 = vector.shape_cast %82 : vector<8x4xbf16> to vector<1x8x4xbf16>
    %84 = vector.extract_strided_slice %58 {offsets = [0, 4], sizes = [8, 4], strides = [1, 1]} : vector<8x32xbf16> to vector<8x4xbf16>
    %85 = vector.shape_cast %84 : vector<8x4xbf16> to vector<1x8x4xbf16>
    %86 = vector.extract_strided_slice %59 {offsets = [0, 4], sizes = [8, 4], strides = [1, 1]} : vector<8x32xbf16> to vector<8x4xbf16>
    %87 = vector.shape_cast %86 : vector<8x4xbf16> to vector<1x8x4xbf16>
    "tpu.trace_start"() <{level = 10 : i32, message = "bqd,bkd->bqk"}> : () -> ()
    %cst_32 = arith.constant dense<0.000000e+00> : vector<1x8x8xf32>
    %88 = tpu.matmul %83, %85, %cst_32 {dimension_numbers = #tpu.dot_dimension_numbers<[2], [2], [1], [1], [0, 0, 0, 1, 1, 1], [0], [0]>} : vector<1x8x4xbf16>, vector<1x8x4xbf16>, vector<1x8x8xf32> -> vector<1x8x8xf32>
    "tpu.trace_stop"() : () -> ()
    %89 = vector.shape_cast %5 : vector<8x8xf32> to vector<1x8x8xf32>
    %90 = arith.addf %88, %89 : vector<1x8x8xf32>
    %cst_33 = arith.constant dense<0xFF800000> : vector<1x8xf32>
    %91 = vector.multi_reduction <maximumf>, %90, %cst_33 [2] : vector<1x8x8xf32> to vector<1x8xf32>
    %92 = vector.shape_cast %91 : vector<1x8xf32> to vector<1x8x1xf32>
    %93 = vector.broadcast %92 : vector<1x8x1xf32> to vector<1x8x8xf32>
    %94 = arith.subf %90, %93 : vector<1x8x8xf32>
    %95 = math.exp %94 : vector<1x8x8xf32>
    %cst_34 = arith.constant dense<0.000000e+00> : vector<1x8xf32>
    %96 = vector.multi_reduction <add>, %95, %cst_34 [2] : vector<1x8x8xf32> to vector<1x8xf32>
    %97 = vector.shape_cast %96 : vector<1x8xf32> to vector<1x8x1xf32>
    %98 = tpu.reciprocal %97 {approx = true} : vector<1x8x1xf32> -> vector<1x8x1xf32>
    %99 = vector.broadcast %98 : vector<1x8x1xf32> to vector<1x8x8xf32>
    %100 = arith.mulf %95, %99 : vector<1x8x8xf32>
    %101 = arith.truncf %100 : vector<1x8x8xf32> to vector<1x8x8xbf16>
    "tpu.trace_start"() <{level = 10 : i32, message = "bqk,bkd->bqd"}> : () -> ()
    %cst_35 = arith.constant dense<0.000000e+00> : vector<1x8x4xf32>
    %102 = tpu.matmul %101, %87, %cst_35 {dimension_numbers = #tpu.dot_dimension_numbers<[2], [1], [1], [2], [0, 0, 0, 1, 1, 2], [0], [0]>} : vector<1x8x8xbf16>, vector<1x8x4xbf16>, vector<1x8x4xf32> -> vector<1x8x4xf32>
    "tpu.trace_stop"() : () -> ()
    %103 = vector.shape_cast %102 : vector<1x8x4xf32> to vector<8x4xf32>
    %104 = vector.extract_strided_slice %57 {offsets = [0, 8], sizes = [8, 4], strides = [1, 1]} : vector<8x32xbf16> to vector<8x4xbf16>
    %105 = vector.shape_cast %104 : vector<8x4xbf16> to vector<1x8x4xbf16>
    %106 = vector.extract_strided_slice %58 {offsets = [0, 8], sizes = [8, 4], strides = [1, 1]} : vector<8x32xbf16> to vector<8x4xbf16>
    %107 = vector.shape_cast %106 : vector<8x4xbf16> to vector<1x8x4xbf16>
    %108 = vector.extract_strided_slice %59 {offsets = [0, 8], sizes = [8, 4], strides = [1, 1]} : vector<8x32xbf16> to vector<8x4xbf16>
    %109 = vector.shape_cast %108 : vector<8x4xbf16> to vector<1x8x4xbf16>
    "tpu.trace_start"() <{level = 10 : i32, message = "bqd,bkd->bqk"}> : () -> ()
    %cst_36 = arith.constant dense<0.000000e+00> : vector<1x8x8xf32>
    %110 = tpu.matmul %105, %107, %cst_36 {dimension_numbers = #tpu.dot_dimension_numbers<[2], [2], [1], [1], [0, 0, 0, 1, 1, 1], [0], [0]>} : vector<1x8x4xbf16>, vector<1x8x4xbf16>, vector<1x8x8xf32> -> vector<1x8x8xf32>
    "tpu.trace_stop"() : () -> ()
    %111 = vector.shape_cast %5 : vector<8x8xf32> to vector<1x8x8xf32>
    %112 = arith.addf %110, %111 : vector<1x8x8xf32>
    %cst_37 = arith.constant dense<0xFF800000> : vector<1x8xf32>
    %113 = vector.multi_reduction <maximumf>, %112, %cst_37 [2] : vector<1x8x8xf32> to vector<1x8xf32>
    %114 = vector.shape_cast %113 : vector<1x8xf32> to vector<1x8x1xf32>
    %115 = vector.broadcast %114 : vector<1x8x1xf32> to vector<1x8x8xf32>
    %116 = arith.subf %112, %115 : vector<1x8x8xf32>
    %117 = math.exp %116 : vector<1x8x8xf32>
    %cst_38 = arith.constant dense<0.000000e+00> : vector<1x8xf32>
    %118 = vector.multi_reduction <add>, %117, %cst_38 [2] : vector<1x8x8xf32> to vector<1x8xf32>
    %119 = vector.shape_cast %118 : vector<1x8xf32> to vector<1x8x1xf32>
    %120 = tpu.reciprocal %119 {approx = true} : vector<1x8x1xf32> -> vector<1x8x1xf32>
    %121 = vector.broadcast %120 : vector<1x8x1xf32> to vector<1x8x8xf32>
    %122 = arith.mulf %117, %121 : vector<1x8x8xf32>
    %123 = arith.truncf %122 : vector<1x8x8xf32> to vector<1x8x8xbf16>
    "tpu.trace_start"() <{level = 10 : i32, message = "bqk,bkd->bqd"}> : () -> ()
    %cst_39 = arith.constant dense<0.000000e+00> : vector<1x8x4xf32>
    %124 = tpu.matmul %123, %109, %cst_39 {dimension_numbers = #tpu.dot_dimension_numbers<[2], [1], [1], [2], [0, 0, 0, 1, 1, 2], [0], [0]>} : vector<1x8x8xbf16>, vector<1x8x4xbf16>, vector<1x8x4xf32> -> vector<1x8x4xf32>
    "tpu.trace_stop"() : () -> ()
    %125 = vector.shape_cast %124 : vector<1x8x4xf32> to vector<8x4xf32>
    %126 = vector.extract_strided_slice %57 {offsets = [0, 12], sizes = [8, 4], strides = [1, 1]} : vector<8x32xbf16> to vector<8x4xbf16>
    %127 = vector.shape_cast %126 : vector<8x4xbf16> to vector<1x8x4xbf16>
    %128 = vector.extract_strided_slice %58 {offsets = [0, 12], sizes = [8, 4], strides = [1, 1]} : vector<8x32xbf16> to vector<8x4xbf16>
    %129 = vector.shape_cast %128 : vector<8x4xbf16> to vector<1x8x4xbf16>
    %130 = vector.extract_strided_slice %59 {offsets = [0, 12], sizes = [8, 4], strides = [1, 1]} : vector<8x32xbf16> to vector<8x4xbf16>
    %131 = vector.shape_cast %130 : vector<8x4xbf16> to vector<1x8x4xbf16>
    "tpu.trace_start"() <{level = 10 : i32, message = "bqd,bkd->bqk"}> : () -> ()
    %cst_40 = arith.constant dense<0.000000e+00> : vector<1x8x8xf32>
    %132 = tpu.matmul %127, %129, %cst_40 {dimension_numbers = #tpu.dot_dimension_numbers<[2], [2], [1], [1], [0, 0, 0, 1, 1, 1], [0], [0]>} : vector<1x8x4xbf16>, vector<1x8x4xbf16>, vector<1x8x8xf32> -> vector<1x8x8xf32>
    "tpu.trace_stop"() : () -> ()
    %133 = vector.shape_cast %5 : vector<8x8xf32> to vector<1x8x8xf32>
    %134 = arith.addf %132, %133 : vector<1x8x8xf32>
    %cst_41 = arith.constant dense<0xFF800000> : vector<1x8xf32>
    %135 = vector.multi_reduction <maximumf>, %134, %cst_41 [2] : vector<1x8x8xf32> to vector<1x8xf32>
    %136 = vector.shape_cast %135 : vector<1x8xf32> to vector<1x8x1xf32>
    %137 = vector.broadcast %136 : vector<1x8x1xf32> to vector<1x8x8xf32>
    %138 = arith.subf %134, %137 : vector<1x8x8xf32>
    %139 = math.exp %138 : vector<1x8x8xf32>
    %cst_42 = arith.constant dense<0.000000e+00> : vector<1x8xf32>
    %140 = vector.multi_reduction <add>, %139, %cst_42 [2] : vector<1x8x8xf32> to vector<1x8xf32>
    %141 = vector.shape_cast %140 : vector<1x8xf32> to vector<1x8x1xf32>
    %142 = tpu.reciprocal %141 {approx = true} : vector<1x8x1xf32> -> vector<1x8x1xf32>
    %143 = vector.broadcast %142 : vector<1x8x1xf32> to vector<1x8x8xf32>
    %144 = arith.mulf %139, %143 : vector<1x8x8xf32>
    %145 = arith.truncf %144 : vector<1x8x8xf32> to vector<1x8x8xbf16>
    "tpu.trace_start"() <{level = 10 : i32, message = "bqk,bkd->bqd"}> : () -> ()
    %cst_43 = arith.constant dense<0.000000e+00> : vector<1x8x4xf32>
    %146 = tpu.matmul %145, %131, %cst_43 {dimension_numbers = #tpu.dot_dimension_numbers<[2], [1], [1], [2], [0, 0, 0, 1, 1, 2], [0], [0]>} : vector<1x8x8xbf16>, vector<1x8x4xbf16>, vector<1x8x4xf32> -> vector<1x8x4xf32>
    "tpu.trace_stop"() : () -> ()
    %147 = vector.shape_cast %146 : vector<1x8x4xf32> to vector<8x4xf32>
    %148 = vector.extract_strided_slice %57 {offsets = [0, 16], sizes = [8, 4], strides = [1, 1]} : vector<8x32xbf16> to vector<8x4xbf16>
    %149 = vector.shape_cast %148 : vector<8x4xbf16> to vector<1x8x4xbf16>
    %150 = vector.extract_strided_slice %58 {offsets = [0, 16], sizes = [8, 4], strides = [1, 1]} : vector<8x32xbf16> to vector<8x4xbf16>
    %151 = vector.shape_cast %150 : vector<8x4xbf16> to vector<1x8x4xbf16>
    %152 = vector.extract_strided_slice %59 {offsets = [0, 16], sizes = [8, 4], strides = [1, 1]} : vector<8x32xbf16> to vector<8x4xbf16>
    %153 = vector.shape_cast %152 : vector<8x4xbf16> to vector<1x8x4xbf16>
    "tpu.trace_start"() <{level = 10 : i32, message = "bqd,bkd->bqk"}> : () -> ()
    %cst_44 = arith.constant dense<0.000000e+00> : vector<1x8x8xf32>
    %154 = tpu.matmul %149, %151, %cst_44 {dimension_numbers = #tpu.dot_dimension_numbers<[2], [2], [1], [1], [0, 0, 0, 1, 1, 1], [0], [0]>} : vector<1x8x4xbf16>, vector<1x8x4xbf16>, vector<1x8x8xf32> -> vector<1x8x8xf32>
    "tpu.trace_stop"() : () -> ()
    %155 = vector.shape_cast %5 : vector<8x8xf32> to vector<1x8x8xf32>
    %156 = arith.addf %154, %155 : vector<1x8x8xf32>
    %cst_45 = arith.constant dense<0xFF800000> : vector<1x8xf32>
    %157 = vector.multi_reduction <maximumf>, %156, %cst_45 [2] : vector<1x8x8xf32> to vector<1x8xf32>
    %158 = vector.shape_cast %157 : vector<1x8xf32> to vector<1x8x1xf32>
    %159 = vector.broadcast %158 : vector<1x8x1xf32> to vector<1x8x8xf32>
    %160 = arith.subf %156, %159 : vector<1x8x8xf32>
    %161 = math.exp %160 : vector<1x8x8xf32>
    %cst_46 = arith.constant dense<0.000000e+00> : vector<1x8xf32>
    %162 = vector.multi_reduction <add>, %161, %cst_46 [2] : vector<1x8x8xf32> to vector<1x8xf32>
    %163 = vector.shape_cast %162 : vector<1x8xf32> to vector<1x8x1xf32>
    %164 = tpu.reciprocal %163 {approx = true} : vector<1x8x1xf32> -> vector<1x8x1xf32>
    %165 = vector.broadcast %164 : vector<1x8x1xf32> to vector<1x8x8xf32>
    %166 = arith.mulf %161, %165 : vector<1x8x8xf32>
    %167 = arith.truncf %166 : vector<1x8x8xf32> to vector<1x8x8xbf16>
    "tpu.trace_start"() <{level = 10 : i32, message = "bqk,bkd->bqd"}> : () -> ()
    %cst_47 = arith.constant dense<0.000000e+00> : vector<1x8x4xf32>
    %168 = tpu.matmul %167, %153, %cst_47 {dimension_numbers = #tpu.dot_dimension_numbers<[2], [1], [1], [2], [0, 0, 0, 1, 1, 2], [0], [0]>} : vector<1x8x8xbf16>, vector<1x8x4xbf16>, vector<1x8x4xf32> -> vector<1x8x4xf32>
    "tpu.trace_stop"() : () -> ()
    %169 = vector.shape_cast %168 : vector<1x8x4xf32> to vector<8x4xf32>
    %170 = vector.extract_strided_slice %57 {offsets = [0, 20], sizes = [8, 4], strides = [1, 1]} : vector<8x32xbf16> to vector<8x4xbf16>
    %171 = vector.shape_cast %170 : vector<8x4xbf16> to vector<1x8x4xbf16>
    %172 = vector.extract_strided_slice %58 {offsets = [0, 20], sizes = [8, 4], strides = [1, 1]} : vector<8x32xbf16> to vector<8x4xbf16>
    %173 = vector.shape_cast %172 : vector<8x4xbf16> to vector<1x8x4xbf16>
    %174 = vector.extract_strided_slice %59 {offsets = [0, 20], sizes = [8, 4], strides = [1, 1]} : vector<8x32xbf16> to vector<8x4xbf16>
    %175 = vector.shape_cast %174 : vector<8x4xbf16> to vector<1x8x4xbf16>
    "tpu.trace_start"() <{level = 10 : i32, message = "bqd,bkd->bqk"}> : () -> ()
    %cst_48 = arith.constant dense<0.000000e+00> : vector<1x8x8xf32>
    %176 = tpu.matmul %171, %173, %cst_48 {dimension_numbers = #tpu.dot_dimension_numbers<[2], [2], [1], [1], [0, 0, 0, 1, 1, 1], [0], [0]>} : vector<1x8x4xbf16>, vector<1x8x4xbf16>, vector<1x8x8xf32> -> vector<1x8x8xf32>
    "tpu.trace_stop"() : () -> ()
    %177 = vector.shape_cast %5 : vector<8x8xf32> to vector<1x8x8xf32>
    %178 = arith.addf %176, %177 : vector<1x8x8xf32>
    %cst_49 = arith.constant dense<0xFF800000> : vector<1x8xf32>
    %179 = vector.multi_reduction <maximumf>, %178, %cst_49 [2] : vector<1x8x8xf32> to vector<1x8xf32>
    %180 = vector.shape_cast %179 : vector<1x8xf32> to vector<1x8x1xf32>
    %181 = vector.broadcast %180 : vector<1x8x1xf32> to vector<1x8x8xf32>
    %182 = arith.subf %178, %181 : vector<1x8x8xf32>
    %183 = math.exp %182 : vector<1x8x8xf32>
    %cst_50 = arith.constant dense<0.000000e+00> : vector<1x8xf32>
    %184 = vector.multi_reduction <add>, %183, %cst_50 [2] : vector<1x8x8xf32> to vector<1x8xf32>
    %185 = vector.shape_cast %184 : vector<1x8xf32> to vector<1x8x1xf32>
    %186 = tpu.reciprocal %185 {approx = true} : vector<1x8x1xf32> -> vector<1x8x1xf32>
    %187 = vector.broadcast %186 : vector<1x8x1xf32> to vector<1x8x8xf32>
    %188 = arith.mulf %183, %187 : vector<1x8x8xf32>
    %189 = arith.truncf %188 : vector<1x8x8xf32> to vector<1x8x8xbf16>
    "tpu.trace_start"() <{level = 10 : i32, message = "bqk,bkd->bqd"}> : () -> ()
    %cst_51 = arith.constant dense<0.000000e+00> : vector<1x8x4xf32>
    %190 = tpu.matmul %189, %175, %cst_51 {dimension_numbers = #tpu.dot_dimension_numbers<[2], [1], [1], [2], [0, 0, 0, 1, 1, 2], [0], [0]>} : vector<1x8x8xbf16>, vector<1x8x4xbf16>, vector<1x8x4xf32> -> vector<1x8x4xf32>
    "tpu.trace_stop"() : () -> ()
    %191 = vector.shape_cast %190 : vector<1x8x4xf32> to vector<8x4xf32>
    %192 = vector.extract_strided_slice %57 {offsets = [0, 24], sizes = [8, 4], strides = [1, 1]} : vector<8x32xbf16> to vector<8x4xbf16>
    %193 = vector.shape_cast %192 : vector<8x4xbf16> to vector<1x8x4xbf16>
    %194 = vector.extract_strided_slice %58 {offsets = [0, 24], sizes = [8, 4], strides = [1, 1]} : vector<8x32xbf16> to vector<8x4xbf16>
    %195 = vector.shape_cast %194 : vector<8x4xbf16> to vector<1x8x4xbf16>
    %196 = vector.extract_strided_slice %59 {offsets = [0, 24], sizes = [8, 4], strides = [1, 1]} : vector<8x32xbf16> to vector<8x4xbf16>
    %197 = vector.shape_cast %196 : vector<8x4xbf16> to vector<1x8x4xbf16>
    "tpu.trace_start"() <{level = 10 : i32, message = "bqd,bkd->bqk"}> : () -> ()
    %cst_52 = arith.constant dense<0.000000e+00> : vector<1x8x8xf32>
    %198 = tpu.matmul %193, %195, %cst_52 {dimension_numbers = #tpu.dot_dimension_numbers<[2], [2], [1], [1], [0, 0, 0, 1, 1, 1], [0], [0]>} : vector<1x8x4xbf16>, vector<1x8x4xbf16>, vector<1x8x8xf32> -> vector<1x8x8xf32>
    "tpu.trace_stop"() : () -> ()
    %199 = vector.shape_cast %5 : vector<8x8xf32> to vector<1x8x8xf32>
    %200 = arith.addf %198, %199 : vector<1x8x8xf32>
    %cst_53 = arith.constant dense<0xFF800000> : vector<1x8xf32>
    %201 = vector.multi_reduction <maximumf>, %200, %cst_53 [2] : vector<1x8x8xf32> to vector<1x8xf32>
    %202 = vector.shape_cast %201 : vector<1x8xf32> to vector<1x8x1xf32>
    %203 = vector.broadcast %202 : vector<1x8x1xf32> to vector<1x8x8xf32>
    %204 = arith.subf %200, %203 : vector<1x8x8xf32>
    %205 = math.exp %204 : vector<1x8x8xf32>
    %cst_54 = arith.constant dense<0.000000e+00> : vector<1x8xf32>
    %206 = vector.multi_reduction <add>, %205, %cst_54 [2] : vector<1x8x8xf32> to vector<1x8xf32>
    %207 = vector.shape_cast %206 : vector<1x8xf32> to vector<1x8x1xf32>
    %208 = tpu.reciprocal %207 {approx = true} : vector<1x8x1xf32> -> vector<1x8x1xf32>
    %209 = vector.broadcast %208 : vector<1x8x1xf32> to vector<1x8x8xf32>
    %210 = arith.mulf %205, %209 : vector<1x8x8xf32>
    %211 = arith.truncf %210 : vector<1x8x8xf32> to vector<1x8x8xbf16>
    "tpu.trace_start"() <{level = 10 : i32, message = "bqk,bkd->bqd"}> : () -> ()
    %cst_55 = arith.constant dense<0.000000e+00> : vector<1x8x4xf32>
    %212 = tpu.matmul %211, %197, %cst_55 {dimension_numbers = #tpu.dot_dimension_numbers<[2], [1], [1], [2], [0, 0, 0, 1, 1, 2], [0], [0]>} : vector<1x8x8xbf16>, vector<1x8x4xbf16>, vector<1x8x4xf32> -> vector<1x8x4xf32>
    "tpu.trace_stop"() : () -> ()
    %213 = vector.shape_cast %212 : vector<1x8x4xf32> to vector<8x4xf32>
    %214 = vector.extract_strided_slice %57 {offsets = [0, 28], sizes = [8, 4], strides = [1, 1]} : vector<8x32xbf16> to vector<8x4xbf16>
    %215 = vector.shape_cast %214 : vector<8x4xbf16> to vector<1x8x4xbf16>
    %216 = vector.extract_strided_slice %58 {offsets = [0, 28], sizes = [8, 4], strides = [1, 1]} : vector<8x32xbf16> to vector<8x4xbf16>
    %217 = vector.shape_cast %216 : vector<8x4xbf16> to vector<1x8x4xbf16>
    %218 = vector.extract_strided_slice %59 {offsets = [0, 28], sizes = [8, 4], strides = [1, 1]} : vector<8x32xbf16> to vector<8x4xbf16>
    %219 = vector.shape_cast %218 : vector<8x4xbf16> to vector<1x8x4xbf16>
    "tpu.trace_start"() <{level = 10 : i32, message = "bqd,bkd->bqk"}> : () -> ()
    %cst_56 = arith.constant dense<0.000000e+00> : vector<1x8x8xf32>
    %220 = tpu.matmul %215, %217, %cst_56 {dimension_numbers = #tpu.dot_dimension_numbers<[2], [2], [1], [1], [0, 0, 0, 1, 1, 1], [0], [0]>} : vector<1x8x4xbf16>, vector<1x8x4xbf16>, vector<1x8x8xf32> -> vector<1x8x8xf32>
    "tpu.trace_stop"() : () -> ()
    %221 = vector.shape_cast %5 : vector<8x8xf32> to vector<1x8x8xf32>
    %222 = arith.addf %220, %221 : vector<1x8x8xf32>
    %cst_57 = arith.constant dense<0xFF800000> : vector<1x8xf32>
    %223 = vector.multi_reduction <maximumf>, %222, %cst_57 [2] : vector<1x8x8xf32> to vector<1x8xf32>
    %224 = vector.shape_cast %223 : vector<1x8xf32> to vector<1x8x1xf32>
    %225 = vector.broadcast %224 : vector<1x8x1xf32> to vector<1x8x8xf32>
    %226 = arith.subf %222, %225 : vector<1x8x8xf32>
    %227 = math.exp %226 : vector<1x8x8xf32>
    %cst_58 = arith.constant dense<0.000000e+00> : vector<1x8xf32>
    %228 = vector.multi_reduction <add>, %227, %cst_58 [2] : vector<1x8x8xf32> to vector<1x8xf32>
    %229 = vector.shape_cast %228 : vector<1x8xf32> to vector<1x8x1xf32>
    %230 = tpu.reciprocal %229 {approx = true} : vector<1x8x1xf32> -> vector<1x8x1xf32>
    %231 = vector.broadcast %230 : vector<1x8x1xf32> to vector<1x8x8xf32>
    %232 = arith.mulf %227, %231 : vector<1x8x8xf32>
    %233 = arith.truncf %232 : vector<1x8x8xf32> to vector<1x8x8xbf16>
    "tpu.trace_start"() <{level = 10 : i32, message = "bqk,bkd->bqd"}> : () -> ()
    %cst_59 = arith.constant dense<0.000000e+00> : vector<1x8x4xf32>
    %234 = tpu.matmul %233, %219, %cst_59 {dimension_numbers = #tpu.dot_dimension_numbers<[2], [1], [1], [2], [0, 0, 0, 1, 1, 2], [0], [0]>} : vector<1x8x8xbf16>, vector<1x8x4xbf16>, vector<1x8x4xf32> -> vector<1x8x4xf32>
    "tpu.trace_stop"() : () -> ()
    %235 = vector.shape_cast %234 : vector<1x8x4xf32> to vector<8x4xf32>
    %236 = tpu.concatenate %81, %103, %125, %147, %169, %191, %213, %235 in 1 : vector<8x4xf32>, vector<8x4xf32>, vector<8x4xf32>, vector<8x4xf32>, vector<8x4xf32>, vector<8x4xf32>, vector<8x4xf32>, vector<8x4xf32> -> vector<8x32xf32>
    %237 = arith.truncf %236 : vector<8x32xf32> to vector<8x32xbf16>
    %c0_60 = arith.constant 0 : index
    %c3 = arith.constant 3 : index
    %c0_61 = arith.constant 0 : index
    %c0_62 = arith.constant 0 : index
    %238 = vector.load %arg4[%c0_60, %c3, %c0_61, %c0_62] : memref<2x4x32x32xbf16, #tpu.memory_space<vmem>>, vector<1x1x32x32xbf16>
    %239 = vector.shape_cast %238 : vector<1x1x32x32xbf16> to vector<32x32xbf16>
    %cst_63 = arith.constant dense<0.000000e+00> : vector<8x32xf32>
    %240 = tpu.matmul %237, %239, %cst_63 {dimension_numbers = #tpu.dot_dimension_numbers<[1], [0], [0], [1], [0, 0, 1, 1], [], []>} : vector<8x32xbf16>, vector<32x32xbf16>, vector<8x32xf32> -> vector<8x32xf32>
    %241 = arith.addf %11, %240 : vector<8x32xf32>
    %242 = vector.extract_strided_slice %13 {offsets = [5, 0], sizes = [1, 32], strides = [1, 1]} : vector<9x32xf32> to vector<1x32xf32>
    %243 = vector.broadcast %242 : vector<1x32xf32> to vector<8x32xf32>
    %244 = arith.addf %241, %243 : vector<8x32xf32>
    %245 = vector.extract_strided_slice %13 {offsets = [6, 0], sizes = [1, 32], strides = [1, 1]} : vector<9x32xf32> to vector<1x32xf32>
    %246 = vector.extract_strided_slice %13 {offsets = [7, 0], sizes = [1, 32], strides = [1, 1]} : vector<9x32xf32> to vector<1x32xf32>
    %cst_64 = arith.constant dense<0.000000e+00> : vector<8xf32>
    %247 = vector.multi_reduction <add>, %244, %cst_64 [1] : vector<8x32xf32> to vector<8xf32>
    %248 = vector.shape_cast %247 : vector<8xf32> to vector<8x1xf32>
    %cst_65 = arith.constant 3.200000e+01 : f32
    %249 = vector.broadcast %cst_65 : f32 to vector<8x1xf32>
    %250 = arith.divf %248, %249 : vector<8x1xf32>
    %251 = vector.broadcast %250 : vector<8x1xf32> to vector<8x32xf32>
    %252 = arith.subf %244, %251 : vector<8x32xf32>
    %253 = arith.mulf %252, %252 : vector<8x32xf32>
    %cst_66 = arith.constant dense<0.000000e+00> : vector<8xf32>
    %254 = vector.multi_reduction <add>, %253, %cst_66 [1] : vector<8x32xf32> to vector<8xf32>
    %255 = vector.shape_cast %254 : vector<8xf32> to vector<8x1xf32>
    %cst_67 = arith.constant 3.200000e+01 : f32
    %256 = vector.broadcast %cst_67 : f32 to vector<8x1xf32>
    %257 = arith.divf %255, %256 : vector<8x1xf32>
    %258 = vector.broadcast %250 : vector<8x1xf32> to vector<8x32xf32>
    %259 = arith.subf %244, %258 : vector<8x32xf32>
    %cst_68 = arith.constant 9.99999974E-6 : f32
    %260 = vector.broadcast %cst_68 : f32 to vector<8x1xf32>
    %261 = arith.addf %257, %260 : vector<8x1xf32>
    %262 = math.rsqrt %261 : vector<8x1xf32>
    %263 = vector.broadcast %262 : vector<8x1xf32> to vector<8x32xf32>
    %264 = arith.mulf %259, %263 : vector<8x32xf32>
    %265 = vector.broadcast %245 : vector<1x32xf32> to vector<8x32xf32>
    %266 = arith.mulf %264, %265 : vector<8x32xf32>
    %267 = vector.broadcast %246 : vector<1x32xf32> to vector<8x32xf32>
    %268 = arith.addf %266, %267 : vector<8x32xf32>
    %269 = arith.truncf %268 : vector<8x32xf32> to vector<8x32xbf16>
    %c0_69 = arith.constant 0 : index
    %c0_70 = arith.constant 0 : index
    %c0_71 = arith.constant 0 : index
    %270 = vector.load %arg5[%c0_69, %c0_70, %c0_71] : memref<2x32x128xbf16, #tpu.memory_space<vmem>>, vector<1x32x128xbf16>
    %271 = vector.shape_cast %270 : vector<1x32x128xbf16> to vector<32x128xbf16>
    %cst_72 = arith.constant dense<0.000000e+00> : vector<8x128xf32>
    %272 = tpu.matmul %269, %271, %cst_72 {dimension_numbers = #tpu.dot_dimension_numbers<[1], [0], [0], [1], [0, 0, 1, 1], [], []>} : vector<8x32xbf16>, vector<32x128xbf16>, vector<8x128xf32> -> vector<8x128xf32>
    %c0_73 = arith.constant 0 : index
    %c0_74 = arith.constant 0 : index
    %c0_75 = arith.constant 0 : index
    %273 = vector.load %arg6[%c0_73, %c0_74, %c0_75] : memref<2x1x128xf32, #tpu.memory_space<vmem>>, vector<1x1x128xf32>
    %274 = vector.shape_cast %273 : vector<1x1x128xf32> to vector<1x128xf32>
    %275 = vector.broadcast %274 : vector<1x128xf32> to vector<8x128xf32>
    %276 = arith.addf %272, %275 : vector<8x128xf32>
    %cst_76 = arith.constant 0.000000e+00 : f32
    %277 = vector.broadcast %cst_76 : f32 to vector<8x128xf32>
    %278 = arith.maximumf %276, %277 : vector<8x128xf32>
    %279 = arith.truncf %278 : vector<8x128xf32> to vector<8x128xbf16>
    %c0_77 = arith.constant 0 : index
    %c0_78 = arith.constant 0 : index
    %c0_79 = arith.constant 0 : index
    %280 = vector.load %arg7[%c0_77, %c0_78, %c0_79] : memref<2x128x32xbf16, #tpu.memory_space<vmem>>, vector<1x128x32xbf16>
    %281 = vector.shape_cast %280 : vector<1x128x32xbf16> to vector<128x32xbf16>
    %cst_80 = arith.constant dense<0.000000e+00> : vector<8x32xf32>
    %282 = tpu.matmul %279, %281, %cst_80 {dimension_numbers = #tpu.dot_dimension_numbers<[1], [0], [0], [1], [0, 0, 1, 1], [], []>} : vector<8x128xbf16>, vector<128x32xbf16>, vector<8x32xf32> -> vector<8x32xf32>
    %283 = vector.extract_strided_slice %13 {offsets = [8, 0], sizes = [1, 32], strides = [1, 1]} : vector<9x32xf32> to vector<1x32xf32>
    %284 = vector.broadcast %283 : vector<1x32xf32> to vector<8x32xf32>
    %285 = arith.addf %282, %284 : vector<8x32xf32>
    %286 = arith.addf %244, %285 : vector<8x32xf32>
    %c1_81 = arith.constant 1 : index
    %c0_82 = arith.constant 0 : index
    %c0_83 = arith.constant 0 : index
    %287 = vector.load %arg8[%c1_81, %c0_82, %c0_83] : memref<2x9x32xf32, #tpu.memory_space<vmem>>, vector<1x9x32xf32>
    %288 = vector.shape_cast %287 : vector<1x9x32xf32> to vector<9x32xf32>
    %289 = vector.extract_strided_slice %288 {offsets = [0, 0], sizes = [1, 32], strides = [1, 1]} : vector<9x32xf32> to vector<1x32xf32>
    %290 = vector.extract_strided_slice %288 {offsets = [1, 0], sizes = [1, 32], strides = [1, 1]} : vector<9x32xf32> to vector<1x32xf32>
    %cst_84 = arith.constant dense<0.000000e+00> : vector<8xf32>
    %291 = vector.multi_reduction <add>, %286, %cst_84 [1] : vector<8x32xf32> to vector<8xf32>
    %292 = vector.shape_cast %291 : vector<8xf32> to vector<8x1xf32>
    %cst_85 = arith.constant 3.200000e+01 : f32
    %293 = vector.broadcast %cst_85 : f32 to vector<8x1xf32>
    %294 = arith.divf %292, %293 : vector<8x1xf32>
    %295 = vector.broadcast %294 : vector<8x1xf32> to vector<8x32xf32>
    %296 = arith.subf %286, %295 : vector<8x32xf32>
    %297 = arith.mulf %296, %296 : vector<8x32xf32>
    %cst_86 = arith.constant dense<0.000000e+00> : vector<8xf32>
    %298 = vector.multi_reduction <add>, %297, %cst_86 [1] : vector<8x32xf32> to vector<8xf32>
    %299 = vector.shape_cast %298 : vector<8xf32> to vector<8x1xf32>
    %cst_87 = arith.constant 3.200000e+01 : f32
    %300 = vector.broadcast %cst_87 : f32 to vector<8x1xf32>
    %301 = arith.divf %299, %300 : vector<8x1xf32>
    %302 = vector.broadcast %294 : vector<8x1xf32> to vector<8x32xf32>
    %303 = arith.subf %286, %302 : vector<8x32xf32>
    %cst_88 = arith.constant 9.99999974E-6 : f32
    %304 = vector.broadcast %cst_88 : f32 to vector<8x1xf32>
    %305 = arith.addf %301, %304 : vector<8x1xf32>
    %306 = math.rsqrt %305 : vector<8x1xf32>
    %307 = vector.broadcast %306 : vector<8x1xf32> to vector<8x32xf32>
    %308 = arith.mulf %303, %307 : vector<8x32xf32>
    %309 = vector.broadcast %289 : vector<1x32xf32> to vector<8x32xf32>
    %310 = arith.mulf %308, %309 : vector<8x32xf32>
    %311 = vector.broadcast %290 : vector<1x32xf32> to vector<8x32xf32>
    %312 = arith.addf %310, %311 : vector<8x32xf32>
    %313 = arith.truncf %312 : vector<8x32xf32> to vector<8x32xbf16>
    %c1_89 = arith.constant 1 : index
    %c0_90 = arith.constant 0 : index
    %c0_91 = arith.constant 0 : index
    %c0_92 = arith.constant 0 : index
    %314 = vector.load %arg4[%c1_89, %c0_90, %c0_91, %c0_92] : memref<2x4x32x32xbf16, #tpu.memory_space<vmem>>, vector<1x1x32x32xbf16>
    %315 = vector.shape_cast %314 : vector<1x1x32x32xbf16> to vector<32x32xbf16>
    %cst_93 = arith.constant dense<0.000000e+00> : vector<8x32xf32>
    %316 = tpu.matmul %313, %315, %cst_93 {dimension_numbers = #tpu.dot_dimension_numbers<[1], [0], [0], [1], [0, 0, 1, 1], [], []>} : vector<8x32xbf16>, vector<32x32xbf16>, vector<8x32xf32> -> vector<8x32xf32>
    %317 = vector.extract_strided_slice %288 {offsets = [2, 0], sizes = [1, 32], strides = [1, 1]} : vector<9x32xf32> to vector<1x32xf32>
    %318 = vector.broadcast %317 : vector<1x32xf32> to vector<8x32xf32>
    %319 = arith.addf %316, %318 : vector<8x32xf32>
    %c1_94 = arith.constant 1 : index
    %c1_95 = arith.constant 1 : index
    %c0_96 = arith.constant 0 : index
    %c0_97 = arith.constant 0 : index
    %320 = vector.load %arg4[%c1_94, %c1_95, %c0_96, %c0_97] : memref<2x4x32x32xbf16, #tpu.memory_space<vmem>>, vector<1x1x32x32xbf16>
    %321 = vector.shape_cast %320 : vector<1x1x32x32xbf16> to vector<32x32xbf16>
    %cst_98 = arith.constant dense<0.000000e+00> : vector<8x32xf32>
    %322 = tpu.matmul %313, %321, %cst_98 {dimension_numbers = #tpu.dot_dimension_numbers<[1], [0], [0], [1], [0, 0, 1, 1], [], []>} : vector<8x32xbf16>, vector<32x32xbf16>, vector<8x32xf32> -> vector<8x32xf32>
    %323 = vector.extract_strided_slice %288 {offsets = [3, 0], sizes = [1, 32], strides = [1, 1]} : vector<9x32xf32> to vector<1x32xf32>
    %324 = vector.broadcast %323 : vector<1x32xf32> to vector<8x32xf32>
    %325 = arith.addf %322, %324 : vector<8x32xf32>
    %c1_99 = arith.constant 1 : index
    %c2_100 = arith.constant 2 : index
    %c0_101 = arith.constant 0 : index
    %c0_102 = arith.constant 0 : index
    %326 = vector.load %arg4[%c1_99, %c2_100, %c0_101, %c0_102] : memref<2x4x32x32xbf16, #tpu.memory_space<vmem>>, vector<1x1x32x32xbf16>
    %327 = vector.shape_cast %326 : vector<1x1x32x32xbf16> to vector<32x32xbf16>
    %cst_103 = arith.constant dense<0.000000e+00> : vector<8x32xf32>
    %328 = tpu.matmul %313, %327, %cst_103 {dimension_numbers = #tpu.dot_dimension_numbers<[1], [0], [0], [1], [0, 0, 1, 1], [], []>} : vector<8x32xbf16>, vector<32x32xbf16>, vector<8x32xf32> -> vector<8x32xf32>
    %329 = vector.extract_strided_slice %288 {offsets = [4, 0], sizes = [1, 32], strides = [1, 1]} : vector<9x32xf32> to vector<1x32xf32>
    %330 = vector.broadcast %329 : vector<1x32xf32> to vector<8x32xf32>
    %331 = arith.addf %328, %330 : vector<8x32xf32>
    %332 = arith.truncf %319 : vector<8x32xf32> to vector<8x32xbf16>
    %333 = arith.truncf %325 : vector<8x32xf32> to vector<8x32xbf16>
    %334 = arith.truncf %331 : vector<8x32xf32> to vector<8x32xbf16>
    %335 = vector.extract_strided_slice %332 {offsets = [0, 0], sizes = [8, 4], strides = [1, 1]} : vector<8x32xbf16> to vector<8x4xbf16>
    %336 = vector.shape_cast %335 : vector<8x4xbf16> to vector<1x8x4xbf16>
    %337 = vector.extract_strided_slice %333 {offsets = [0, 0], sizes = [8, 4], strides = [1, 1]} : vector<8x32xbf16> to vector<8x4xbf16>
    %338 = vector.shape_cast %337 : vector<8x4xbf16> to vector<1x8x4xbf16>
    %339 = vector.extract_strided_slice %334 {offsets = [0, 0], sizes = [8, 4], strides = [1, 1]} : vector<8x32xbf16> to vector<8x4xbf16>
    %340 = vector.shape_cast %339 : vector<8x4xbf16> to vector<1x8x4xbf16>
    "tpu.trace_start"() <{level = 10 : i32, message = "bqd,bkd->bqk"}> : () -> ()
    %cst_104 = arith.constant dense<0.000000e+00> : vector<1x8x8xf32>
    %341 = tpu.matmul %336, %338, %cst_104 {dimension_numbers = #tpu.dot_dimension_numbers<[2], [2], [1], [1], [0, 0, 0, 1, 1, 1], [0], [0]>} : vector<1x8x4xbf16>, vector<1x8x4xbf16>, vector<1x8x8xf32> -> vector<1x8x8xf32>
    "tpu.trace_stop"() : () -> ()
    %342 = vector.shape_cast %5 : vector<8x8xf32> to vector<1x8x8xf32>
    %343 = arith.addf %341, %342 : vector<1x8x8xf32>
    %cst_105 = arith.constant dense<0xFF800000> : vector<1x8xf32>
    %344 = vector.multi_reduction <maximumf>, %343, %cst_105 [2] : vector<1x8x8xf32> to vector<1x8xf32>
    %345 = vector.shape_cast %344 : vector<1x8xf32> to vector<1x8x1xf32>
    %346 = vector.broadcast %345 : vector<1x8x1xf32> to vector<1x8x8xf32>
    %347 = arith.subf %343, %346 : vector<1x8x8xf32>
    %348 = math.exp %347 : vector<1x8x8xf32>
    %cst_106 = arith.constant dense<0.000000e+00> : vector<1x8xf32>
    %349 = vector.multi_reduction <add>, %348, %cst_106 [2] : vector<1x8x8xf32> to vector<1x8xf32>
    %350 = vector.shape_cast %349 : vector<1x8xf32> to vector<1x8x1xf32>
    %351 = tpu.reciprocal %350 {approx = true} : vector<1x8x1xf32> -> vector<1x8x1xf32>
    %352 = vector.broadcast %351 : vector<1x8x1xf32> to vector<1x8x8xf32>
    %353 = arith.mulf %348, %352 : vector<1x8x8xf32>
    %354 = arith.truncf %353 : vector<1x8x8xf32> to vector<1x8x8xbf16>
    "tpu.trace_start"() <{level = 10 : i32, message = "bqk,bkd->bqd"}> : () -> ()
    %cst_107 = arith.constant dense<0.000000e+00> : vector<1x8x4xf32>
    %355 = tpu.matmul %354, %340, %cst_107 {dimension_numbers = #tpu.dot_dimension_numbers<[2], [1], [1], [2], [0, 0, 0, 1, 1, 2], [0], [0]>} : vector<1x8x8xbf16>, vector<1x8x4xbf16>, vector<1x8x4xf32> -> vector<1x8x4xf32>
    "tpu.trace_stop"() : () -> ()
    %356 = vector.shape_cast %355 : vector<1x8x4xf32> to vector<8x4xf32>
    %357 = vector.extract_strided_slice %332 {offsets = [0, 4], sizes = [8, 4], strides = [1, 1]} : vector<8x32xbf16> to vector<8x4xbf16>
    %358 = vector.shape_cast %357 : vector<8x4xbf16> to vector<1x8x4xbf16>
    %359 = vector.extract_strided_slice %333 {offsets = [0, 4], sizes = [8, 4], strides = [1, 1]} : vector<8x32xbf16> to vector<8x4xbf16>
    %360 = vector.shape_cast %359 : vector<8x4xbf16> to vector<1x8x4xbf16>
    %361 = vector.extract_strided_slice %334 {offsets = [0, 4], sizes = [8, 4], strides = [1, 1]} : vector<8x32xbf16> to vector<8x4xbf16>
    %362 = vector.shape_cast %361 : vector<8x4xbf16> to vector<1x8x4xbf16>
    "tpu.trace_start"() <{level = 10 : i32, message = "bqd,bkd->bqk"}> : () -> ()
    %cst_108 = arith.constant dense<0.000000e+00> : vector<1x8x8xf32>
    %363 = tpu.matmul %358, %360, %cst_108 {dimension_numbers = #tpu.dot_dimension_numbers<[2], [2], [1], [1], [0, 0, 0, 1, 1, 1], [0], [0]>} : vector<1x8x4xbf16>, vector<1x8x4xbf16>, vector<1x8x8xf32> -> vector<1x8x8xf32>
    "tpu.trace_stop"() : () -> ()
    %364 = vector.shape_cast %5 : vector<8x8xf32> to vector<1x8x8xf32>
    %365 = arith.addf %363, %364 : vector<1x8x8xf32>
    %cst_109 = arith.constant dense<0xFF800000> : vector<1x8xf32>
    %366 = vector.multi_reduction <maximumf>, %365, %cst_109 [2] : vector<1x8x8xf32> to vector<1x8xf32>
    %367 = vector.shape_cast %366 : vector<1x8xf32> to vector<1x8x1xf32>
    %368 = vector.broadcast %367 : vector<1x8x1xf32> to vector<1x8x8xf32>
    %369 = arith.subf %365, %368 : vector<1x8x8xf32>
    %370 = math.exp %369 : vector<1x8x8xf32>
    %cst_110 = arith.constant dense<0.000000e+00> : vector<1x8xf32>
    %371 = vector.multi_reduction <add>, %370, %cst_110 [2] : vector<1x8x8xf32> to vector<1x8xf32>
    %372 = vector.shape_cast %371 : vector<1x8xf32> to vector<1x8x1xf32>
    %373 = tpu.reciprocal %372 {approx = true} : vector<1x8x1xf32> -> vector<1x8x1xf32>
    %374 = vector.broadcast %373 : vector<1x8x1xf32> to vector<1x8x8xf32>
    %375 = arith.mulf %370, %374 : vector<1x8x8xf32>
    %376 = arith.truncf %375 : vector<1x8x8xf32> to vector<1x8x8xbf16>
    "tpu.trace_start"() <{level = 10 : i32, message = "bqk,bkd->bqd"}> : () -> ()
    %cst_111 = arith.constant dense<0.000000e+00> : vector<1x8x4xf32>
    %377 = tpu.matmul %376, %362, %cst_111 {dimension_numbers = #tpu.dot_dimension_numbers<[2], [1], [1], [2], [0, 0, 0, 1, 1, 2], [0], [0]>} : vector<1x8x8xbf16>, vector<1x8x4xbf16>, vector<1x8x4xf32> -> vector<1x8x4xf32>
    "tpu.trace_stop"() : () -> ()
    %378 = vector.shape_cast %377 : vector<1x8x4xf32> to vector<8x4xf32>
    %379 = vector.extract_strided_slice %332 {offsets = [0, 8], sizes = [8, 4], strides = [1, 1]} : vector<8x32xbf16> to vector<8x4xbf16>
    %380 = vector.shape_cast %379 : vector<8x4xbf16> to vector<1x8x4xbf16>
    %381 = vector.extract_strided_slice %333 {offsets = [0, 8], sizes = [8, 4], strides = [1, 1]} : vector<8x32xbf16> to vector<8x4xbf16>
    %382 = vector.shape_cast %381 : vector<8x4xbf16> to vector<1x8x4xbf16>
    %383 = vector.extract_strided_slice %334 {offsets = [0, 8], sizes = [8, 4], strides = [1, 1]} : vector<8x32xbf16> to vector<8x4xbf16>
    %384 = vector.shape_cast %383 : vector<8x4xbf16> to vector<1x8x4xbf16>
    "tpu.trace_start"() <{level = 10 : i32, message = "bqd,bkd->bqk"}> : () -> ()
    %cst_112 = arith.constant dense<0.000000e+00> : vector<1x8x8xf32>
    %385 = tpu.matmul %380, %382, %cst_112 {dimension_numbers = #tpu.dot_dimension_numbers<[2], [2], [1], [1], [0, 0, 0, 1, 1, 1], [0], [0]>} : vector<1x8x4xbf16>, vector<1x8x4xbf16>, vector<1x8x8xf32> -> vector<1x8x8xf32>
    "tpu.trace_stop"() : () -> ()
    %386 = vector.shape_cast %5 : vector<8x8xf32> to vector<1x8x8xf32>
    %387 = arith.addf %385, %386 : vector<1x8x8xf32>
    %cst_113 = arith.constant dense<0xFF800000> : vector<1x8xf32>
    %388 = vector.multi_reduction <maximumf>, %387, %cst_113 [2] : vector<1x8x8xf32> to vector<1x8xf32>
    %389 = vector.shape_cast %388 : vector<1x8xf32> to vector<1x8x1xf32>
    %390 = vector.broadcast %389 : vector<1x8x1xf32> to vector<1x8x8xf32>
    %391 = arith.subf %387, %390 : vector<1x8x8xf32>
    %392 = math.exp %391 : vector<1x8x8xf32>
    %cst_114 = arith.constant dense<0.000000e+00> : vector<1x8xf32>
    %393 = vector.multi_reduction <add>, %392, %cst_114 [2] : vector<1x8x8xf32> to vector<1x8xf32>
    %394 = vector.shape_cast %393 : vector<1x8xf32> to vector<1x8x1xf32>
    %395 = tpu.reciprocal %394 {approx = true} : vector<1x8x1xf32> -> vector<1x8x1xf32>
    %396 = vector.broadcast %395 : vector<1x8x1xf32> to vector<1x8x8xf32>
    %397 = arith.mulf %392, %396 : vector<1x8x8xf32>
    %398 = arith.truncf %397 : vector<1x8x8xf32> to vector<1x8x8xbf16>
    "tpu.trace_start"() <{level = 10 : i32, message = "bqk,bkd->bqd"}> : () -> ()
    %cst_115 = arith.constant dense<0.000000e+00> : vector<1x8x4xf32>
    %399 = tpu.matmul %398, %384, %cst_115 {dimension_numbers = #tpu.dot_dimension_numbers<[2], [1], [1], [2], [0, 0, 0, 1, 1, 2], [0], [0]>} : vector<1x8x8xbf16>, vector<1x8x4xbf16>, vector<1x8x4xf32> -> vector<1x8x4xf32>
    "tpu.trace_stop"() : () -> ()
    %400 = vector.shape_cast %399 : vector<1x8x4xf32> to vector<8x4xf32>
    %401 = vector.extract_strided_slice %332 {offsets = [0, 12], sizes = [8, 4], strides = [1, 1]} : vector<8x32xbf16> to vector<8x4xbf16>
    %402 = vector.shape_cast %401 : vector<8x4xbf16> to vector<1x8x4xbf16>
    %403 = vector.extract_strided_slice %333 {offsets = [0, 12], sizes = [8, 4], strides = [1, 1]} : vector<8x32xbf16> to vector<8x4xbf16>
    %404 = vector.shape_cast %403 : vector<8x4xbf16> to vector<1x8x4xbf16>
    %405 = vector.extract_strided_slice %334 {offsets = [0, 12], sizes = [8, 4], strides = [1, 1]} : vector<8x32xbf16> to vector<8x4xbf16>
    %406 = vector.shape_cast %405 : vector<8x4xbf16> to vector<1x8x4xbf16>
    "tpu.trace_start"() <{level = 10 : i32, message = "bqd,bkd->bqk"}> : () -> ()
    %cst_116 = arith.constant dense<0.000000e+00> : vector<1x8x8xf32>
    %407 = tpu.matmul %402, %404, %cst_116 {dimension_numbers = #tpu.dot_dimension_numbers<[2], [2], [1], [1], [0, 0, 0, 1, 1, 1], [0], [0]>} : vector<1x8x4xbf16>, vector<1x8x4xbf16>, vector<1x8x8xf32> -> vector<1x8x8xf32>
    "tpu.trace_stop"() : () -> ()
    %408 = vector.shape_cast %5 : vector<8x8xf32> to vector<1x8x8xf32>
    %409 = arith.addf %407, %408 : vector<1x8x8xf32>
    %cst_117 = arith.constant dense<0xFF800000> : vector<1x8xf32>
    %410 = vector.multi_reduction <maximumf>, %409, %cst_117 [2] : vector<1x8x8xf32> to vector<1x8xf32>
    %411 = vector.shape_cast %410 : vector<1x8xf32> to vector<1x8x1xf32>
    %412 = vector.broadcast %411 : vector<1x8x1xf32> to vector<1x8x8xf32>
    %413 = arith.subf %409, %412 : vector<1x8x8xf32>
    %414 = math.exp %413 : vector<1x8x8xf32>
    %cst_118 = arith.constant dense<0.000000e+00> : vector<1x8xf32>
    %415 = vector.multi_reduction <add>, %414, %cst_118 [2] : vector<1x8x8xf32> to vector<1x8xf32>
    %416 = vector.shape_cast %415 : vector<1x8xf32> to vector<1x8x1xf32>
    %417 = tpu.reciprocal %416 {approx = true} : vector<1x8x1xf32> -> vector<1x8x1xf32>
    %418 = vector.broadcast %417 : vector<1x8x1xf32> to vector<1x8x8xf32>
    %419 = arith.mulf %414, %418 : vector<1x8x8xf32>
    %420 = arith.truncf %419 : vector<1x8x8xf32> to vector<1x8x8xbf16>
    "tpu.trace_start"() <{level = 10 : i32, message = "bqk,bkd->bqd"}> : () -> ()
    %cst_119 = arith.constant dense<0.000000e+00> : vector<1x8x4xf32>
    %421 = tpu.matmul %420, %406, %cst_119 {dimension_numbers = #tpu.dot_dimension_numbers<[2], [1], [1], [2], [0, 0, 0, 1, 1, 2], [0], [0]>} : vector<1x8x8xbf16>, vector<1x8x4xbf16>, vector<1x8x4xf32> -> vector<1x8x4xf32>
    "tpu.trace_stop"() : () -> ()
    %422 = vector.shape_cast %421 : vector<1x8x4xf32> to vector<8x4xf32>
    %423 = vector.extract_strided_slice %332 {offsets = [0, 16], sizes = [8, 4], strides = [1, 1]} : vector<8x32xbf16> to vector<8x4xbf16>
    %424 = vector.shape_cast %423 : vector<8x4xbf16> to vector<1x8x4xbf16>
    %425 = vector.extract_strided_slice %333 {offsets = [0, 16], sizes = [8, 4], strides = [1, 1]} : vector<8x32xbf16> to vector<8x4xbf16>
    %426 = vector.shape_cast %425 : vector<8x4xbf16> to vector<1x8x4xbf16>
    %427 = vector.extract_strided_slice %334 {offsets = [0, 16], sizes = [8, 4], strides = [1, 1]} : vector<8x32xbf16> to vector<8x4xbf16>
    %428 = vector.shape_cast %427 : vector<8x4xbf16> to vector<1x8x4xbf16>
    "tpu.trace_start"() <{level = 10 : i32, message = "bqd,bkd->bqk"}> : () -> ()
    %cst_120 = arith.constant dense<0.000000e+00> : vector<1x8x8xf32>
    %429 = tpu.matmul %424, %426, %cst_120 {dimension_numbers = #tpu.dot_dimension_numbers<[2], [2], [1], [1], [0, 0, 0, 1, 1, 1], [0], [0]>} : vector<1x8x4xbf16>, vector<1x8x4xbf16>, vector<1x8x8xf32> -> vector<1x8x8xf32>
    "tpu.trace_stop"() : () -> ()
    %430 = vector.shape_cast %5 : vector<8x8xf32> to vector<1x8x8xf32>
    %431 = arith.addf %429, %430 : vector<1x8x8xf32>
    %cst_121 = arith.constant dense<0xFF800000> : vector<1x8xf32>
    %432 = vector.multi_reduction <maximumf>, %431, %cst_121 [2] : vector<1x8x8xf32> to vector<1x8xf32>
    %433 = vector.shape_cast %432 : vector<1x8xf32> to vector<1x8x1xf32>
    %434 = vector.broadcast %433 : vector<1x8x1xf32> to vector<1x8x8xf32>
    %435 = arith.subf %431, %434 : vector<1x8x8xf32>
    %436 = math.exp %435 : vector<1x8x8xf32>
    %cst_122 = arith.constant dense<0.000000e+00> : vector<1x8xf32>
    %437 = vector.multi_reduction <add>, %436, %cst_122 [2] : vector<1x8x8xf32> to vector<1x8xf32>
    %438 = vector.shape_cast %437 : vector<1x8xf32> to vector<1x8x1xf32>
    %439 = tpu.reciprocal %438 {approx = true} : vector<1x8x1xf32> -> vector<1x8x1xf32>
    %440 = vector.broadcast %439 : vector<1x8x1xf32> to vector<1x8x8xf32>
    %441 = arith.mulf %436, %440 : vector<1x8x8xf32>
    %442 = arith.truncf %441 : vector<1x8x8xf32> to vector<1x8x8xbf16>
    "tpu.trace_start"() <{level = 10 : i32, message = "bqk,bkd->bqd"}> : () -> ()
    %cst_123 = arith.constant dense<0.000000e+00> : vector<1x8x4xf32>
    %443 = tpu.matmul %442, %428, %cst_123 {dimension_numbers = #tpu.dot_dimension_numbers<[2], [1], [1], [2], [0, 0, 0, 1, 1, 2], [0], [0]>} : vector<1x8x8xbf16>, vector<1x8x4xbf16>, vector<1x8x4xf32> -> vector<1x8x4xf32>
    "tpu.trace_stop"() : () -> ()
    %444 = vector.shape_cast %443 : vector<1x8x4xf32> to vector<8x4xf32>
    %445 = vector.extract_strided_slice %332 {offsets = [0, 20], sizes = [8, 4], strides = [1, 1]} : vector<8x32xbf16> to vector<8x4xbf16>
    %446 = vector.shape_cast %445 : vector<8x4xbf16> to vector<1x8x4xbf16>
    %447 = vector.extract_strided_slice %333 {offsets = [0, 20], sizes = [8, 4], strides = [1, 1]} : vector<8x32xbf16> to vector<8x4xbf16>
    %448 = vector.shape_cast %447 : vector<8x4xbf16> to vector<1x8x4xbf16>
    %449 = vector.extract_strided_slice %334 {offsets = [0, 20], sizes = [8, 4], strides = [1, 1]} : vector<8x32xbf16> to vector<8x4xbf16>
    %450 = vector.shape_cast %449 : vector<8x4xbf16> to vector<1x8x4xbf16>
    "tpu.trace_start"() <{level = 10 : i32, message = "bqd,bkd->bqk"}> : () -> ()
    %cst_124 = arith.constant dense<0.000000e+00> : vector<1x8x8xf32>
    %451 = tpu.matmul %446, %448, %cst_124 {dimension_numbers = #tpu.dot_dimension_numbers<[2], [2], [1], [1], [0, 0, 0, 1, 1, 1], [0], [0]>} : vector<1x8x4xbf16>, vector<1x8x4xbf16>, vector<1x8x8xf32> -> vector<1x8x8xf32>
    "tpu.trace_stop"() : () -> ()
    %452 = vector.shape_cast %5 : vector<8x8xf32> to vector<1x8x8xf32>
    %453 = arith.addf %451, %452 : vector<1x8x8xf32>
    %cst_125 = arith.constant dense<0xFF800000> : vector<1x8xf32>
    %454 = vector.multi_reduction <maximumf>, %453, %cst_125 [2] : vector<1x8x8xf32> to vector<1x8xf32>
    %455 = vector.shape_cast %454 : vector<1x8xf32> to vector<1x8x1xf32>
    %456 = vector.broadcast %455 : vector<1x8x1xf32> to vector<1x8x8xf32>
    %457 = arith.subf %453, %456 : vector<1x8x8xf32>
    %458 = math.exp %457 : vector<1x8x8xf32>
    %cst_126 = arith.constant dense<0.000000e+00> : vector<1x8xf32>
    %459 = vector.multi_reduction <add>, %458, %cst_126 [2] : vector<1x8x8xf32> to vector<1x8xf32>
    %460 = vector.shape_cast %459 : vector<1x8xf32> to vector<1x8x1xf32>
    %461 = tpu.reciprocal %460 {approx = true} : vector<1x8x1xf32> -> vector<1x8x1xf32>
    %462 = vector.broadcast %461 : vector<1x8x1xf32> to vector<1x8x8xf32>
    %463 = arith.mulf %458, %462 : vector<1x8x8xf32>
    %464 = arith.truncf %463 : vector<1x8x8xf32> to vector<1x8x8xbf16>
    "tpu.trace_start"() <{level = 10 : i32, message = "bqk,bkd->bqd"}> : () -> ()
    %cst_127 = arith.constant dense<0.000000e+00> : vector<1x8x4xf32>
    %465 = tpu.matmul %464, %450, %cst_127 {dimension_numbers = #tpu.dot_dimension_numbers<[2], [1], [1], [2], [0, 0, 0, 1, 1, 2], [0], [0]>} : vector<1x8x8xbf16>, vector<1x8x4xbf16>, vector<1x8x4xf32> -> vector<1x8x4xf32>
    "tpu.trace_stop"() : () -> ()
    %466 = vector.shape_cast %465 : vector<1x8x4xf32> to vector<8x4xf32>
    %467 = vector.extract_strided_slice %332 {offsets = [0, 24], sizes = [8, 4], strides = [1, 1]} : vector<8x32xbf16> to vector<8x4xbf16>
    %468 = vector.shape_cast %467 : vector<8x4xbf16> to vector<1x8x4xbf16>
    %469 = vector.extract_strided_slice %333 {offsets = [0, 24], sizes = [8, 4], strides = [1, 1]} : vector<8x32xbf16> to vector<8x4xbf16>
    %470 = vector.shape_cast %469 : vector<8x4xbf16> to vector<1x8x4xbf16>
    %471 = vector.extract_strided_slice %334 {offsets = [0, 24], sizes = [8, 4], strides = [1, 1]} : vector<8x32xbf16> to vector<8x4xbf16>
    %472 = vector.shape_cast %471 : vector<8x4xbf16> to vector<1x8x4xbf16>
    "tpu.trace_start"() <{level = 10 : i32, message = "bqd,bkd->bqk"}> : () -> ()
    %cst_128 = arith.constant dense<0.000000e+00> : vector<1x8x8xf32>
    %473 = tpu.matmul %468, %470, %cst_128 {dimension_numbers = #tpu.dot_dimension_numbers<[2], [2], [1], [1], [0, 0, 0, 1, 1, 1], [0], [0]>} : vector<1x8x4xbf16>, vector<1x8x4xbf16>, vector<1x8x8xf32> -> vector<1x8x8xf32>
    "tpu.trace_stop"() : () -> ()
    %474 = vector.shape_cast %5 : vector<8x8xf32> to vector<1x8x8xf32>
    %475 = arith.addf %473, %474 : vector<1x8x8xf32>
    %cst_129 = arith.constant dense<0xFF800000> : vector<1x8xf32>
    %476 = vector.multi_reduction <maximumf>, %475, %cst_129 [2] : vector<1x8x8xf32> to vector<1x8xf32>
    %477 = vector.shape_cast %476 : vector<1x8xf32> to vector<1x8x1xf32>
    %478 = vector.broadcast %477 : vector<1x8x1xf32> to vector<1x8x8xf32>
    %479 = arith.subf %475, %478 : vector<1x8x8xf32>
    %480 = math.exp %479 : vector<1x8x8xf32>
    %cst_130 = arith.constant dense<0.000000e+00> : vector<1x8xf32>
    %481 = vector.multi_reduction <add>, %480, %cst_130 [2] : vector<1x8x8xf32> to vector<1x8xf32>
    %482 = vector.shape_cast %481 : vector<1x8xf32> to vector<1x8x1xf32>
    %483 = tpu.reciprocal %482 {approx = true} : vector<1x8x1xf32> -> vector<1x8x1xf32>
    %484 = vector.broadcast %483 : vector<1x8x1xf32> to vector<1x8x8xf32>
    %485 = arith.mulf %480, %484 : vector<1x8x8xf32>
    %486 = arith.truncf %485 : vector<1x8x8xf32> to vector<1x8x8xbf16>
    "tpu.trace_start"() <{level = 10 : i32, message = "bqk,bkd->bqd"}> : () -> ()
    %cst_131 = arith.constant dense<0.000000e+00> : vector<1x8x4xf32>
    %487 = tpu.matmul %486, %472, %cst_131 {dimension_numbers = #tpu.dot_dimension_numbers<[2], [1], [1], [2], [0, 0, 0, 1, 1, 2], [0], [0]>} : vector<1x8x8xbf16>, vector<1x8x4xbf16>, vector<1x8x4xf32> -> vector<1x8x4xf32>
    "tpu.trace_stop"() : () -> ()
    %488 = vector.shape_cast %487 : vector<1x8x4xf32> to vector<8x4xf32>
    %489 = vector.extract_strided_slice %332 {offsets = [0, 28], sizes = [8, 4], strides = [1, 1]} : vector<8x32xbf16> to vector<8x4xbf16>
    %490 = vector.shape_cast %489 : vector<8x4xbf16> to vector<1x8x4xbf16>
    %491 = vector.extract_strided_slice %333 {offsets = [0, 28], sizes = [8, 4], strides = [1, 1]} : vector<8x32xbf16> to vector<8x4xbf16>
    %492 = vector.shape_cast %491 : vector<8x4xbf16> to vector<1x8x4xbf16>
    %493 = vector.extract_strided_slice %334 {offsets = [0, 28], sizes = [8, 4], strides = [1, 1]} : vector<8x32xbf16> to vector<8x4xbf16>
    %494 = vector.shape_cast %493 : vector<8x4xbf16> to vector<1x8x4xbf16>
    "tpu.trace_start"() <{level = 10 : i32, message = "bqd,bkd->bqk"}> : () -> ()
    %cst_132 = arith.constant dense<0.000000e+00> : vector<1x8x8xf32>
    %495 = tpu.matmul %490, %492, %cst_132 {dimension_numbers = #tpu.dot_dimension_numbers<[2], [2], [1], [1], [0, 0, 0, 1, 1, 1], [0], [0]>} : vector<1x8x4xbf16>, vector<1x8x4xbf16>, vector<1x8x8xf32> -> vector<1x8x8xf32>
    "tpu.trace_stop"() : () -> ()
    %496 = vector.shape_cast %5 : vector<8x8xf32> to vector<1x8x8xf32>
    %497 = arith.addf %495, %496 : vector<1x8x8xf32>
    %cst_133 = arith.constant dense<0xFF800000> : vector<1x8xf32>
    %498 = vector.multi_reduction <maximumf>, %497, %cst_133 [2] : vector<1x8x8xf32> to vector<1x8xf32>
    %499 = vector.shape_cast %498 : vector<1x8xf32> to vector<1x8x1xf32>
    %500 = vector.broadcast %499 : vector<1x8x1xf32> to vector<1x8x8xf32>
    %501 = arith.subf %497, %500 : vector<1x8x8xf32>
    %502 = math.exp %501 : vector<1x8x8xf32>
    %cst_134 = arith.constant dense<0.000000e+00> : vector<1x8xf32>
    %503 = vector.multi_reduction <add>, %502, %cst_134 [2] : vector<1x8x8xf32> to vector<1x8xf32>
    %504 = vector.shape_cast %503 : vector<1x8xf32> to vector<1x8x1xf32>
    %505 = tpu.reciprocal %504 {approx = true} : vector<1x8x1xf32> -> vector<1x8x1xf32>
    %506 = vector.broadcast %505 : vector<1x8x1xf32> to vector<1x8x8xf32>
    %507 = arith.mulf %502, %506 : vector<1x8x8xf32>
    %508 = arith.truncf %507 : vector<1x8x8xf32> to vector<1x8x8xbf16>
    "tpu.trace_start"() <{level = 10 : i32, message = "bqk,bkd->bqd"}> : () -> ()
    %cst_135 = arith.constant dense<0.000000e+00> : vector<1x8x4xf32>
    %509 = tpu.matmul %508, %494, %cst_135 {dimension_numbers = #tpu.dot_dimension_numbers<[2], [1], [1], [2], [0, 0, 0, 1, 1, 2], [0], [0]>} : vector<1x8x8xbf16>, vector<1x8x4xbf16>, vector<1x8x4xf32> -> vector<1x8x4xf32>
    "tpu.trace_stop"() : () -> ()
    %510 = vector.shape_cast %509 : vector<1x8x4xf32> to vector<8x4xf32>
    %511 = tpu.concatenate %356, %378, %400, %422, %444, %466, %488, %510 in 1 : vector<8x4xf32>, vector<8x4xf32>, vector<8x4xf32>, vector<8x4xf32>, vector<8x4xf32>, vector<8x4xf32>, vector<8x4xf32>, vector<8x4xf32> -> vector<8x32xf32>
    %512 = arith.truncf %511 : vector<8x32xf32> to vector<8x32xbf16>
    %c1_136 = arith.constant 1 : index
    %c3_137 = arith.constant 3 : index
    %c0_138 = arith.constant 0 : index
    %c0_139 = arith.constant 0 : index
    %513 = vector.load %arg4[%c1_136, %c3_137, %c0_138, %c0_139] : memref<2x4x32x32xbf16, #tpu.memory_space<vmem>>, vector<1x1x32x32xbf16>
    %514 = vector.shape_cast %513 : vector<1x1x32x32xbf16> to vector<32x32xbf16>
    %cst_140 = arith.constant dense<0.000000e+00> : vector<8x32xf32>
    %515 = tpu.matmul %512, %514, %cst_140 {dimension_numbers = #tpu.dot_dimension_numbers<[1], [0], [0], [1], [0, 0, 1, 1], [], []>} : vector<8x32xbf16>, vector<32x32xbf16>, vector<8x32xf32> -> vector<8x32xf32>
    %516 = arith.addf %286, %515 : vector<8x32xf32>
    %517 = vector.extract_strided_slice %288 {offsets = [5, 0], sizes = [1, 32], strides = [1, 1]} : vector<9x32xf32> to vector<1x32xf32>
    %518 = vector.broadcast %517 : vector<1x32xf32> to vector<8x32xf32>
    %519 = arith.addf %516, %518 : vector<8x32xf32>
    %520 = vector.extract_strided_slice %288 {offsets = [6, 0], sizes = [1, 32], strides = [1, 1]} : vector<9x32xf32> to vector<1x32xf32>
    %521 = vector.extract_strided_slice %288 {offsets = [7, 0], sizes = [1, 32], strides = [1, 1]} : vector<9x32xf32> to vector<1x32xf32>
    %cst_141 = arith.constant dense<0.000000e+00> : vector<8xf32>
    %522 = vector.multi_reduction <add>, %519, %cst_141 [1] : vector<8x32xf32> to vector<8xf32>
    %523 = vector.shape_cast %522 : vector<8xf32> to vector<8x1xf32>
    %cst_142 = arith.constant 3.200000e+01 : f32
    %524 = vector.broadcast %cst_142 : f32 to vector<8x1xf32>
    %525 = arith.divf %523, %524 : vector<8x1xf32>
    %526 = vector.broadcast %525 : vector<8x1xf32> to vector<8x32xf32>
    %527 = arith.subf %519, %526 : vector<8x32xf32>
    %528 = arith.mulf %527, %527 : vector<8x32xf32>
    %cst_143 = arith.constant dense<0.000000e+00> : vector<8xf32>
    %529 = vector.multi_reduction <add>, %528, %cst_143 [1] : vector<8x32xf32> to vector<8xf32>
    %530 = vector.shape_cast %529 : vector<8xf32> to vector<8x1xf32>
    %cst_144 = arith.constant 3.200000e+01 : f32
    %531 = vector.broadcast %cst_144 : f32 to vector<8x1xf32>
    %532 = arith.divf %530, %531 : vector<8x1xf32>
    %533 = vector.broadcast %525 : vector<8x1xf32> to vector<8x32xf32>
    %534 = arith.subf %519, %533 : vector<8x32xf32>
    %cst_145 = arith.constant 9.99999974E-6 : f32
    %535 = vector.broadcast %cst_145 : f32 to vector<8x1xf32>
    %536 = arith.addf %532, %535 : vector<8x1xf32>
    %537 = math.rsqrt %536 : vector<8x1xf32>
    %538 = vector.broadcast %537 : vector<8x1xf32> to vector<8x32xf32>
    %539 = arith.mulf %534, %538 : vector<8x32xf32>
    %540 = vector.broadcast %520 : vector<1x32xf32> to vector<8x32xf32>
    %541 = arith.mulf %539, %540 : vector<8x32xf32>
    %542 = vector.broadcast %521 : vector<1x32xf32> to vector<8x32xf32>
    %543 = arith.addf %541, %542 : vector<8x32xf32>
    %544 = arith.truncf %543 : vector<8x32xf32> to vector<8x32xbf16>
    %c1_146 = arith.constant 1 : index
    %c0_147 = arith.constant 0 : index
    %c0_148 = arith.constant 0 : index
    %545 = vector.load %arg5[%c1_146, %c0_147, %c0_148] : memref<2x32x128xbf16, #tpu.memory_space<vmem>>, vector<1x32x128xbf16>
    %546 = vector.shape_cast %545 : vector<1x32x128xbf16> to vector<32x128xbf16>
    %cst_149 = arith.constant dense<0.000000e+00> : vector<8x128xf32>
    %547 = tpu.matmul %544, %546, %cst_149 {dimension_numbers = #tpu.dot_dimension_numbers<[1], [0], [0], [1], [0, 0, 1, 1], [], []>} : vector<8x32xbf16>, vector<32x128xbf16>, vector<8x128xf32> -> vector<8x128xf32>
    %c1_150 = arith.constant 1 : index
    %c0_151 = arith.constant 0 : index
    %c0_152 = arith.constant 0 : index
    %548 = vector.load %arg6[%c1_150, %c0_151, %c0_152] : memref<2x1x128xf32, #tpu.memory_space<vmem>>, vector<1x1x128xf32>
    %549 = vector.shape_cast %548 : vector<1x1x128xf32> to vector<1x128xf32>
    %550 = vector.broadcast %549 : vector<1x128xf32> to vector<8x128xf32>
    %551 = arith.addf %547, %550 : vector<8x128xf32>
    %cst_153 = arith.constant 0.000000e+00 : f32
    %552 = vector.broadcast %cst_153 : f32 to vector<8x128xf32>
    %553 = arith.maximumf %551, %552 : vector<8x128xf32>
    %554 = arith.truncf %553 : vector<8x128xf32> to vector<8x128xbf16>
    %c1_154 = arith.constant 1 : index
    %c0_155 = arith.constant 0 : index
    %c0_156 = arith.constant 0 : index
    %555 = vector.load %arg7[%c1_154, %c0_155, %c0_156] : memref<2x128x32xbf16, #tpu.memory_space<vmem>>, vector<1x128x32xbf16>
    %556 = vector.shape_cast %555 : vector<1x128x32xbf16> to vector<128x32xbf16>
    %cst_157 = arith.constant dense<0.000000e+00> : vector<8x32xf32>
    %557 = tpu.matmul %554, %556, %cst_157 {dimension_numbers = #tpu.dot_dimension_numbers<[1], [0], [0], [1], [0, 0, 1, 1], [], []>} : vector<8x128xbf16>, vector<128x32xbf16>, vector<8x32xf32> -> vector<8x32xf32>
    %558 = vector.extract_strided_slice %288 {offsets = [8, 0], sizes = [1, 32], strides = [1, 1]} : vector<9x32xf32> to vector<1x32xf32>
    %559 = vector.broadcast %558 : vector<1x32xf32> to vector<8x32xf32>
    %560 = arith.addf %557, %559 : vector<8x32xf32>
    %561 = arith.addf %519, %560 : vector<8x32xf32>
    %c0_158 = arith.constant 0 : index
    %c0_159 = arith.constant 0 : index
    %c0_160 = arith.constant 0 : index
    %562 = vector.load %arg9[%c0_158, %c0_159, %c0_160] : memref<2x1x32xf32, #tpu.memory_space<vmem>>, vector<1x1x32xf32>
    %563 = vector.shape_cast %562 : vector<1x1x32xf32> to vector<1x32xf32>
    %c1_161 = arith.constant 1 : index
    %c0_162 = arith.constant 0 : index
    %c0_163 = arith.constant 0 : index
    %564 = vector.load %arg9[%c1_161, %c0_162, %c0_163] : memref<2x1x32xf32, #tpu.memory_space<vmem>>, vector<1x1x32xf32>
    %565 = vector.shape_cast %564 : vector<1x1x32xf32> to vector<1x32xf32>
    %cst_164 = arith.constant dense<0.000000e+00> : vector<8xf32>
    %566 = vector.multi_reduction <add>, %561, %cst_164 [1] : vector<8x32xf32> to vector<8xf32>
    %567 = vector.shape_cast %566 : vector<8xf32> to vector<8x1xf32>
    %cst_165 = arith.constant 3.200000e+01 : f32
    %568 = vector.broadcast %cst_165 : f32 to vector<8x1xf32>
    %569 = arith.divf %567, %568 : vector<8x1xf32>
    %570 = vector.broadcast %569 : vector<8x1xf32> to vector<8x32xf32>
    %571 = arith.subf %561, %570 : vector<8x32xf32>
    %572 = arith.mulf %571, %571 : vector<8x32xf32>
    %cst_166 = arith.constant dense<0.000000e+00> : vector<8xf32>
    %573 = vector.multi_reduction <add>, %572, %cst_166 [1] : vector<8x32xf32> to vector<8xf32>
    %574 = vector.shape_cast %573 : vector<8xf32> to vector<8x1xf32>
    %cst_167 = arith.constant 3.200000e+01 : f32
    %575 = vector.broadcast %cst_167 : f32 to vector<8x1xf32>
    %576 = arith.divf %574, %575 : vector<8x1xf32>
    %577 = vector.broadcast %569 : vector<8x1xf32> to vector<8x32xf32>
    %578 = arith.subf %561, %577 : vector<8x32xf32>
    %cst_168 = arith.constant 9.99999974E-6 : f32
    %579 = vector.broadcast %cst_168 : f32 to vector<8x1xf32>
    %580 = arith.addf %576, %579 : vector<8x1xf32>
    %581 = math.rsqrt %580 : vector<8x1xf32>
    %582 = vector.broadcast %581 : vector<8x1xf32> to vector<8x32xf32>
    %583 = arith.mulf %578, %582 : vector<8x32xf32>
    %584 = vector.broadcast %563 : vector<1x32xf32> to vector<8x32xf32>
    %585 = arith.mulf %583, %584 : vector<8x32xf32>
    %586 = vector.broadcast %565 : vector<1x32xf32> to vector<8x32xf32>
    %587 = arith.addf %585, %586 : vector<8x32xf32>
    %588 = arith.truncf %587 : vector<8x32xf32> to vector<8x32xbf16>
    %c0_169 = arith.constant 0 : index
    %c0_170 = arith.constant 0 : index
    %589 = vector.load %arg10[%c0_169, %c0_170] : memref<32x128xbf16, #tpu.memory_space<vmem>>, vector<32x128xbf16>
    %cst_171 = arith.constant dense<0.000000e+00> : vector<8x128xf32>
    %590 = tpu.matmul %588, %589, %cst_171 {dimension_numbers = #tpu.dot_dimension_numbers<[1], [0], [0], [1], [0, 0, 1, 1], [], []>} : vector<8x32xbf16>, vector<32x128xbf16>, vector<8x128xf32> -> vector<8x128xf32>
    %c0_172 = arith.constant 0 : index
    %c0_173 = arith.constant 0 : index
    %591 = vector.load %arg11[%c0_172, %c0_173] : memref<1x128xf32, #tpu.memory_space<vmem>>, vector<1x128xf32>
    %592 = vector.broadcast %591 : vector<1x128xf32> to vector<8x128xf32>
    %593 = arith.addf %590, %592 : vector<8x128xf32>
    %c0_174 = arith.constant 0 : index
    %c0_175 = arith.constant 0 : index
    %594 = vector.load %arg12[%c0_174, %c0_175] : memref<8x128xf32, #tpu.memory_space<vmem>>, vector<8x128xf32>
    tpu.vector_store %arg12[%c0_174, %c0_175], %593 {strides = array<i32>} : memref<8x128xf32, #tpu.memory_space<vmem>>, vector<8x128xf32>,
    return
  }
  func.func @transform_0(%arg0: i32) -> (i32, i32) {
    %c0_i32 = arith.constant 0 : i32
    %c0_i32_0 = arith.constant 0 : i32
    return %arg0, %c0_i32 : i32, i32
  }
  func.func @transform_1(%arg0: i32) -> (i32, i32) {
    %c0_i32 = arith.constant 0 : i32
    %c0_i32_0 = arith.constant 0 : i32
    %c0_i32_1 = arith.constant 0 : i32
    return %c0_i32, %c0_i32_0 : i32, i32
  }
  func.func @transform_2(%arg0: i32) -> (i32, i32) {
    %c0_i32 = arith.constant 0 : i32
    %c0_i32_0 = arith.constant 0 : i32
    %c0_i32_1 = arith.constant 0 : i32
    return %c0_i32, %c0_i32_0 : i32, i32
  }
  func.func @transform_3(%arg0: i32) -> (i32, i32, i32, i32) {
    %c0_i32 = arith.constant 0 : i32
    %c0_i32_0 = arith.constant 0 : i32
    %c0_i32_1 = arith.constant 0 : i32
    %c0_i32_2 = arith.constant 0 : i32
    %c0_i32_3 = arith.constant 0 : i32
    return %c0_i32, %c0_i32_0, %c0_i32_1, %c0_i32_2 : i32, i32, i32, i32
  }
  func.func @transform_4(%arg0: i32) -> (i32, i32, i32) {
    %c0_i32 = arith.constant 0 : i32
    %c0_i32_0 = arith.constant 0 : i32
    %c0_i32_1 = arith.constant 0 : i32
    %c0_i32_2 = arith.constant 0 : i32
    return %c0_i32, %c0_i32_0, %c0_i32_1 : i32, i32, i32
  }
  func.func @transform_5(%arg0: i32) -> (i32, i32, i32) {
    %c0_i32 = arith.constant 0 : i32
    %c0_i32_0 = arith.constant 0 : i32
    %c0_i32_1 = arith.constant 0 : i32
    %c0_i32_2 = arith.constant 0 : i32
    return %c0_i32, %c0_i32_0, %c0_i32_1 : i32, i32, i32
  }
  func.func @transform_6(%arg0: i32) -> (i32, i32, i32) {
    %c0_i32 = arith.constant 0 : i32
    %c0_i32_0 = arith.constant 0 : i32
    %c0_i32_1 = arith.constant 0 : i32
    %c0_i32_2 = arith.constant 0 : i32
    return %c0_i32, %c0_i32_0, %c0_i32_1 : i32, i32, i32
  }
  func.func @transform_7(%arg0: i32) -> (i32, i32, i32) {
    %c0_i32 = arith.constant 0 : i32
    %c0_i32_0 = arith.constant 0 : i32
    %c0_i32_1 = arith.constant 0 : i32
    %c0_i32_2 = arith.constant 0 : i32
    return %c0_i32, %c0_i32_0, %c0_i32_1 : i32, i32, i32
  }
  func.func @transform_8(%arg0: i32) -> (i32, i32, i32) {
    %c0_i32 = arith.constant 0 : i32
    %c0_i32_0 = arith.constant 0 : i32
    %c0_i32_1 = arith.constant 0 : i32
    %c0_i32_2 = arith.constant 0 : i32
    return %c0_i32, %c0_i32_0, %c0_i32_1 : i32, i32, i32
  }
  func.func @transform_9(%arg0: i32) -> (i32, i32) {
    %c0_i32 = arith.constant 0 : i32
    %c0_i32_0 = arith.constant 0 : i32
    %c0_i32_1 = arith.constant 0 : i32
    return %c0_i32, %c0_i32_0 : i32, i32
  }
  func.func @transform_10(%arg0: i32) -> (i32, i32) {
    %c0_i32 = arith.constant 0 : i32
    %c0_i32_0 = arith.constant 0 : i32
    %c0_i32_1 = arith.constant 0 : i32
    return %c0_i32, %c0_i32_0 : i32, i32
  }
  func.func @transform_11(%arg0: i32) -> (i32, i32) {
    %c0_i32 = arith.constant 0 : i32
    %c0_i32_0 = arith.constant 0 : i32
    return %arg0, %c0_i32 : i32, i32
  }
}

</mosaic_0001>

<bundles_post_ra>
// kernel: tpu_custom_call.1
= control target key start
LH: loop header
LB: loop body
LE: loop exit
PB: predicated region body
PF: predicated region fallthrough
CT: control target
= control target key end

     0   :  { %16 = vsyncpa [#allocation3], 0  ;;  %s5421_s0 = inlined_call_operand.vmem [shape: f32[16,16], index: 0, kind: input, shape index: {}]   ;;  %s5422_s1 = inlined_call_operand.hbm [shape: f32[8,32], index: 1, kind: input, shape index: {}]   ;;  %s5423_s2 = inlined_call_operand.hbm [shape: bf16[16,32], index: 2, kind: input, shape index: {}]   ;;  %s5424_s3 = inlined_call_operand.vmem [shape: bf16[2,4,32,32], index: 3, kind: input, shape index: {}]   ;;  %s5425_s4 = inlined_call_operand.vmem [shape: bf16[2,32,128], index: 4, kind: input, shape index: {}]   ;;  %s5426_s5 = inlined_call_operand.hbm [shape: f32[2,1,128], index: 5, kind: input, shape index: {}]   ;;  %s5427_s6 = inlined_call_operand.vmem [shape: bf16[2,128,32], index: 6, kind: input, shape index: {}]   ;;  %s5428_s7 = inlined_call_operand.vmem [shape: f32[2,9,32], index: 7, kind: input, shape index: {}]   ;;  %s5429_s8 = inlined_call_operand.hbm [shape: f32[2,1,32], index: 8, kind: input, shape index: {}]   ;;  %s5430_s9 = inlined_call_operand.vmem [shape: bf16[32,128], index: 9, kind: input, shape index: {}]   ;;  %s5431_s10 = inlined_call_operand.vmem [shape: f32[1,128], index: 10, kind: input, shape index: {}]   ;;  %s5432_s11 = inlined_call_operand.hbm [shape: f32[16,128], index: 11, kind: output, shape index: {}]  }
   0x1   :  { %17 = vsyncpa [#allocation6], 0 }
   0x2   :  { %18 = vsyncpa [#allocation9], 0 }
   0x3   :  { %19 = vsyncpa [#allocation4], 0 }
   0x4   :  { %21 = vsyncpa [#allocation4 + $0x1], 0  ;;  %s4594_s17 = smov 0   ;;  %s4596_s18 = smov 0  }
   0x5   :  { %s4598_s19 = smov 0   ;;  %s4600_s20 = smov 0  }
   0x6 LB: > { %5449 = sst [smem:[#allocation15_spill]] %s4502_s19  ;;  %s4615_s21 = sadd.s32 4294967295, %s4506_s20   ;;  %s4506_s20 = sphi %s4600_s20, %s5477_s20   ;;  %s4502_s19 = sphi %s4598_s19, %s5474_s19   ;;  %s4498_s18 = sphi %s4596_s18, %s5476_s18   ;;  %s4494_s17 = sphi %s4594_s17, %s5475_s17  }
   0x7   : > { %s3515_s22 = sadd.s32 4294967294, %s4506_s20   ;;  %s4619_s23 = sadd.s32 1, %s4506_s20  }
   0x8   : > { %s270_s24 = sadd.s32 1, %s4502_s19  ;;  %s267_s25 = ssub.s32 %s4506_s20, %s4619_s23 }
   0x9   : > { %p280_p0 = scmp.ne.s32.totalorder %s4502_s19, %s4498_s18  ;;  %p268_p1 = scmp.eq.s32.totalorder %s267_s25, 0 }
   0xa   : > { %p281_p2 = scmp.eq.s32.totalorder %s4615_s21, 1  ;;  %p286_p3 = scmp.ne.s32.totalorder %s4498_s18, %s4494_s17 }
   0xb   : > { %p287_p4 = scmp.eq.s32.totalorder %s3515_s22, 1  ;;  %p3516_p7 = scmp.ge.s32.totalorder %s4506_s20, 1 }
   0xc   : > { %s4630_s26 = scalar_select %p268_p1, %s4502_s19, %s270_s24  }
   0xd   : > { %p4632_p5 = por %p281_p2, %p280_p0  ;;  %p4636_p6 = por %p287_p4, %p286_p3 }
   0xe   : > { %5450 = sst [smem:[#allocation16_spill]] %s4630_s26  ;;  %p294_p8 = scmp.lt.s32.totalorder %s4506_s20, 3 }
   0xf   : > { %s5451_s27 = scalar_select %p4632_p5, 1, 0 }
  0x10   : > { %s5452_s28 = scalar_select %p4636_p6, 1, 0 }
  0x11   : > { %p5433_p9 = scmp.eq.s32.totalorder %s4615_s21, 0  ;;  %p4643_p10 = pnand %p3516_p7, %p294_p8 }
  0x12   : > { %s4508_s30 = smov [#allocation5]   ;;  %s4509_s14 = smov [#allocation2]  }
  0x13   : > { %s317_s12 = sshll.u32 %s4508_s30, 4  ;;  %p4134_p11 = pneg %p4643_p10  ;;  %s318_s12 = int_to_ptr.vmem [resolvable:$true] %s317_s12 }
  0x14   : > { %s307_s15 = sshll.u32 %s4509_s14, 4  ;;  %s4510_s16 = smov [#allocation7]   ;;  %s308_s15 = int_to_ptr.vmem [resolvable:$true] %s307_s15 }
  0x15   : > { %p4651_p12 = pnand %p5433_p9, %p4134_p11  ;;  %s336_s22 = sshll.u32 %s4510_s16, 4  ;;  %s337_s22 = int_to_ptr.vmem [resolvable:$true] %s336_s22 }
  0x16   : > { %s4341_s24 = scalar_lea.vmem %s318_s12, 128  ;;  %p4349_p3 = scmp.lt.s32.totalorder %s318_s12, %s318_s12 }
  0x17   : > { %p4332_p13 = pneg %p4651_p12  ;;  %p4342_p0 = scmp.ne.s32.totalorder %s318_s12, %s4341_s24 }
  0x18   : > { %p4350_p4 = scmp.lt.s32.totalorder %s4341_s24, %s4341_s24 }
  0x19   : > { %p4344_p1 = pnand %p4342_p0, %p4332_p13 }
  0x1a   : > { %p4351_p7 = por %p4350_p4, %p4349_p3 }
  0x1b   : > { %p4345_p2 = pneg %p4344_p1 }
  0x1d   : > { %p4352_p8 = pnand %p4351_p7, %p4345_p2 }
  0x1f   : > { %4355 = shalt.err (!%p4352_p8)
}
  0x20   : > { %s4511_s25 = smov 64   ;;  %s4512_s30 = smov 4  }
  0x21   : > { %4140 = dma.hbm_to_vmem [thread:$0]  (!%p4651_p12), %s5423_s2, 128, %s318_s12, [#allocation6], %s4511_s25, %s4511_s25, %s4512_s30  }
  0x22   : > { %s4367_s26 = scalar_lea.vmem %s308_s15, 128  ;;  %p4375_p9 = scmp.lt.s32.totalorder %s308_s15, %s308_s15 }
  0x23   : > { %p4368_p11 = scmp.ne.s32.totalorder %s308_s15, %s4367_s26  ;;  %p4376_p6 = scmp.lt.s32.totalorder %s4367_s26, %s4367_s26 }
  0x25   : > { %p4370_p0 = pnand %p4368_p11, %p4332_p13  ;;  %p4377_p3 = por %p4376_p6, %p4375_p9 }
  0x27   : > { %p4371_p1 = pneg %p4370_p0 }
  0x29   : > { %p4378_p2 = pnand %p4377_p3, %p4371_p1 }
  0x2b   : > { %4381 = shalt.err (!%p4378_p2)
}
  0x2c   : > { %4137 = dma.hbm_to_vmem [thread:$0]  (!%p4651_p12), %s5422_s1, 128, %s308_s15, [#allocation3]  }
  0x2d   : > { %s4393_s12 = scalar_lea.vmem %s337_s22, 32  ;;  %p4401_p11 = scmp.lt.s32.totalorder %s337_s22, %s337_s22 }
  0x2e   : > { %p4394_p4 = scmp.ne.s32.totalorder %s337_s22, %s4393_s12  ;;  %p4402_p0 = scmp.lt.s32.totalorder %s4393_s12, %s4393_s12 }
  0x30   : > { %p4396_p7 = pnand %p4394_p4, %p4332_p13  ;;  %p4403_p5 = por %p4402_p0, %p4401_p11 }
  0x32   : > { %p4397_p8 = pneg %p4396_p7 }
  0x34   : > { %p4404_p6 = pnand %p4403_p5, %p4397_p8 }
  0x36   : > { %4407 = shalt.err (!%p4404_p6)
}
  0x37   : > { %s4513_s26 = smov 16   ;;  %s4514_s25 = smov 1  }
  0x38   : > { %4143 = dma.hbm_to_vmem [thread:$0]  (!%p4651_p12), %s5426_s5, 32, %s337_s22, [#allocation6], %s4513_s26, %s4513_s26, %s4514_s25  }
  0x39   : > { %s4515_s15 = smov [#allocation8]  }
  0x3a   : > { %s355_s14 = sshll.u32 %s4515_s15, 4  ;;  %s356_s14 = int_to_ptr.vmem [resolvable:$true] %s355_s14 }
  0x3b   : > { %s4419_s16 = scalar_lea.vmem %s356_s14, 32  ;;  %p4427_p5 = scmp.lt.s32.totalorder %s356_s14, %s356_s14 }
  0x3c   : > { %p4420_p9 = scmp.ne.s32.totalorder %s356_s14, %s4419_s16  ;;  %p4428_p2 = scmp.lt.s32.totalorder %s4419_s16, %s4419_s16 }
  0x3e   : > { %p4422_p1 = pnand %p4420_p9, %p4332_p13  ;;  %p4429_p4 = por %p4428_p2, %p4427_p5 }
  0x40   : > { %p4423_p3 = pneg %p4422_p1 }
  0x42   : > { %p4430_p7 = pnand %p4429_p4, %p4423_p3 }
  0x44   : > { %4433 = shalt.err (!%p4430_p7)
}
  0x45   : > { %4146 = dma.hbm_to_vmem [thread:$0]  (!%p4651_p12), %s5429_s8, 32, %s356_s14, [#allocation9], %s4513_s26, %s4513_s26, %s4514_s25  }
  0x46   : > { %384 = sbr.rel (%p4643_p10) target bundleno = 5698 (0x1642), region = 64  ;;  %p5455_p8 = scmp.eq.s32.totalorder (!%p4643_p10), %s4615_s21, 0 }
  0x4b   : > { %4477 = dma.done.wait (%p5455_p8), [#allocation3], 128   ;;  %p5456_p13 = pmov %p5455_p8 }
  0x4c   : > { %p5457_p11 = pmov %p5455_p8 }
  0x4d   : > { %4479 = vsyncadd (%p5456_p13), [#allocation3], 4294967168 }
  0x4e   : > { %4481 = dma.done.wait (%p5457_p11), [#allocation6], 160   ;;  %p5458_p0 = pmov %p5455_p8 }
  0x50   : > { %4483 = vsyncadd (%p5458_p0), [#allocation6], 4294967136  ;;  %p5459_p6 = pmov %p5458_p0 }
  0x51   : > { %p5460_p12 = pmov %p5458_p0 }
  0x52   : > { %4485 = dma.done.wait (%p5459_p6), [#allocation9], 32  }
  0x53   : > { %4487 = vsyncadd (%p5460_p12), [#allocation9], 4294967264  ;;  %p435_p10 = scmp.lt.s32.totalorder %s4615_s21, 1  ;;  %v4516_v0 = vmov 0.0   ;;  %vm4517_vm0 = vmmov 0   ;;  %v4217_v1 = vld [vmem:[#allocation5] sm:$0xff]   ;;  %v440_v23 = vlaneseq }
  0x54   : > { %3790 = vmatprep.subr.bf16.mxu0 %v4516_v0  ;;  %3792 = vmatprep.mubr.msk.bf16.mxu0 %vm4517_vm0, %v4516_v0  ;;  %vm457_vm1 = vcmask 130048   ;;  %v450_v4 = vld [vmem:[#allocation2] sm:$0xff]  ;;  %vm503_vm2 = vcmask 261120   ;;  %v4218_v16 = vld [vmem:[%s5424_s3 + $0x8] sm:$0xff]   ;;  %v4222_v34 = vld [vmem:[%s5424_s3 + $0x18] sm:$0xff]   ;;  %vm780_vm3 = vcmask 1043456  }
  0x55   : > { %s436_s29 = scalar_select %p435_p10, %s4615_s21, 1  ;;  %3812 = vmatprep.subr.bf16.mxu1 %v4516_v0  ;;  %3816 = vmatprep.mubr.msk.bf16.mxu1 %vm4517_vm0, %v4516_v0  ;;  %v4219_v17 = vld [vmem:[%s5424_s3 + $0x28] sm:$0xff]   ;;  %v4220_v18 = vld [vmem:[%s5424_s3] sm:$0xff]   ;;  %v4741_v24 = vshrl.u32 %v440_v23, 7  ;;  %v4223_v36 = vld [vmem:[%s5424_s3 + $0x10] sm:$0xff]   ;;  %vm717_vm4 = vcmask 31744  }
  0x56   : > { %3791 = vmatpush3.bf16.msra.mxu0 %v4217_v1  ;;  %3813 = vmatpush3.bf16.msra.mxu1 %v4219_v17  ;;  %v4221_v19 = vld [vmem:[%s5424_s3 + $0x20] sm:$0xff]   ;;  %s4518_s15 = smov 120   ;;  %s4519_s14 = smov 124   ;;  %vm764_vm6 = vcmask 64512   ;;  %vm1627_vm7 = vcmask 97280   ;;  %vm1630_vm8 = vcmask 162816  }
  0x57   : > { %s3528_s13 = sshll.u32 %s436_s29, 3  ;;  %3796 = vmatprep.subr.bf16.mxu0 %v4516_v0  ;;  %3814 = vmatprep.subr.bf16.mxu1 %v4516_v0  ;;  %v520_v25 = vsub.s32 0, %v4741_v24  ;;  %v4747_v26 = vld [vmem:[%s5428_s7] sm:$0xff]  ;;  %v525_v27 = vsub.s32 1, %v4741_v24  ;;  %v660_v37 = vsub.s32 4, %v4741_v24  ;;  %v599_v42 = vsub.s32 3, %v4741_v24 }
  0x58   : > { %s438_s25 = scalar_lea.vmem %s5421_s0, %s3528_s13  ;;  %v535_v45 = vsub.s32 2, %v4741_v24  ;;  %s5447_s16 = smov 108   ;;  %vm1632_vm9 = vcmask 195584   ;;  %vm1634_vm10 = vcmask 228352  }
  0x59   : > { %v446_v2 = vld [vmem:[%s438_s25] sm:$0xff]  ;;  %v521_v28 = vrot.slane %v4747_v26, %v520_v25  ;;  %v526_v31 = vrot.slane %v4747_v26, %v525_v27  ;;  %v661_v38 = vrot.slane %v4747_v26, %v660_v37  ;;  %v600_v50 = vrot.slane %v4747_v26, %v599_v42  ;;  %s5445_s24 = smov 104   ;;  %s5439_s12 = smov 100  }
  0x5a   : > { %v447_v3 = vpack.c.bf16 %v446_v2, %v446_v2  ;;  %3815 = vmatpush3.bf16.msra.mxu1 %v4221_v19  ;;  %v536_v53 = vrot.slane %v4747_v26, %v535_v45  ;;  %s4523_s29 = smov 116   ;;  %s4524_s13 = smov 112  }
  0x5b   : > { %3826 = vmatprep.subr.bf16.mxu1 %v4516_v0  ;;  %s5436_s22 = smov 4   ;;  %s5437_s26 = smov 8  }
  0x5c   : > { %3793 = vmatmul.mubr.msk.bf16.vlgmr.msra.gmra.mxu0 %vm457_vm1, %v447_v3  ;;  %s5438_s25 = smov 12   ;;  %s5444_s19 = smov 16  }
  0x5d   : > { %3800 = vmatprep.mubr.msk.bf16.mxu0 %vm4517_vm0, %v4516_v0  ;;  %3797 = vmatpush3.bf16.msra.mxu0 %v4218_v16  ;;  %s5441_s30 = smov 28   ;;  %p5471_p1 = scmp.ne.s32.totalorder %s5451_s27, 0 }
  0x5e   : > { %3798 = vmatprep.subr.bf16.mxu0 %v4516_v0 }
  0x61   : > { %3799 = vmatpush3.bf16.msra.mxu0 %v4220_v18 }
  0x62   : > { %3804 = vmatprep.subr.bf16.mxu0 %v4516_v0 }
 0x11c   : > { %v495_v5 = vpop.f32.mrf.mxu0 }
 0x11d   : > { %v4718_v6 = vadd.f32 %v495_v5, %v450_v4 }
 0x11e   : > { %v3794_v7 = vpop.f32.mrf.mxu0 }
 0x11f   : > { %v504_v8 = vsel %vm503_vm2, %v4718_v6, 0.0 }
 0x120   : > { %505 = vadd.xlane.f32.xlu0 %v504_v8  ;;  %v498_v9 = vpop.f32.mrf.mxu0 }
 0x122   : > { %v3795_v10 = vpop.f32.mrf.mxu0 }
 0x1a9   : > { %v506_v11 = vpop.xlane.xlu0 %505 }
 0x1aa   : > { %v508_v12 = vmul.f32 0.03125, %v506_v11 }
 0x1ac   : > { %v509_v13 = vsub.f32 %v4718_v6, %v508_v12 }
 0x1ae   : > { %v510_v14 = vmul.f32 %v509_v13, %v509_v13 }
 0x1b0   : > { %v511_v15 = vsel %vm503_vm2, %v510_v14, 0.0 }
 0x1b1   : > { %512 = vadd.xlane.f32.xlu0 %v511_v15 }
 0x23a   : > { %v513_v20 = vpop.xlane.xlu0 %512 }
 0x23b   : > { %v514_v21 = vmul.f32 0.03125, %v513_v20 }
 0x23d   : > { %v515_v22 = vadd.f32 1e-05, %v514_v21 }
 0x23f   : > { %4256 = vrsqrt.f32 %v515_v22  ;;  %v443_v22 = vand.u32 127, %v440_v23 }
 0x241   : > { %vm444_vm5 = vcmp.le.s32.totalorder %v443_v22, %v4741_v24 }
 0x24c   : > { %v4257_v29 = vpop.eup %4256 }
 0x24d   : > { %v517_v30 = vmul.f32 %v4257_v29, %v509_v13 }
 0x24f   : > { %v522_v32 = vmul.f32 %v521_v28, %v517_v30  ;;  %v4525_v28 = vmov -1e+09  }
 0x250   : > { %v4846_v29 = vsel %vm444_vm5, 0.0, %v4525_v28 }
 0x251   : > { %v527_v33 = vadd.f32 %v526_v31, %v522_v32 }
 0x253   : > { %v528_v35 = vpack.c.bf16 %v527_v33, %v527_v33 }
 0x255   : > { %3801 = vmatmul.mubr.msk.bf16.vlgmr.msra.gmra.mxu0 %vm503_vm2, %v528_v35  ;;  %3817 = vmatmul.mubr.msk.bf16.vlgmr.msra.gmra.mxu1 %vm503_vm2, %v528_v35 }
 0x256   : > { %3805 = vmatpush3.bf16.msra.mxu0 %v4222_v34  ;;  %3808 = vmatprep.mubr.msk.bf16.mxu0 %vm4517_vm0, %v4516_v0 }
 0x257   : > { %3806 = vmatprep.subr.bf16.mxu0 %v4516_v0  ;;  %3828 = vmatprep.mubr.msk.bf16.mxu1 %vm4517_vm0, %v4516_v0 }
 0x25a   : > { %3807 = vmatpush3.bf16.msra.mxu0 %v4223_v36 }
 0x25b   : > { %3820 = vmatprep.subr.bf16.mxu0 %v4516_v0 }
 0x25d   : > { %3809 = vmatmul.mubr.msk.bf16.vlgmr.msra.gmra.mxu0 %vm503_vm2, %v528_v35 }
 0x25e   : > { %3822 = vmatprep.mubr.msk.bf16.mxu0 %vm4517_vm0, %v4516_v0 }
 0x315   : > { %v586_v39 = vpop.f32.mrf.mxu0  ;;  %v708_v40 = vpop.f32.mrf.mxu1 }
 0x316   : > { %v709_v41 = vadd.f32 %v708_v40, %v661_v38  ;;  %v587_v57 = vadd.f32 %v586_v39, %v536_v53 }
 0x317   : > { %v3802_v43 = vpop.f32.mrf.mxu0  ;;  %v3818_v44 = vpop.f32.mrf.mxu1 }
 0x318   : > { %v4779_v46 = vpack.c.bf16 %v709_v41, %v709_v41  ;;  %v714_v62 = vpack.c.bf16 %v587_v57, %v587_v57 }
 0x319   : > { %v589_v47 = vpop.f32.mrf.mxu0  ;;  %v711_v48 = vpop.f32.mrf.mxu1 }
 0x31a   : > { %v782_v49 = vsel %vm780_vm3, %v4779_v46, 0 }
 0x31b   : > { %v3803_v51 = vpop.f32.mrf.mxu0  ;;  %v3819_v52 = vpop.f32.mrf.mxu1  ;;  %3827 = vmatpush3.bf16.msra.mxu1 %v782_v49 }
 0x31c   : > { %3838 = vmatprep.subr.bf16.mxu1 %v4516_v0 }
 0x31d   : > { %v647_v54 = vpop.f32.mrf.mxu0 }
 0x31e   : > { %v648_v55 = vadd.f32 %v647_v54, %v600_v50 }
 0x31f   : > { %v3810_v56 = vpop.f32.mrf.mxu0 }
 0x320   : > { %v715_v58 = vpack.c.bf16 %v648_v55, %v648_v55 }
 0x321   : > { %v650_v59 = vpop.f32.mrf.mxu0 }
 0x322   : > { %939 = vrot.lane.b32.xlu0 %v715_v58, %s4518_s15  ;;  %828 = vrot.lane.b32.xlu1 %v715_v58, %s4519_s14  ;;  %v722_v60 = vsel %vm717_vm4, %v715_v58, 0 }
 0x323   : > { %v3811_v61 = vpop.f32.mrf.mxu0  ;;  %3821 = vmatpush3.bf16.xpose.msra.mxu0 %v722_v60 }
 0x324   : > { %3832 = vmatprep.subr.bf16.mxu0 %v4516_v0 }
 0x326   : > { %1267 = vrot.lane.b32.xlu0 %v714_v62, %s5447_s16  ;;  %825 = vrot.lane.b32.xlu1 %v714_v62, %s4519_s14 }
 0x32a   : > { %1377 = vrot.lane.b32.xlu0 %v714_v62, %s5445_s24  ;;  %937 = vrot.lane.b32.xlu1 %v714_v62, %s4518_s15 }
 0x32b   : > { %3823 = vmatmul.mubr.msk.bf16.vlgmr.msra.gmra.mxu0 %vm717_vm4, %v714_v62 }
 0x32c   : > { %3834 = vmatprep.mubr.msk.bf16.mxu0 %vm4517_vm0, %v4516_v0 }
 0x32e   : > { %1487 = vrot.lane.b32.xlu0 %v714_v62, %s5439_s12  ;;  %1049 = vrot.lane.b32.xlu1 %v715_v58, %s4523_s29 }
 0x332   : > { %1047 = vrot.lane.b32.xlu1 %v714_v62, %s4523_s29 }
 0x336   : > { %1159 = vrot.lane.b32.xlu1 %v715_v58, %s4524_s13 }
 0x33a   : > { %1157 = vrot.lane.b32.xlu1 %v714_v62, %s4524_s13 }
 0x33e   : > { %1269 = vrot.lane.b32.xlu1 %v715_v58, %s5447_s16 }
 0x342   : > { %1379 = vrot.lane.b32.xlu1 %v715_v58, %s5445_s24 }
 0x346   : > { %1489 = vrot.lane.b32.xlu1 %v715_v58, %s5439_s12 }
 0x394   : > { %v829_v63 = vpop.permute.xlu1 %828  ;;  %v940_v3 = vpop.permute.xlu0 %939 }
 0x395   : > { %v834_v1 = vsel %vm717_vm4, %v829_v63, 0  ;;  %v945_v5 = vsel %vm717_vm4, %v940_v3, 0 }
 0x396   : > { %3833 = vmatpush3.bf16.xpose.msra.mxu0 %v834_v1 }
 0x397   : > { %3844 = vmatprep.subr.bf16.mxu0 %v4516_v0 }
 0x398   : > { %v826_v2 = vpop.permute.xlu1 %825  ;;  %v1268_v16 = vpop.permute.xlu0 %1267 }
 0x39c   : > { %v938_v4 = vpop.permute.xlu1 %937  ;;  %v1378_v19 = vpop.permute.xlu0 %1377 }
 0x39d   : > { %3835 = vmatmul.mubr.msk.bf16.vlgmr.msra.gmra.mxu0 %vm717_vm4, %v826_v2 }
 0x39e   : > { %3845 = vmatpush3.bf16.xpose.msra.mxu0 %v945_v5  ;;  %3846 = vmatprep.mubr.msk.bf16.mxu0 %vm4517_vm0, %v4516_v0 }
 0x39f   : > { %3856 = vmatprep.subr.bf16.mxu0 %v4516_v0 }
 0x3a0   : > { %v1050_v7 = vpop.permute.xlu1 %1049  ;;  %v1488_v21 = vpop.permute.xlu0 %1487 }
 0x3a1   : > { %v1055_v9 = vsel %vm717_vm4, %v1050_v7, 0 }
 0x3a4   : > { %v1048_v8 = vpop.permute.xlu1 %1047 }
 0x3a5   : > { %3847 = vmatmul.mubr.msk.bf16.vlgmr.msra.gmra.mxu0 %vm717_vm4, %v938_v4 }
 0x3a6   : > { %3857 = vmatpush3.bf16.xpose.msra.mxu0 %v1055_v9  ;;  %3858 = vmatprep.mubr.msk.bf16.mxu0 %vm4517_vm0, %v4516_v0 }
 0x3a7   : > { %3868 = vmatprep.subr.bf16.mxu0 %v4516_v0 }
 0x3a8   : > { %v1160_v10 = vpop.permute.xlu1 %1159 }
 0x3a9   : > { %v1165_v12 = vsel %vm717_vm4, %v1160_v10, 0 }
 0x3ac   : > { %v1158_v11 = vpop.permute.xlu1 %1157 }
 0x3ad   : > { %3859 = vmatmul.mubr.msk.bf16.vlgmr.msra.gmra.mxu0 %vm717_vm4, %v1048_v8 }
 0x3ae   : > { %3869 = vmatpush3.bf16.xpose.msra.mxu0 %v1165_v12  ;;  %3870 = vmatprep.mubr.msk.bf16.mxu0 %vm4517_vm0, %v4516_v0 }
 0x3af   : > { %3880 = vmatprep.subr.bf16.mxu0 %v4516_v0 }
 0x3b0   : > { %v1270_v13 = vpop.permute.xlu1 %1269 }
 0x3b1   : > { %v1275_v14 = vsel %vm717_vm4, %v1270_v13, 0 }
 0x3b4   : > { %v1380_v15 = vpop.permute.xlu1 %1379 }
 0x3b5   : > { %3871 = vmatmul.mubr.msk.bf16.vlgmr.msra.gmra.mxu0 %vm717_vm4, %v1158_v11  ;;  %v1385_v17 = vsel %vm717_vm4, %v1380_v15, 0 }
 0x3b6   : > { %3881 = vmatpush3.bf16.xpose.msra.mxu0 %v1275_v14  ;;  %3882 = vmatprep.mubr.msk.bf16.mxu0 %vm4517_vm0, %v4516_v0 }
 0x3b7   : > { %3892 = vmatprep.subr.bf16.mxu0 %v4516_v0 }
 0x3b8   : > { %v1490_v18 = vpop.permute.xlu1 %1489 }
 0x3b9   : > { %v1495_v20 = vsel %vm717_vm4, %v1490_v18, 0 }
 0x3bd   : > { %3883 = vmatmul.mubr.msk.bf16.vlgmr.msra.gmra.mxu0 %vm717_vm4, %v1268_v16 }
 0x3be   : > { %3893 = vmatpush3.bf16.xpose.msra.mxu0 %v1385_v17  ;;  %3894 = vmatprep.mubr.msk.bf16.mxu0 %vm4517_vm0, %v4516_v0 }
 0x3bf   : > { %3904 = vmatprep.subr.bf16.mxu0 %v4516_v0 }
 0x3c5   : > { %3895 = vmatmul.mubr.msk.bf16.vlgmr.msra.gmra.mxu0 %vm717_vm4, %v1378_v19 }
 0x3c6   : > { %3905 = vmatpush3.bf16.xpose.msra.mxu0 %v1495_v20  ;;  %3906 = vmatprep.mubr.msk.bf16.mxu0 %vm4517_vm0, %v4516_v0 }
 0x3c7   : > { %3916 = vmatprep.subr.bf16.mxu0 %v4516_v0 }
 0x3cd   : > { %3907 = vmatmul.mubr.msk.bf16.vlgmr.msra.gmra.mxu0 %vm717_vm4, %v1488_v21 }
 0x3ce   : > { %3920 = vmatprep.mubr.msk.bf16.mxu0 %vm4517_vm0, %v4516_v0 }
 0x3eb   : > { %v758_v30 = vpop.f32.mrf.mxu0 }
 0x3ec   : > { %v759_v31 = vadd.f32 %v758_v30, %v4846_v29 }
 0x3ed   : > { %v3824_v32 = vpop.f32.mrf.mxu0 }
 0x3ee   : > { %v765_v33 = vsel %vm764_vm6, %v759_v31, -inf }
 0x3ef   : > { %766 = vmax.xlane.f32.xlu1 %v765_v33  ;;  %v761_v34 = vpop.f32.mrf.mxu0 }
 0x3f1   : > { %v3825_v35 = vpop.f32.mrf.mxu0 }
 0x45d   : > { %v870_v36 = vpop.f32.mrf.mxu0 }
 0x45e   : > { %v871_v38 = vadd.f32 %v870_v36, %v4846_v29 }
 0x45f   : > { %v3836_v39 = vpop.f32.mrf.mxu0 }
 0x460   : > { %v876_v23 = vsel %vm764_vm6, %v871_v38, -inf }
 0x461   : > { %877 = vmax.xlane.f32.xlu0 %v876_v23  ;;  %v873_v40 = vpop.f32.mrf.mxu0 }
 0x463   : > { %v3837_v41 = vpop.f32.mrf.mxu0 }
 0x465   : > { %v981_v43 = vpop.f32.mrf.mxu0 }
 0x466   : > { %v982_v44 = vadd.f32 %v981_v43, %v4846_v29 }
 0x467   : > { %v3848_v47 = vpop.f32.mrf.mxu0 }
 0x468   : > { %v987_v48 = vsel %vm764_vm6, %v982_v44, -inf }
 0x469   : > { %988 = vmax.xlane.f32.xlu0 %v987_v48  ;;  %v984_v49 = vpop.f32.mrf.mxu0 }
 0x46b   : > { %v3849_v50 = vpop.f32.mrf.mxu0 }
 0x46d   : > { %v1091_v51 = vpop.f32.mrf.mxu0 }
 0x46e   : > { %v1092_v52 = vadd.f32 %v1091_v51, %v4846_v29 }
 0x46f   : > { %v3860_v53 = vpop.f32.mrf.mxu0 }
 0x470   : > { %v1097_v54 = vsel %vm764_vm6, %v1092_v52, -inf }
 0x471   : > { %1098 = vmax.xlane.f32.xlu1 %v1097_v54  ;;  %v1094_v55 = vpop.f32.mrf.mxu0 }
 0x473   : > { %v3861_v56 = vpop.f32.mrf.mxu0 }
 0x475   : > { %v1201_v57 = vpop.f32.mrf.mxu0 }
 0x476   : > { %v4857_v58 = vadd.f32 %v1201_v57, %v4846_v29 }
 0x477   : > { %v3872_v59 = vpop.f32.mrf.mxu0 }
 0x478   : > { %v767_v60 = vpop.xlane.xlu1 %766  ;;  %v1207_v61 = vsel %vm764_vm6, %v4857_v58, -inf }
 0x479   : > { %v768_v62 = vsub.f32 %v759_v31, %v767_v60  ;;  %1208 = vmax.xlane.f32.xlu0 %v1207_v61  ;;  %v1204_v63 = vpop.f32.mrf.mxu0 }
 0x47b   : > { %v769_v1 = vmul.f32 1.442695, %v768_v62  ;;  %v3873_v2 = vpop.f32.mrf.mxu0 }
 0x47d   : > { %4258 = vpow2.f32 %v769_v1  ;;  %v1311_v3 = vpop.f32.mrf.mxu0 }
 0x47e   : > { %v4862_v4 = vadd.f32 %v1311_v3, %v4846_v29 }
 0x47f   : > { %v3884_v5 = vpop.f32.mrf.mxu0 }
 0x480   : > { %v1317_v7 = vsel %vm764_vm6, %v4862_v4, -inf }
 0x481   : > { %1318 = vmax.xlane.f32.xlu1 %v1317_v7  ;;  %v1314_v8 = vpop.f32.mrf.mxu0 }
 0x483   : > { %v3885_v9 = vpop.f32.mrf.mxu0 }
 0x485   : > { %v1421_v10 = vpop.f32.mrf.mxu0 }
 0x486   : > { %v4867_v11 = vadd.f32 %v1421_v10, %v4846_v29 }
 0x487   : > { %v3896_v12 = vpop.f32.mrf.mxu0 }
 0x488   : > { %v1427_v13 = vsel %vm764_vm6, %v4867_v11, -inf }
 0x489   : > { %1428 = vmax.xlane.f32.xlu0 %v1427_v13  ;;  %v1424_v14 = vpop.f32.mrf.mxu0 }
 0x48a   : > { %v4259_v15 = vpop.eup %4258 }
 0x48b   : > { %v3897_v16 = vpop.f32.mrf.mxu0  ;;  %v771_v17 = vsel %vm764_vm6, %v4259_v15, 0.0 }
 0x48d   : > { %772 = vadd.xlane.f32.xlu0 %v771_v17  ;;  %v1531_v18 = vpop.f32.mrf.mxu0 }
 0x48e   : > { %v1532_v19 = vadd.f32 %v1531_v18, %v4846_v29 }
 0x48f   : > { %v3908_v20 = vpop.f32.mrf.mxu0 }
 0x490   : > { %v1537_v21 = vsel %vm764_vm6, %v1532_v19, -inf }
 0x491   : > { %1538 = vmax.xlane.f32.xlu1 %v1537_v21  ;;  %v1534_v22 = vpop.f32.mrf.mxu0 }
 0x493   : > { %v3909_v28 = vpop.f32.mrf.mxu0 }
 0x4a2   : > { %889 = vrot.lane.b32.xlu1 %v4779_v46, %s4519_s14 }
 0x4a3   : > { %999 = vrot.lane.b32.xlu0 %v4779_v46, %s4518_s15 }
 0x4ea   : > { %v878_v30 = vpop.xlane.xlu0 %877 }
 0x4eb   : > { %v879_v31 = vsub.f32 %v871_v38, %v878_v30 }
 0x4ed   : > { %v880_v32 = vmul.f32 1.442695, %v879_v31 }
 0x4ef   : > { %4260 = vpow2.f32 %v880_v32 }
 0x4f2   : > { %v989_v33 = vpop.xlane.xlu0 %988 }
 0x4f3   : > { %v990_v34 = vsub.f32 %v982_v44, %v989_v33 }
 0x4f5   : > { %v991_v35 = vmul.f32 1.442695, %v990_v34 }
 0x4f7   : > { %4262 = vpow2.f32 %v991_v35 }
 0x4fa   : > { %v1099_v36 = vpop.xlane.xlu1 %1098 }
 0x4fb   : > { %v1100_v39 = vsub.f32 %v1092_v52, %v1099_v36 }
 0x4fc   : > { %v4261_v23 = vpop.eup %4260 }
 0x4fd   : > { %v1101_v40 = vmul.f32 1.442695, %v1100_v39  ;;  %v882_v41 = vsel %vm764_vm6, %v4261_v23, 0.0 }
 0x4fe   : > { %883 = vadd.xlane.f32.xlu1 %v882_v41 }
 0x4ff   : > { %4264 = vpow2.f32 %v1101_v40 }
 0x502   : > { %v1209_v48 = vpop.xlane.xlu0 %1208 }
 0x503   : > { %v1210_v53 = vsub.f32 %v4857_v58, %v1209_v48 }
 0x504   : > { %v4879_v43 = vpop.eup %4262 }
 0x505   : > { %v993_v47 = vsel %vm764_vm6, %v4879_v43, 0.0  ;;  %v1211_v55 = vmul.f32 1.442695, %v1210_v53 }
 0x506   : > { %994 = vadd.xlane.f32.xlu0 %v993_v47 }
 0x50a   : > { %v1319_v51 = vpop.xlane.xlu1 %1318 }
 0x50b   : > { %v1320_v56 = vsub.f32 %v4862_v4, %v1319_v51 }
 0x50c   : > { %v4883_v38 = vpop.eup %4264 }
 0x50d   : > { %v1103_v44 = vsel %vm764_vm6, %v4883_v38, 0.0  ;;  %v1321_v62 = vmul.f32 1.442695, %v1320_v56 }
 0x50e   : > { %1104 = vadd.xlane.f32.xlu1 %v1103_v44 }
 0x512   : > { %v1429_v49 = vpop.xlane.xlu0 %1428 }
 0x513   : > { %v1430_v61 = vsub.f32 %v4867_v11, %v1429_v49 }
 0x515   : > { %v1431_v58 = vmul.f32 1.442695, %v1430_v61 }
 0x516   : > { %v773_v50 = vpop.xlane.xlu0 %772 }
 0x517   : > { %4266 = vrcp.f32 %v773_v50 }
 0x518   : > { %4268 = vpow2.f32 %v1211_v55 }
 0x519   : > { %4270 = vpow2.f32 %v1321_v62 }
 0x51a   : > { %v1539_v52 = vpop.xlane.xlu1 %1538  ;;  %4272 = vpow2.f32 %v1431_v58  ;;  %v1000_v13 = vpop.permute.xlu0 %999 }
 0x51b   : > { %v1540_v63 = vsub.f32 %v1532_v19, %v1539_v52  ;;  %v1005_v19 = vsel %vm780_vm3, %v1000_v13, 0 }
 0x51c   : > { %1109 = vrot.lane.b32.xlu0 %v4779_v46, %s4523_s29 }
 0x51d   : > { %v1541_v2 = vmul.f32 1.442695, %v1540_v63 }
 0x51e   : > { %v890_v59 = vpop.permute.xlu1 %889 }
 0x51f   : > { %1219 = vrot.lane.b32.xlu1 %v4779_v46, %s4524_s13  ;;  %v895_v1 = vsel %vm780_vm3, %v890_v59, 0  ;;  %4274 = vpow2.f32 %v1541_v2 }
 0x524   : > { %v4267_v54 = vpop.eup %4266 }
 0x525   : > { %v775_v57 = vmul.f32 %v4267_v54, %v4259_v15  ;;  %v4269_v3 = vpop.eup %4268 }
 0x526   : > { %v1213_v4 = vsel %vm764_vm6, %v4269_v3, 0.0  ;;  %v4900_v5 = vpop.eup %4270 }
 0x527   : > { %v776_v60 = vpack.c.bf16 %v775_v57, %v775_v57  ;;  %v4902_v7 = vpop.eup %4272  ;;  %v1323_v8 = vsel %vm764_vm6, %v4900_v5, 0.0 }
 0x528   : > { %v1433_v10 = vsel %vm764_vm6, %v4902_v7, 0.0 }
 0x529   : > { %3829 = vmatmul.mubr.msk.bf16.vlgmr.msra.gmra.mxu1 %vm764_vm6, %v776_v60 }
 0x52a   : > { %3839 = vmatpush3.bf16.msra.mxu1 %v895_v1  ;;  %3840 = vmatprep.mubr.msk.bf16.mxu1 %vm4517_vm0, %v4516_v0 }
 0x52b   : > { %3850 = vmatprep.subr.bf16.mxu1 %v4516_v0 }
 0x52c   : > { %v4906_v9 = vpop.eup %4274 }
 0x52d   : > { %v1543_v11 = vsel %vm764_vm6, %v4906_v9, 0.0 }
 0x53b   : > { %1214 = vadd.xlane.f32.xlu0 %v1213_v4 }
 0x53f   : > { %1324 = vadd.xlane.f32.xlu0 %v1323_v8 }
 0x543   : > { %1434 = vadd.xlane.f32.xlu1 %v1433_v10  ;;  %1544 = vadd.xlane.f32.xlu0 %v1543_v11 }
 0x554   : > { %1439 = vrot.lane.b32.xlu1 %v4779_v46, %s5445_s24  ;;  %s5463_s24 = smov 100  }
 0x558   : > { %1549 = vrot.lane.b32.xlu1 %v4779_v46, %s5439_s12  ;;  %s3670_s12 = sshll.u32 %s4615_s21, 7  ;;  %s4533_s21 = smov [#allocation10]  }
 0x559   : > { %1329 = vrot.lane.b32.xlu0 %v4779_v46, %s5447_s16  ;;  %s5462_s16 = smov 104  }
 0x587   : > { %v884_v12 = vpop.xlane.xlu1 %883 }
 0x588   : > { %4276 = vrcp.f32 %v884_v12 }
 0x58f   : > { %v995_v14 = vpop.xlane.xlu0 %994 }
 0x590   : > { %4278 = vrcp.f32 %v995_v14 }
 0x593   : > { %v1110_v21 = vpop.permute.xlu0 %1109 }
 0x594   : > { %v1115_v28 = vsel %vm780_vm3, %v1110_v21, 0  ;;  %v4225_v21 = vld [vmem:[%s5424_s3 + $0x30] sm:$0xff]  }
 0x595   : > { %v4277_v15 = vpop.eup %4276 }
 0x596   : > { %v886_v16 = vmul.f32 %v4277_v15, %v4261_v23 }
 0x597   : > { %v1105_v17 = vpop.xlane.xlu1 %1104 }
 0x598   : > { %4280 = vrcp.f32 %v1105_v17  ;;  %v887_v18 = vpack.c.bf16 %v886_v16, %v886_v16  ;;  %v4224_v17 = vld [vmem:[%s5424_s3 + $0x38] sm:$0xff]  }
 0x599   : > { %3917 = vmatpush3.bf16.msra.mxu0 %v4224_v17  ;;  %v1718_v17 = vsub.s32 6, %v4741_v24 }
 0x59a   : > { %3841 = vmatmul.mubr.msk.bf16.vlgmr.msra.gmra.mxu1 %vm764_vm6, %v887_v18  ;;  %3918 = vmatprep.subr.bf16.mxu0 %v4516_v0 }
 0x59b   : > { %3851 = vmatpush3.bf16.msra.mxu1 %v1005_v19  ;;  %3852 = vmatprep.mubr.msk.bf16.mxu1 %vm4517_vm0, %v4516_v0  ;;  %v1220_v32 = vpop.permute.xlu1 %1219 }
 0x59c   : > { %3862 = vmatprep.subr.bf16.mxu1 %v4516_v0  ;;  %v1225_v34 = vsel %vm780_vm3, %v1220_v32, 0 }
 0x59d   : > { %v4279_v46 = vpop.eup %4278  ;;  %3919 = vmatpush3.bf16.msra.mxu0 %v4225_v21 }
 0x59e   : > { %v997_v20 = vmul.f32 %v4279_v46, %v4879_v43  ;;  %3932 = vmatprep.subr.bf16.mxu0 %v4516_v0 }
 0x5a0   : > { %v998_v22 = vpack.c.bf16 %v997_v20, %v997_v20 }
 0x5a2   : > { %3853 = vmatmul.mubr.msk.bf16.vlgmr.msra.gmra.mxu1 %vm764_vm6, %v998_v22 }
 0x5a3   : > { %3863 = vmatpush3.bf16.msra.mxu1 %v1115_v28  ;;  %3864 = vmatprep.mubr.msk.bf16.mxu1 %vm4517_vm0, %v4516_v0 }
 0x5a4   : > { %3874 = vmatprep.subr.bf16.mxu1 %v4516_v0 }
 0x5a5   : > { %v4281_v30 = vpop.eup %4280 }
 0x5a6   : > { %v1107_v31 = vmul.f32 %v4281_v30, %v4883_v38 }
 0x5a8   : > { %v1108_v33 = vpack.c.bf16 %v1107_v31, %v1107_v31 }
 0x5aa   : > { %3865 = vmatmul.mubr.msk.bf16.vlgmr.msra.gmra.mxu1 %vm764_vm6, %v1108_v33 }
 0x5ab   : > { %3875 = vmatpush3.bf16.msra.mxu1 %v1225_v34  ;;  %3876 = vmatprep.mubr.msk.bf16.mxu1 %vm4517_vm0, %v4516_v0 }
 0x5ac   : > { %3886 = vmatprep.subr.bf16.mxu1 %v4516_v0 }
 0x5c4   : > { %v1215_v35 = vpop.xlane.xlu0 %1214 }
 0x5c5   : > { %4282 = vrcp.f32 %v1215_v35 }
 0x5c8   : > { %v1325_v36 = vpop.xlane.xlu0 %1324 }
 0x5c9   : > { %4284 = vrcp.f32 %v1325_v36 }
 0x5cc   : > { %v1545_v39 = vpop.xlane.xlu0 %1544  ;;  %v1435_v23 = vpop.xlane.xlu1 %1434 }
 0x5cd   : > { %4286 = vrcp.f32 %v1435_v23 }
 0x5ce   : > { %4288 = vrcp.f32 %v1545_v39 }
 0x5d0   : > { %v1330_v43 = vpop.permute.xlu0 %1329  ;;  %v1440_v49 = vpop.permute.xlu1 %1439 }
 0x5d1   : > { %v1335_v44 = vsel %vm780_vm3, %v1330_v43, 0  ;;  %v1445_v52 = vsel %vm780_vm3, %v1440_v49, 0 }
 0x5d2   : > { %v4283_v40 = vpop.eup %4282 }
 0x5d3   : > { %v1217_v41 = vmul.f32 %v4283_v40, %v4269_v3 }
 0x5d4   : > { %v1550_v54 = vpop.permute.xlu1 %1549 }
 0x5d5   : > { %v1218_v47 = vpack.c.bf16 %v1217_v41, %v1217_v41  ;;  %v1555_v57 = vsel %vm780_vm3, %v1550_v54, 0 }
 0x5d6   : > { %v4285_v38 = vpop.eup %4284 }
 0x5d7   : > { %3877 = vmatmul.mubr.msk.bf16.vlgmr.msra.gmra.mxu1 %vm764_vm6, %v1218_v47  ;;  %v1327_v48 = vmul.f32 %v4285_v38, %v4900_v5 }
 0x5d8   : > { %3887 = vmatpush3.bf16.msra.mxu1 %v1335_v44  ;;  %3888 = vmatprep.mubr.msk.bf16.mxu1 %vm4517_vm0, %v4516_v0 }
 0x5d9   : > { %3898 = vmatprep.subr.bf16.mxu1 %v4516_v0  ;;  %v1328_v50 = vpack.c.bf16 %v1327_v48, %v1327_v48 }
 0x5da   : > { %v4287_v51 = vpop.eup %4286 }
 0x5db   : > { %v1437_v53 = vmul.f32 %v4287_v51, %v4902_v7  ;;  %v4289_v56 = vpop.eup %4288 }
 0x5dc   : > { %v1547_v59 = vmul.f32 %v4289_v56, %v4906_v9 }
 0x5dd   : > { %v1438_v55 = vpack.c.bf16 %v1437_v53, %v1437_v53 }
 0x5de   : > { %v1548_v62 = vpack.c.bf16 %v1547_v59, %v1547_v59 }
 0x5df   : > { %3889 = vmatmul.mubr.msk.bf16.vlgmr.msra.gmra.mxu1 %vm764_vm6, %v1328_v50 }
 0x5e0   : > { %3899 = vmatpush3.bf16.msra.mxu1 %v1445_v52  ;;  %3900 = vmatprep.mubr.msk.bf16.mxu1 %vm4517_vm0, %v4516_v0 }
 0x5e1   : > { %3910 = vmatprep.subr.bf16.mxu1 %v4516_v0 }
 0x5e7   : > { %3901 = vmatmul.mubr.msk.bf16.vlgmr.msra.gmra.mxu1 %vm764_vm6, %v1438_v55  ;;  %v1700_v55 = vsub.s32 5, %v4741_v24 }
 0x5e8   : > { %3911 = vmatpush3.bf16.msra.mxu1 %v1555_v57  ;;  %3912 = vmatprep.mubr.msk.bf16.mxu1 %vm4517_vm0, %v4516_v0 }
 0x5e9   : > { %3924 = vmatprep.subr.bf16.mxu1 %v4516_v0  ;;  %v818_v60 = vpop.f32.mrf.mxu1  ;;  %v1701_v56 = vrot.slane %v4747_v26, %v1700_v55 }
 0x5eb   : > { %v3830_v61 = vpop.f32.mrf.mxu1 }
 0x5ed   : > { %v821_v63 = vpop.f32.mrf.mxu1 }
 0x5ef   : > { %3913 = vmatmul.mubr.msk.bf16.vlgmr.msra.gmra.mxu1 %vm764_vm6, %v1548_v62  ;;  %v3831_v1 = vpop.f32.mrf.mxu1 }
 0x5f0   : > { %3928 = vmatprep.mubr.msk.bf16.mxu1 %vm4517_vm0, %v4516_v0 }
 0x65a   : > { %v931_v58 = vpop.f32.mrf.mxu1 }
 0x65b   : > { %1598 = vrot.lane.b32.xlu1 %v931_v58, %s5436_s22  ;;  %s5442_s22 = smov 24  }
 0x65c   : > { %v3842_v2 = vpop.f32.mrf.mxu1 }
 0x65e   : > { %v934_v3 = vpop.f32.mrf.mxu1 }
 0x660   : > { %v3843_v4 = vpop.f32.mrf.mxu1 }
 0x662   : > { %v1041_v5 = vpop.f32.mrf.mxu1 }
 0x663   : > { %1602 = vrot.lane.b32.xlu1 %v1041_v5, %s5437_s26  ;;  %s5443_s26 = smov 20  }
 0x664   : > { %v3854_v7 = vpop.f32.mrf.mxu1 }
 0x665   : > { %v4227_v7 = vld [vmem:[%s5425_s4] sm:$0xff]  }
 0x666   : > { %v1044_v8 = vpop.f32.mrf.mxu1 }
 0x667   : > { %v4228_v8 = vld [vmem:[%s5427_s6 + $0x38] sm:$0xff]  }
 0x668   : > { %v3855_v9 = vpop.f32.mrf.mxu1 }
 0x669   : > { %v4229_v9 = vld [vmem:[%s5427_s6 + $0x30] sm:$0xff]  }
 0x66a   : > { %v1151_v10 = vpop.f32.mrf.mxu1 }
 0x66b   : > { %1606 = vrot.lane.b32.xlu0 %v1151_v10, %s5438_s25  ;;  %v4230_v10 = vld [vmem:[%s5427_s6 + $0x28] sm:$0xff]  }
 0x66c   : > { %v3866_v11 = vpop.f32.mrf.mxu1 }
 0x66d   : > { %v4231_v11 = vld [vmem:[%s5427_s6 + $0x20] sm:$0xff]  }
 0x66e   : > { %v1154_v12 = vpop.f32.mrf.mxu1 }
 0x66f   : > { %v4232_v12 = vld [vmem:[%s5427_s6 + $0x18] sm:$0xff]  }
 0x670   : > { %v3867_v13 = vpop.f32.mrf.mxu1 }
 0x671   : > { %v4233_v13 = vld [vmem:[%s5427_s6 + $0x10] sm:$0xff]  }
 0x697   : > { %v1261_v14 = vpop.f32.mrf.mxu1 }
 0x698   : > { %1610 = vrot.lane.b32.xlu1 %v1261_v14, %s5444_s19 }
 0x699   : > { %v3878_v15 = vpop.f32.mrf.mxu1 }
 0x69b   : > { %v1264_v16 = vpop.f32.mrf.mxu1 }
 0x69d   : > { %v3879_v18 = vpop.f32.mrf.mxu1 }
 0x69e   : > { %v1723_v18 = vsub.s32 7, %v4741_v24  ;;  %v4253_v24 = vld [vmem:[%s5427_s6 + $0x40] sm:$0xff]  }
 0x69f   : > { %v1371_v19 = vpop.f32.mrf.mxu1 }
 0x6a0   : > { %1614 = vrot.lane.b32.xlu0 %v1371_v19, %s5443_s26  ;;  %v1719_v19 = vrot.slane %v4747_v26, %v1718_v17  ;;  %v1724_v21 = vrot.slane %v4747_v26, %v1723_v18  ;;  %v3571_v26 = vld [vmem:[#allocation7] ss:$0 sm:$0xff]  ;;  %s5461_s26 = smov 108  }
 0x6a1   : > { %v3890_v46 = vpop.f32.mrf.mxu1 }
 0x6a3   : > { %v1374_v20 = vpop.f32.mrf.mxu1 }
 0x6a5   : > { %v3891_v22 = vpop.f32.mrf.mxu1 }
 0x6a7   : > { %v1481_v28 = vpop.f32.mrf.mxu1 }
 0x6a8   : > { %1618 = vrot.lane.b32.xlu1 %v1481_v28, %s5442_s22  ;;  %s5468_s22 = smov 20  }
 0x6a9   : > { %v3902_v30 = vpop.f32.mrf.mxu1 }
 0x6ab   : > { %v1484_v31 = vpop.f32.mrf.mxu1 }
 0x6ac   : > { %v4234_v31 = vld [vmem:[%s5427_s6 + $0x8] sm:$0xff]  }
 0x6ad   : > { %v3903_v32 = vpop.f32.mrf.mxu1 }
 0x6ae   : > { %v4235_v32 = vld [vmem:[%s5427_s6] sm:$0xff]  }
 0x6af   : > { %v1591_v33 = vpop.f32.mrf.mxu1 }
 0x6b0   : > { %1622 = vrot.lane.b32.xlu0 %v1591_v33, %s5441_s30 }
 0x6b1   : > { %v3914_v34 = vpop.f32.mrf.mxu1 }
 0x6b3   : > { %v1594_v35 = vpop.f32.mrf.mxu1 }
 0x6b5   : > { %v3915_v36 = vpop.f32.mrf.mxu1 }
 0x6cd   : > { %v1599_v39 = vpop.permute.xlu1 %1598 }
 0x6ce   : > { %v1625_v43 = vsel %vm717_vm4, %v818_v60, %v1599_v39 }
 0x6d5   : > { %v1603_v23 = vpop.permute.xlu1 %1602 }
 0x6d6   : > { %v1626_v47 = vsel %vm764_vm6, %v1625_v43, %v1603_v23 }
 0x6dd   : > { %v1607_v40 = vpop.permute.xlu0 %1606 }
 0x6de   : > { %v1628_v44 = vsel %vm1627_vm7, %v1626_v47, %v1607_v40 }
 0x70a   : > { %v1611_v41 = vpop.permute.xlu1 %1610 }
 0x70b   : > { %v1629_v49 = vsel %vm457_vm1, %v1628_v44, %v1611_v41  ;;  %v3575_v41 = vld [vmem:[%s5428_s7 + $0x8] ss:$0 sm:$0xff] }
 0x712   : > { %v1615_v38 = vpop.permute.xlu0 %1614 }
 0x713   : > { %v1631_v50 = vsel %vm1630_vm8, %v1629_v49, %v1615_v38 }
 0x71a   : > { %v1619_v48 = vpop.permute.xlu1 %1618 }
 0x71b   : > { %v1633_v51 = vsel %vm1632_vm9, %v1631_v50, %v1619_v48 }
 0x722   : > { %v1623_v52 = vpop.permute.xlu0 %1622 }
 0x723   : > { %v1635_v53 = vsel %vm1634_vm10, %v1633_v51, %v1623_v52 }
 0x724   : > { %v1636_v54 = vpack.c.bf16 %v1635_v53, %v1635_v53 }
 0x726   : > { %3921 = vmatmul.mubr.msk.bf16.vlgmr.msra.gmra.mxu0 %vm503_vm2, %v1636_v54 }
 0x727   : > { %3948 = vmatprep.mubr.msk.bf16.mxu0 %vm4517_vm0, %v4516_v0  ;;  %3933 = vmatpush3.bf16.msra.mxu0 %v4228_v8  ;;  %v4241_v8 = vld [vmem:[%s5424_s3 + $0x60] sm:$0xff]  }
 0x728   : > { %3934 = vmatprep.subr.bf16.mxu0 %v4516_v0 }
 0x72b   : > { %3935 = vmatpush3.bf16.msra.mxu0 %v4229_v9 }
 0x72c   : > { %3936 = vmatprep.subr.bf16.mxu0 %v4516_v0 }
 0x72f   : > { %3937 = vmatpush3.bf16.msra.mxu0 %v4230_v10 }
 0x730   : > { %3938 = vmatprep.subr.bf16.mxu0 %v4516_v0 }
 0x733   : > { %3939 = vmatpush3.bf16.msra.mxu0 %v4231_v11 }
 0x734   : > { %3940 = vmatprep.subr.bf16.mxu0 %v4516_v0 }
 0x737   : > { %3941 = vmatpush3.bf16.msra.mxu0 %v4232_v12 }
 0x738   : > { %3942 = vmatprep.subr.bf16.mxu0 %v4516_v0 }
 0x73b   : > { %3943 = vmatpush3.bf16.msra.mxu0 %v4233_v13 }
 0x73c   : > { %3944 = vmatprep.subr.bf16.mxu0 %v4516_v0 }
 0x73f   : > { %3945 = vmatpush3.bf16.msra.mxu0 %v4234_v31 }
 0x740   : > { %3946 = vmatprep.subr.bf16.mxu0 %v4516_v0 }
 0x743   : > { %3947 = vmatpush3.bf16.msra.mxu0 %v4235_v32 }
 0x744   : > { %3982 = vmatprep.subr.bf16.mxu0 %v4516_v0 }
 0x7e6   : > { %v1691_v57 = vpop.f32.mrf.mxu0 }
 0x7e7   : > { %v1697_v59 = vadd.f32 %v1691_v57, %v4718_v6  ;;  %v4226_v6 = vld [vmem:[%s5425_s4 + $0x8] sm:$0xff]  }
 0x7e8   : > { %v3922_v60 = vpop.f32.mrf.mxu0  ;;  %3925 = vmatpush3.bf16.msra.mxu1 %v4226_v6  ;;  %v4236_v57 = vld [vmem:[%s5424_s3 + $0x48] sm:$0xff]   ;;  %v4238_v6 = vld [vmem:[%s5424_s3 + $0x58] sm:$0xff]  }
 0x7e9   : > { %v4986_v61 = vadd.f32 %v1701_v56, %v1697_v59  ;;  %3926 = vmatprep.subr.bf16.mxu1 %v4516_v0  ;;  %v4237_v59 = vld [vmem:[%s5424_s3 + $0x40] sm:$0xff]  }
 0x7ea   : > { %v1694_v62 = vpop.f32.mrf.mxu0 }
 0x7eb   : > { %v1703_v63 = vsel %vm503_vm2, %v4986_v61, 0.0 }
 0x7ec   : > { %1704 = vadd.xlane.f32.xlu1 %v1703_v63  ;;  %v3923_v1 = vpop.f32.mrf.mxu0  ;;  %3927 = vmatpush3.bf16.msra.mxu1 %v4227_v7  ;;  %v5066_v63 = vld [vmem:[%s5428_s7 + $0x10] sm:$0xff] }
 0x7ed   : > { %3952 = vmatprep.subr.bf16.mxu1 %v4516_v0  ;;  %v1923_v1 = vrot.slane %v5066_v63, %v520_v25  ;;  %v4239_v25 = vld [vmem:[%s5424_s3 + $0x50] sm:$0xff]   ;;  %v1939_v9 = vrot.slane %v5066_v63, %v535_v45 }
 0x875   : > { %v1705_v58 = vpop.xlane.xlu1 %1704 }
 0x876   : > { %v1706_v2 = vmul.f32 0.03125, %v1705_v58 }
 0x878   : > { %v1707_v3 = vsub.f32 %v4986_v61, %v1706_v2 }
 0x87a   : > { %v1708_v4 = vmul.f32 %v1707_v3, %v1707_v3 }
 0x87c   : > { %v1709_v5 = vsel %vm503_vm2, %v1708_v4, 0.0 }
 0x87d   : > { %1710 = vadd.xlane.f32.xlu0 %v1709_v5 }
 0x906   : > { %v1711_v14 = vpop.xlane.xlu0 %1710 }
 0x907   : > { %v1712_v15 = vmul.f32 0.03125, %v1711_v14 }
 0x909   : > { %v1713_v16 = vadd.f32 1e-05, %v1712_v15  ;;  %v2003_v15 = vrot.slane %v5066_v63, %v599_v42 }
 0x90b   : > { %4290 = vrsqrt.f32 %v1713_v16 }
 0x918   : > { %v4291_v46 = vpop.eup %4290 }
 0x919   : > { %v1715_v20 = vmul.f32 %v4291_v46, %v1707_v3  ;;  %v1928_v3 = vrot.slane %v5066_v63, %v525_v27  ;;  %v4240_v27 = vld [vmem:[%s5424_s3 + $0x68] sm:$0xff]  }
 0x91b   : > { %v1720_v22 = vmul.f32 %v1719_v19, %v1715_v20 }
 0x91d   : > { %v1725_v28 = vadd.f32 %v1724_v21, %v1720_v22 }
 0x91f   : > { %v1726_v30 = vpack.c.bf16 %v1725_v28, %v1725_v28  ;;  %v2064_v28 = vrot.slane %v5066_v63, %v660_v37 }
 0x921   : > { %3929 = vmatmul.mubr.msk.bf16.vlgmr.msra.gmra.mxu1 %vm503_vm2, %v1726_v30 }
 0x922   : > { %3956 = vmatprep.mubr.msk.bf16.mxu1 %vm4517_vm0, %v4516_v0  ;;  %3953 = vmatpush3.bf16.msra.mxu1 %v4236_v57 }
 0x923   : > { %3954 = vmatprep.subr.bf16.mxu1 %v4516_v0 }
 0x926   : > { %3955 = vmatpush3.bf16.msra.mxu1 %v4237_v59 }
 0x927   : > { %3960 = vmatprep.subr.bf16.mxu1 %v4516_v0 }
 0x9e1   : > { %v1787_v33 = vpop.f32.mrf.mxu1 }
 0x9e2   : > { %v1788_v34 = vadd.f32 %v3571_v26, %v1787_v33 }
 0x9e3   : > { %v3930_v35 = vpop.f32.mrf.mxu1 }
 0x9e4   : > { %v1793_v36 = vmax.f32 %v1788_v34, 0.0 }
 0x9e5   : > { %v1790_v39 = vpop.f32.mrf.mxu1 }
 0x9e6   : > { %v1794_v23 = vpack.c.bf16 %v1793_v36, %v1793_v36 }
 0x9e7   : > { %v3931_v40 = vpop.f32.mrf.mxu1 }
 0x9e8   : > { %3949 = vmatmul.mubr.bf16.vlgmr.msra.gmra.mxu0 %v1794_v23 }
 0x9e9   : > { %3984 = vmatprep.mubr.msk.bf16.mxu0 %vm4517_vm0, %v4516_v0 }
 0xaa8   : > { %v1897_v43 = vpop.f32.mrf.mxu0 }
 0xaa9   : > { %v1898_v47 = vadd.f32 %v3575_v41, %v1897_v43 }
 0xaaa   : > { %v3950_v38 = vpop.f32.mrf.mxu0 }
 0xaab   : > { %v5049_v44 = vadd.f32 %v1898_v47, %v4986_v61 }
 0xaac   : > { %v1900_v48 = vpop.f32.mrf.mxu0 }
 0xaad   : > { %v1907_v49 = vsel %vm503_vm2, %v5049_v44, 0.0 }
 0xaae   : > { %1908 = vadd.xlane.f32.xlu0 %v1907_v49  ;;  %v3951_v50 = vpop.f32.mrf.mxu0 }
 0xb37   : > { %v1909_v51 = vpop.xlane.xlu0 %1908 }
 0xb38   : > { %v1910_v52 = vmul.f32 0.03125, %v1909_v51 }
 0xb3a   : > { %v1911_v53 = vsub.f32 %v5049_v44, %v1910_v52 }
 0xb3c   : > { %v1912_v54 = vmul.f32 %v1911_v53, %v1911_v53 }
 0xb3e   : > { %v1913_v56 = vsel %vm503_vm2, %v1912_v54, 0.0 }
 0xb3f   : > { %1914 = vadd.xlane.f32.xlu1 %v1913_v56 }
 0xbc8   : > { %v1915_v60 = vpop.xlane.xlu1 %1914 }
 0xbc9   : > { %v1916_v61 = vmul.f32 0.03125, %v1915_v60 }
 0xbcb   : > { %v1917_v62 = vadd.f32 1e-05, %v1916_v61 }
 0xbcd   : > { %4292 = vrsqrt.f32 %v1917_v62 }
 0xbda   : > { %v4293_v58 = vpop.eup %4292 }
 0xbdb   : > { %v1919_v2 = vmul.f32 %v4293_v58, %v1911_v53 }
 0xbdd   : > { %v1924_v4 = vmul.f32 %v1923_v1, %v1919_v2 }
 0xbdf   : > { %v1929_v5 = vadd.f32 %v1928_v3, %v1924_v4 }
 0xbe1   : > { %v1930_v7 = vpack.c.bf16 %v1929_v5, %v1929_v5 }
 0xbe3   : > { %3957 = vmatmul.mubr.msk.bf16.vlgmr.msra.gmra.mxu1 %vm503_vm2, %v1930_v7 }
 0xbe4   : > { %3961 = vmatpush3.bf16.msra.mxu1 %v4238_v6  ;;  %3964 = vmatprep.mubr.msk.bf16.mxu1 %vm4517_vm0, %v4516_v0 }
 0xbe5   : > { %3962 = vmatprep.subr.bf16.mxu1 %v4516_v0 }
 0xbe8   : > { %3963 = vmatpush3.bf16.msra.mxu1 %v4239_v25 }
 0xbe9   : > { %3968 = vmatprep.subr.bf16.mxu1 %v4516_v0 }
 0xbeb   : > { %3965 = vmatmul.mubr.msk.bf16.vlgmr.msra.gmra.mxu1 %vm503_vm2, %v1930_v7 }
 0xbec   : > { %3969 = vmatpush3.bf16.msra.mxu1 %v4240_v27  ;;  %3972 = vmatprep.mubr.msk.bf16.mxu1 %vm4517_vm0, %v4516_v0 }
 0xbed   : > { %3970 = vmatprep.subr.bf16.mxu1 %v4516_v0 }
 0xbf0   : > { %3971 = vmatpush3.bf16.msra.mxu1 %v4241_v8 }
 0xbf1   : > { %3976 = vmatprep.subr.bf16.mxu1 %v4516_v0 }
 0xbf3   : > { %3973 = vmatmul.mubr.msk.bf16.vlgmr.msra.gmra.mxu1 %vm503_vm2, %v1930_v7 }
 0xbf4   : > { %3978 = vmatprep.mubr.msk.bf16.mxu1 %vm4517_vm0, %v4516_v0 }
 0xca3   : > { %v1989_v10 = vpop.f32.mrf.mxu1 }
 0xca4   : > { %v1990_v11 = vadd.f32 %v1989_v10, %v1939_v9 }
 0xca5   : > { %v3958_v12 = vpop.f32.mrf.mxu1 }
 0xca6   : > { %v2117_v13 = vpack.c.bf16 %v1990_v11, %v1990_v11 }
 0xca7   : > { %v1992_v14 = vpop.f32.mrf.mxu1 }
 0xca8   : > { %2225 = vrot.lane.b32.xlu1 %v2117_v13, %s4519_s14 }
 0xca9   : > { %v3959_v16 = vpop.f32.mrf.mxu1 }
 0xcab   : > { %v2050_v19 = vpop.f32.mrf.mxu1 }
 0xcac   : > { %v2051_v46 = vadd.f32 %v2050_v19, %v2003_v15 }
 0xcad   : > { %v3966_v20 = vpop.f32.mrf.mxu1 }
 0xcae   : > { %v2118_v21 = vpack.c.bf16 %v2051_v46, %v2051_v46 }
 0xcaf   : > { %v2053_v22 = vpop.f32.mrf.mxu1 }
 0xcb0   : > { %2339 = vrot.lane.b32.xlu1 %v2118_v21, %s4518_s15  ;;  %2228 = vrot.lane.b32.xlu0 %v2118_v21, %s4519_s14  ;;  %v2124_v45 = vsel %vm717_vm4, %v2118_v21, 0 }
 0xcb1   : > { %v3967_v30 = vpop.f32.mrf.mxu1  ;;  %3977 = vmatpush3.bf16.xpose.msra.mxu1 %v2124_v45 }
 0xcb2   : > { %3988 = vmatprep.subr.bf16.mxu1 %v4516_v0 }
 0xcb3   : > { %v2111_v42 = vpop.f32.mrf.mxu1 }
 0xcb4   : > { %v2112_v31 = vadd.f32 %v2111_v42, %v2064_v28  ;;  %2449 = vrot.lane.b32.xlu1 %v2118_v21, %s4523_s29  ;;  %2337 = vrot.lane.b32.xlu0 %v2117_v13, %s4518_s15 }
 0xcb5   : > { %v3974_v32 = vpop.f32.mrf.mxu1 }
 0xcb6   : > { %v5115_v26 = vpack.c.bf16 %v2112_v31, %v2112_v31 }
 0xcb7   : > { %v2114_v33 = vpop.f32.mrf.mxu1 }
 0xcb8   : > { %2559 = vrot.lane.b32.xlu1 %v2118_v21, %s4524_s13  ;;  %2447 = vrot.lane.b32.xlu0 %v2117_v13, %s4523_s29  ;;  %v2182_v37 = vsel %vm780_vm3, %v5115_v26, 0 }
 0xcb9   : > { %3979 = vmatmul.mubr.msk.bf16.vlgmr.msra.gmra.mxu1 %vm717_vm4, %v2117_v13  ;;  %v3975_v34 = vpop.f32.mrf.mxu1  ;;  %3983 = vmatpush3.bf16.msra.mxu0 %v2182_v37 }
 0xcba   : > { %3990 = vmatprep.mubr.msk.bf16.mxu1 %vm4517_vm0, %v4516_v0  ;;  %3994 = vmatprep.subr.bf16.mxu0 %v4516_v0 }
 0xcbc   : > { %2669 = vrot.lane.b32.xlu1 %v2118_v21, %s5461_s26  ;;  %2557 = vrot.lane.b32.xlu0 %v2117_v13, %s4524_s13 }
 0xcc0   : > { %2779 = vrot.lane.b32.xlu1 %v2118_v21, %s5462_s16  ;;  %2667 = vrot.lane.b32.xlu0 %v2117_v13, %s5461_s26 }
 0xcc4   : > { %2889 = vrot.lane.b32.xlu1 %v2118_v21, %s5463_s24  ;;  %2777 = vrot.lane.b32.xlu0 %v2117_v13, %s5462_s16 }
 0xcc8   : > { %2887 = vrot.lane.b32.xlu0 %v2117_v13, %s5463_s24 }
 0xd1a   : > { %v2226_v39 = vpop.permute.xlu1 %2225 }
 0xd22   : > { %v2229_v35 = vpop.permute.xlu0 %2228  ;;  %v2340_v23 = vpop.permute.xlu1 %2339 }
 0xd23   : > { %v2234_v36 = vsel %vm717_vm4, %v2229_v35, 0  ;;  %v2345_v40 = vsel %vm717_vm4, %v2340_v23, 0 }
 0xd24   : > { %3989 = vmatpush3.bf16.xpose.msra.mxu1 %v2234_v36 }
 0xd25   : > { %4000 = vmatprep.subr.bf16.mxu1 %v4516_v0 }
 0xd26   : > { %v2450_v41 = vpop.permute.xlu1 %2449  ;;  %v2338_v43 = vpop.permute.xlu0 %2337 }
 0xd27   : > { %v2455_v47 = vsel %vm717_vm4, %v2450_v41, 0 }
 0xd2a   : > { %v2560_v38 = vpop.permute.xlu1 %2559  ;;  %v2448_v48 = vpop.permute.xlu0 %2447 }
 0xd2b   : > { %3991 = vmatmul.mubr.msk.bf16.vlgmr.msra.gmra.mxu1 %vm717_vm4, %v2226_v39  ;;  %v2565_v49 = vsel %vm717_vm4, %v2560_v38, 0 }
 0xd2c   : > { %4001 = vmatpush3.bf16.xpose.msra.mxu1 %v2345_v40  ;;  %4002 = vmatprep.mubr.msk.bf16.mxu1 %vm4517_vm0, %v4516_v0 }
 0xd2d   : > { %4012 = vmatprep.subr.bf16.mxu1 %v4516_v0 }
 0xd2e   : > { %v2670_v50 = vpop.permute.xlu1 %2669  ;;  %v2558_v51 = vpop.permute.xlu0 %2557 }
 0xd2f   : > { %v2675_v52 = vsel %vm717_vm4, %v2670_v50, 0 }
 0xd32   : > { %v2780_v53 = vpop.permute.xlu1 %2779  ;;  %v2668_v54 = vpop.permute.xlu0 %2667 }
 0xd33   : > { %4003 = vmatmul.mubr.msk.bf16.vlgmr.msra.gmra.mxu1 %vm717_vm4, %v2338_v43  ;;  %v2785_v56 = vsel %vm717_vm4, %v2780_v53, 0 }
 0xd34   : > { %4013 = vmatpush3.bf16.xpose.msra.mxu1 %v2455_v47  ;;  %4014 = vmatprep.mubr.msk.bf16.mxu1 %vm4517_vm0, %v4516_v0 }
 0xd35   : > { %4024 = vmatprep.subr.bf16.mxu1 %v4516_v0 }
 0xd36   : > { %v2890_v57 = vpop.permute.xlu1 %2889  ;;  %v2778_v59 = vpop.permute.xlu0 %2777 }
 0xd37   : > { %v2895_v60 = vsel %vm717_vm4, %v2890_v57, 0 }
 0xd3a   : > { %v2888_v61 = vpop.permute.xlu0 %2887 }
 0xd3b   : > { %4015 = vmatmul.mubr.msk.bf16.vlgmr.msra.gmra.mxu1 %vm717_vm4, %v2448_v48 }
 0xd3c   : > { %4025 = vmatpush3.bf16.xpose.msra.mxu1 %v2565_v49  ;;  %4026 = vmatprep.mubr.msk.bf16.mxu1 %vm4517_vm0, %v4516_v0 }
 0xd3d   : > { %4036 = vmatprep.subr.bf16.mxu1 %v4516_v0 }
 0xd43   : > { %4027 = vmatmul.mubr.msk.bf16.vlgmr.msra.gmra.mxu1 %vm717_vm4, %v2558_v51 }
 0xd44   : > { %4037 = vmatpush3.bf16.xpose.msra.mxu1 %v2675_v52  ;;  %4038 = vmatprep.mubr.msk.bf16.mxu1 %vm4517_vm0, %v4516_v0 }
 0xd45   : > { %4048 = vmatprep.subr.bf16.mxu1 %v4516_v0 }
 0xd4b   : > { %4039 = vmatmul.mubr.msk.bf16.vlgmr.msra.gmra.mxu1 %vm717_vm4, %v2668_v54 }
 0xd4c   : > { %4049 = vmatpush3.bf16.xpose.msra.mxu1 %v2785_v56  ;;  %4050 = vmatprep.mubr.msk.bf16.mxu1 %vm4517_vm0, %v4516_v0 }
 0xd4d   : > { %4060 = vmatprep.subr.bf16.mxu1 %v4516_v0 }
 0xd53   : > { %4051 = vmatmul.mubr.msk.bf16.vlgmr.msra.gmra.mxu1 %vm717_vm4, %v2778_v59 }
 0xd54   : > { %4061 = vmatpush3.bf16.xpose.msra.mxu1 %v2895_v60  ;;  %4062 = vmatprep.mubr.msk.bf16.mxu1 %vm4517_vm0, %v4516_v0 }
 0xd55   : > { %4072 = vmatprep.subr.bf16.mxu1 %v4516_v0 }
 0xd5b   : > { %4063 = vmatmul.mubr.msk.bf16.vlgmr.msra.gmra.mxu1 %vm717_vm4, %v2888_v61 }
 0xd5c   : > { %4076 = vmatprep.mubr.msk.bf16.mxu1 %vm4517_vm0, %v4516_v0 }
 0xd79   : > { %v2160_v62 = vpop.f32.mrf.mxu1 }
 0xd7a   : > { %v2161_v1 = vadd.f32 %v2160_v62, %v4846_v29 }
 0xd7b   : > { %v3980_v58 = vpop.f32.mrf.mxu1 }
 0xd7c   : > { %v2166_v2 = vsel %vm764_vm6, %v2161_v1, -inf }
 0xd7d   : > { %2167 = vmax.xlane.f32.xlu1 %v2166_v2  ;;  %v2163_v3 = vpop.f32.mrf.mxu1 }
 0xd7f   : > { %v3981_v4 = vpop.f32.mrf.mxu1 }
 0xdeb   : > { %v2270_v5 = vpop.f32.mrf.mxu1 }
 0xdec   : > { %v2271_v6 = vadd.f32 %v2270_v5, %v4846_v29 }
 0xded   : > { %v3992_v7 = vpop.f32.mrf.mxu1 }
 0xdee   : > { %v2276_v25 = vsel %vm764_vm6, %v2271_v6, -inf }
 0xdef   : > { %2277 = vmax.xlane.f32.xlu0 %v2276_v25  ;;  %v2273_v27 = vpop.f32.mrf.mxu1 }
 0xdf1   : > { %v3993_v8 = vpop.f32.mrf.mxu1 }
 0xdf3   : > { %v2381_v9 = vpop.f32.mrf.mxu1 }
 0xdf4   : > { %v2382_v10 = vadd.f32 %v2381_v9, %v4846_v29 }
 0xdf5   : > { %v4004_v11 = vpop.f32.mrf.mxu1 }
 0xdf6   : > { %v2387_v12 = vsel %vm764_vm6, %v2382_v10, -inf }
 0xdf7   : > { %2388 = vmax.xlane.f32.xlu0 %v2387_v12  ;;  %v2384_v13 = vpop.f32.mrf.mxu1 }
 0xdf9   : > { %v4005_v14 = vpop.f32.mrf.mxu1 }
 0xdfb   : > { %v2491_v15 = vpop.f32.mrf.mxu1 }
 0xdfc   : > { %v2492_v16 = vadd.f32 %v2491_v15, %v4846_v29 }
 0xdfd   : > { %v4016_v19 = vpop.f32.mrf.mxu1 }
 0xdfe   : > { %v2497_v46 = vsel %vm764_vm6, %v2492_v16, -inf }
 0xdff   : > { %2498 = vmax.xlane.f32.xlu1 %v2497_v46  ;;  %v2494_v20 = vpop.f32.mrf.mxu1 }
 0xe01   : > { %v4017_v21 = vpop.f32.mrf.mxu1 }
 0xe03   : > { %v2601_v22 = vpop.f32.mrf.mxu1 }
 0xe04   : > { %v5176_v45 = vadd.f32 %v2601_v22, %v4846_v29 }
 0xe05   : > { %v4028_v28 = vpop.f32.mrf.mxu1 }
 0xe06   : > { %v2168_v30 = vpop.xlane.xlu1 %2167  ;;  %v2607_v42 = vsel %vm764_vm6, %v5176_v45, -inf }
 0xe07   : > { %v2169_v31 = vsub.f32 %v2161_v1, %v2168_v30  ;;  %2608 = vmax.xlane.f32.xlu0 %v2607_v42  ;;  %v2604_v32 = vpop.f32.mrf.mxu1 }
 0xe09   : > { %v2170_v33 = vmul.f32 1.442695, %v2169_v31  ;;  %v4029_v37 = vpop.f32.mrf.mxu1 }
 0xe0b   : > { %4294 = vpow2.f32 %v2170_v33  ;;  %v2711_v34 = vpop.f32.mrf.mxu1 }
 0xe0c   : > { %v5181_v35 = vadd.f32 %v2711_v34, %v4846_v29 }
 0xe0d   : > { %v4040_v36 = vpop.f32.mrf.mxu1 }
 0xe0e   : > { %v2717_v39 = vsel %vm764_vm6, %v5181_v35, -inf }
 0xe0f   : > { %2718 = vmax.xlane.f32.xlu1 %v2717_v39  ;;  %v2714_v23 = vpop.f32.mrf.mxu1 }
 0xe11   : > { %v4041_v40 = vpop.f32.mrf.mxu1 }
 0xe13   : > { %v2821_v41 = vpop.f32.mrf.mxu1 }
 0xe14   : > { %v5186_v43 = vadd.f32 %v2821_v41, %v4846_v29 }
 0xe15   : > { %v4052_v47 = vpop.f32.mrf.mxu1 }
 0xe16   : > { %v2827_v38 = vsel %vm764_vm6, %v5186_v43, -inf }
 0xe17   : > { %2828 = vmax.xlane.f32.xlu0 %v2827_v38  ;;  %v2824_v48 = vpop.f32.mrf.mxu1 }
 0xe18   : > { %v4295_v49 = vpop.eup %4294 }
 0xe19   : > { %v4053_v50 = vpop.f32.mrf.mxu1  ;;  %v2172_v51 = vsel %vm764_vm6, %v4295_v49, 0.0 }
 0xe1b   : > { %2173 = vadd.xlane.f32.xlu0 %v2172_v51  ;;  %v2931_v52 = vpop.f32.mrf.mxu1 }
 0xe1c   : > { %v2932_v53 = vadd.f32 %v2931_v52, %v4846_v29 }
 0xe1d   : > { %v4064_v54 = vpop.f32.mrf.mxu1 }
 0xe1e   : > { %v2937_v56 = vsel %vm764_vm6, %v2932_v53, -inf }
 0xe1f   : > { %2938 = vmax.xlane.f32.xlu1 %v2937_v56  ;;  %v2934_v57 = vpop.f32.mrf.mxu1 }
 0xe21   : > { %v4065_v59 = vpop.f32.mrf.mxu1 }
 0xe30   : > { %2289 = vrot.lane.b32.xlu1 %v5115_v26, %s4519_s14  ;;  %s5465_s14 = smov 8  }
 0xe31   : > { %2399 = vrot.lane.b32.xlu0 %v5115_v26, %s4518_s15  ;;  %s5464_s15 = smov 4  }
 0xe78   : > { %v2278_v60 = vpop.xlane.xlu0 %2277 }
 0xe79   : > { %v2279_v61 = vsub.f32 %v2271_v6, %v2278_v60 }
 0xe7b   : > { %v2280_v62 = vmul.f32 1.442695, %v2279_v61 }
 0xe7d   : > { %4296 = vpow2.f32 %v2280_v62 }
 0xe80   : > { %v2389_v1 = vpop.xlane.xlu0 %2388 }
 0xe81   : > { %v2390_v58 = vsub.f32 %v2382_v10, %v2389_v1 }
 0xe83   : > { %v2391_v2 = vmul.f32 1.442695, %v2390_v58 }
 0xe85   : > { %4298 = vpow2.f32 %v2391_v2 }
 0xe88   : > { %v2499_v29 = vpop.xlane.xlu1 %2498 }
 0xe89   : > { %v2500_v3 = vsub.f32 %v2492_v16, %v2499_v29 }
 0xe8a   : > { %v4297_v4 = vpop.eup %4296 }
 0xe8b   : > { %v2501_v5 = vmul.f32 1.442695, %v2500_v3  ;;  %v2282_v7 = vsel %vm764_vm6, %v4297_v4, 0.0 }
 0xe8c   : > { %2283 = vadd.xlane.f32.xlu1 %v2282_v7 }
 0xe8d   : > { %4300 = vpow2.f32 %v2501_v5 }
 0xe90   : > { %v2609_v9 = vpop.xlane.xlu0 %2608 }
 0xe91   : > { %v2610_v14 = vsub.f32 %v5176_v45, %v2609_v9 }
 0xe92   : > { %v5198_v25 = vpop.eup %4298 }
 0xe93   : > { %v2393_v27 = vsel %vm764_vm6, %v5198_v25, 0.0  ;;  %v2611_v16 = vmul.f32 1.442695, %v2610_v14 }
 0xe94   : > { %2394 = vadd.xlane.f32.xlu0 %v2393_v27 }
 0xe98   : > { %v2719_v12 = vpop.xlane.xlu1 %2718 }
 0xe99   : > { %v2720_v19 = vsub.f32 %v5181_v35, %v2719_v12 }
 0xe9a   : > { %v5202_v6 = vpop.eup %4300 }
 0xe9b   : > { %v2503_v8 = vsel %vm764_vm6, %v5202_v6, 0.0  ;;  %v2721_v28 = vmul.f32 1.442695, %v2720_v19 }
 0xe9c   : > { %2504 = vadd.xlane.f32.xlu1 %v2503_v8 }
 0xea0   : > { %v2829_v10 = vpop.xlane.xlu0 %2828 }
 0xea1   : > { %v2830_v22 = vsub.f32 %v5186_v43, %v2829_v10 }
 0xea3   : > { %v2831_v45 = vmul.f32 1.442695, %v2830_v22 }
 0xea4   : > { %v2174_v11 = vpop.xlane.xlu0 %2173 }
 0xea5   : > { %4302 = vrcp.f32 %v2174_v11 }
 0xea6   : > { %4304 = vpow2.f32 %v2611_v16 }
 0xea7   : > { %4306 = vpow2.f32 %v2721_v28 }
 0xea8   : > { %v2939_v13 = vpop.xlane.xlu1 %2938  ;;  %4308 = vpow2.f32 %v2831_v45  ;;  %v2400_v41 = vpop.permute.xlu0 %2399 }
 0xea9   : > { %v2940_v30 = vsub.f32 %v2932_v53, %v2939_v13  ;;  %v2405_v50 = vsel %vm780_vm3, %v2400_v41, 0 }
 0xeaa   : > { %2509 = vrot.lane.b32.xlu0 %v5115_v26, %s4523_s29  ;;  %s5466_s29 = smov 12  }
 0xeab   : > { %v2941_v31 = vmul.f32 1.442695, %v2940_v30 }
 0xeac   : > { %v2290_v20 = vpop.permute.xlu1 %2289 }
 0xead   : > { %2619 = vrot.lane.b32.xlu1 %v5115_v26, %s4524_s13  ;;  %v2295_v42 = vsel %vm780_vm3, %v2290_v20, 0  ;;  %4310 = vpow2.f32 %v2941_v31  ;;  %s5467_s13 = smov 16  }
 0xeb2   : > { %v4303_v15 = vpop.eup %4302 }
 0xeb3   : > { %v2176_v46 = vmul.f32 %v4303_v15, %v4295_v49  ;;  %v4305_v32 = vpop.eup %4304 }
 0xeb4   : > { %v2613_v33 = vsel %vm764_vm6, %v4305_v32, 0.0  ;;  %v5219_v37 = vpop.eup %4306 }
 0xeb5   : > { %v2177_v21 = vpack.c.bf16 %v2176_v46, %v2176_v46  ;;  %v5221_v34 = vpop.eup %4308  ;;  %v2723_v35 = vsel %vm764_vm6, %v5219_v37, 0.0 }
 0xeb6   : > { %v2833_v39 = vsel %vm764_vm6, %v5221_v34, 0.0 }
 0xeb7   : > { %3985 = vmatmul.mubr.msk.bf16.vlgmr.msra.gmra.mxu0 %vm764_vm6, %v2177_v21 }
 0xeb8   : > { %3995 = vmatpush3.bf16.msra.mxu0 %v2295_v42  ;;  %3996 = vmatprep.mubr.msk.bf16.mxu0 %vm4517_vm0, %v4516_v0 }
 0xeb9   : > { %4006 = vmatprep.subr.bf16.mxu0 %v4516_v0 }
 0xeba   : > { %v5225_v36 = vpop.eup %4310 }
 0xebb   : > { %v2943_v23 = vsel %vm764_vm6, %v5225_v36, 0.0 }
 0xec9   : > { %2614 = vadd.xlane.f32.xlu0 %v2613_v33 }
 0xecd   : > { %2724 = vadd.xlane.f32.xlu0 %v2723_v35 }
 0xed1   : > { %2834 = vadd.xlane.f32.xlu1 %v2833_v39  ;;  %2944 = vadd.xlane.f32.xlu0 %v2943_v23 }
 0xee2   : > { %2839 = vrot.lane.b32.xlu1 %v5115_v26, %s5462_s16  ;;  %s5470_s16 = smov 28  }
 0xee6   : > { %2949 = vrot.lane.b32.xlu1 %v5115_v26, %s5463_s24 }
 0xee7   : > { %2729 = vrot.lane.b32.xlu0 %v5115_v26, %s5461_s26  ;;  %s5469_s26 = smov 24  }
 0xf15   : > { %v2284_v40 = vpop.xlane.xlu1 %2283 }
 0xf16   : > { %4312 = vrcp.f32 %v2284_v40 }
 0xf1d   : > { %v2395_v43 = vpop.xlane.xlu0 %2394 }
 0xf1e   : > { %4314 = vrcp.f32 %v2395_v43  ;;  %v4242_v43 = vld [vmem:[%s5424_s3 + $0x78] sm:$0xff]  }
 0xf1f   : > { %4073 = vmatpush3.bf16.msra.mxu1 %v4242_v43 }
 0xf20   : > { %4074 = vmatprep.subr.bf16.mxu1 %v4516_v0 }
 0xf21   : > { %v2510_v52 = vpop.permute.xlu0 %2509 }
 0xf22   : > { %v2515_v54 = vsel %vm780_vm3, %v2510_v52, 0 }
 0xf23   : > { %v4313_v47 = vpop.eup %4312 }
 0xf24   : > { %v2286_v38 = vmul.f32 %v4313_v47, %v4297_v4 }
 0xf25   : > { %v2505_v48 = vpop.xlane.xlu1 %2504 }
 0xf26   : > { %4316 = vrcp.f32 %v2505_v48  ;;  %v2287_v49 = vpack.c.bf16 %v2286_v38, %v2286_v38 }
 0xf28   : > { %3997 = vmatmul.mubr.msk.bf16.vlgmr.msra.gmra.mxu0 %vm764_vm6, %v2287_v49 }
 0xf29   : > { %4007 = vmatpush3.bf16.msra.mxu0 %v2405_v50  ;;  %4008 = vmatprep.mubr.msk.bf16.mxu0 %vm4517_vm0, %v4516_v0  ;;  %v2620_v59 = vpop.permute.xlu1 %2619  ;;  %v4243_v50 = vld [vmem:[%s5424_s3 + $0x70] sm:$0xff]  }
 0xf2a   : > { %4018 = vmatprep.subr.bf16.mxu0 %v4516_v0  ;;  %v2625_v61 = vsel %vm780_vm3, %v2620_v59, 0  ;;  %4075 = vmatpush3.bf16.msra.mxu1 %v4243_v50 }
 0xf2b   : > { %v4315_v26 = vpop.eup %4314  ;;  %4088 = vmatprep.subr.bf16.mxu1 %v4516_v0 }
 0xf2c   : > { %v2397_v51 = vmul.f32 %v4315_v26, %v5198_v25 }
 0xf2e   : > { %v2398_v53 = vpack.c.bf16 %v2397_v51, %v2397_v51 }
 0xf30   : > { %4009 = vmatmul.mubr.msk.bf16.vlgmr.msra.gmra.mxu0 %vm764_vm6, %v2398_v53 }
 0xf31   : > { %4019 = vmatpush3.bf16.msra.mxu0 %v2515_v54  ;;  %4020 = vmatprep.mubr.msk.bf16.mxu0 %vm4517_vm0, %v4516_v0 }
 0xf32   : > { %4030 = vmatprep.subr.bf16.mxu0 %v4516_v0 }
 0xf33   : > { %v4317_v56 = vpop.eup %4316 }
 0xf34   : > { %v2507_v57 = vmul.f32 %v4317_v56, %v5202_v6 }
 0xf36   : > { %v2508_v60 = vpack.c.bf16 %v2507_v57, %v2507_v57 }
 0xf38   : > { %4021 = vmatmul.mubr.msk.bf16.vlgmr.msra.gmra.mxu0 %vm764_vm6, %v2508_v60 }
 0xf39   : > { %4031 = vmatpush3.bf16.msra.mxu0 %v2625_v61  ;;  %4032 = vmatprep.mubr.msk.bf16.mxu0 %vm4517_vm0, %v4516_v0 }
 0xf3a   : > { %4042 = vmatprep.subr.bf16.mxu0 %v4516_v0 }
 0xf52   : > { %v2615_v62 = vpop.xlane.xlu0 %2614 }
 0xf53   : > { %4318 = vrcp.f32 %v2615_v62 }
 0xf56   : > { %v2725_v1 = vpop.xlane.xlu0 %2724 }
 0xf57   : > { %4320 = vrcp.f32 %v2725_v1 }
 0xf5a   : > { %v2945_v58 = vpop.xlane.xlu0 %2944  ;;  %v2835_v2 = vpop.xlane.xlu1 %2834 }
 0xf5b   : > { %4322 = vrcp.f32 %v2835_v2 }
 0xf5c   : > { %4324 = vrcp.f32 %v2945_v58 }
 0xf5e   : > { %v2730_v4 = vpop.permute.xlu0 %2729  ;;  %v2840_v6 = vpop.permute.xlu1 %2839 }
 0xf5f   : > { %v2735_v25 = vsel %vm780_vm3, %v2730_v4, 0  ;;  %v2845_v10 = vsel %vm780_vm3, %v2840_v6, 0 }
 0xf60   : > { %v4319_v29 = vpop.eup %4318 }
 0xf61   : > { %v2617_v3 = vmul.f32 %v4319_v29, %v4305_v32 }
 0xf62   : > { %v2950_v12 = vpop.permute.xlu1 %2949 }
 0xf63   : > { %v2618_v5 = vpack.c.bf16 %v2617_v3, %v2617_v3  ;;  %v2955_v15 = vsel %vm780_vm3, %v2950_v12, 0 }
 0xf64   : > { %v4321_v7 = vpop.eup %4320 }
 0xf65   : > { %4033 = vmatmul.mubr.msk.bf16.vlgmr.msra.gmra.mxu0 %vm764_vm6, %v2618_v5  ;;  %v2727_v27 = vmul.f32 %v4321_v7, %v5219_v37 }
 0xf66   : > { %4043 = vmatpush3.bf16.msra.mxu0 %v2735_v25  ;;  %4044 = vmatprep.mubr.msk.bf16.mxu0 %vm4517_vm0, %v4516_v0 }
 0xf67   : > { %4054 = vmatprep.subr.bf16.mxu0 %v4516_v0  ;;  %v2728_v8 = vpack.c.bf16 %v2727_v27, %v2727_v27 }
 0xf68   : > { %v4323_v9 = vpop.eup %4322 }
 0xf69   : > { %v2837_v11 = vmul.f32 %v4323_v9, %v5221_v34  ;;  %v4325_v14 = vpop.eup %4324 }
 0xf6a   : > { %v2947_v16 = vmul.f32 %v4325_v14, %v5225_v36 }
 0xf6b   : > { %v2838_v13 = vpack.c.bf16 %v2837_v11, %v2837_v11 }
 0xf6c   : > { %v2948_v20 = vpack.c.bf16 %v2947_v16, %v2947_v16 }
 0xf6d   : > { %4045 = vmatmul.mubr.msk.bf16.vlgmr.msra.gmra.mxu0 %vm764_vm6, %v2728_v8 }
 0xf6e   : > { %4055 = vmatpush3.bf16.msra.mxu0 %v2845_v10  ;;  %4056 = vmatprep.mubr.msk.bf16.mxu0 %vm4517_vm0, %v4516_v0  ;;  %v3097_v10 = vrot.slane %v5066_v63, %v1700_v55  ;;  %v4244_v55 = vld [vmem:[%s5425_s4 + $0x18] sm:$0xff]  }
 0xf6f   : > { %4066 = vmatprep.subr.bf16.mxu0 %v4516_v0 }
 0xf75   : > { %4057 = vmatmul.mubr.msk.bf16.vlgmr.msra.gmra.mxu0 %vm764_vm6, %v2838_v13 }
 0xf76   : > { %4067 = vmatpush3.bf16.msra.mxu0 %v2955_v15  ;;  %4068 = vmatprep.mubr.msk.bf16.mxu0 %vm4517_vm0, %v4516_v0 }
 0xf77   : > { %4080 = vmatprep.subr.bf16.mxu0 %v4516_v0  ;;  %v2218_v19 = vpop.f32.mrf.mxu0 }
 0xf79   : > { %v3986_v46 = vpop.f32.mrf.mxu0 }
 0xf7b   : > { %v2221_v21 = vpop.f32.mrf.mxu0 }
 0xf7d   : > { %4069 = vmatmul.mubr.msk.bf16.vlgmr.msra.gmra.mxu0 %vm764_vm6, %v2948_v20  ;;  %v3987_v22 = vpop.f32.mrf.mxu0 }
 0xf7e   : > { %4084 = vmatprep.mubr.msk.bf16.mxu0 %vm4517_vm0, %v4516_v0  ;;  %4081 = vmatpush3.bf16.msra.mxu0 %v4244_v55 }
 0xf7f   : > { %4082 = vmatprep.subr.bf16.mxu0 %v4516_v0 }
 0xfe8   : > { %v2331_v28 = vpop.f32.mrf.mxu0 }
 0xfe9   : > { %2998 = vrot.lane.b32.xlu1 %v2331_v28, %s5464_s15 }
 0xfea   : > { %v3998_v30 = vpop.f32.mrf.mxu0 }
 0xfeb   : > { %v4246_v30 = vld [vmem:[%s5427_s6 + $0x78] sm:$0xff]  }
 0xfec   : > { %v2334_v42 = vpop.f32.mrf.mxu0 }
 0xfed   : > { %v4247_v42 = vld [vmem:[%s5427_s6 + $0x70] sm:$0xff]  }
 0xfee   : > { %v3999_v45 = vpop.f32.mrf.mxu0 }
 0xfef   : > { %v4248_v45 = vld [vmem:[%s5427_s6 + $0x68] sm:$0xff]  }
 0xff0   : > { %v2441_v31 = vpop.f32.mrf.mxu0 }
 0xff1   : > { %3002 = vrot.lane.b32.xlu1 %v2441_v31, %s5465_s14  ;;  %v4249_v31 = vld [vmem:[%s5427_s6 + $0x60] sm:$0xff]   ;;  %s432_s14 = sand.u32 1, %s4498_s18  }
 0xff2   : > { %v4010_v32 = vpop.f32.mrf.mxu0  ;;  %s3402_s24 = scalar_lea.sflag [#allocation4], %s432_s14 }
 0xff3   : > { %v4250_v32 = vld [vmem:[%s5427_s6 + $0x58] sm:$0xff]  }
 0xff4   : > { %v2444_v33 = vpop.f32.mrf.mxu0 }
 0xff5   : > { %v4251_v33 = vld [vmem:[%s5427_s6 + $0x50] sm:$0xff]  }
 0xff6   : > { %v4011_v37 = vpop.f32.mrf.mxu0 }
 0xff8   : > { %v2551_v34 = vpop.f32.mrf.mxu0 }
 0xff9   : > { %3006 = vrot.lane.b32.xlu0 %v2551_v34, %s5466_s29  ;;  %s3527_s29 = sshll.u32 %s432_s14, 3 }
 0xffa   : > { %v4022_v35 = vpop.f32.mrf.mxu0 }
 0xffc   : > { %v2554_v36 = vpop.f32.mrf.mxu0 }
 0xffd   : > { %v3115_v36 = vrot.slane %v5066_v63, %v1718_v17  ;;  %v3634_v17 = vld [vmem:[#allocation7 + $0x1] ss:$0 sm:$0xff] }
 0xffe   : > { %v4023_v39 = vpop.f32.mrf.mxu0 }
0x1025   : > { %v2661_v23 = vpop.f32.mrf.mxu0 }
0x1026   : > { %3010 = vrot.lane.b32.xlu1 %v2661_v23, %s5467_s13 }
0x1027   : > { %v4034_v40 = vpop.f32.mrf.mxu0 }
0x1028   : > { %v3120_v40 = vrot.slane %v5066_v63, %v1723_v18 }
0x1029   : > { %v2664_v41 = vpop.f32.mrf.mxu0 }
0x102b   : > { %v4035_v47 = vpop.f32.mrf.mxu0 }
0x102d   : > { %v2771_v38 = vpop.f32.mrf.mxu0 }
0x102e   : > { %3014 = vrot.lane.b32.xlu0 %v2771_v38, %s5468_s22  ;;  %v4252_v38 = vld [vmem:[%s5427_s6 + $0x48] sm:$0xff]   ;;  %s434_s22 = scalar_lea.vmem [#allocation10], %s3527_s29  ;;  %s4438_s29 = sshll.u32 %s4533_s21, 4  ;;  %s4439_s29 = int_to_ptr.vmem [resolvable:$false] %s4438_s29 }
0x102f   : > { %v4046_v48 = vpop.f32.mrf.mxu0  ;;  %s3415_s30 = sshll.u32 %s434_s22, 4  ;;  %s4440_s13 = scalar_lea.vmem %s4439_s29, 256  ;;  %s5382_s30 = int_to_ptr.vmem [resolvable:$true] %s3415_s30 }
0x1030   : > { %s4434_s15 = scalar_lea.vmem %s5382_s30, 128  ;;  %p4441_p2 = scmp.lt.s32.totalorder %s5382_s30, %s4439_s29 }
0x1031   : > { %v2774_v49 = vpop.f32.mrf.mxu0  ;;  %p4435_p9 = scmp.ne.s32.totalorder %s5382_s30, %s4434_s15  ;;  %p4442_p4 = scmp.lt.s32.totalorder %s4440_s13, %s4434_s15 }
0x1033   : > { %v4047_v26 = vpop.f32.mrf.mxu0  ;;  %p4436_p3 = pnand %p4435_p9, %p5471_p1  ;;  %p4443_p7 = por %p4442_p4, %p4441_p2 }
0x1035   : > { %v2881_v51 = vpop.f32.mrf.mxu0  ;;  %p4437_p5 = pneg %p4436_p3 }
0x1036   : > { %3018 = vrot.lane.b32.xlu1 %v2881_v51, %s5469_s26 }
0x1037   : > { %v4058_v52 = vpop.f32.mrf.mxu0  ;;  %p4444_p8 = pnand %p4443_p7, %p4437_p5 }
0x1038   : > { %v3654_v52 = vld [vmem:[%s5428_s7 + $0x18] ss:$0 sm:$0xff] }
0x1039   : > { %v2884_v53 = vpop.f32.mrf.mxu0 }
0x103b   : > { %v4059_v54 = vpop.f32.mrf.mxu0 }
0x103d   : > { %v2991_v56 = vpop.f32.mrf.mxu0 }
0x103e   : > { %3022 = vrot.lane.b32.xlu0 %v2991_v56, %s5470_s16  ;;  %s5380_s16 = scalar_lea.hbm %s5432_s11, %s3670_s12 }
0x103f   : > { %v4070_v57 = vpop.f32.mrf.mxu0 }
0x1041   : > { %v2994_v59 = vpop.f32.mrf.mxu0 }
0x1043   : > { %v4071_v60 = vpop.f32.mrf.mxu0 }
0x105b   : > { %v2999_v61 = vpop.permute.xlu1 %2998 }
0x105c   : > { %v3025_v2 = vsel %vm717_vm4, %v2218_v19, %v2999_v61 }
0x1063   : > { %v3003_v62 = vpop.permute.xlu1 %3002 }
0x1064   : > { %v3026_v29 = vsel %vm764_vm6, %v3025_v2, %v3003_v62 }
0x106b   : > { %v3007_v1 = vpop.permute.xlu0 %3006 }
0x106c   : > { %v3027_v4 = vsel %vm1627_vm7, %v3026_v29, %v3007_v1 }
0x1098   : > { %v3011_v58 = vpop.permute.xlu1 %3010 }
0x1099   : > { %v3028_v7 = vsel %vm457_vm1, %v3027_v4, %v3011_v58  ;;  %v4255_v4 = vld [vmem:[%s5430_s9] sm:$0xff]  }
0x10a0   : > { %v3015_v3 = vpop.permute.xlu0 %3014 }
0x10a1   : > { %v3029_v25 = vsel %vm1630_vm8, %v3028_v7, %v3015_v3  ;;  %v4254_v3 = vld [vmem:[%s5430_s9 + $0x8] sm:$0xff]  }
0x10a8   : > { %v3019_v5 = vpop.permute.xlu1 %3018 }
0x10a9   : > { %v3030_v27 = vsel %vm1632_vm9, %v3029_v25, %v3019_v5 }
0x10b0   : > { %v3023_v6 = vpop.permute.xlu0 %3022 }
0x10b1   : > { %v3031_v8 = vsel %vm1634_vm10, %v3030_v27, %v3023_v6  ;;  %v3663_v6 = vld [vmem:[#allocation8] ss:$0 sm:$0xff] }
0x10b2   : > { %v3032_v9 = vpack.c.bf16 %v3031_v8, %v3031_v8 }
0x10b4   : > { %4077 = vmatmul.mubr.msk.bf16.vlgmr.msra.gmra.mxu1 %vm503_vm2, %v3032_v9  ;;  %v3664_v9 = vld [vmem:[#allocation8 + $0x1] ss:$0 sm:$0xff] }
0x10b5   : > { %4104 = vmatprep.mubr.msk.bf16.mxu1 %vm4517_vm0, %v4516_v0  ;;  %4089 = vmatpush3.bf16.msra.mxu1 %v4246_v30 }
0x10b6   : > { %4090 = vmatprep.subr.bf16.mxu1 %v4516_v0 }
0x10b9   : > { %4091 = vmatpush3.bf16.msra.mxu1 %v4247_v42 }
0x10ba   : > { %4092 = vmatprep.subr.bf16.mxu1 %v4516_v0 }
0x10bd   : > { %4093 = vmatpush3.bf16.msra.mxu1 %v4248_v45 }
0x10be   : > { %4094 = vmatprep.subr.bf16.mxu1 %v4516_v0 }
0x10c1   : > { %4095 = vmatpush3.bf16.msra.mxu1 %v4249_v31 }
0x10c2   : > { %4096 = vmatprep.subr.bf16.mxu1 %v4516_v0 }
0x10c5   : > { %4097 = vmatpush3.bf16.msra.mxu1 %v4250_v32 }
0x10c6   : > { %4098 = vmatprep.subr.bf16.mxu1 %v4516_v0 }
0x10c9   : > { %4099 = vmatpush3.bf16.msra.mxu1 %v4251_v33 }
0x10ca   : > { %4100 = vmatprep.subr.bf16.mxu1 %v4516_v0 }
0x10cd   : > { %4101 = vmatpush3.bf16.msra.mxu1 %v4252_v38 }
0x10ce   : > { %4102 = vmatprep.subr.bf16.mxu1 %v4516_v0 }
0x10d1   : > { %4103 = vmatpush3.bf16.msra.mxu1 %v4253_v24 }
0x1174   : > { %v3087_v11 = vpop.f32.mrf.mxu1 }
0x1175   : > { %v3093_v12 = vadd.f32 %v3087_v11, %v5049_v44  ;;  %v4245_v44 = vld [vmem:[%s5425_s4 + $0x10] sm:$0xff]  }
0x1176   : > { %v4078_v13 = vpop.f32.mrf.mxu1  ;;  %4083 = vmatpush3.bf16.msra.mxu0 %v4245_v44 }
0x1177   : > { %v5304_v14 = vadd.f32 %v3097_v10, %v3093_v12  ;;  %4108 = vmatprep.subr.bf16.mxu0 %v4516_v0 }
0x1178   : > { %v3090_v15 = vpop.f32.mrf.mxu1 }
0x1179   : > { %v3099_v16 = vsel %vm503_vm2, %v5304_v14, 0.0 }
0x117a   : > { %3100 = vadd.xlane.f32.xlu1 %v3099_v16  ;;  %v4079_v19 = vpop.f32.mrf.mxu1 }
0x1203   : > { %v3101_v46 = vpop.xlane.xlu1 %3100 }
0x1204   : > { %v3102_v20 = vmul.f32 0.03125, %v3101_v46 }
0x1206   : > { %v3103_v21 = vsub.f32 %v5304_v14, %v3102_v20 }
0x1208   : > { %v3104_v22 = vmul.f32 %v3103_v21, %v3103_v21 }
0x120a   : > { %v3105_v28 = vsel %vm503_vm2, %v3104_v22, 0.0 }
0x120b   : > { %3106 = vadd.xlane.f32.xlu0 %v3105_v28 }
0x1294   : > { %v3107_v37 = vpop.xlane.xlu0 %3106 }
0x1295   : > { %v3108_v34 = vmul.f32 0.03125, %v3107_v37 }
0x1297   : > { %v3109_v35 = vadd.f32 1e-05, %v3108_v34 }
0x1299   : > { %4326 = vrsqrt.f32 %v3109_v35 }
0x12a6   : > { %v4327_v39 = vpop.eup %4326 }
0x12a7   : > { %v3111_v23 = vmul.f32 %v4327_v39, %v3103_v21 }
0x12a9   : > { %v3116_v41 = vmul.f32 %v3115_v36, %v3111_v23 }
0x12ab   : > { %v3121_v43 = vadd.f32 %v3120_v40, %v3116_v41 }
0x12ad   : > { %v3122_v47 = vpack.c.bf16 %v3121_v43, %v3121_v43 }
0x12af   : > { %4085 = vmatmul.mubr.msk.bf16.vlgmr.msra.gmra.mxu0 %vm503_vm2, %v3122_v47 }
0x12b0   : > { %4112 = vmatprep.mubr.msk.bf16.mxu0 %vm4517_vm0, %v4516_v0  ;;  %4109 = vmatpush3.bf16.msra.mxu0 %v4254_v3 }
0x12b1   : > { %4110 = vmatprep.subr.bf16.mxu0 %v4516_v0  ;;  %v3665_v0 = vld [vmem:[%s5431_s10] ss:$0 sm:$0xff] }
0x12b4   : > { %4111 = vmatpush3.bf16.msra.mxu0 %v4255_v4 }
0x136f   : > { %v3185_v18 = vpop.f32.mrf.mxu0 }
0x1370   : > { %v3186_v63 = vadd.f32 %v3634_v17, %v3185_v18 }
0x1371   : > { %v4086_v48 = vpop.f32.mrf.mxu0 }
0x1372   : > { %v3191_v49 = vmax.f32 %v3186_v63, 0.0 }
0x1373   : > { %v3188_v50 = vpop.f32.mrf.mxu0 }
0x1374   : > { %v3192_v26 = vpack.c.bf16 %v3191_v49, %v3191_v49 }
0x1375   : > { %v4087_v51 = vpop.f32.mrf.mxu0 }
0x1376   : > { %4105 = vmatmul.mubr.bf16.vlgmr.msra.gmra.mxu1 %v3192_v26 }
0x1436   : > { %v3296_v53 = vpop.f32.mrf.mxu1 }
0x1437   : > { %v3297_v54 = vadd.f32 %v3654_v52, %v3296_v53 }
0x1438   : > { %v4106_v56 = vpop.f32.mrf.mxu1 }
0x1439   : > { %v3302_v57 = vadd.f32 %v3297_v54, %v5304_v14 }
0x143a   : > { %v3299_v59 = vpop.f32.mrf.mxu1 }
0x143b   : > { %v3306_v60 = vsel %vm503_vm2, %v3302_v57, 0.0 }
0x143c   : > { %3307 = vadd.xlane.f32.xlu0 %v3306_v60  ;;  %v4107_v61 = vpop.f32.mrf.mxu1 }
0x14c5   : > { %v3308_v62 = vpop.xlane.xlu0 %3307 }
0x14c6   : > { %v3309_v1 = vmul.f32 0.03125, %v3308_v62 }
0x14c8   : > { %v3310_v58 = vsub.f32 %v3302_v57, %v3309_v1 }
0x14ca   : > { %v3311_v2 = vmul.f32 %v3310_v58, %v3310_v58 }
0x14cc   : > { %v3312_v29 = vsel %vm503_vm2, %v3311_v2, 0.0 }
0x14cd   : > { %3313 = vadd.xlane.f32.xlu1 %v3312_v29 }
0x1556   : > { %v3314_v5 = vpop.xlane.xlu1 %3313 }
0x1557   : > { %v3315_v7 = vmul.f32 0.03125, %v3314_v5 }
0x1559   : > { %v3316_v25 = vadd.f32 1e-05, %v3315_v7 }
0x155b   : > { %4328 = vrsqrt.f32 %v3316_v25 }
0x1568   : > { %v4329_v27 = vpop.eup %4328 }
0x1569   : > { %v3318_v8 = vmul.f32 %v4329_v27, %v3310_v58 }
0x156b   : > { %v3325_v10 = vmul.f32 %v3663_v6, %v3318_v8 }
0x156d   : > { %v3332_v11 = vadd.f32 %v3664_v9, %v3325_v10 }
0x156f   : > { %v3333_v12 = vpack.c.bf16 %v3332_v11, %v3332_v11 }
0x1571   : > { %4113 = vmatmul.mubr.msk.bf16.vlgmr.msra.gmra.mxu0 %vm503_vm2, %v3333_v12 }
0x1631   : > { %v3394_v13 = vpop.f32.mrf.mxu0 }
0x1632   : > { %v3395_v14 = vadd.f32 %v3665_v0, %v3394_v13 }
0x1633   : > { %v4114_v15 = vpop.f32.mrf.mxu0 }
0x1634   : > { %3400 = vst [vmem:[%s434_s22] sm:$0xff] %v3395_v14 }
0x1635   : > { %v3397_v16 = vpop.f32.mrf.mxu0 }
0x1636   : > { %4447 = shalt.err (!%p4444_p8)
}
0x1637   : > { %s4448_s19 = scalar_lea.hbm %s5380_s16, 128  ;;  %s4452_s22 = scalar_lea.hbm %s5432_s11, 256 }
0x1638   : > { %p4449_p13 = scmp.ne.s32.totalorder %s5380_s16, %s4448_s19  ;;  %p4453_p6 = scmp.lt.s32.totalorder %s5380_s16, %s5432_s11 }
0x1639   : > { %p4454_p12 = scmp.lt.s32.totalorder %s4452_s22, %s4448_s19 }
0x163a   : > { %p4450_p11 = pnand %p4449_p13, %p5471_p1 }
0x163b   : > { %p4455_p10 = por %p4454_p12, %p4453_p6 }
0x163c   : > { %p4451_p0 = pneg %p4450_p11 }
0x163e   : > { %p4456_p9 = pnand %p4455_p10, %p4451_p0 }
0x1640   : > { %4459 = shalt.err (!%p4456_p9)
}
0x1641   : > { %4132 = dma.vmem_to_hbm [thread:$0]  (%p5471_p1), %s5382_s30, 128, %s5380_s16, %s3402_s24   ;;  %v4115_v19 = vpop.f32.mrf.mxu0 }
0x1642 PF: > { %p4159_p3 = scmp.ge.s32.totalorder %s4506_s20, 2  ;;  %s3427_s15 = sand.u32 1, %s4494_s17  }
0x1643   : > { %p5472_p5 = scmp.ne.s32.totalorder %s5452_s28, 0  ;;  %s3428_s21 = scalar_lea.sflag [#allocation4], %s3427_s15 }
0x1645   : > { %p4148_p2 = pnand %p4159_p3, %p5472_p5 }
0x1647   : > { %p4149_p4 = pneg %p4148_p2 }
0x1649   : > { %4489 = dma.done.wait (%p4149_p4), %s3428_s21, 128  }
0x164a   : > { %4491 = vsyncadd (%p4149_p4), %s3428_s21, 4294967168  ;;  %s5473_s29 = sld [smem:[#allocation15_spill]]  ;;  %p24_p7 = scmp.ge.s32.totalorder %s4619_s23, 4  }
0x164b   : > { %s5474_s19 = sld [smem:[#allocation16_spill]]  ;;  %s5475_s17 = smov %s4498_s18 }
0x164c   : > { %s5477_s20 = smov %s4619_s23  ;;  %26 = sbr.rel (!%p24_p7) target bundleno = 6 (0x6), region = 128 }
0x1650   : > { %s5476_s18 = smov %s5473_s29 }
0x1651   :  { %3433 = vsyncpa [#allocation3], 1 }
0x1652   :  { %3435 = vsyncpa [#allocation3 + $0x1], 1 }
0x1653   :  { %3436 = vsyncpa [#allocation6], 1 }
0x1654   :  { %3437 = vsyncpa [#allocation9], 1 }
0x1655   :  { %3438 = vsyncpa [#allocation4], 1 }
0x1656   :  { %3440 = vsyncpa [#allocation4 + $0x1], 1 }

// kernel: tpu_custom_call.1
= control target key start
LH: loop header
LB: loop body
LE: loop exit
PB: predicated region body
PF: predicated region fallthrough
CT: control target
= control target key end

     0   :  { %16 = vsyncpa [#allocation3], 0  ;;  %s5421_s0 = inlined_call_operand.vmem [shape: f32[16,16], index: 0, kind: input, shape index: {}]   ;;  %s5422_s1 = inlined_call_operand.hbm [shape: f32[8,32], index: 1, kind: input, shape index: {}]   ;;  %s5423_s2 = inlined_call_operand.hbm [shape: bf16[16,32], index: 2, kind: input, shape index: {}]   ;;  %s5424_s3 = inlined_call_operand.vmem [shape: bf16[2,4,32,32], index: 3, kind: input, shape index: {}]   ;;  %s5425_s4 = inlined_call_operand.vmem [shape: bf16[2,32,128], index: 4, kind: input, shape index: {}]   ;;  %s5426_s5 = inlined_call_operand.hbm [shape: f32[2,1,128], index: 5, kind: input, shape index: {}]   ;;  %s5427_s6 = inlined_call_operand.vmem [shape: bf16[2,128,32], index: 6, kind: input, shape index: {}]   ;;  %s5428_s7 = inlined_call_operand.vmem [shape: f32[2,9,32], index: 7, kind: input, shape index: {}]   ;;  %s5429_s8 = inlined_call_operand.hbm [shape: f32[2,1,32], index: 8, kind: input, shape index: {}]   ;;  %s5430_s9 = inlined_call_operand.vmem [shape: bf16[32,128], index: 9, kind: input, shape index: {}]   ;;  %s5431_s10 = inlined_call_operand.vmem [shape: f32[1,128], index: 10, kind: input, shape index: {}]   ;;  %s5432_s11 = inlined_call_operand.hbm [shape: f32[16,128], index: 11, kind: output, shape index: {}]  }
   0x1   :  { %17 = vsyncpa [#allocation6], 0 }
   0x2   :  { %18 = vsyncpa [#allocation9], 0 }
   0x3   :  { %19 = vsyncpa [#allocation4], 0 }
   0x4   :  { %21 = vsyncpa [#allocation4 + $0x1], 0  ;;  %s4594_s17 = smov 0   ;;  %s4596_s18 = smov 0  }
   0x5   :  { %s4598_s19 = smov 0   ;;  %s4600_s20 = smov 0  }
   0x6 LB: > { %5449 = sst [smem:[#allocation15_spill]] %s4502_s19  ;;  %s4615_s21 = sadd.s32 4294967295, %s4506_s20   ;;  %s4506_s20 = sphi %s4600_s20, %s5477_s20   ;;  %s4502_s19 = sphi %s4598_s19, %s5474_s19   ;;  %s4498_s18 = sphi %s4596_s18, %s5476_s18   ;;  %s4494_s17 = sphi %s4594_s17, %s5475_s17  }
   0x7   : > { %s3515_s22 = sadd.s32 4294967294, %s4506_s20   ;;  %s4619_s23 = sadd.s32 1, %s4506_s20  }
   0x8   : > { %s270_s24 = sadd.s32 1, %s4502_s19  ;;  %s267_s25 = ssub.s32 %s4506_s20, %s4619_s23 }
   0x9   : > { %p280_p0 = scmp.ne.s32.totalorder %s4502_s19, %s4498_s18  ;;  %p268_p1 = scmp.eq.s32.totalorder %s267_s25, 0 }
   0xa   : > { %p281_p2 = scmp.eq.s32.totalorder %s4615_s21, 1  ;;  %p286_p3 = scmp.ne.s32.totalorder %s4498_s18, %s4494_s17 }
   0xb   : > { %p287_p4 = scmp.eq.s32.totalorder %s3515_s22, 1  ;;  %p3516_p7 = scmp.ge.s32.totalorder %s4506_s20, 1 }
   0xc   : > { %s4630_s26 = scalar_select %p268_p1, %s4502_s19, %s270_s24  }
   0xd   : > { %p4632_p5 = por %p281_p2, %p280_p0  ;;  %p4636_p6 = por %p287_p4, %p286_p3 }
   0xe   : > { %5450 = sst [smem:[#allocation16_spill]] %s4630_s26  ;;  %p294_p8 = scmp.lt.s32.totalorder %s4506_s20, 3 }
   0xf   : > { %s5451_s27 = scalar_select %p4632_p5, 1, 0 }
  0x10   : > { %s5452_s28 = scalar_select %p4636_p6, 1, 0 }
  0x11   : > { %p5433_p9 = scmp.eq.s32.totalorder %s4615_s21, 0  ;;  %p4643_p10 = pnand %p3516_p7, %p294_p8 }
  0x12   : > { %s4508_s30 = smov [#allocation5]   ;;  %s4509_s14 = smov [#allocation2]  }
  0x13   : > { %s317_s12 = sshll.u32 %s4508_s30, 4  ;;  %p4134_p11 = pneg %p4643_p10  ;;  %s318_s12 = int_to_ptr.vmem [resolvable:$true] %s317_s12 }
  0x14   : > { %s307_s15 = sshll.u32 %s4509_s14, 4  ;;  %s4510_s16 = smov [#allocation7]   ;;  %s308_s15 = int_to_ptr.vmem [resolvable:$true] %s307_s15 }
  0x15   : > { %p4651_p12 = pnand %p5433_p9, %p4134_p11  ;;  %s336_s22 = sshll.u32 %s4510_s16, 4  ;;  %s337_s22 = int_to_ptr.vmem [resolvable:$true] %s336_s22 }
  0x16   : > { %s4341_s24 = scalar_lea.vmem %s318_s12, 128  ;;  %p4349_p3 = scmp.lt.s32.totalorder %s318_s12, %s318_s12 }
  0x17   : > { %p4332_p13 = pneg %p4651_p12  ;;  %p4342_p0 = scmp.ne.s32.totalorder %s318_s12, %s4341_s24 }
  0x18   : > { %p4350_p4 = scmp.lt.s32.totalorder %s4341_s24, %s4341_s24 }
  0x19   : > { %p4344_p1 = pnand %p4342_p0, %p4332_p13 }
  0x1a   : > { %p4351_p7 = por %p4350_p4, %p4349_p3 }
  0x1b   : > { %p4345_p2 = pneg %p4344_p1 }
  0x1d   : > { %p4352_p8 = pnand %p4351_p7, %p4345_p2 }
  0x1f   : > { %4355 = shalt.err (!%p4352_p8)
}
  0x20   : > { %s4511_s25 = smov 64   ;;  %s4512_s30 = smov 4  }
  0x21   : > { %4140 = dma.hbm_to_vmem [thread:$0]  (!%p4651_p12), %s5423_s2, 128, %s318_s12, [#allocation6], %s4511_s25, %s4511_s25, %s4512_s30  }
  0x22   : > { %s4367_s26 = scalar_lea.vmem %s308_s15, 128  ;;  %p4375_p9 = scmp.lt.s32.totalorder %s308_s15, %s308_s15 }
  0x23   : > { %p4368_p11 = scmp.ne.s32.totalorder %s308_s15, %s4367_s26  ;;  %p4376_p6 = scmp.lt.s32.totalorder %s4367_s26, %s4367_s26 }
  0x25   : > { %p4370_p0 = pnand %p4368_p11, %p4332_p13  ;;  %p4377_p3 = por %p4376_p6, %p4375_p9 }
  0x27   : > { %p4371_p1 = pneg %p4370_p0 }
  0x29   : > { %p4378_p2 = pnand %p4377_p3, %p4371_p1 }
  0x2b   : > { %4381 = shalt.err (!%p4378_p2)
}
  0x2c   : > { %4137 = dma.hbm_to_vmem [thread:$0]  (!%p4651_p12), %s5422_s1, 128, %s308_s15, [#allocation3]  }
  0x2d   : > { %s4393_s12 = scalar_lea.vmem %s337_s22, 32  ;;  %p4401_p11 = scmp.lt.s32.totalorder %s337_s22, %s337_s22 }
  0x2e   : > { %p4394_p4 = scmp.ne.s32.totalorder %s337_s22, %s4393_s12  ;;  %p4402_p0 = scmp.lt.s32.totalorder %s4393_s12, %s4393_s12 }
  0x30   : > { %p4396_p7 = pnand %p4394_p4, %p4332_p13  ;;  %p4403_p5 = por %p4402_p0, %p4401_p11 }
  0x32   : > { %p4397_p8 = pneg %p4396_p7 }
  0x34   : > { %p4404_p6 = pnand %p4403_p5, %p4397_p8 }
  0x36   : > { %4407 = shalt.err (!%p4404_p6)
}
  0x37   : > { %s4513_s26 = smov 16   ;;  %s4514_s25 = smov 1  }
  0x38   : > { %4143 = dma.hbm_to_vmem [thread:$0]  (!%p4651_p12), %s5426_s5, 32, %s337_s22, [#allocation6], %s4513_s26, %s4513_s26, %s4514_s25  }
  0x39   : > { %s4515_s15 = smov [#allocation8]  }
  0x3a   : > { %s355_s14 = sshll.u32 %s4515_s15, 4  ;;  %s356_s14 = int_to_ptr.vmem [resolvable:$true] %s355_s14 }
  0x3b   : > { %s4419_s16 = scalar_lea.vmem %s356_s14, 32  ;;  %p4427_p5 = scmp.lt.s32.totalorder %s356_s14, %s356_s14 }
  0x3c   : > { %p4420_p9 = scmp.ne.s32.totalorder %s356_s14, %s4419_s16  ;;  %p4428_p2 = scmp.lt.s32.totalorder %s4419_s16, %s4419_s16 }
  0x3e   : > { %p4422_p1 = pnand %p4420_p9, %p4332_p13  ;;  %p4429_p4 = por %p4428_p2, %p4427_p5 }
  0x40   : > { %p4423_p3 = pneg %p4422_p1 }
  0x42   : > { %p4430_p7 = pnand %p4429_p4, %p4423_p3 }
  0x44   : > { %4433 = shalt.err (!%p4430_p7)
}
  0x45   : > { %4146 = dma.hbm_to_vmem [thread:$0]  (!%p4651_p12), %s5429_s8, 32, %s356_s14, [#allocation9], %s4513_s26, %s4513_s26, %s4514_s25  }
  0x46   : > { %384 = sbr.rel (%p4643_p10) target bundleno = 5698 (0x1642), region = 64  ;;  %p5455_p8 = scmp.eq.s32.totalorder (!%p4643_p10), %s4615_s21, 0 }
  0x4b   : > { %4477 = dma.done.wait (%p5455_p8), [#allocation3], 128   ;;  %p5456_p13 = pmov %p5455_p8 }
  0x4c   : > { %p5457_p11 = pmov %p5455_p8 }
  0x4d   : > { %4479 = vsyncadd (%p5456_p13), [#allocation3], 4294967168 }
  0x4e   : > { %4481 = dma.done.wait (%p5457_p11), [#allocation6], 160   ;;  %p5458_p0 = pmov %p5455_p8 }
  0x50   : > { %4483 = vsyncadd (%p5458_p0), [#allocation6], 4294967136  ;;  %p5459_p6 = pmov %p5458_p0 }
  0x51   : > { %p5460_p12 = pmov %p5458_p0 }
  0x52   : > { %4485 = dma.done.wait (%p5459_p6), [#allocation9], 32  }
  0x53   : > { %4487 = vsyncadd (%p5460_p12), [#allocation9], 4294967264  ;;  %p435_p10 = scmp.lt.s32.totalorder %s4615_s21, 1  ;;  %v4516_v0 = vmov 0.0   ;;  %vm4517_vm0 = vmmov 0   ;;  %v4217_v1 = vld [vmem:[#allocation5] sm:$0xff]   ;;  %v440_v23 = vlaneseq }
  0x54   : > { %3790 = vmatprep.subr.bf16.mxu0 %v4516_v0  ;;  %3792 = vmatprep.mubr.msk.bf16.mxu0 %vm4517_vm0, %v4516_v0  ;;  %vm457_vm1 = vcmask 130048   ;;  %v450_v4 = vld [vmem:[#allocation2] sm:$0xff]  ;;  %vm503_vm2 = vcmask 261120   ;;  %v4218_v16 = vld [vmem:[%s5424_s3 + $0x8] sm:$0xff]   ;;  %v4222_v34 = vld [vmem:[%s5424_s3 + $0x18] sm:$0xff]   ;;  %vm780_vm3 = vcmask 1043456  }
  0x55   : > { %s436_s29 = scalar_select %p435_p10, %s4615_s21, 1  ;;  %3812 = vmatprep.subr.bf16.mxu1 %v4516_v0  ;;  %3816 = vmatprep.mubr.msk.bf16.mxu1 %vm4517_vm0, %v4516_v0  ;;  %v4219_v17 = vld [vmem:[%s5424_s3 + $0x28] sm:$0xff]   ;;  %v4220_v18 = vld [vmem:[%s5424_s3] sm:$0xff]   ;;  %v4741_v24 = vshrl.u32 %v440_v23, 7  ;;  %v4223_v36 = vld [vmem:[%s5424_s3 + $0x10] sm:$0xff]   ;;  %vm717_vm4 = vcmask 31744  }
  0x56   : > { %3791 = vmatpush3.bf16.msra.mxu0 %v4217_v1  ;;  %3813 = vmatpush3.bf16.msra.mxu1 %v4219_v17  ;;  %v4221_v19 = vld [vmem:[%s5424_s3 + $0x20] sm:$0xff]   ;;  %s4518_s15 = smov 120   ;;  %s4519_s14 = smov 124   ;;  %vm764_vm6 = vcmask 64512   ;;  %vm1627_vm7 = vcmask 97280   ;;  %vm1630_vm8 = vcmask 162816  }
  0x57   : > { %s3528_s13 = sshll.u32 %s436_s29, 3  ;;  %3796 = vmatprep.subr.bf16.mxu0 %v4516_v0  ;;  %3814 = vmatprep.subr.bf16.mxu1 %v4516_v0  ;;  %v520_v25 = vsub.s32 0, %v4741_v24  ;;  %v4747_v26 = vld [vmem:[%s5428_s7] sm:$0xff]  ;;  %v525_v27 = vsub.s32 1, %v4741_v24  ;;  %v660_v37 = vsub.s32 4, %v4741_v24  ;;  %v599_v42 = vsub.s32 3, %v4741_v24 }
  0x58   : > { %s438_s25 = scalar_lea.vmem %s5421_s0, %s3528_s13  ;;  %v535_v45 = vsub.s32 2, %v4741_v24  ;;  %s5447_s16 = smov 108   ;;  %vm1632_vm9 = vcmask 195584   ;;  %vm1634_vm10 = vcmask 228352  }
  0x59   : > { %v446_v2 = vld [vmem:[%s438_s25] sm:$0xff]  ;;  %v521_v28 = vrot.slane %v4747_v26, %v520_v25  ;;  %v526_v31 = vrot.slane %v4747_v26, %v525_v27  ;;  %v661_v38 = vrot.slane %v4747_v26, %v660_v37  ;;  %v600_v50 = vrot.slane %v4747_v26, %v599_v42  ;;  %s5445_s24 = smov 104   ;;  %s5439_s12 = smov 100  }
  0x5a   : > { %v447_v3 = vpack.c.bf16 %v446_v2, %v446_v2  ;;  %3815 = vmatpush3.bf16.msra.mxu1 %v4221_v19  ;;  %v536_v53 = vrot.slane %v4747_v26, %v535_v45  ;;  %s4523_s29 = smov 116   ;;  %s4524_s13 = smov 112  }
  0x5b   : > { %3826 = vmatprep.subr.bf16.mxu1 %v4516_v0  ;;  %s5436_s22 = smov 4   ;;  %s5437_s26 = smov 8  }
  0x5c   : > { %3793 = vmatmul.mubr.msk.bf16.vlgmr.msra.gmra.mxu0 %vm457_vm1, %v447_v3  ;;  %s5438_s25 = smov 12   ;;  %s5444_s19 = smov 16  }
  0x5d   : > { %3800 = vmatprep.mubr.msk.bf16.mxu0 %vm4517_vm0, %v4516_v0  ;;  %3797 = vmatpush3.bf16.msra.mxu0 %v4218_v16  ;;  %s5441_s30 = smov 28   ;;  %p5471_p1 = scmp.ne.s32.totalorder %s5451_s27, 0 }
  0x5e   : > { %3798 = vmatprep.subr.bf16.mxu0 %v4516_v0 }
  0x61   : > { %3799 = vmatpush3.bf16.msra.mxu0 %v4220_v18 }
  0x62   : > { %3804 = vmatprep.subr.bf16.mxu0 %v4516_v0 }
 0x11c   : > { %v495_v5 = vpop.f32.mrf.mxu0 }
 0x11d   : > { %v4718_v6 = vadd.f32 %v495_v5, %v450_v4 }
 0x11e   : > { %v3794_v7 = vpop.f32.mrf.mxu0 }
 0x11f   : > { %v504_v8 = vsel %vm503_vm2, %v4718_v6, 0.0 }
 0x120   : > { %505 = vadd.xlane.f32.xlu0 %v504_v8  ;;  %v498_v9 = vpop.f32.mrf.mxu0 }
 0x122   : > { %v3795_v10 = vpop.f32.mrf.mxu0 }
 0x1a9   : > { %v506_v11 = vpop.xlane.xlu0 %505 }
 0x1aa   : > { %v508_v12 = vmul.f32 0.03125, %v506_v11 }
 0x1ac   : > { %v509_v13 = vsub.f32 %v4718_v6, %v508_v12 }
 0x1ae   : > { %v510_v14 = vmul.f32 %v509_v13, %v509_v13 }
 0x1b0   : > { %v511_v15 = vsel %vm503_vm2, %v510_v14, 0.0 }
 0x1b1   : > { %512 = vadd.xlane.f32.xlu0 %v511_v15 }
 0x23a   : > { %v513_v20 = vpop.xlane.xlu0 %512 }
 0x23b   : > { %v514_v21 = vmul.f32 0.03125, %v513_v20 }
 0x23d   : > { %v515_v22 = vadd.f32 1e-05, %v514_v21 }
 0x23f   : > { %4256 = vrsqrt.f32 %v515_v22  ;;  %v443_v22 = vand.u32 127, %v440_v23 }
 0x241   : > { %vm444_vm5 = vcmp.le.s32.totalorder %v443_v22, %v4741_v24 }
 0x24c   : > { %v4257_v29 = vpop.eup %4256 }
 0x24d   : > { %v517_v30 = vmul.f32 %v4257_v29, %v509_v13 }
 0x24f   : > { %v522_v32 = vmul.f32 %v521_v28, %v517_v30  ;;  %v4525_v28 = vmov -1e+09  }
 0x250   : > { %v4846_v29 = vsel %vm444_vm5, 0.0, %v4525_v28 }
 0x251   : > { %v527_v33 = vadd.f32 %v526_v31, %v522_v32 }
 0x253   : > { %v528_v35 = vpack.c.bf16 %v527_v33, %v527_v33 }
 0x255   : > { %3801 = vmatmul.mubr.msk.bf16.vlgmr.msra.gmra.mxu0 %vm503_vm2, %v528_v35  ;;  %3817 = vmatmul.mubr.msk.bf16.vlgmr.msra.gmra.mxu1 %vm503_vm2, %v528_v35 }
 0x256   : > { %3805 = vmatpush3.bf16.msra.mxu0 %v4222_v34  ;;  %3808 = vmatprep.mubr.msk.bf16.mxu0 %vm4517_vm0, %v4516_v0 }
 0x257   : > { %3806 = vmatprep.subr.bf16.mxu0 %v4516_v0  ;;  %3828 = vmatprep.mubr.msk.bf16.mxu1 %vm4517_vm0, %v4516_v0 }
 0x25a   : > { %3807 = vmatpush3.bf16.msra.mxu0 %v4223_v36 }
 0x25b   : > { %3820 = vmatprep.subr.bf16.mxu0 %v4516_v0 }
 0x25d   : > { %3809 = vmatmul.mubr.msk.bf16.vlgmr.msra.gmra.mxu0 %vm503_vm2, %v528_v35 }
 0x25e   : > { %3822 = vmatprep.mubr.msk.bf16.mxu0 %vm4517_vm0, %v4516_v0 }
 0x315   : > { %v586_v39 = vpop.f32.mrf.mxu0  ;;  %v708_v40 = vpop.f32.mrf.mxu1 }
 0x316   : > { %v709_v41 = vadd.f32 %v708_v40, %v661_v38  ;;  %v587_v57 = vadd.f32 %v586_v39, %v536_v53 }
 0x317   : > { %v3802_v43 = vpop.f32.mrf.mxu0  ;;  %v3818_v44 = vpop.f32.mrf.mxu1 }
 0x318   : > { %v4779_v46 = vpack.c.bf16 %v709_v41, %v709_v41  ;;  %v714_v62 = vpack.c.bf16 %v587_v57, %v587_v57 }
 0x319   : > { %v589_v47 = vpop.f32.mrf.mxu0  ;;  %v711_v48 = vpop.f32.mrf.mxu1 }
 0x31a   : > { %v782_v49 = vsel %vm780_vm3, %v4779_v46, 0 }
 0x31b   : > { %v3803_v51 = vpop.f32.mrf.mxu0  ;;  %v3819_v52 = vpop.f32.mrf.mxu1  ;;  %3827 = vmatpush3.bf16.msra.mxu1 %v782_v49 }
 0x31c   : > { %3838 = vmatprep.subr.bf16.mxu1 %v4516_v0 }
 0x31d   : > { %v647_v54 = vpop.f32.mrf.mxu0 }
 0x31e   : > { %v648_v55 = vadd.f32 %v647_v54, %v600_v50 }
 0x31f   : > { %v3810_v56 = vpop.f32.mrf.mxu0 }
 0x320   : > { %v715_v58 = vpack.c.bf16 %v648_v55, %v648_v55 }
 0x321   : > { %v650_v59 = vpop.f32.mrf.mxu0 }
 0x322   : > { %939 = vrot.lane.b32.xlu0 %v715_v58, %s4518_s15  ;;  %828 = vrot.lane.b32.xlu1 %v715_v58, %s4519_s14  ;;  %v722_v60 = vsel %vm717_vm4, %v715_v58, 0 }
 0x323   : > { %v3811_v61 = vpop.f32.mrf.mxu0  ;;  %3821 = vmatpush3.bf16.xpose.msra.mxu0 %v722_v60 }
 0x324   : > { %3832 = vmatprep.subr.bf16.mxu0 %v4516_v0 }
 0x326   : > { %1267 = vrot.lane.b32.xlu0 %v714_v62, %s5447_s16  ;;  %825 = vrot.lane.b32.xlu1 %v714_v62, %s4519_s14 }
 0x32a   : > { %1377 = vrot.lane.b32.xlu0 %v714_v62, %s5445_s24  ;;  %937 = vrot.lane.b32.xlu1 %v714_v62, %s4518_s15 }
 0x32b   : > { %3823 = vmatmul.mubr.msk.bf16.vlgmr.msra.gmra.mxu0 %vm717_vm4, %v714_v62 }
 0x32c   : > { %3834 = vmatprep.mubr.msk.bf16.mxu0 %vm4517_vm0, %v4516_v0 }
 0x32e   : > { %1487 = vrot.lane.b32.xlu0 %v714_v62, %s5439_s12  ;;  %1049 = vrot.lane.b32.xlu1 %v715_v58, %s4523_s29 }
 0x332   : > { %1047 = vrot.lane.b32.xlu1 %v714_v62, %s4523_s29 }
 0x336   : > { %1159 = vrot.lane.b32.xlu1 %v715_v58, %s4524_s13 }
 0x33a   : > { %1157 = vrot.lane.b32.xlu1 %v714_v62, %s4524_s13 }
 0x33e   : > { %1269 = vrot.lane.b32.xlu1 %v715_v58, %s5447_s16 }
 0x342   : > { %1379 = vrot.lane.b32.xlu1 %v715_v58, %s5445_s24 }
 0x346   : > { %1489 = vrot.lane.b32.xlu1 %v715_v58, %s5439_s12 }
 0x394   : > { %v829_v63 = vpop.permute.xlu1 %828  ;;  %v940_v3 = vpop.permute.xlu0 %939 }
 0x395   : > { %v834_v1 = vsel %vm717_vm4, %v829_v63, 0  ;;  %v945_v5 = vsel %vm717_vm4, %v940_v3, 0 }
 0x396   : > { %3833 = vmatpush3.bf16.xpose.msra.mxu0 %v834_v1 }
 0x397   : > { %3844 = vmatprep.subr.bf16.mxu0 %v4516_v0 }
 0x398   : > { %v826_v2 = vpop.permute.xlu1 %825  ;;  %v1268_v16 = vpop.permute.xlu0 %1267 }
 0x39c   : > { %v938_v4 = vpop.permute.xlu1 %937  ;;  %v1378_v19 = vpop.permute.xlu0 %1377 }
 0x39d   : > { %3835 = vmatmul.mubr.msk.bf16.vlgmr.msra.gmra.mxu0 %vm717_vm4, %v826_v2 }
 0x39e   : > { %3845 = vmatpush3.bf16.xpose.msra.mxu0 %v945_v5  ;;  %3846 = vmatprep.mubr.msk.bf16.mxu0 %vm4517_vm0, %v4516_v0 }
 0x39f   : > { %3856 = vmatprep.subr.bf16.mxu0 %v4516_v0 }
 0x3a0   : > { %v1050_v7 = vpop.permute.xlu1 %1049  ;;  %v1488_v21 = vpop.permute.xlu0 %1487 }
 0x3a1   : > { %v1055_v9 = vsel %vm717_vm4, %v1050_v7, 0 }
 0x3a4   : > { %v1048_v8 = vpop.permute.xlu1 %1047 }
 0x3a5   : > { %3847 = vmatmul.mubr.msk.bf16.vlgmr.msra.gmra.mxu0 %vm717_vm4, %v938_v4 }
 0x3a6   : > { %3857 = vmatpush3.bf16.xpose.msra.mxu0 %v1055_v9  ;;  %3858 = vmatprep.mubr.msk.bf16.mxu0 %vm4517_vm0, %v4516_v0 }
 0x3a7   : > { %3868 = vmatprep.subr.bf16.mxu0 %v4516_v0 }
 0x3a8   : > { %v1160_v10 = vpop.permute.xlu1 %1159 }
 0x3a9   : > { %v1165_v12 = vsel %vm717_vm4, %v1160_v10, 0 }
 0x3ac   : > { %v1158_v11 = vpop.permute.xlu1 %1157 }
 0x3ad   : > { %3859 = vmatmul.mubr.msk.bf16.vlgmr.msra.gmra.mxu0 %vm717_vm4, %v1048_v8 }
 0x3ae   : > { %3869 = vmatpush3.bf16.xpose.msra.mxu0 %v1165_v12  ;;  %3870 = vmatprep.mubr.msk.bf16.mxu0 %vm4517_vm0, %v4516_v0 }
 0x3af   : > { %3880 = vmatprep.subr.bf16.mxu0 %v4516_v0 }
 0x3b0   : > { %v1270_v13 = vpop.permute.xlu1 %1269 }
 0x3b1   : > { %v1275_v14 = vsel %vm717_vm4, %v1270_v13, 0 }
 0x3b4   : > { %v1380_v15 = vpop.permute.xlu1 %1379 }
 0x3b5   : > { %3871 = vmatmul.mubr.msk.bf16.vlgmr.msra.gmra.mxu0 %vm717_vm4, %v1158_v11  ;;  %v1385_v17 = vsel %vm717_vm4, %v1380_v15, 0 }
 0x3b6   : > { %3881 = vmatpush3.bf16.xpose.msra.mxu0 %v1275_v14  ;;  %3882 = vmatprep.mubr.msk.bf16.mxu0 %vm4517_vm0, %v4516_v0 }
 0x3b7   : > { %3892 = vmatprep.subr.bf16.mxu0 %v4516_v0 }
 0x3b8   : > { %v1490_v18 = vpop.permute.xlu1 %1489 }
 0x3b9   : > { %v1495_v20 = vsel %vm717_vm4, %v1490_v18, 0 }
 0x3bd   : > { %3883 = vmatmul.mubr.msk.bf16.vlgmr.msra.gmra.mxu0 %vm717_vm4, %v1268_v16 }
 0x3be   : > { %3893 = vmatpush3.bf16.xpose.msra.mxu0 %v1385_v17  ;;  %3894 = vmatprep.mubr.msk.bf16.mxu0 %vm4517_vm0, %v4516_v0 }
 0x3bf   : > { %3904 = vmatprep.subr.bf16.mxu0 %v4516_v0 }
 0x3c5   : > { %3895 = vmatmul.mubr.msk.bf16.vlgmr.msra.gmra.mxu0 %vm717_vm4, %v1378_v19 }
 0x3c6   : > { %3905 = vmatpush3.bf16.xpose.msra.mxu0 %v1495_v20  ;;  %3906 = vmatprep.mubr.msk.bf16.mxu0 %vm4517_vm0, %v4516_v0 }
 0x3c7   : > { %3916 = vmatprep.subr.bf16.mxu0 %v4516_v0 }
 0x3cd   : > { %3907 = vmatmul.mubr.msk.bf16.vlgmr.msra.gmra.mxu0 %vm717_vm4, %v1488_v21 }
 0x3ce   : > { %3920 = vmatprep.mubr.msk.bf16.mxu0 %vm4517_vm0, %v4516_v0 }
 0x3eb   : > { %v758_v30 = vpop.f32.mrf.mxu0 }
 0x3ec   : > { %v759_v31 = vadd.f32 %v758_v30, %v4846_v29 }
 0x3ed   : > { %v3824_v32 = vpop.f32.mrf.mxu0 }
 0x3ee   : > { %v765_v33 = vsel %vm764_vm6, %v759_v31, -inf }
 0x3ef   : > { %766 = vmax.xlane.f32.xlu1 %v765_v33  ;;  %v761_v34 = vpop.f32.mrf.mxu0 }
 0x3f1   : > { %v3825_v35 = vpop.f32.mrf.mxu0 }
 0x45d   : > { %v870_v36 = vpop.f32.mrf.mxu0 }
 0x45e   : > { %v871_v38 = vadd.f32 %v870_v36, %v4846_v29 }
 0x45f   : > { %v3836_v39 = vpop.f32.mrf.mxu0 }
 0x460   : > { %v876_v23 = vsel %vm764_vm6, %v871_v38, -inf }
 0x461   : > { %877 = vmax.xlane.f32.xlu0 %v876_v23  ;;  %v873_v40 = vpop.f32.mrf.mxu0 }
 0x463   : > { %v3837_v41 = vpop.f32.mrf.mxu0 }
 0x465   : > { %v981_v43 = vpop.f32.mrf.mxu0 }
 0x466   : > { %v982_v44 = vadd.f32 %v981_v43, %v4846_v29 }
 0x467   : > { %v3848_v47 = vpop.f32.mrf.mxu0 }
 0x468   : > { %v987_v48 = vsel %vm764_vm6, %v982_v44, -inf }
 0x469   : > { %988 = vmax.xlane.f32.xlu0 %v987_v48  ;;  %v984_v49 = vpop.f32.mrf.mxu0 }
 0x46b   : > { %v3849_v50 = vpop.f32.mrf.mxu0 }
 0x46d   : > { %v1091_v51 = vpop.f32.mrf.mxu0 }
 0x46e   : > { %v1092_v52 = vadd.f32 %v1091_v51, %v4846_v29 }
 0x46f   : > { %v3860_v53 = vpop.f32.mrf.mxu0 }
 0x470   : > { %v1097_v54 = vsel %vm764_vm6, %v1092_v52, -inf }
 0x471   : > { %1098 = vmax.xlane.f32.xlu1 %v1097_v54  ;;  %v1094_v55 = vpop.f32.mrf.mxu0 }
 0x473   : > { %v3861_v56 = vpop.f32.mrf.mxu0 }
 0x475   : > { %v1201_v57 = vpop.f32.mrf.mxu0 }
 0x476   : > { %v4857_v58 = vadd.f32 %v1201_v57, %v4846_v29 }
 0x477   : > { %v3872_v59 = vpop.f32.mrf.mxu0 }
 0x478   : > { %v767_v60 = vpop.xlane.xlu1 %766  ;;  %v1207_v61 = vsel %vm764_vm6, %v4857_v58, -inf }
 0x479   : > { %v768_v62 = vsub.f32 %v759_v31, %v767_v60  ;;  %1208 = vmax.xlane.f32.xlu0 %v1207_v61  ;;  %v1204_v63 = vpop.f32.mrf.mxu0 }
 0x47b   : > { %v769_v1 = vmul.f32 1.442695, %v768_v62  ;;  %v3873_v2 = vpop.f32.mrf.mxu0 }
 0x47d   : > { %4258 = vpow2.f32 %v769_v1  ;;  %v1311_v3 = vpop.f32.mrf.mxu0 }
 0x47e   : > { %v4862_v4 = vadd.f32 %v1311_v3, %v4846_v29 }
 0x47f   : > { %v3884_v5 = vpop.f32.mrf.mxu0 }
 0x480   : > { %v1317_v7 = vsel %vm764_vm6, %v4862_v4, -inf }
 0x481   : > { %1318 = vmax.xlane.f32.xlu1 %v1317_v7  ;;  %v1314_v8 = vpop.f32.mrf.mxu0 }
 0x483   : > { %v3885_v9 = vpop.f32.mrf.mxu0 }
 0x485   : > { %v1421_v10 = vpop.f32.mrf.mxu0 }
 0x486   : > { %v4867_v11 = vadd.f32 %v1421_v10, %v4846_v29 }
 0x487   : > { %v3896_v12 = vpop.f32.mrf.mxu0 }
 0x488   : > { %v1427_v13 = vsel %vm764_vm6, %v4867_v11, -inf }
 0x489   : > { %1428 = vmax.xlane.f32.xlu0 %v1427_v13  ;;  %v1424_v14 = vpop.f32.mrf.mxu0 }
 0x48a   : > { %v4259_v15 = vpop.eup %4258 }
 0x48b   : > { %v3897_v16 = vpop.f32.mrf.mxu0  ;;  %v771_v17 = vsel %vm764_vm6, %v4259_v15, 0.0 }
 0x48d   : > { %772 = vadd.xlane.f32.xlu0 %v771_v17  ;;  %v1531_v18 = vpop.f32.mrf.mxu0 }
 0x48e   : > { %v1532_v19 = vadd.f32 %v1531_v18, %v4846_v29 }
 0x48f   : > { %v3908_v20 = vpop.f32.mrf.mxu0 }
 0x490   : > { %v1537_v21 = vsel %vm764_vm6, %v1532_v19, -inf }
 0x491   : > { %1538 = vmax.xlane.f32.xlu1 %v1537_v21  ;;  %v1534_v22 = vpop.f32.mrf.mxu0 }
 0x493   : > { %v3909_v28 = vpop.f32.mrf.mxu0 }
 0x4a2   : > { %889 = vrot.lane.b32.xlu1 %v4779_v46, %s4519_s14 }
 0x4a3   : > { %999 = vrot.lane.b32.xlu0 %v4779_v46, %s4518_s15 }
 0x4ea   : > { %v878_v30 = vpop.xlane.xlu0 %877 }
 0x4eb   : > { %v879_v31 = vsub.f32 %v871_v38, %v878_v30 }
 0x4ed   : > { %v880_v32 = vmul.f32 1.442695, %v879_v31 }
 0x4ef   : > { %4260 = vpow2.f32 %v880_v32 }
 0x4f2   : > { %v989_v33 = vpop.xlane.xlu0 %988 }
 0x4f3   : > { %v990_v34 = vsub.f32 %v982_v44, %v989_v33 }
 0x4f5   : > { %v991_v35 = vmul.f32 1.442695, %v990_v34 }
 0x4f7   : > { %4262 = vpow2.f32 %v991_v35 }
 0x4fa   : > { %v1099_v36 = vpop.xlane.xlu1 %1098 }
 0x4fb   : > { %v1100_v39 = vsub.f32 %v1092_v52, %v1099_v36 }
 0x4fc   : > { %v4261_v23 = vpop.eup %4260 }
 0x4fd   : > { %v1101_v40 = vmul.f32 1.442695, %v1100_v39  ;;  %v882_v41 = vsel %vm764_vm6, %v4261_v23, 0.0 }
 0x4fe   : > { %883 = vadd.xlane.f32.xlu1 %v882_v41 }
 0x4ff   : > { %4264 = vpow2.f32 %v1101_v40 }
 0x502   : > { %v1209_v48 = vpop.xlane.xlu0 %1208 }
 0x503   : > { %v1210_v53 = vsub.f32 %v4857_v58, %v1209_v48 }
 0x504   : > { %v4879_v43 = vpop.eup %4262 }
 0x505   : > { %v993_v47 = vsel %vm764_vm6, %v4879_v43, 0.0  ;;  %v1211_v55 = vmul.f32 1.442695, %v1210_v53 }
 0x506   : > { %994 = vadd.xlane.f32.xlu0 %v993_v47 }
 0x50a   : > { %v1319_v51 = vpop.xlane.xlu1 %1318 }
 0x50b   : > { %v1320_v56 = vsub.f32 %v4862_v4, %v1319_v51 }
 0x50c   : > { %v4883_v38 = vpop.eup %4264 }
 0x50d   : > { %v1103_v44 = vsel %vm764_vm6, %v4883_v38, 0.0  ;;  %v1321_v62 = vmul.f32 1.442695, %v1320_v56 }
 0x50e   : > { %1104 = vadd.xlane.f32.xlu1 %v1103_v44 }
 0x512   : > { %v1429_v49 = vpop.xlane.xlu0 %1428 }
 0x513   : > { %v1430_v61 = vsub.f32 %v4867_v11, %v1429_v49 }
 0x515   : > { %v1431_v58 = vmul.f32 1.442695, %v1430_v61 }
 0x516   : > { %v773_v50 = vpop.xlane.xlu0 %772 }
 0x517   : > { %4266 = vrcp.f32 %v773_v50 }
 0x518   : > { %4268 = vpow2.f32 %v1211_v55 }
 0x519   : > { %4270 = vpow2.f32 %v1321_v62 }
 0x51a   : > { %v1539_v52 = vpop.xlane.xlu1 %1538  ;;  %4272 = vpow2.f32 %v1431_v58  ;;  %v1000_v13 = vpop.permute.xlu0 %999 }
 0x51b   : > { %v1540_v63 = vsub.f32 %v1532_v19, %v1539_v52  ;;  %v1005_v19 = vsel %vm780_vm3, %v1000_v13, 0 }
 0x51c   : > { %1109 = vrot.lane.b32.xlu0 %v4779_v46, %s4523_s29 }
 0x51d   : > { %v1541_v2 = vmul.f32 1.442695, %v1540_v63 }
 0x51e   : > { %v890_v59 = vpop.permute.xlu1 %889 }
 0x51f   : > { %1219 = vrot.lane.b32.xlu1 %v4779_v46, %s4524_s13  ;;  %v895_v1 = vsel %vm780_vm3, %v890_v59, 0  ;;  %4274 = vpow2.f32 %v1541_v2 }
 0x524   : > { %v4267_v54 = vpop.eup %4266 }
 0x525   : > { %v775_v57 = vmul.f32 %v4267_v54, %v4259_v15  ;;  %v4269_v3 = vpop.eup %4268 }
 0x526   : > { %v1213_v4 = vsel %vm764_vm6, %v4269_v3, 0.0  ;;  %v4900_v5 = vpop.eup %4270 }
 0x527   : > { %v776_v60 = vpack.c.bf16 %v775_v57, %v775_v57  ;;  %v4902_v7 = vpop.eup %4272  ;;  %v1323_v8 = vsel %vm764_vm6, %v4900_v5, 0.0 }
 0x528   : > { %v1433_v10 = vsel %vm764_vm6, %v4902_v7, 0.0 }
 0x529   : > { %3829 = vmatmul.mubr.msk.bf16.vlgmr.msra.gmra.mxu1 %vm764_vm6, %v776_v60 }
 0x52a   : > { %3839 = vmatpush3.bf16.msra.mxu1 %v895_v1  ;;  %3840 = vmatprep.mubr.msk.bf16.mxu1 %vm4517_vm0, %v4516_v0 }
 0x52b   : > { %3850 = vmatprep.subr.bf16.mxu1 %v4516_v0 }
 0x52c   : > { %v4906_v9 = vpop.eup %4274 }
 0x52d   : > { %v1543_v11 = vsel %vm764_vm6, %v4906_v9, 0.0 }
 0x53b   : > { %1214 = vadd.xlane.f32.xlu0 %v1213_v4 }
 0x53f   : > { %1324 = vadd.xlane.f32.xlu0 %v1323_v8 }
 0x543   : > { %1434 = vadd.xlane.f32.xlu1 %v1433_v10  ;;  %1544 = vadd.xlane.f32.xlu0 %v1543_v11 }
 0x554   : > { %1439 = vrot.lane.b32.xlu1 %v4779_v46, %s5445_s24  ;;  %s5463_s24 = smov 100  }
 0x558   : > { %1549 = vrot.lane.b32.xlu1 %v4779_v46, %s5439_s12  ;;  %s3670_s12 = sshll.u32 %s4615_s21, 7  ;;  %s4533_s21 = smov [#allocation10]  }
 0x559   : > { %1329 = vrot.lane.b32.xlu0 %v4779_v46, %s5447_s16  ;;  %s5462_s16 = smov 104  }
 0x587   : > { %v884_v12 = vpop.xlane.xlu1 %883 }
 0x588   : > { %4276 = vrcp.f32 %v884_v12 }
 0x58f   : > { %v995_v14 = vpop.xlane.xlu0 %994 }
 0x590   : > { %4278 = vrcp.f32 %v995_v14 }
 0x593   : > { %v1110_v21 = vpop.permute.xlu0 %1109 }
 0x594   : > { %v1115_v28 = vsel %vm780_vm3, %v1110_v21, 0  ;;  %v4225_v21 = vld [vmem:[%s5424_s3 + $0x30] sm:$0xff]  }
 0x595   : > { %v4277_v15 = vpop.eup %4276 }
 0x596   : > { %v886_v16 = vmul.f32 %v4277_v15, %v4261_v23 }
 0x597   : > { %v1105_v17 = vpop.xlane.xlu1 %1104 }
 0x598   : > { %4280 = vrcp.f32 %v1105_v17  ;;  %v887_v18 = vpack.c.bf16 %v886_v16, %v886_v16  ;;  %v4224_v17 = vld [vmem:[%s5424_s3 + $0x38] sm:$0xff]  }
 0x599   : > { %3917 = vmatpush3.bf16.msra.mxu0 %v4224_v17  ;;  %v1718_v17 = vsub.s32 6, %v4741_v24 }
 0x59a   : > { %3841 = vmatmul.mubr.msk.bf16.vlgmr.msra.gmra.mxu1 %vm764_vm6, %v887_v18  ;;  %3918 = vmatprep.subr.bf16.mxu0 %v4516_v0 }
 0x59b   : > { %3851 = vmatpush3.bf16.msra.mxu1 %v1005_v19  ;;  %3852 = vmatprep.mubr.msk.bf16.mxu1 %vm4517_vm0, %v4516_v0  ;;  %v1220_v32 = vpop.permute.xlu1 %1219 }
 0x59c   : > { %3862 = vmatprep.subr.bf16.mxu1 %v4516_v0  ;;  %v1225_v34 = vsel %vm780_vm3, %v1220_v32, 0 }
 0x59d   : > { %v4279_v46 = vpop.eup %4278  ;;  %3919 = vmatpush3.bf16.msra.mxu0 %v4225_v21 }
 0x59e   : > { %v997_v20 = vmul.f32 %v4279_v46, %v4879_v43  ;;  %3932 = vmatprep.subr.bf16.mxu0 %v4516_v0 }
 0x5a0   : > { %v998_v22 = vpack.c.bf16 %v997_v20, %v997_v20 }
 0x5a2   : > { %3853 = vmatmul.mubr.msk.bf16.vlgmr.msra.gmra.mxu1 %vm764_vm6, %v998_v22 }
 0x5a3   : > { %3863 = vmatpush3.bf16.msra.mxu1 %v1115_v28  ;;  %3864 = vmatprep.mubr.msk.bf16.mxu1 %vm4517_vm0, %v4516_v0 }
 0x5a4   : > { %3874 = vmatprep.subr.bf16.mxu1 %v4516_v0 }
 0x5a5   : > { %v4281_v30 = vpop.eup %4280 }
 0x5a6   : > { %v1107_v31 = vmul.f32 %v4281_v30, %v4883_v38 }
 0x5a8   : > { %v1108_v33 = vpack.c.bf16 %v1107_v31, %v1107_v31 }
 0x5aa   : > { %3865 = vmatmul.mubr.msk.bf16.vlgmr.msra.gmra.mxu1 %vm764_vm6, %v1108_v33 }
 0x5ab   : > { %3875 = vmatpush3.bf16.msra.mxu1 %v1225_v34  ;;  %3876 = vmatprep.mubr.msk.bf16.mxu1 %vm4517_vm0, %v4516_v0 }
 0x5ac   : > { %3886 = vmatprep.subr.bf16.mxu1 %v4516_v0 }
 0x5c4   : > { %v1215_v35 = vpop.xlane.xlu0 %1214 }
 0x5c5   : > { %4282 = vrcp.f32 %v1215_v35 }
 0x5c8   : > { %v1325_v36 = vpop.xlane.xlu0 %1324 }
 0x5c9   : > { %4284 = vrcp.f32 %v1325_v36 }
 0x5cc   : > { %v1545_v39 = vpop.xlane.xlu0 %1544  ;;  %v1435_v23 = vpop.xlane.xlu1 %1434 }
 0x5cd   : > { %4286 = vrcp.f32 %v1435_v23 }
 0x5ce   : > { %4288 = vrcp.f32 %v1545_v39 }
 0x5d0   : > { %v1330_v43 = vpop.permute.xlu0 %1329  ;;  %v1440_v49 = vpop.permute.xlu1 %1439 }
 0x5d1   : > { %v1335_v44 = vsel %vm780_vm3, %v1330_v43, 0  ;;  %v1445_v52 = vsel %vm780_vm3, %v1440_v49, 0 }
 0x5d2   : > { %v4283_v40 = vpop.eup %4282 }
 0x5d3   : > { %v1217_v41 = vmul.f32 %v4283_v40, %v4269_v3 }
 0x5d4   : > { %v1550_v54 = vpop.permute.xlu1 %1549 }
 0x5d5   : > { %v1218_v47 = vpack.c.bf16 %v1217_v41, %v1217_v41  ;;  %v1555_v57 = vsel %vm780_vm3, %v1550_v54, 0 }
 0x5d6   : > { %v4285_v38 = vpop.eup %4284 }
 0x5d7   : > { %3877 = vmatmul.mubr.msk.bf16.vlgmr.msra.gmra.mxu1 %vm764_vm6, %v1218_v47  ;;  %v1327_v48 = vmul.f32 %v4285_v38, %v4900_v5 }
 0x5d8   : > { %3887 = vmatpush3.bf16.msra.mxu1 %v1335_v44  ;;  %3888 = vmatprep.mubr.msk.bf16.mxu1 %vm4517_vm0, %v4516_v0 }
 0x5d9   : > { %3898 = vmatprep.subr.bf16.mxu1 %v4516_v0  ;;  %v1328_v50 = vpack.c.bf16 %v1327_v48, %v1327_v48 }
 0x5da   : > { %v4287_v51 = vpop.eup %4286 }
 0x5db   : > { %v1437_v53 = vmul.f32 %v4287_v51, %v4902_v7  ;;  %v4289_v56 = vpop.eup %4288 }
 0x5dc   : > { %v1547_v59 = vmul.f32 %v4289_v56, %v4906_v9 }
 0x5dd   : > { %v1438_v55 = vpack.c.bf16 %v1437_v53, %v1437_v53 }
 0x5de   : > { %v1548_v62 = vpack.c.bf16 %v1547_v59, %v1547_v59 }
 0x5df   : > { %3889 = vmatmul.mubr.msk.bf16.vlgmr.msra.gmra.mxu1 %vm764_vm6, %v1328_v50 }
 0x5e0   : > { %3899 = vmatpush3.bf16.msra.mxu1 %v1445_v52  ;;  %3900 = vmatprep.mubr.msk.bf16.mxu1 %vm4517_vm0, %v4516_v0 }
 0x5e1   : > { %3910 = vmatprep.subr.bf16.mxu1 %v4516_v0 }
 0x5e7   : > { %3901 = vmatmul.mubr.msk.bf16.vlgmr.msra.gmra.mxu1 %vm764_vm6, %v1438_v55  ;;  %v1700_v55 = vsub.s32 5, %v4741_v24 }
 0x5e8   : > { %3911 = vmatpush3.bf16.msra.mxu1 %v1555_v57  ;;  %3912 = vmatprep.mubr.msk.bf16.mxu1 %vm4517_vm0, %v4516_v0 }
 0x5e9   : > { %3924 = vmatprep.subr.bf16.mxu1 %v4516_v0  ;;  %v818_v60 = vpop.f32.mrf.mxu1  ;;  %v1701_v56 = vrot.slane %v4747_v26, %v1700_v55 }
 0x5eb   : > { %v3830_v61 = vpop.f32.mrf.mxu1 }
 0x5ed   : > { %v821_v63 = vpop.f32.mrf.mxu1 }
 0x5ef   : > { %3913 = vmatmul.mubr.msk.bf16.vlgmr.msra.gmra.mxu1 %vm764_vm6, %v1548_v62  ;;  %v3831_v1 = vpop.f32.mrf.mxu1 }
 0x5f0   : > { %3928 = vmatprep.mubr.msk.bf16.mxu1 %vm4517_vm0, %v4516_v0 }
 0x65a   : > { %v931_v58 = vpop.f32.mrf.mxu1 }
 0x65b   : > { %1598 = vrot.lane.b32.xlu1 %v931_v58, %s5436_s22  ;;  %s5442_s22 = smov 24  }
 0x65c   : > { %v3842_v2 = vpop.f32.mrf.mxu1 }
 0x65e   : > { %v934_v3 = vpop.f32.mrf.mxu1 }
 0x660   : > { %v3843_v4 = vpop.f32.mrf.mxu1 }
 0x662   : > { %v1041_v5 = vpop.f32.mrf.mxu1 }
 0x663   : > { %1602 = vrot.lane.b32.xlu1 %v1041_v5, %s5437_s26  ;;  %s5443_s26 = smov 20  }
 0x664   : > { %v3854_v7 = vpop.f32.mrf.mxu1 }
 0x665   : > { %v4227_v7 = vld [vmem:[%s5425_s4] sm:$0xff]  }
 0x666   : > { %v1044_v8 = vpop.f32.mrf.mxu1 }
 0x667   : > { %v4228_v8 = vld [vmem:[%s5427_s6 + $0x38] sm:$0xff]  }
 0x668   : > { %v3855_v9 = vpop.f32.mrf.mxu1 }
 0x669   : > { %v4229_v9 = vld [vmem:[%s5427_s6 + $0x30] sm:$0xff]  }
 0x66a   : > { %v1151_v10 = vpop.f32.mrf.mxu1 }
 0x66b   : > { %1606 = vrot.lane.b32.xlu0 %v1151_v10, %s5438_s25  ;;  %v4230_v10 = vld [vmem:[%s5427_s6 + $0x28] sm:$0xff]  }
 0x66c   : > { %v3866_v11 = vpop.f32.mrf.mxu1 }
 0x66d   : > { %v4231_v11 = vld [vmem:[%s5427_s6 + $0x20] sm:$0xff]  }
 0x66e   : > { %v1154_v12 = vpop.f32.mrf.mxu1 }
 0x66f   : > { %v4232_v12 = vld [vmem:[%s5427_s6 + $0x18] sm:$0xff]  }
 0x670   : > { %v3867_v13 = vpop.f32.mrf.mxu1 }
 0x671   : > { %v4233_v13 = vld [vmem:[%s5427_s6 + $0x10] sm:$0xff]  }
 0x697   : > { %v1261_v14 = vpop.f32.mrf.mxu1 }
 0x698   : > { %1610 = vrot.lane.b32.xlu1 %v1261_v14, %s5444_s19 }
 0x699   : > { %v3878_v15 = vpop.f32.mrf.mxu1 }
 0x69b   : > { %v1264_v16 = vpop.f32.mrf.mxu1 }
 0x69d   : > { %v3879_v18 = vpop.f32.mrf.mxu1 }
 0x69e   : > { %v1723_v18 = vsub.s32 7, %v4741_v24  ;;  %v4253_v24 = vld [vmem:[%s5427_s6 + $0x40] sm:$0xff]  }
 0x69f   : > { %v1371_v19 = vpop.f32.mrf.mxu1 }
 0x6a0   : > { %1614 = vrot.lane.b32.xlu0 %v1371_v19, %s5443_s26  ;;  %v1719_v19 = vrot.slane %v4747_v26, %v1718_v17  ;;  %v1724_v21 = vrot.slane %v4747_v26, %v1723_v18  ;;  %v3571_v26 = vld [vmem:[#allocation7] ss:$0 sm:$0xff]  ;;  %s5461_s26 = smov 108  }
 0x6a1   : > { %v3890_v46 = vpop.f32.mrf.mxu1 }
 0x6a3   : > { %v1374_v20 = vpop.f32.mrf.mxu1 }
 0x6a5   : > { %v3891_v22 = vpop.f32.mrf.mxu1 }
 0x6a7   : > { %v1481_v28 = vpop.f32.mrf.mxu1 }
 0x6a8   : > { %1618 = vrot.lane.b32.xlu1 %v1481_v28, %s5442_s22  ;;  %s5468_s22 = smov 20  }
 0x6a9   : > { %v3902_v30 = vpop.f32.mrf.mxu1 }
 0x6ab   : > { %v1484_v31 = vpop.f32.mrf.mxu1 }
 0x6ac   : > { %v4234_v31 = vld [vmem:[%s5427_s6 + $0x8] sm:$0xff]  }
 0x6ad   : > { %v3903_v32 = vpop.f32.mrf.mxu1 }
 0x6ae   : > { %v4235_v32 = vld [vmem:[%s5427_s6] sm:$0xff]  }
 0x6af   : > { %v1591_v33 = vpop.f32.mrf.mxu1 }
 0x6b0   : > { %1622 = vrot.lane.b32.xlu0 %v1591_v33, %s5441_s30 }
 0x6b1   : > { %v3914_v34 = vpop.f32.mrf.mxu1 }
 0x6b3   : > { %v1594_v35 = vpop.f32.mrf.mxu1 }
 0x6b5   : > { %v3915_v36 = vpop.f32.mrf.mxu1 }
 0x6cd   : > { %v1599_v39 = vpop.permute.xlu1 %1598 }
 0x6ce   : > { %v1625_v43 = vsel %vm717_vm4, %v818_v60, %v1599_v39 }
 0x6d5   : > { %v1603_v23 = vpop.permute.xlu1 %1602 }
 0x6d6   : > { %v1626_v47 = vsel %vm764_vm6, %v1625_v43, %v1603_v23 }
 0x6dd   : > { %v1607_v40 = vpop.permute.xlu0 %1606 }
 0x6de   : > { %v1628_v44 = vsel %vm1627_vm7, %v1626_v47, %v1607_v40 }
 0x70a   : > { %v1611_v41 = vpop.permute.xlu1 %1610 }
 0x70b   : > { %v1629_v49 = vsel %vm457_vm1, %v1628_v44, %v1611_v41  ;;  %v3575_v41 = vld [vmem:[%s5428_s7 + $0x8] ss:$0 sm:$0xff] }
 0x712   : > { %v1615_v38 = vpop.permute.xlu0 %1614 }
 0x713   : > { %v1631_v50 = vsel %vm1630_vm8, %v1629_v49, %v1615_v38 }
 0x71a   : > { %v1619_v48 = vpop.permute.xlu1 %1618 }
 0x71b   : > { %v1633_v51 = vsel %vm1632_vm9, %v1631_v50, %v1619_v48 }
 0x722   : > { %v1623_v52 = vpop.permute.xlu0 %1622 }
 0x723   : > { %v1635_v53 = vsel %vm1634_vm10, %v1633_v51, %v1623_v52 }
 0x724   : > { %v1636_v54 = vpack.c.bf16 %v1635_v53, %v1635_v53 }
 0x726   : > { %3921 = vmatmul.mubr.msk.bf16.vlgmr.msra.gmra.mxu0 %vm503_vm2, %v1636_v54 }
 0x727   : > { %3948 = vmatprep.mubr.msk.bf16.mxu0 %vm4517_vm0, %v4516_v0  ;;  %3933 = vmatpush3.bf16.msra.mxu0 %v4228_v8  ;;  %v4241_v8 = vld [vmem:[%s5424_s3 + $0x60] sm:$0xff]  }
 0x728   : > { %3934 = vmatprep.subr.bf16.mxu0 %v4516_v0 }
 0x72b   : > { %3935 = vmatpush3.bf16.msra.mxu0 %v4229_v9 }
 0x72c   : > { %3936 = vmatprep.subr.bf16.mxu0 %v4516_v0 }
 0x72f   : > { %3937 = vmatpush3.bf16.msra.mxu0 %v4230_v10 }
 0x730   : > { %3938 = vmatprep.subr.bf16.mxu0 %v4516_v0 }
 0x733   : > { %3939 = vmatpush3.bf16.msra.mxu0 %v4231_v11 }
 0x734   : > { %3940 = vmatprep.subr.bf16.mxu0 %v4516_v0 }
 0x737   : > { %3941 = vmatpush3.bf16.msra.mxu0 %v4232_v12 }
 0x738   : > { %3942 = vmatprep.subr.bf16.mxu0 %v4516_v0 }
 0x73b   : > { %3943 = vmatpush3.bf16.msra.mxu0 %v4233_v13 }
 0x73c   : > { %3944 = vmatprep.subr.bf16.mxu0 %v4516_v0 }
 0x73f   : > { %3945 = vmatpush3.bf16.msra.mxu0 %v4234_v31 }
 0x740   : > { %3946 = vmatprep.subr.bf16.mxu0 %v4516_v0 }
 0x743   : > { %3947 = vmatpush3.bf16.msra.mxu0 %v4235_v32 }
 0x744   : > { %3982 = vmatprep.subr.bf16.mxu0 %v4516_v0 }
 0x7e6   : > { %v1691_v57 = vpop.f32.mrf.mxu0 }
 0x7e7   : > { %v1697_v59 = vadd.f32 %v1691_v57, %v4718_v6  ;;  %v4226_v6 = vld [vmem:[%s5425_s4 + $0x8] sm:$0xff]  }
 0x7e8   : > { %v3922_v60 = vpop.f32.mrf.mxu0  ;;  %3925 = vmatpush3.bf16.msra.mxu1 %v4226_v6  ;;  %v4236_v57 = vld [vmem:[%s5424_s3 + $0x48] sm:$0xff]   ;;  %v4238_v6 = vld [vmem:[%s5424_s3 + $0x58] sm:$0xff]  }
 0x7e9   : > { %v4986_v61 = vadd.f32 %v1701_v56, %v1697_v59  ;;  %3926 = vmatprep.subr.bf16.mxu1 %v4516_v0  ;;  %v4237_v59 = vld [vmem:[%s5424_s3 + $0x40] sm:$0xff]  }
 0x7ea   : > { %v1694_v62 = vpop.f32.mrf.mxu0 }
 0x7eb   : > { %v1703_v63 = vsel %vm503_vm2, %v4986_v61, 0.0 }
 0x7ec   : > { %1704 = vadd.xlane.f32.xlu1 %v1703_v63  ;;  %v3923_v1 = vpop.f32.mrf.mxu0  ;;  %3927 = vmatpush3.bf16.msra.mxu1 %v4227_v7  ;;  %v5066_v63 = vld [vmem:[%s5428_s7 + $0x10] sm:$0xff] }
 0x7ed   : > { %3952 = vmatprep.subr.bf16.mxu1 %v4516_v0  ;;  %v1923_v1 = vrot.slane %v5066_v63, %v520_v25  ;;  %v4239_v25 = vld [vmem:[%s5424_s3 + $0x50] sm:$0xff]   ;;  %v1939_v9 = vrot.slane %v5066_v63, %v535_v45 }
 0x875   : > { %v1705_v58 = vpop.xlane.xlu1 %1704 }
 0x876   : > { %v1706_v2 = vmul.f32 0.03125, %v1705_v58 }
 0x878   : > { %v1707_v3 = vsub.f32 %v4986_v61, %v1706_v2 }
 0x87a   : > { %v1708_v4 = vmul.f32 %v1707_v3, %v1707_v3 }
 0x87c   : > { %v1709_v5 = vsel %vm503_vm2, %v1708_v4, 0.0 }
 0x87d   : > { %1710 = vadd.xlane.f32.xlu0 %v1709_v5 }
 0x906   : > { %v1711_v14 = vpop.xlane.xlu0 %1710 }
 0x907   : > { %v1712_v15 = vmul.f32 0.03125, %v1711_v14 }
 0x909   : > { %v1713_v16 = vadd.f32 1e-05, %v1712_v15  ;;  %v2003_v15 = vrot.slane %v5066_v63, %v599_v42 }
 0x90b   : > { %4290 = vrsqrt.f32 %v1713_v16 }
 0x918   : > { %v4291_v46 = vpop.eup %4290 }
 0x919   : > { %v1715_v20 = vmul.f32 %v4291_v46, %v1707_v3  ;;  %v1928_v3 = vrot.slane %v5066_v63, %v525_v27  ;;  %v4240_v27 = vld [vmem:[%s5424_s3 + $0x68] sm:$0xff]  }
 0x91b   : > { %v1720_v22 = vmul.f32 %v1719_v19, %v1715_v20 }
 0x91d   : > { %v1725_v28 = vadd.f32 %v1724_v21, %v1720_v22 }
 0x91f   : > { %v1726_v30 = vpack.c.bf16 %v1725_v28, %v1725_v28  ;;  %v2064_v28 = vrot.slane %v5066_v63, %v660_v37 }
 0x921   : > { %3929 = vmatmul.mubr.msk.bf16.vlgmr.msra.gmra.mxu1 %vm503_vm2, %v1726_v30 }
 0x922   : > { %3956 = vmatprep.mubr.msk.bf16.mxu1 %vm4517_vm0, %v4516_v0  ;;  %3953 = vmatpush3.bf16.msra.mxu1 %v4236_v57 }
 0x923   : > { %3954 = vmatprep.subr.bf16.mxu1 %v4516_v0 }
 0x926   : > { %3955 = vmatpush3.bf16.msra.mxu1 %v4237_v59 }
 0x927   : > { %3960 = vmatprep.subr.bf16.mxu1 %v4516_v0 }
 0x9e1   : > { %v1787_v33 = vpop.f32.mrf.mxu1 }
 0x9e2   : > { %v1788_v34 = vadd.f32 %v3571_v26, %v1787_v33 }
 0x9e3   : > { %v3930_v35 = vpop.f32.mrf.mxu1 }
 0x9e4   : > { %v1793_v36 = vmax.f32 %v1788_v34, 0.0 }
 0x9e5   : > { %v1790_v39 = vpop.f32.mrf.mxu1 }
 0x9e6   : > { %v1794_v23 = vpack.c.bf16 %v1793_v36, %v1793_v36 }
 0x9e7   : > { %v3931_v40 = vpop.f32.mrf.mxu1 }
 0x9e8   : > { %3949 = vmatmul.mubr.bf16.vlgmr.msra.gmra.mxu0 %v1794_v23 }
 0x9e9   : > { %3984 = vmatprep.mubr.msk.bf16.mxu0 %vm4517_vm0, %v4516_v0 }
 0xaa8   : > { %v1897_v43 = vpop.f32.mrf.mxu0 }
 0xaa9   : > { %v1898_v47 = vadd.f32 %v3575_v41, %v1897_v43 }
 0xaaa   : > { %v3950_v38 = vpop.f32.mrf.mxu0 }
 0xaab   : > { %v5049_v44 = vadd.f32 %v1898_v47, %v4986_v61 }
 0xaac   : > { %v1900_v48 = vpop.f32.mrf.mxu0 }
 0xaad   : > { %v1907_v49 = vsel %vm503_vm2, %v5049_v44, 0.0 }
 0xaae   : > { %1908 = vadd.xlane.f32.xlu0 %v1907_v49  ;;  %v3951_v50 = vpop.f32.mrf.mxu0 }
 0xb37   : > { %v1909_v51 = vpop.xlane.xlu0 %1908 }
 0xb38   : > { %v1910_v52 = vmul.f32 0.03125, %v1909_v51 }
 0xb3a   : > { %v1911_v53 = vsub.f32 %v5049_v44, %v1910_v52 }
 0xb3c   : > { %v1912_v54 = vmul.f32 %v1911_v53, %v1911_v53 }
 0xb3e   : > { %v1913_v56 = vsel %vm503_vm2, %v1912_v54, 0.0 }
 0xb3f   : > { %1914 = vadd.xlane.f32.xlu1 %v1913_v56 }
 0xbc8   : > { %v1915_v60 = vpop.xlane.xlu1 %1914 }
 0xbc9   : > { %v1916_v61 = vmul.f32 0.03125, %v1915_v60 }
 0xbcb   : > { %v1917_v62 = vadd.f32 1e-05, %v1916_v61 }
 0xbcd   : > { %4292 = vrsqrt.f32 %v1917_v62 }
 0xbda   : > { %v4293_v58 = vpop.eup %4292 }
 0xbdb   : > { %v1919_v2 = vmul.f32 %v4293_v58, %v1911_v53 }
 0xbdd   : > { %v1924_v4 = vmul.f32 %v1923_v1, %v1919_v2 }
 0xbdf   : > { %v1929_v5 = vadd.f32 %v1928_v3, %v1924_v4 }
 0xbe1   : > { %v1930_v7 = vpack.c.bf16 %v1929_v5, %v1929_v5 }
 0xbe3   : > { %3957 = vmatmul.mubr.msk.bf16.vlgmr.msra.gmra.mxu1 %vm503_vm2, %v1930_v7 }
 0xbe4   : > { %3961 = vmatpush3.bf16.msra.mxu1 %v4238_v6  ;;  %3964 = vmatprep.mubr.msk.bf16.mxu1 %vm4517_vm0, %v4516_v0 }
 0xbe5   : > { %3962 = vmatprep.subr.bf16.mxu1 %v4516_v0 }
 0xbe8   : > { %3963 = vmatpush3.bf16.msra.mxu1 %v4239_v25 }
 0xbe9   : > { %3968 = vmatprep.subr.bf16.mxu1 %v4516_v0 }
 0xbeb   : > { %3965 = vmatmul.mubr.msk.bf16.vlgmr.msra.gmra.mxu1 %vm503_vm2, %v1930_v7 }
 0xbec   : > { %3969 = vmatpush3.bf16.msra.mxu1 %v4240_v27  ;;  %3972 = vmatprep.mubr.msk.bf16.mxu1 %vm4517_vm0, %v4516_v0 }
 0xbed   : > { %3970 = vmatprep.subr.bf16.mxu1 %v4516_v0 }
 0xbf0   : > { %3971 = vmatpush3.bf16.msra.mxu1 %v4241_v8 }
 0xbf1   : > { %3976 = vmatprep.subr.bf16.mxu1 %v4516_v0 }
 0xbf3   : > { %3973 = vmatmul.mubr.msk.bf16.vlgmr.msra.gmra.mxu1 %vm503_vm2, %v1930_v7 }
 0xbf4   : > { %3978 = vmatprep.mubr.msk.bf16.mxu1 %vm4517_vm0, %v4516_v0 }
 0xca3   : > { %v1989_v10 = vpop.f32.mrf.mxu1 }
 0xca4   : > { %v1990_v11 = vadd.f32 %v1989_v10, %v1939_v9 }
 0xca5   : > { %v3958_v12 = vpop.f32.mrf.mxu1 }
 0xca6   : > { %v2117_v13 = vpack.c.bf16 %v1990_v11, %v1990_v11 }
 0xca7   : > { %v1992_v14 = vpop.f32.mrf.mxu1 }
 0xca8   : > { %2225 = vrot.lane.b32.xlu1 %v2117_v13, %s4519_s14 }
 0xca9   : > { %v3959_v16 = vpop.f32.mrf.mxu1 }
 0xcab   : > { %v2050_v19 = vpop.f32.mrf.mxu1 }
 0xcac   : > { %v2051_v46 = vadd.f32 %v2050_v19, %v2003_v15 }
 0xcad   : > { %v3966_v20 = vpop.f32.mrf.mxu1 }
 0xcae   : > { %v2118_v21 = vpack.c.bf16 %v2051_v46, %v2051_v46 }
 0xcaf   : > { %v2053_v22 = vpop.f32.mrf.mxu1 }
 0xcb0   : > { %2339 = vrot.lane.b32.xlu1 %v2118_v21, %s4518_s15  ;;  %2228 = vrot.lane.b32.xlu0 %v2118_v21, %s4519_s14  ;;  %v2124_v45 = vsel %vm717_vm4, %v2118_v21, 0 }
 0xcb1   : > { %v3967_v30 = vpop.f32.mrf.mxu1  ;;  %3977 = vmatpush3.bf16.xpose.msra.mxu1 %v2124_v45 }
 0xcb2   : > { %3988 = vmatprep.subr.bf16.mxu1 %v4516_v0 }
 0xcb3   : > { %v2111_v42 = vpop.f32.mrf.mxu1 }
 0xcb4   : > { %v2112_v31 = vadd.f32 %v2111_v42, %v2064_v28  ;;  %2449 = vrot.lane.b32.xlu1 %v2118_v21, %s4523_s29  ;;  %2337 = vrot.lane.b32.xlu0 %v2117_v13, %s4518_s15 }
 0xcb5   : > { %v3974_v32 = vpop.f32.mrf.mxu1 }
 0xcb6   : > { %v5115_v26 = vpack.c.bf16 %v2112_v31, %v2112_v31 }
 0xcb7   : > { %v2114_v33 = vpop.f32.mrf.mxu1 }
 0xcb8   : > { %2559 = vrot.lane.b32.xlu1 %v2118_v21, %s4524_s13  ;;  %2447 = vrot.lane.b32.xlu0 %v2117_v13, %s4523_s29  ;;  %v2182_v37 = vsel %vm780_vm3, %v5115_v26, 0 }
 0xcb9   : > { %3979 = vmatmul.mubr.msk.bf16.vlgmr.msra.gmra.mxu1 %vm717_vm4, %v2117_v13  ;;  %v3975_v34 = vpop.f32.mrf.mxu1  ;;  %3983 = vmatpush3.bf16.msra.mxu0 %v2182_v37 }
 0xcba   : > { %3990 = vmatprep.mubr.msk.bf16.mxu1 %vm4517_vm0, %v4516_v0  ;;  %3994 = vmatprep.subr.bf16.mxu0 %v4516_v0 }
 0xcbc   : > { %2669 = vrot.lane.b32.xlu1 %v2118_v21, %s5461_s26  ;;  %2557 = vrot.lane.b32.xlu0 %v2117_v13, %s4524_s13 }
 0xcc0   : > { %2779 = vrot.lane.b32.xlu1 %v2118_v21, %s5462_s16  ;;  %2667 = vrot.lane.b32.xlu0 %v2117_v13, %s5461_s26 }
 0xcc4   : > { %2889 = vrot.lane.b32.xlu1 %v2118_v21, %s5463_s24  ;;  %2777 = vrot.lane.b32.xlu0 %v2117_v13, %s5462_s16 }
 0xcc8   : > { %2887 = vrot.lane.b32.xlu0 %v2117_v13, %s5463_s24 }
 0xd1a   : > { %v2226_v39 = vpop.permute.xlu1 %2225 }
 0xd22   : > { %v2229_v35 = vpop.permute.xlu0 %2228  ;;  %v2340_v23 = vpop.permute.xlu1 %2339 }
 0xd23   : > { %v2234_v36 = vsel %vm717_vm4, %v2229_v35, 0  ;;  %v2345_v40 = vsel %vm717_vm4, %v2340_v23, 0 }
 0xd24   : > { %3989 = vmatpush3.bf16.xpose.msra.mxu1 %v2234_v36 }
 0xd25   : > { %4000 = vmatprep.subr.bf16.mxu1 %v4516_v0 }
 0xd26   : > { %v2450_v41 = vpop.permute.xlu1 %2449  ;;  %v2338_v43 = vpop.permute.xlu0 %2337 }
 0xd27   : > { %v2455_v47 = vsel %vm717_vm4, %v2450_v41, 0 }
 0xd2a   : > { %v2560_v38 = vpop.permute.xlu1 %2559  ;;  %v2448_v48 = vpop.permute.xlu0 %2447 }
 0xd2b   : > { %3991 = vmatmul.mubr.msk.bf16.vlgmr.msra.gmra.mxu1 %vm717_vm4, %v2226_v39  ;;  %v2565_v49 = vsel %vm717_vm4, %v2560_v38, 0 }
 0xd2c   : > { %4001 = vmatpush3.bf16.xpose.msra.mxu1 %v2345_v40  ;;  %4002 = vmatprep.mubr.msk.bf16.mxu1 %vm4517_vm0, %v4516_v0 }
 0xd2d   : > { %4012 = vmatprep.subr.bf16.mxu1 %v4516_v0 }
 0xd2e   : > { %v2670_v50 = vpop.permute.xlu1 %2669  ;;  %v2558_v51 = vpop.permute.xlu0 %2557 }
 0xd2f   : > { %v2675_v52 = vsel %vm717_vm4, %v2670_v50, 0 }
 0xd32   : > { %v2780_v53 = vpop.permute.xlu1 %2779  ;;  %v2668_v54 = vpop.permute.xlu0 %2667 }
 0xd33   : > { %4003 = vmatmul.mubr.msk.bf16.vlgmr.msra.gmra.mxu1 %vm717_vm4, %v2338_v43  ;;  %v2785_v56 = vsel %vm717_vm4, %v2780_v53, 0 }
 0xd34   : > { %4013 = vmatpush3.bf16.xpose.msra.mxu1 %v2455_v47  ;;  %4014 = vmatprep.mubr.msk.bf16.mxu1 %vm4517_vm0, %v4516_v0 }
 0xd35   : > { %4024 = vmatprep.subr.bf16.mxu1 %v4516_v0 }
 0xd36   : > { %v2890_v57 = vpop.permute.xlu1 %2889  ;;  %v2778_v59 = vpop.permute.xlu0 %2777 }
 0xd37   : > { %v2895_v60 = vsel %vm717_vm4, %v2890_v57, 0 }
 0xd3a   : > { %v2888_v61 = vpop.permute.xlu0 %2887 }
 0xd3b   : > { %4015 = vmatmul.mubr.msk.bf16.vlgmr.msra.gmra.mxu1 %vm717_vm4, %v2448_v48 }
 0xd3c   : > { %4025 = vmatpush3.bf16.xpose.msra.mxu1 %v2565_v49  ;;  %4026 = vmatprep.mubr.msk.bf16.mxu1 %vm4517_vm0, %v4516_v0 }
 0xd3d   : > { %4036 = vmatprep.subr.bf16.mxu1 %v4516_v0 }
 0xd43   : > { %4027 = vmatmul.mubr.msk.bf16.vlgmr.msra.gmra.mxu1 %vm717_vm4, %v2558_v51 }
 0xd44   : > { %4037 = vmatpush3.bf16.xpose.msra.mxu1 %v2675_v52  ;;  %4038 = vmatprep.mubr.msk.bf16.mxu1 %vm4517_vm0, %v4516_v0 }
 0xd45   : > { %4048 = vmatprep.subr.bf16.mxu1 %v4516_v0 }
 0xd4b   : > { %4039 = vmatmul.mubr.msk.bf16.vlgmr.msra.gmra.mxu1 %vm717_vm4, %v2668_v54 }
 0xd4c   : > { %4049 = vmatpush3.bf16.xpose.msra.mxu1 %v2785_v56  ;;  %4050 = vmatprep.mubr.msk.bf16.mxu1 %vm4517_vm0, %v4516_v0 }
 0xd4d   : > { %4060 = vmatprep.subr.bf16.mxu1 %v4516_v0 }
 0xd53   : > { %4051 = vmatmul.mubr.msk.bf16.vlgmr.msra.gmra.mxu1 %vm717_vm4, %v2778_v59 }
 0xd54   : > { %4061 = vmatpush3.bf16.xpose.msra.mxu1 %v2895_v60  ;;  %4062 = vmatprep.mubr.msk.bf16.mxu1 %vm4517_vm0, %v4516_v0 }
 0xd55   : > { %4072 = vmatprep.subr.bf16.mxu1 %v4516_v0 }
 0xd5b   : > { %4063 = vmatmul.mubr.msk.bf16.vlgmr.msra.gmra.mxu1 %vm717_vm4, %v2888_v61 }
 0xd5c   : > { %4076 = vmatprep.mubr.msk.bf16.mxu1 %vm4517_vm0, %v4516_v0 }
 0xd79   : > { %v2160_v62 = vpop.f32.mrf.mxu1 }
 0xd7a   : > { %v2161_v1 = vadd.f32 %v2160_v62, %v4846_v29 }
 0xd7b   : > { %v3980_v58 = vpop.f32.mrf.mxu1 }
 0xd7c   : > { %v2166_v2 = vsel %vm764_vm6, %v2161_v1, -inf }
 0xd7d   : > { %2167 = vmax.xlane.f32.xlu1 %v2166_v2  ;;  %v2163_v3 = vpop.f32.mrf.mxu1 }
 0xd7f   : > { %v3981_v4 = vpop.f32.mrf.mxu1 }
 0xdeb   : > { %v2270_v5 = vpop.f32.mrf.mxu1 }
 0xdec   : > { %v2271_v6 = vadd.f32 %v2270_v5, %v4846_v29 }
 0xded   : > { %v3992_v7 = vpop.f32.mrf.mxu1 }
 0xdee   : > { %v2276_v25 = vsel %vm764_vm6, %v2271_v6, -inf }
 0xdef   : > { %2277 = vmax.xlane.f32.xlu0 %v2276_v25  ;;  %v2273_v27 = vpop.f32.mrf.mxu1 }
 0xdf1   : > { %v3993_v8 = vpop.f32.mrf.mxu1 }
 0xdf3   : > { %v2381_v9 = vpop.f32.mrf.mxu1 }
 0xdf4   : > { %v2382_v10 = vadd.f32 %v2381_v9, %v4846_v29 }
 0xdf5   : > { %v4004_v11 = vpop.f32.mrf.mxu1 }
 0xdf6   : > { %v2387_v12 = vsel %vm764_vm6, %v2382_v10, -inf }
 0xdf7   : > { %2388 = vmax.xlane.f32.xlu0 %v2387_v12  ;;  %v2384_v13 = vpop.f32.mrf.mxu1 }
 0xdf9   : > { %v4005_v14 = vpop.f32.mrf.mxu1 }
 0xdfb   : > { %v2491_v15 = vpop.f32.mrf.mxu1 }
 0xdfc   : > { %v2492_v16 = vadd.f32 %v2491_v15, %v4846_v29 }
 0xdfd   : > { %v4016_v19 = vpop.f32.mrf.mxu1 }
 0xdfe   : > { %v2497_v46 = vsel %vm764_vm6, %v2492_v16, -inf }
 0xdff   : > { %2498 = vmax.xlane.f32.xlu1 %v2497_v46  ;;  %v2494_v20 = vpop.f32.mrf.mxu1 }
 0xe01   : > { %v4017_v21 = vpop.f32.mrf.mxu1 }
 0xe03   : > { %v2601_v22 = vpop.f32.mrf.mxu1 }
 0xe04   : > { %v5176_v45 = vadd.f32 %v2601_v22, %v4846_v29 }
 0xe05   : > { %v4028_v28 = vpop.f32.mrf.mxu1 }
 0xe06   : > { %v2168_v30 = vpop.xlane.xlu1 %2167  ;;  %v2607_v42 = vsel %vm764_vm6, %v5176_v45, -inf }
 0xe07   : > { %v2169_v31 = vsub.f32 %v2161_v1, %v2168_v30  ;;  %2608 = vmax.xlane.f32.xlu0 %v2607_v42  ;;  %v2604_v32 = vpop.f32.mrf.mxu1 }
 0xe09   : > { %v2170_v33 = vmul.f32 1.442695, %v2169_v31  ;;  %v4029_v37 = vpop.f32.mrf.mxu1 }
 0xe0b   : > { %4294 = vpow2.f32 %v2170_v33  ;;  %v2711_v34 = vpop.f32.mrf.mxu1 }
 0xe0c   : > { %v5181_v35 = vadd.f32 %v2711_v34, %v4846_v29 }
 0xe0d   : > { %v4040_v36 = vpop.f32.mrf.mxu1 }
 0xe0e   : > { %v2717_v39 = vsel %vm764_vm6, %v5181_v35, -inf }
 0xe0f   : > { %2718 = vmax.xlane.f32.xlu1 %v2717_v39  ;;  %v2714_v23 = vpop.f32.mrf.mxu1 }
 0xe11   : > { %v4041_v40 = vpop.f32.mrf.mxu1 }
 0xe13   : > { %v2821_v41 = vpop.f32.mrf.mxu1 }
 0xe14   : > { %v5186_v43 = vadd.f32 %v2821_v41, %v4846_v29 }
 0xe15   : > { %v4052_v47 = vpop.f32.mrf.mxu1 }
 0xe16   : > { %v2827_v38 = vsel %vm764_vm6, %v5186_v43, -inf }
 0xe17   : > { %2828 = vmax.xlane.f32.xlu0 %v2827_v38  ;;  %v2824_v48 = vpop.f32.mrf.mxu1 }
 0xe18   : > { %v4295_v49 = vpop.eup %4294 }
 0xe19   : > { %v4053_v50 = vpop.f32.mrf.mxu1  ;;  %v2172_v51 = vsel %vm764_vm6, %v4295_v49, 0.0 }
 0xe1b   : > { %2173 = vadd.xlane.f32.xlu0 %v2172_v51  ;;  %v2931_v52 = vpop.f32.mrf.mxu1 }
 0xe1c   : > { %v2932_v53 = vadd.f32 %v2931_v52, %v4846_v29 }
 0xe1d   : > { %v4064_v54 = vpop.f32.mrf.mxu1 }
 0xe1e   : > { %v2937_v56 = vsel %vm764_vm6, %v2932_v53, -inf }
 0xe1f   : > { %2938 = vmax.xlane.f32.xlu1 %v2937_v56  ;;  %v2934_v57 = vpop.f32.mrf.mxu1 }
 0xe21   : > { %v4065_v59 = vpop.f32.mrf.mxu1 }
 0xe30   : > { %2289 = vrot.lane.b32.xlu1 %v5115_v26, %s4519_s14  ;;  %s5465_s14 = smov 8  }
 0xe31   : > { %2399 = vrot.lane.b32.xlu0 %v5115_v26, %s4518_s15  ;;  %s5464_s15 = smov 4  }
 0xe78   : > { %v2278_v60 = vpop.xlane.xlu0 %2277 }
 0xe79   : > { %v2279_v61 = vsub.f32 %v2271_v6, %v2278_v60 }
 0xe7b   : > { %v2280_v62 = vmul.f32 1.442695, %v2279_v61 }
 0xe7d   : > { %4296 = vpow2.f32 %v2280_v62 }
 0xe80   : > { %v2389_v1 = vpop.xlane.xlu0 %2388 }
 0xe81   : > { %v2390_v58 = vsub.f32 %v2382_v10, %v2389_v1 }
 0xe83   : > { %v2391_v2 = vmul.f32 1.442695, %v2390_v58 }
 0xe85   : > { %4298 = vpow2.f32 %v2391_v2 }
 0xe88   : > { %v2499_v29 = vpop.xlane.xlu1 %2498 }
 0xe89   : > { %v2500_v3 = vsub.f32 %v2492_v16, %v2499_v29 }
 0xe8a   : > { %v4297_v4 = vpop.eup %4296 }
 0xe8b   : > { %v2501_v5 = vmul.f32 1.442695, %v2500_v3  ;;  %v2282_v7 = vsel %vm764_vm6, %v4297_v4, 0.0 }
 0xe8c   : > { %2283 = vadd.xlane.f32.xlu1 %v2282_v7 }
 0xe8d   : > { %4300 = vpow2.f32 %v2501_v5 }
 0xe90   : > { %v2609_v9 = vpop.xlane.xlu0 %2608 }
 0xe91   : > { %v2610_v14 = vsub.f32 %v5176_v45, %v2609_v9 }
 0xe92   : > { %v5198_v25 = vpop.eup %4298 }
 0xe93   : > { %v2393_v27 = vsel %vm764_vm6, %v5198_v25, 0.0  ;;  %v2611_v16 = vmul.f32 1.442695, %v2610_v14 }
 0xe94   : > { %2394 = vadd.xlane.f32.xlu0 %v2393_v27 }
 0xe98   : > { %v2719_v12 = vpop.xlane.xlu1 %2718 }
 0xe99   : > { %v2720_v19 = vsub.f32 %v5181_v35, %v2719_v12 }
 0xe9a   : > { %v5202_v6 = vpop.eup %4300 }
 0xe9b   : > { %v2503_v8 = vsel %vm764_vm6, %v5202_v6, 0.0  ;;  %v2721_v28 = vmul.f32 1.442695, %v2720_v19 }
 0xe9c   : > { %2504 = vadd.xlane.f32.xlu1 %v2503_v8 }
 0xea0   : > { %v2829_v10 = vpop.xlane.xlu0 %2828 }
 0xea1   : > { %v2830_v22 = vsub.f32 %v5186_v43, %v2829_v10 }
 0xea3   : > { %v2831_v45 = vmul.f32 1.442695, %v2830_v22 }
 0xea4   : > { %v2174_v11 = vpop.xlane.xlu0 %2173 }
 0xea5   : > { %4302 = vrcp.f32 %v2174_v11 }
 0xea6   : > { %4304 = vpow2.f32 %v2611_v16 }
 0xea7   : > { %4306 = vpow2.f32 %v2721_v28 }
 0xea8   : > { %v2939_v13 = vpop.xlane.xlu1 %2938  ;;  %4308 = vpow2.f32 %v2831_v45  ;;  %v2400_v41 = vpop.permute.xlu0 %2399 }
 0xea9   : > { %v2940_v30 = vsub.f32 %v2932_v53, %v2939_v13  ;;  %v2405_v50 = vsel %vm780_vm3, %v2400_v41, 0 }
 0xeaa   : > { %2509 = vrot.lane.b32.xlu0 %v5115_v26, %s4523_s29  ;;  %s5466_s29 = smov 12  }
 0xeab   : > { %v2941_v31 = vmul.f32 1.442695, %v2940_v30 }
 0xeac   : > { %v2290_v20 = vpop.permute.xlu1 %2289 }
 0xead   : > { %2619 = vrot.lane.b32.xlu1 %v5115_v26, %s4524_s13  ;;  %v2295_v42 = vsel %vm780_vm3, %v2290_v20, 0  ;;  %4310 = vpow2.f32 %v2941_v31  ;;  %s5467_s13 = smov 16  }
 0xeb2   : > { %v4303_v15 = vpop.eup %4302 }
 0xeb3   : > { %v2176_v46 = vmul.f32 %v4303_v15, %v4295_v49  ;;  %v4305_v32 = vpop.eup %4304 }
 0xeb4   : > { %v2613_v33 = vsel %vm764_vm6, %v4305_v32, 0.0  ;;  %v5219_v37 = vpop.eup %4306 }
 0xeb5   : > { %v2177_v21 = vpack.c.bf16 %v2176_v46, %v2176_v46  ;;  %v5221_v34 = vpop.eup %4308  ;;  %v2723_v35 = vsel %vm764_vm6, %v5219_v37, 0.0 }
 0xeb6   : > { %v2833_v39 = vsel %vm764_vm6, %v5221_v34, 0.0 }
 0xeb7   : > { %3985 = vmatmul.mubr.msk.bf16.vlgmr.msra.gmra.mxu0 %vm764_vm6, %v2177_v21 }
 0xeb8   : > { %3995 = vmatpush3.bf16.msra.mxu0 %v2295_v42  ;;  %3996 = vmatprep.mubr.msk.bf16.mxu0 %vm4517_vm0, %v4516_v0 }
 0xeb9   : > { %4006 = vmatprep.subr.bf16.mxu0 %v4516_v0 }
 0xeba   : > { %v5225_v36 = vpop.eup %4310 }
 0xebb   : > { %v2943_v23 = vsel %vm764_vm6, %v5225_v36, 0.0 }
 0xec9   : > { %2614 = vadd.xlane.f32.xlu0 %v2613_v33 }
 0xecd   : > { %2724 = vadd.xlane.f32.xlu0 %v2723_v35 }
 0xed1   : > { %2834 = vadd.xlane.f32.xlu1 %v2833_v39  ;;  %2944 = vadd.xlane.f32.xlu0 %v2943_v23 }
 0xee2   : > { %2839 = vrot.lane.b32.xlu1 %v5115_v26, %s5462_s16  ;;  %s5470_s16 = smov 28  }
 0xee6   : > { %2949 = vrot.lane.b32.xlu1 %v5115_v26, %s5463_s24 }
 0xee7   : > { %2729 = vrot.lane.b32.xlu0 %v5115_v26, %s5461_s26  ;;  %s5469_s26 = smov 24  }
 0xf15   : > { %v2284_v40 = vpop.xlane.xlu1 %2283 }
 0xf16   : > { %4312 = vrcp.f32 %v2284_v40 }
 0xf1d   : > { %v2395_v43 = vpop.xlane.xlu0 %2394 }
 0xf1e   : > { %4314 = vrcp.f32 %v2395_v43  ;;  %v4242_v43 = vld [vmem:[%s5424_s3 + $0x78] sm:$0xff]  }
 0xf1f   : > { %4073 = vmatpush3.bf16.msra.mxu1 %v4242_v43 }
 0xf20   : > { %4074 = vmatprep.subr.bf16.mxu1 %v4516_v0 }
 0xf21   : > { %v2510_v52 = vpop.permute.xlu0 %2509 }
 0xf22   : > { %v2515_v54 = vsel %vm780_vm3, %v2510_v52, 0 }
 0xf23   : > { %v4313_v47 = vpop.eup %4312 }
 0xf24   : > { %v2286_v38 = vmul.f32 %v4313_v47, %v4297_v4 }
 0xf25   : > { %v2505_v48 = vpop.xlane.xlu1 %2504 }
 0xf26   : > { %4316 = vrcp.f32 %v2505_v48  ;;  %v2287_v49 = vpack.c.bf16 %v2286_v38, %v2286_v38 }
 0xf28   : > { %3997 = vmatmul.mubr.msk.bf16.vlgmr.msra.gmra.mxu0 %vm764_vm6, %v2287_v49 }
 0xf29   : > { %4007 = vmatpush3.bf16.msra.mxu0 %v2405_v50  ;;  %4008 = vmatprep.mubr.msk.bf16.mxu0 %vm4517_vm0, %v4516_v0  ;;  %v2620_v59 = vpop.permute.xlu1 %2619  ;;  %v4243_v50 = vld [vmem:[%s5424_s3 + $0x70] sm:$0xff]  }
 0xf2a   : > { %4018 = vmatprep.subr.bf16.mxu0 %v4516_v0  ;;  %v2625_v61 = vsel %vm780_vm3, %v2620_v59, 0  ;;  %4075 = vmatpush3.bf16.msra.mxu1 %v4243_v50 }
 0xf2b   : > { %v4315_v26 = vpop.eup %4314  ;;  %4088 = vmatprep.subr.bf16.mxu1 %v4516_v0 }
 0xf2c   : > { %v2397_v51 = vmul.f32 %v4315_v26, %v5198_v25 }
 0xf2e   : > { %v2398_v53 = vpack.c.bf16 %v2397_v51, %v2397_v51 }
 0xf30   : > { %4009 = vmatmul.mubr.msk.bf16.vlgmr.msra.gmra.mxu0 %vm764_vm6, %v2398_v53 }
 0xf31   : > { %4019 = vmatpush3.bf16.msra.mxu0 %v2515_v54  ;;  %4020 = vmatprep.mubr.msk.bf16.mxu0 %vm4517_vm0, %v4516_v0 }
 0xf32   : > { %4030 = vmatprep.subr.bf16.mxu0 %v4516_v0 }
 0xf33   : > { %v4317_v56 = vpop.eup %4316 }
 0xf34   : > { %v2507_v57 = vmul.f32 %v4317_v56, %v5202_v6 }
 0xf36   : > { %v2508_v60 = vpack.c.bf16 %v2507_v57, %v2507_v57 }
 0xf38   : > { %4021 = vmatmul.mubr.msk.bf16.vlgmr.msra.gmra.mxu0 %vm764_vm6, %v2508_v60 }
 0xf39   : > { %4031 = vmatpush3.bf16.msra.mxu0 %v2625_v61  ;;  %4032 = vmatprep.mubr.msk.bf16.mxu0 %vm4517_vm0, %v4516_v0 }
 0xf3a   : > { %4042 = vmatprep.subr.bf16.mxu0 %v4516_v0 }
 0xf52   : > { %v2615_v62 = vpop.xlane.xlu0 %2614 }
 0xf53   : > { %4318 = vrcp.f32 %v2615_v62 }
 0xf56   : > { %v2725_v1 = vpop.xlane.xlu0 %2724 }
 0xf57   : > { %4320 = vrcp.f32 %v2725_v1 }
 0xf5a   : > { %v2945_v58 = vpop.xlane.xlu0 %2944  ;;  %v2835_v2 = vpop.xlane.xlu1 %2834 }
 0xf5b   : > { %4322 = vrcp.f32 %v2835_v2 }
 0xf5c   : > { %4324 = vrcp.f32 %v2945_v58 }
 0xf5e   : > { %v2730_v4 = vpop.permute.xlu0 %2729  ;;  %v2840_v6 = vpop.permute.xlu1 %2839 }
 0xf5f   : > { %v2735_v25 = vsel %vm780_vm3, %v2730_v4, 0  ;;  %v2845_v10 = vsel %vm780_vm3, %v2840_v6, 0 }
 0xf60   : > { %v4319_v29 = vpop.eup %4318 }
 0xf61   : > { %v2617_v3 = vmul.f32 %v4319_v29, %v4305_v32 }
 0xf62   : > { %v2950_v12 = vpop.permute.xlu1 %2949 }
 0xf63   : > { %v2618_v5 = vpack.c.bf16 %v2617_v3, %v2617_v3  ;;  %v2955_v15 = vsel %vm780_vm3, %v2950_v12, 0 }
 0xf64   : > { %v4321_v7 = vpop.eup %4320 }
 0xf65   : > { %4033 = vmatmul.mubr.msk.bf16.vlgmr.msra.gmra.mxu0 %vm764_vm6, %v2618_v5  ;;  %v2727_v27 = vmul.f32 %v4321_v7, %v5219_v37 }
 0xf66   : > { %4043 = vmatpush3.bf16.msra.mxu0 %v2735_v25  ;;  %4044 = vmatprep.mubr.msk.bf16.mxu0 %vm4517_vm0, %v4516_v0 }
 0xf67   : > { %4054 = vmatprep.subr.bf16.mxu0 %v4516_v0  ;;  %v2728_v8 = vpack.c.bf16 %v2727_v27, %v2727_v27 }
 0xf68   : > { %v4323_v9 = vpop.eup %4322 }
 0xf69   : > { %v2837_v11 = vmul.f32 %v4323_v9, %v5221_v34  ;;  %v4325_v14 = vpop.eup %4324 }
 0xf6a   : > { %v2947_v16 = vmul.f32 %v4325_v14, %v5225_v36 }
 0xf6b   : > { %v2838_v13 = vpack.c.bf16 %v2837_v11, %v2837_v11 }
 0xf6c   : > { %v2948_v20 = vpack.c.bf16 %v2947_v16, %v2947_v16 }
 0xf6d   : > { %4045 = vmatmul.mubr.msk.bf16.vlgmr.msra.gmra.mxu0 %vm764_vm6, %v2728_v8 }
 0xf6e   : > { %4055 = vmatpush3.bf16.msra.mxu0 %v2845_v10  ;;  %4056 = vmatprep.mubr.msk.bf16.mxu0 %vm4517_vm0, %v4516_v0  ;;  %v3097_v10 = vrot.slane %v5066_v63, %v1700_v55  ;;  %v4244_v55 = vld [vmem:[%s5425_s4 + $0x18] sm:$0xff]  }
 0xf6f   : > { %4066 = vmatprep.subr.bf16.mxu0 %v4516_v0 }
 0xf75   : > { %4057 = vmatmul.mubr.msk.bf16.vlgmr.msra.gmra.mxu0 %vm764_vm6, %v2838_v13 }
 0xf76   : > { %4067 = vmatpush3.bf16.msra.mxu0 %v2955_v15  ;;  %4068 = vmatprep.mubr.msk.bf16.mxu0 %vm4517_vm0, %v4516_v0 }
 0xf77   : > { %4080 = vmatprep.subr.bf16.mxu0 %v4516_v0  ;;  %v2218_v19 = vpop.f32.mrf.mxu0 }
 0xf79   : > { %v3986_v46 = vpop.f32.mrf.mxu0 }
 0xf7b   : > { %v2221_v21 = vpop.f32.mrf.mxu0 }
 0xf7d   : > { %4069 = vmatmul.mubr.msk.bf16.vlgmr.msra.gmra.mxu0 %vm764_vm6, %v2948_v20  ;;  %v3987_v22 = vpop.f32.mrf.mxu0 }
 0xf7e   : > { %4084 = vmatprep.mubr.msk.bf16.mxu0 %vm4517_vm0, %v4516_v0  ;;  %4081 = vmatpush3.bf16.msra.mxu0 %v4244_v55 }
 0xf7f   : > { %4082 = vmatprep.subr.bf16.mxu0 %v4516_v0 }
 0xfe8   : > { %v2331_v28 = vpop.f32.mrf.mxu0 }
 0xfe9   : > { %2998 = vrot.lane.b32.xlu1 %v2331_v28, %s5464_s15 }
 0xfea   : > { %v3998_v30 = vpop.f32.mrf.mxu0 }
 0xfeb   : > { %v4246_v30 = vld [vmem:[%s5427_s6 + $0x78] sm:$0xff]  }
 0xfec   : > { %v2334_v42 = vpop.f32.mrf.mxu0 }
 0xfed   : > { %v4247_v42 = vld [vmem:[%s5427_s6 + $0x70] sm:$0xff]  }
 0xfee   : > { %v3999_v45 = vpop.f32.mrf.mxu0 }
 0xfef   : > { %v4248_v45 = vld [vmem:[%s5427_s6 + $0x68] sm:$0xff]  }
 0xff0   : > { %v2441_v31 = vpop.f32.mrf.mxu0 }
 0xff1   : > { %3002 = vrot.lane.b32.xlu1 %v2441_v31, %s5465_s14  ;;  %v4249_v31 = vld [vmem:[%s5427_s6 + $0x60] sm:$0xff]   ;;  %s432_s14 = sand.u32 1, %s4498_s18  }
 0xff2   : > { %v4010_v32 = vpop.f32.mrf.mxu0  ;;  %s3402_s24 = scalar_lea.sflag [#allocation4], %s432_s14 }
 0xff3   : > { %v4250_v32 = vld [vmem:[%s5427_s6 + $0x58] sm:$0xff]  }
 0xff4   : > { %v2444_v33 = vpop.f32.mrf.mxu0 }
 0xff5   : > { %v4251_v33 = vld [vmem:[%s5427_s6 + $0x50] sm:$0xff]  }
 0xff6   : > { %v4011_v37 = vpop.f32.mrf.mxu0 }
 0xff8   : > { %v2551_v34 = vpop.f32.mrf.mxu0 }
 0xff9   : > { %3006 = vrot.lane.b32.xlu0 %v2551_v34, %s5466_s29  ;;  %s3527_s29 = sshll.u32 %s432_s14, 3 }
 0xffa   : > { %v4022_v35 = vpop.f32.mrf.mxu0 }
 0xffc   : > { %v2554_v36 = vpop.f32.mrf.mxu0 }
 0xffd   : > { %v3115_v36 = vrot.slane %v5066_v63, %v1718_v17  ;;  %v3634_v17 = vld [vmem:[#allocation7 + $0x1] ss:$0 sm:$0xff] }
 0xffe   : > { %v4023_v39 = vpop.f32.mrf.mxu0 }
0x1025   : > { %v2661_v23 = vpop.f32.mrf.mxu0 }
0x1026   : > { %3010 = vrot.lane.b32.xlu1 %v2661_v23, %s5467_s13 }
0x1027   : > { %v4034_v40 = vpop.f32.mrf.mxu0 }
0x1028   : > { %v3120_v40 = vrot.slane %v5066_v63, %v1723_v18 }
0x1029   : > { %v2664_v41 = vpop.f32.mrf.mxu0 }
0x102b   : > { %v4035_v47 = vpop.f32.mrf.mxu0 }
0x102d   : > { %v2771_v38 = vpop.f32.mrf.mxu0 }
0x102e   : > { %3014 = vrot.lane.b32.xlu0 %v2771_v38, %s5468_s22  ;;  %v4252_v38 = vld [vmem:[%s5427_s6 + $0x48] sm:$0xff]   ;;  %s434_s22 = scalar_lea.vmem [#allocation10], %s3527_s29  ;;  %s4438_s29 = sshll.u32 %s4533_s21, 4  ;;  %s4439_s29 = int_to_ptr.vmem [resolvable:$false] %s4438_s29 }
0x102f   : > { %v4046_v48 = vpop.f32.mrf.mxu0  ;;  %s3415_s30 = sshll.u32 %s434_s22, 4  ;;  %s4440_s13 = scalar_lea.vmem %s4439_s29, 256  ;;  %s5382_s30 = int_to_ptr.vmem [resolvable:$true] %s3415_s30 }
0x1030   : > { %s4434_s15 = scalar_lea.vmem %s5382_s30, 128  ;;  %p4441_p2 = scmp.lt.s32.totalorder %s5382_s30, %s4439_s29 }
0x1031   : > { %v2774_v49 = vpop.f32.mrf.mxu0  ;;  %p4435_p9 = scmp.ne.s32.totalorder %s5382_s30, %s4434_s15  ;;  %p4442_p4 = scmp.lt.s32.totalorder %s4440_s13, %s4434_s15 }
0x1033   : > { %v4047_v26 = vpop.f32.mrf.mxu0  ;;  %p4436_p3 = pnand %p4435_p9, %p5471_p1  ;;  %p4443_p7 = por %p4442_p4, %p4441_p2 }
0x1035   : > { %v2881_v51 = vpop.f32.mrf.mxu0  ;;  %p4437_p5 = pneg %p4436_p3 }
0x1036   : > { %3018 = vrot.lane.b32.xlu1 %v2881_v51, %s5469_s26 }
0x1037   : > { %v4058_v52 = vpop.f32.mrf.mxu0  ;;  %p4444_p8 = pnand %p4443_p7, %p4437_p5 }
0x1038   : > { %v3654_v52 = vld [vmem:[%s5428_s7 + $0x18] ss:$0 sm:$0xff] }
0x1039   : > { %v2884_v53 = vpop.f32.mrf.mxu0 }
0x103b   : > { %v4059_v54 = vpop.f32.mrf.mxu0 }
0x103d   : > { %v2991_v56 = vpop.f32.mrf.mxu0 }
0x103e   : > { %3022 = vrot.lane.b32.xlu0 %v2991_v56, %s5470_s16  ;;  %s5380_s16 = scalar_lea.hbm %s5432_s11, %s3670_s12 }
0x103f   : > { %v4070_v57 = vpop.f32.mrf.mxu0 }
0x1041   : > { %v2994_v59 = vpop.f32.mrf.mxu0 }
0x1043   : > { %v4071_v60 = vpop.f32.mrf.mxu0 }
0x105b   : > { %v2999_v61 = vpop.permute.xlu1 %2998 }
0x105c   : > { %v3025_v2 = vsel %vm717_vm4, %v2218_v19, %v2999_v61 }
0x1063   : > { %v3003_v62 = vpop.permute.xlu1 %3002 }
0x1064   : > { %v3026_v29 = vsel %vm764_vm6, %v3025_v2, %v3003_v62 }
0x106b   : > { %v3007_v1 = vpop.permute.xlu0 %3006 }
0x106c   : > { %v3027_v4 = vsel %vm1627_vm7, %v3026_v29, %v3007_v1 }
0x1098   : > { %v3011_v58 = vpop.permute.xlu1 %3010 }
0x1099   : > { %v3028_v7 = vsel %vm457_vm1, %v3027_v4, %v3011_v58  ;;  %v4255_v4 = vld [vmem:[%s5430_s9] sm:$0xff]  }
0x10a0   : > { %v3015_v3 = vpop.permute.xlu0 %3014 }
0x10a1   : > { %v3029_v25 = vsel %vm1630_vm8, %v3028_v7, %v3015_v3  ;;  %v4254_v3 = vld [vmem:[%s5430_s9 + $0x8] sm:$0xff]  }
0x10a8   : > { %v3019_v5 = vpop.permute.xlu1 %3018 }
0x10a9   : > { %v3030_v27 = vsel %vm1632_vm9, %v3029_v25, %v3019_v5 }
0x10b0   : > { %v3023_v6 = vpop.permute.xlu0 %3022 }
0x10b1   : > { %v3031_v8 = vsel %vm1634_vm10, %v3030_v27, %v3023_v6  ;;  %v3663_v6 = vld [vmem:[#allocation8] ss:$0 sm:$0xff] }
0x10b2   : > { %v3032_v9 = vpack.c.bf16 %v3031_v8, %v3031_v8 }
0x10b4   : > { %4077 = vmatmul.mubr.msk.bf16.vlgmr.msra.gmra.mxu1 %vm503_vm2, %v3032_v9  ;;  %v3664_v9 = vld [vmem:[#allocation8 + $0x1] ss:$0 sm:$0xff] }
0x10b5   : > { %4104 = vmatprep.mubr.msk.bf16.mxu1 %vm4517_vm0, %v4516_v0  ;;  %4089 = vmatpush3.bf16.msra.mxu1 %v4246_v30 }
0x10b6   : > { %4090 = vmatprep.subr.bf16.mxu1 %v4516_v0 }
0x10b9   : > { %4091 = vmatpush3.bf16.msra.mxu1 %v4247_v42 }
0x10ba   : > { %4092 = vmatprep.subr.bf16.mxu1 %v4516_v0 }
0x10bd   : > { %4093 = vmatpush3.bf16.msra.mxu1 %v4248_v45 }
0x10be   : > { %4094 = vmatprep.subr.bf16.mxu1 %v4516_v0 }
0x10c1   : > { %4095 = vmatpush3.bf16.msra.mxu1 %v4249_v31 }
0x10c2   : > { %4096 = vmatprep.subr.bf16.mxu1 %v4516_v0 }
0x10c5   : > { %4097 = vmatpush3.bf16.msra.mxu1 %v4250_v32 }
0x10c6   : > { %4098 = vmatprep.subr.bf16.mxu1 %v4516_v0 }
0x10c9   : > { %4099 = vmatpush3.bf16.msra.mxu1 %v4251_v33 }
0x10ca   : > { %4100 = vmatprep.subr.bf16.mxu1 %v4516_v0 }
0x10cd   : > { %4101 = vmatpush3.bf16.msra.mxu1 %v4252_v38 }
0x10ce   : > { %4102 = vmatprep.subr.bf16.mxu1 %v4516_v0 }
0x10d1   : > { %4103 = vmatpush3.bf16.msra.mxu1 %v4253_v24 }
0x1174   : > { %v3087_v11 = vpop.f32.mrf.mxu1 }
0x1175   : > { %v3093_v12 = vadd.f32 %v3087_v11, %v5049_v44  ;;  %v4245_v44 = vld [vmem:[%s5425_s4 + $0x10] sm:$0xff]  }
0x1176   : > { %v4078_v13 = vpop.f32.mrf.mxu1  ;;  %4083 = vmatpush3.bf16.msra.mxu0 %v4245_v44 }
0x1177   : > { %v5304_v14 = vadd.f32 %v3097_v10, %v3093_v12  ;;  %4108 = vmatprep.subr.bf16.mxu0 %v4516_v0 }
0x1178   : > { %v3090_v15 = vpop.f32.mrf.mxu1 }
0x1179   : > { %v3099_v16 = vsel %vm503_vm2, %v5304_v14, 0.0 }
0x117a   : > { %3100 = vadd.xlane.f32.xlu1 %v3099_v16  ;;  %v4079_v19 = vpop.f32.mrf.mxu1 }
0x1203   : > { %v3101_v46 = vpop.xlane.xlu1 %3100 }
0x1204   : > { %v3102_v20 = vmul.f32 0.03125, %v3101_v46 }
0x1206   : > { %v3103_v21 = vsub.f32 %v5304_v14, %v3102_v20 }
0x1208   : > { %v3104_v22 = vmul.f32 %v3103_v21, %v3103_v21 }
0x120a   : > { %v3105_v28 = vsel %vm503_vm2, %v3104_v22, 0.0 }
0x120b   : > { %3106 = vadd.xlane.f32.xlu0 %v3105_v28 }
0x1294   : > { %v3107_v37 = vpop.xlane.xlu0 %3106 }
0x1295   : > { %v3108_v34 = vmul.f32 0.03125, %v3107_v37 }
0x1297   : > { %v3109_v35 = vadd.f32 1e-05, %v3108_v34 }
0x1299   : > { %4326 = vrsqrt.f32 %v3109_v35 }
0x12a6   : > { %v4327_v39 = vpop.eup %4326 }
0x12a7   : > { %v3111_v23 = vmul.f32 %v4327_v39, %v3103_v21 }
0x12a9   : > { %v3116_v41 = vmul.f32 %v3115_v36, %v3111_v23 }
0x12ab   : > { %v3121_v43 = vadd.f32 %v3120_v40, %v3116_v41 }
0x12ad   : > { %v3122_v47 = vpack.c.bf16 %v3121_v43, %v3121_v43 }
0x12af   : > { %4085 = vmatmul.mubr.msk.bf16.vlgmr.msra.gmra.mxu0 %vm503_vm2, %v3122_v47 }
0x12b0   : > { %4112 = vmatprep.mubr.msk.bf16.mxu0 %vm4517_vm0, %v4516_v0  ;;  %4109 = vmatpush3.bf16.msra.mxu0 %v4254_v3 }
0x12b1   : > { %4110 = vmatprep.subr.bf16.mxu0 %v4516_v0  ;;  %v3665_v0 = vld [vmem:[%s5431_s10] ss:$0 sm:$0xff] }
0x12b4   : > { %4111 = vmatpush3.bf16.msra.mxu0 %v4255_v4 }
0x136f   : > { %v3185_v18 = vpop.f32.mrf.mxu0 }
0x1370   : > { %v3186_v63 = vadd.f32 %v3634_v17, %v3185_v18 }
0x1371   : > { %v4086_v48 = vpop.f32.mrf.mxu0 }
0x1372   : > { %v3191_v49 = vmax.f32 %v3186_v63, 0.0 }
0x1373   : > { %v3188_v50 = vpop.f32.mrf.mxu0 }
0x1374   : > { %v3192_v26 = vpack.c.bf16 %v3191_v49, %v3191_v49 }
0x1375   : > { %v4087_v51 = vpop.f32.mrf.mxu0 }
0x1376   : > { %4105 = vmatmul.mubr.bf16.vlgmr.msra.gmra.mxu1 %v3192_v26 }
0x1436   : > { %v3296_v53 = vpop.f32.mrf.mxu1 }
0x1437   : > { %v3297_v54 = vadd.f32 %v3654_v52, %v3296_v53 }
0x1438   : > { %v4106_v56 = vpop.f32.mrf.mxu1 }
0x1439   : > { %v3302_v57 = vadd.f32 %v3297_v54, %v5304_v14 }
0x143a   : > { %v3299_v59 = vpop.f32.mrf.mxu1 }
0x143b   : > { %v3306_v60 = vsel %vm503_vm2, %v3302_v57, 0.0 }
0x143c   : > { %3307 = vadd.xlane.f32.xlu0 %v3306_v60  ;;  %v4107_v61 = vpop.f32.mrf.mxu1 }
0x14c5   : > { %v3308_v62 = vpop.xlane.xlu0 %3307 }
0x14c6   : > { %v3309_v1 = vmul.f32 0.03125, %v3308_v62 }
0x14c8   : > { %v3310_v58 = vsub.f32 %v3302_v57, %v3309_v1 }
0x14ca   : > { %v3311_v2 = vmul.f32 %v3310_v58, %v3310_v58 }
0x14cc   : > { %v3312_v29 = vsel %vm503_vm2, %v3311_v2, 0.0 }
0x14cd   : > { %3313 = vadd.xlane.f32.xlu1 %v3312_v29 }
0x1556   : > { %v3314_v5 = vpop.xlane.xlu1 %3313 }
0x1557   : > { %v3315_v7 = vmul.f32 0.03125, %v3314_v5 }
0x1559   : > { %v3316_v25 = vadd.f32 1e-05, %v3315_v7 }
0x155b   : > { %4328 = vrsqrt.f32 %v3316_v25 }
0x1568   : > { %v4329_v27 = vpop.eup %4328 }
0x1569   : > { %v3318_v8 = vmul.f32 %v4329_v27, %v3310_v58 }
0x156b   : > { %v3325_v10 = vmul.f32 %v3663_v6, %v3318_v8 }
0x156d   : > { %v3332_v11 = vadd.f32 %v3664_v9, %v3325_v10 }
0x156f   : > { %v3333_v12 = vpack.c.bf16 %v3332_v11, %v3332_v11 }
0x1571   : > { %4113 = vmatmul.mubr.msk.bf16.vlgmr.msra.gmra.mxu0 %vm503_vm2, %v3333_v12 }
0x1631   : > { %v3394_v13 = vpop.f32.mrf.mxu0 }
0x1632   : > { %v3395_v14 = vadd.f32 %v3665_v0, %v3394_v13 }
0x1633   : > { %v4114_v15 = vpop.f32.mrf.mxu0 }
0x1634   : > { %3400 = vst [vmem:[%s434_s22] sm:$0xff] %v3395_v14 }
0x1635   : > { %v3397_v16 = vpop.f32.mrf.mxu0 }
0x1636   : > { %4447 = shalt.err (!%p4444_p8)
}
0x1637   : > { %s4448_s19 = scalar_lea.hbm %s5380_s16, 128  ;;  %s4452_s22 = scalar_lea.hbm %s5432_s11, 256 }
0x1638   : > { %p4449_p13 = scmp.ne.s32.totalorder %s5380_s16, %s4448_s19  ;;  %p4453_p6 = scmp.lt.s32.totalorder %s5380_s16, %s5432_s11 }
0x1639   : > { %p4454_p12 = scmp.lt.s32.totalorder %s4452_s22, %s4448_s19 }
0x163a   : > { %p4450_p11 = pnand %p4449_p13, %p5471_p1 }
0x163b   : > { %p4455_p10 = por %p4454_p12, %p4453_p6 }
0x163c   : > { %p4451_p0 = pneg %p4450_p11 }
0x163e   : > { %p4456_p9 = pnand %p4455_p10, %p4451_p0 }
0x1640   : > { %4459 = shalt.err (!%p4456_p9)
}
0x1641   : > { %4132 = dma.vmem_to_hbm [thread:$0]  (%p5471_p1), %s5382_s30, 128, %s5380_s16, %s3402_s24   ;;  %v4115_v19 = vpop.f32.mrf.mxu0 }
0x1642 PF: > { %p4159_p3 = scmp.ge.s32.totalorder %s4506_s20, 2  ;;  %s3427_s15 = sand.u32 1, %s4494_s17  }
0x1643   : > { %p5472_p5 = scmp.ne.s32.totalorder %s5452_s28, 0  ;;  %s3428_s21 = scalar_lea.sflag [#allocation4], %s3427_s15 }
0x1645   : > { %p4148_p2 = pnand %p4159_p3, %p5472_p5 }
0x1647   : > { %p4149_p4 = pneg %p4148_p2 }
0x1649   : > { %4489 = dma.done.wait (%p4149_p4), %s3428_s21, 128  }
0x164a   : > { %4491 = vsyncadd (%p4149_p4), %s3428_s21, 4294967168  ;;  %s5473_s29 = sld [smem:[#allocation15_spill]]  ;;  %p24_p7 = scmp.ge.s32.totalorder %s4619_s23, 4  }
0x164b   : > { %s5474_s19 = sld [smem:[#allocation16_spill]]  ;;  %s5475_s17 = smov %s4498_s18 }
0x164c   : > { %s5477_s20 = smov %s4619_s23  ;;  %26 = sbr.rel (!%p24_p7) target bundleno = 6 (0x6), region = 128 }
0x1650   : > { %s5476_s18 = smov %s5473_s29 }
0x1651   :  { %3433 = vsyncpa [#allocation3], 1 }
0x1652   :  { %3435 = vsyncpa [#allocation3 + $0x1], 1 }
0x1653   :  { %3436 = vsyncpa [#allocation6], 1 }
0x1654   :  { %3437 = vsyncpa [#allocation9], 1 }
0x1655   :  { %3438 = vsyncpa [#allocation4], 1 }
0x1656   :  { %3440 = vsyncpa [#allocation4 + $0x1], 1 }

</bundles_post_ra>
